<compile_context>
chip_gen: v7x
topology: tpu7x:2x2x1
jax: 0.10.0
libtpu: 0.0.40
codegen_flags: <defaults>
</compile_context>

<pallas_src>
import math
from functools import partial

import jax
import jax.numpy as jnp
from jax import lax
from jax.experimental import pallas as pl
from jax.experimental.pallas import tpu as pltpu


def _elu(x):
    # ELU(alpha=1): x if x > 0 else exp(x) - 1.
    # exp(min(x, 0)) keeps the dead branch finite for large positive x.
    return jnp.where(x > 0, x, jnp.exp(jnp.minimum(x, 0.0)) - 1.0)


def _neural_ode_kernel(t0_ref, dt_ref, nsteps_ref,        # SMEM (S,) schedules
                       z0_ref,                            # VMEM (B, D)
                       w1z_ref, w1t_ref, b1_ref,          # (D,H), (1,H), (1,H)
                       w2_ref, b2_ref,                    # (H,H), (1,H)
                       w3_ref, b3_ref,                    # (H,D), (1,D)
                       out_ref,                           # VMEM (B, D) block (segment s)
                       z_scratch,                         # VMEM (B, D) f32, resident state
                       *, max_steps, unroll):
    s = pl.program_id(0)

    # Initialize the resident state from z0 on the first segment only.
    @pl.when(s == 0)
    def _():
        z_scratch[...] = z0_ref[...].astype(jnp.float32)

    B, D = z_scratch.shape
    H = w2_ref.shape[0]

    w1z = w1z_ref[...]
    w2 = w2_ref[...]
    w3 = w3_ref[...]

    # Hoist loop-invariant broadcasts out of the Euler loop (JAX does not CSE
    # broadcast_in_dim; doing these inside `step` re-materializes them every
    # iteration).
    w1t_b = jnp.broadcast_to(w1t_ref[...], (B, H))
    b1_b = jnp.broadcast_to(b1_ref[...], (B, H))
    b2_b = jnp.broadcast_to(b2_ref[...], (B, H))
    b3_b = jnp.broadcast_to(b3_ref[...], (B, D))

    t0 = t0_ref[s]
    dt = dt_ref[s]
    n_steps = nsteps_ref[s]

    def step(i, z):
        t = t0 + dt * i.astype(jnp.float32)
        h1 = _elu(jnp.dot(z, w1z, preferred_element_type=jnp.float32)
                  + t * w1t_b + b1_b)
        h2 = _elu(jnp.dot(h1, w2, preferred_element_type=jnp.float32) + b2_b)
        f = jnp.dot(h2, w3, preferred_element_type=jnp.float32) + b3_b
        # Segments shorter than max_steps contribute dt = 0 for padding steps
        # (scalar select only; no per-step (B, D) select needed).
        step_dt = jnp.where(i < n_steps, dt, jnp.float32(0.0))
        return z + step_dt * f

    z_final = lax.fori_loop(0, max_steps, step, z_scratch[...], unroll=unroll)
    z_scratch[...] = z_final
    out_ref[...] = z_final.astype(out_ref.dtype)


def neural_ode_forward(z0, t, params, tol=0.05, sequence=False):
    """Mirrors NeuralODE.forward(z0, t, sequence) with the euler solver.

    z0: (B, D) float32; t: python/numpy sequence of times (time_len,)
    Returns y[-1] (B, D) if sequence=False, else y (time_len, B, D).
    All time segments run inside ONE Pallas kernel invocation.
    """
    t = [float(ti) for ti in t]
    num_seg = len(t) - 1
    if num_seg <= 0:
        return z0[None] if sequence else z0

    B, D = z0.shape
    w1z, w1t, b1, w2, b2, w3, b3 = params

    # Per-segment Euler schedule (identical to the reference solver).
    n_steps = [max(1, int(math.ceil(abs(t[i + 1] - t[i]) / tol)))
               for i in range(num_seg)]
    dts = [(t[i + 1] - t[i]) / n for i, n in enumerate(n_steps)]
    max_steps = max(n_steps)
    unroll = True if max_steps <= 32 else 4

    t0_arr = jnp.asarray(t[:-1], dtype=jnp.float32)
    dt_arr = jnp.asarray(dts, dtype=jnp.float32)
    ns_arr = jnp.asarray(n_steps, dtype=jnp.int32)

    kernel = partial(_neural_ode_kernel, max_steps=max_steps, unroll=unroll)

    smem = pl.BlockSpec(memory_space=pltpu.MemorySpace.SMEM)
    vmem = pl.BlockSpec(memory_space=pltpu.MemorySpace.VMEM)

    ys = pl.pallas_call(
        kernel,
        out_shape=jax.ShapeDtypeStruct((num_seg, B, D), z0.dtype),
        grid_spec=pltpu.PrefetchScalarGridSpec(
            num_scalar_prefetch=0,
            grid=(num_seg,),
            in_specs=[smem, smem, smem,        # t0 / dt / n_steps schedules
                      vmem,                    # z0
                      vmem, vmem, vmem,        # w1z, w1t, b1
                      vmem, vmem,              # w2, b2
                      vmem, vmem],             # w3, b3
            out_specs=pl.BlockSpec((None, B, D), lambda s: (s, 0, 0)),
            scratch_shapes=[pltpu.VMEM((B, D), jnp.float32)],
        ),
        compiler_params=pltpu.CompilerParams(
            # State carries across segments -> sequential grid axis.
            dimension_semantics=("arbitrary",)),
    )(t0_arr, dt_arr, ns_arr, z0, w1z, w1t, b1, w2, b2, w3, b3)

    if sequence:
        return jnp.concatenate([z0[None].astype(ys.dtype), ys], axis=0)
    return ys[-1]


def init_params(key, dim, hidden):
    """Deterministic PyTorch-Linear-style init (uniform +-1/sqrt(fan_in))."""
    ks = jax.random.split(key, 7)

    def unif(k, shape, fan_in):
        b = 1.0 / math.sqrt(fan_in)
        return jax.random.uniform(k, shape, jnp.float32, -b, b)

    # lin1: (dim + 1) -> hidden  (time-dependent: split into z-part and t-column)
    w1z = unif(ks[0], (dim, hidden), dim + 1)
    w1t = unif(ks[1], (1, hidden), dim + 1)
    b1 = unif(ks[2], (1, hidden), dim + 1)
    # lin2: hidden -> hidden
    w2 = unif(ks[3], (hidden, hidden), hidden)
    b2 = unif(ks[4], (1, hidden), hidden)
    # lin3: hidden -> dim
    w3 = unif(ks[5], (hidden, dim), hidden)
    b3 = unif(ks[6], (1, dim), hidden)
    return (w1z, w1t, b1, w2, b2, w3, b3)


def _reference_forward(z0, t, params, tol):
    """Pure-JAX reference of the same Euler integration (full sequence)."""
    w1z, w1t, b1, w2, b2, w3, b3 = params
    z = z0.astype(jnp.float32)
    t = [float(ti) for ti in t]
    ys = [z]
    for i in range(len(t) - 1):
        n_steps = max(1, int(math.ceil(abs(t[i + 1] - t[i]) / tol)))
        dt = (t[i + 1] - t[i]) / n_steps
        ti = t[i]
        for s in range(n_steps):
            tt = ti + dt * s
            h1 = _elu(z @ w1z + tt * w1t + b1)
            h2 = _elu(h1 @ w2 + b2)
            f = h2 @ w3 + b3
            z = z + dt * f
        ys.append(z)
    return jnp.stack(ys, axis=0)


if __name__ == "__main__":
    # TODO(synk): only the forward integration is implemented; OdeAdjoint.backward
    # (adjoint reverse-time integration) is autograd machinery, not the forward pass.
    jax.config.update("jax_default_matmul_precision", "highest")

    B, D, H = 8, 32, 64          # batch, state dim, hidden dim
    tol = 0.05                   # euler step size -> 20 steps over [0, 1]

    key = jax.random.PRNGKey(0)
    kz, kp = jax.random.split(key)
    z0 = jax.random.normal(kz, (B, D), jnp.float32)
    params = init_params(kp, D, H)

    # Case 1: module default t = [0., 1.] (single segment), final state only.
    t1 = [0.0, 1.0]
    out = neural_ode_forward(z0, t1, params, tol=tol, sequence=False)
    out = jax.block_until_ready(out)
    ref1 = _reference_forward(z0, t1, params, tol)
    assert out.shape == (B, D)
    assert jnp.allclose(out, ref1[-1], atol=1e-4, rtol=1e-4), "mismatch (t=[0,1])"

    # Case 2: multi-segment t with unequal segment lengths (exercises the fused
    # segment grid + per-segment step-count masking) and sequence=True.
    t2 = [0.0, 0.3, 1.0]
    seq = neural_ode_forward(z0, t2, params, tol=tol, sequence=True)
    seq = jax.block_until_ready(seq)
    ref2 = _reference_forward(z0, t2, params, tol)
    assert seq.shape == (len(t2), B, D)
    assert jnp.allclose(seq, ref2, atol=1e-4, rtol=1e-4), "mismatch (sequence)"

    print("KERNEL_OK")
</pallas_src>

<mosaic_0001>
module attributes {stable_mosaic.version = 11 : i64} {
  func.func @_neural_ode_kernel(%arg0: i32, %arg1: memref<1xf32, #tpu.memory_space<smem>>, %arg2: memref<1xf32, #tpu.memory_space<smem>>, %arg3: memref<1xi32, #tpu.memory_space<smem>>, %arg4: memref<8x32xf32, #tpu.memory_space<vmem>>, %arg5: memref<32x64xf32, #tpu.memory_space<vmem>>, %arg6: memref<1x64xf32, #tpu.memory_space<vmem>>, %arg7: memref<1x64xf32, #tpu.memory_space<vmem>>, %arg8: memref<64x64xf32, #tpu.memory_space<vmem>>, %arg9: memref<1x64xf32, #tpu.memory_space<vmem>>, %arg10: memref<64x32xf32, #tpu.memory_space<vmem>>, %arg11: memref<1x32xf32, #tpu.memory_space<vmem>>, %arg12: memref<1x8x32xf32, #tpu.memory_space<vmem>>, %arg13: memref<8x32xf32, #tpu.memory_space<vmem>>) attributes {dimension_semantics = [#tpu.dimension_semantics<arbitrary>], iteration_bounds = array<i64: 1>, scalar_prefetch = 0 : i64, scratch_operands = 1 : i64, tpu.core_type = #tpu.core_type<tc>, window_params = [{transform_indices = @transform_0, window_bounds = array<i64: 1>}, {transform_indices = @transform_1, window_bounds = array<i64: 1>}, {transform_indices = @transform_2, window_bounds = array<i64: 1>}, {pipeline_mode = #tpu.pipeline_mode<synchronous>, transform_indices = @transform_3, window_bounds = array<i64: 8, 32>}, {pipeline_mode = #tpu.pipeline_mode<synchronous>, transform_indices = @transform_4, window_bounds = array<i64: 32, 64>}, {pipeline_mode = #tpu.pipeline_mode<synchronous>, transform_indices = @transform_5, window_bounds = array<i64: 1, 64>}, {pipeline_mode = #tpu.pipeline_mode<synchronous>, transform_indices = @transform_6, window_bounds = array<i64: 1, 64>}, {pipeline_mode = #tpu.pipeline_mode<synchronous>, transform_indices = @transform_7, window_bounds = array<i64: 64, 64>}, {pipeline_mode = #tpu.pipeline_mode<synchronous>, transform_indices = @transform_8, window_bounds = array<i64: 1, 64>}, {pipeline_mode = #tpu.pipeline_mode<synchronous>, transform_indices = @transform_9, window_bounds = array<i64: 64, 32>}, {pipeline_mode = #tpu.pipeline_mode<synchronous>, transform_indices = @transform_10, window_bounds = array<i64: 1, 32>}, {transform_indices = @transform_11, window_bounds = array<i64: 1, 8, 32>}]} {
    %c0_i32 = arith.constant 0 : i32
    %0 = arith.cmpi eq, %arg0, %c0_i32 : i32
    %1 = arith.extui %0 : i1 to i32
    %c0_i32_0 = arith.constant 0 : i32
    %2 = arith.cmpi ne, %1, %c0_i32_0 : i32
    scf.if %2 {
      %c0_221 = arith.constant 0 : index
      %c0_222 = arith.constant 0 : index
      %689 = vector.load %arg4[%c0_221, %c0_222] : memref<8x32xf32, #tpu.memory_space<vmem>>, vector<8x32xf32>
      %c0_223 = arith.constant 0 : index
      %c0_224 = arith.constant 0 : index
      %690 = vector.load %arg13[%c0_223, %c0_224] : memref<8x32xf32, #tpu.memory_space<vmem>>, vector<8x32xf32>
      tpu.vector_store %arg13[%c0_223, %c0_224], %689 {strides = array<i32>} : memref<8x32xf32, #tpu.memory_space<vmem>>, vector<8x32xf32>,
    } else {
    }
    %c0 = arith.constant 0 : index
    %c0_1 = arith.constant 0 : index
    %3 = vector.load %arg5[%c0, %c0_1] : memref<32x64xf32, #tpu.memory_space<vmem>>, vector<32x64xf32>
    %c0_2 = arith.constant 0 : index
    %c0_3 = arith.constant 0 : index
    %4 = vector.load %arg8[%c0_2, %c0_3] : memref<64x64xf32, #tpu.memory_space<vmem>>, vector<64x64xf32>
    %c0_4 = arith.constant 0 : index
    %c0_5 = arith.constant 0 : index
    %5 = vector.load %arg10[%c0_4, %c0_5] : memref<64x32xf32, #tpu.memory_space<vmem>>, vector<64x32xf32>
    %c0_6 = arith.constant 0 : index
    %c0_7 = arith.constant 0 : index
    %6 = vector.load %arg6[%c0_6, %c0_7] : memref<1x64xf32, #tpu.memory_space<vmem>>, vector<1x64xf32>
    %7 = vector.shape_cast %6 : vector<1x64xf32> to vector<1x64xf32>
    %8 = vector.broadcast %7 : vector<1x64xf32> to vector<8x64xf32>
    %c0_8 = arith.constant 0 : index
    %c0_9 = arith.constant 0 : index
    %9 = vector.load %arg7[%c0_8, %c0_9] : memref<1x64xf32, #tpu.memory_space<vmem>>, vector<1x64xf32>
    %10 = vector.shape_cast %9 : vector<1x64xf32> to vector<1x64xf32>
    %11 = vector.broadcast %10 : vector<1x64xf32> to vector<8x64xf32>
    %c0_10 = arith.constant 0 : index
    %c0_11 = arith.constant 0 : index
    %12 = vector.load %arg9[%c0_10, %c0_11] : memref<1x64xf32, #tpu.memory_space<vmem>>, vector<1x64xf32>
    %13 = vector.shape_cast %12 : vector<1x64xf32> to vector<1x64xf32>
    %14 = vector.broadcast %13 : vector<1x64xf32> to vector<8x64xf32>
    %c0_12 = arith.constant 0 : index
    %c0_13 = arith.constant 0 : index
    %15 = vector.load %arg11[%c0_12, %c0_13] : memref<1x32xf32, #tpu.memory_space<vmem>>, vector<1x32xf32>
    %16 = vector.shape_cast %15 : vector<1x32xf32> to vector<1x32xf32>
    %17 = vector.broadcast %16 : vector<1x32xf32> to vector<8x32xf32>
    %18 = arith.index_cast %arg0 : i32 to index
    %19 = memref.load %arg1[%18] : memref<1xf32, #tpu.memory_space<smem>>
    %20 = arith.index_cast %arg0 : i32 to index
    %21 = memref.load %arg2[%20] : memref<1xf32, #tpu.memory_space<smem>>
    %22 = arith.index_cast %arg0 : i32 to index
    %23 = memref.load %arg3[%22] : memref<1xi32, #tpu.memory_space<smem>>
    %c0_14 = arith.constant 0 : index
    %c0_15 = arith.constant 0 : index
    %24 = vector.load %arg13[%c0_14, %c0_15] : memref<8x32xf32, #tpu.memory_space<vmem>>, vector<8x32xf32>
    %c0_i32_16 = arith.constant 0 : i32
    %25 = arith.sitofp %c0_i32_16 : i32 to f32
    %26 = arith.mulf %21, %25 : f32
    %27 = arith.addf %19, %26 : f32
    %cst = arith.constant dense<0.000000e+00> : vector<8x64xf32>
    %28 = tpu.matmul %24, %3, %cst {dimension_numbers = #tpu.dot_dimension_numbers<[1], [0], [0], [1], [0, 0, 1, 1], [], []>, precision = #tpu.contract_precision<fp32>} : vector<8x32xf32>, vector<32x64xf32>, vector<8x64xf32> -> vector<8x64xf32>
    %29 = vector.broadcast %27 : f32 to vector<8x64xf32>
    %30 = arith.mulf %29, %8 : vector<8x64xf32>
    %31 = arith.addf %28, %30 : vector<8x64xf32>
    %32 = arith.addf %31, %11 : vector<8x64xf32>
    %cst_17 = arith.constant 0.000000e+00 : f32
    %33 = vector.broadcast %cst_17 : f32 to vector<8x64xf32>
    %34 = arith.cmpf ogt, %32, %33 : vector<8x64xf32>
    %cst_18 = arith.constant 0.000000e+00 : f32
    %35 = vector.broadcast %cst_18 : f32 to vector<8x64xf32>
    %36 = arith.minimumf %32, %35 : vector<8x64xf32>
    %37 = math.exp %36 : vector<8x64xf32>
    %cst_19 = arith.constant 1.000000e+00 : f32
    %38 = vector.broadcast %cst_19 : f32 to vector<8x64xf32>
    %39 = arith.subf %37, %38 : vector<8x64xf32>
    %40 = arith.select %34, %32, %39 : vector<8x64xi1>, vector<8x64xf32>
    %cst_20 = arith.constant dense<0.000000e+00> : vector<8x64xf32>
    %41 = tpu.matmul %40, %4, %cst_20 {dimension_numbers = #tpu.dot_dimension_numbers<[1], [0], [0], [1], [0, 0, 1, 1], [], []>, precision = #tpu.contract_precision<fp32>} : vector<8x64xf32>, vector<64x64xf32>, vector<8x64xf32> -> vector<8x64xf32>
    %42 = arith.addf %41, %14 : vector<8x64xf32>
    %cst_21 = arith.constant 0.000000e+00 : f32
    %43 = vector.broadcast %cst_21 : f32 to vector<8x64xf32>
    %44 = arith.cmpf ogt, %42, %43 : vector<8x64xf32>
    %cst_22 = arith.constant 0.000000e+00 : f32
    %45 = vector.broadcast %cst_22 : f32 to vector<8x64xf32>
    %46 = arith.minimumf %42, %45 : vector<8x64xf32>
    %47 = math.exp %46 : vector<8x64xf32>
    %cst_23 = arith.constant 1.000000e+00 : f32
    %48 = vector.broadcast %cst_23 : f32 to vector<8x64xf32>
    %49 = arith.subf %47, %48 : vector<8x64xf32>
    %50 = arith.select %44, %42, %49 : vector<8x64xi1>, vector<8x64xf32>
    %cst_24 = arith.constant dense<0.000000e+00> : vector<8x32xf32>
    %51 = tpu.matmul %50, %5, %cst_24 {dimension_numbers = #tpu.dot_dimension_numbers<[1], [0], [0], [1], [0, 0, 1, 1], [], []>, precision = #tpu.contract_precision<fp32>} : vector<8x64xf32>, vector<64x32xf32>, vector<8x32xf32> -> vector<8x32xf32>
    %52 = arith.addf %51, %17 : vector<8x32xf32>
    %53 = arith.cmpi slt, %c0_i32_16, %23 : i32
    %cst_25 = arith.constant 0.000000e+00 : f32
    %54 = arith.select %53, %21, %cst_25 : f32
    %55 = vector.broadcast %54 : f32 to vector<8x32xf32>
    %56 = arith.mulf %55, %52 : vector<8x32xf32>
    %57 = arith.addf %24, %56 : vector<8x32xf32>
    %c1_i32 = arith.constant 1 : i32
    %58 = arith.sitofp %c1_i32 : i32 to f32
    %59 = arith.mulf %21, %58 : f32
    %60 = arith.addf %19, %59 : f32
    %cst_26 = arith.constant dense<0.000000e+00> : vector<8x64xf32>
    %61 = tpu.matmul %57, %3, %cst_26 {dimension_numbers = #tpu.dot_dimension_numbers<[1], [0], [0], [1], [0, 0, 1, 1], [], []>, precision = #tpu.contract_precision<fp32>} : vector<8x32xf32>, vector<32x64xf32>, vector<8x64xf32> -> vector<8x64xf32>
    %62 = vector.broadcast %60 : f32 to vector<8x64xf32>
    %63 = arith.mulf %62, %8 : vector<8x64xf32>
    %64 = arith.addf %61, %63 : vector<8x64xf32>
    %65 = arith.addf %64, %11 : vector<8x64xf32>
    %cst_27 = arith.constant 0.000000e+00 : f32
    %66 = vector.broadcast %cst_27 : f32 to vector<8x64xf32>
    %67 = arith.cmpf ogt, %65, %66 : vector<8x64xf32>
    %cst_28 = arith.constant 0.000000e+00 : f32
    %68 = vector.broadcast %cst_28 : f32 to vector<8x64xf32>
    %69 = arith.minimumf %65, %68 : vector<8x64xf32>
    %70 = math.exp %69 : vector<8x64xf32>
    %cst_29 = arith.constant 1.000000e+00 : f32
    %71 = vector.broadcast %cst_29 : f32 to vector<8x64xf32>
    %72 = arith.subf %70, %71 : vector<8x64xf32>
    %73 = arith.select %67, %65, %72 : vector<8x64xi1>, vector<8x64xf32>
    %cst_30 = arith.constant dense<0.000000e+00> : vector<8x64xf32>
    %74 = tpu.matmul %73, %4, %cst_30 {dimension_numbers = #tpu.dot_dimension_numbers<[1], [0], [0], [1], [0, 0, 1, 1], [], []>, precision = #tpu.contract_precision<fp32>} : vector<8x64xf32>, vector<64x64xf32>, vector<8x64xf32> -> vector<8x64xf32>
    %75 = arith.addf %74, %14 : vector<8x64xf32>
    %cst_31 = arith.constant 0.000000e+00 : f32
    %76 = vector.broadcast %cst_31 : f32 to vector<8x64xf32>
    %77 = arith.cmpf ogt, %75, %76 : vector<8x64xf32>
    %cst_32 = arith.constant 0.000000e+00 : f32
    %78 = vector.broadcast %cst_32 : f32 to vector<8x64xf32>
    %79 = arith.minimumf %75, %78 : vector<8x64xf32>
    %80 = math.exp %79 : vector<8x64xf32>
    %cst_33 = arith.constant 1.000000e+00 : f32
    %81 = vector.broadcast %cst_33 : f32 to vector<8x64xf32>
    %82 = arith.subf %80, %81 : vector<8x64xf32>
    %83 = arith.select %77, %75, %82 : vector<8x64xi1>, vector<8x64xf32>
    %cst_34 = arith.constant dense<0.000000e+00> : vector<8x32xf32>
    %84 = tpu.matmul %83, %5, %cst_34 {dimension_numbers = #tpu.dot_dimension_numbers<[1], [0], [0], [1], [0, 0, 1, 1], [], []>, precision = #tpu.contract_precision<fp32>} : vector<8x64xf32>, vector<64x32xf32>, vector<8x32xf32> -> vector<8x32xf32>
    %85 = arith.addf %84, %17 : vector<8x32xf32>
    %86 = arith.cmpi slt, %c1_i32, %23 : i32
    %cst_35 = arith.constant 0.000000e+00 : f32
    %87 = arith.select %86, %21, %cst_35 : f32
    %88 = vector.broadcast %87 : f32 to vector<8x32xf32>
    %89 = arith.mulf %88, %85 : vector<8x32xf32>
    %90 = arith.addf %57, %89 : vector<8x32xf32>
    %c2_i32 = arith.constant 2 : i32
    %91 = arith.sitofp %c2_i32 : i32 to f32
    %92 = arith.mulf %21, %91 : f32
    %93 = arith.addf %19, %92 : f32
    %cst_36 = arith.constant dense<0.000000e+00> : vector<8x64xf32>
    %94 = tpu.matmul %90, %3, %cst_36 {dimension_numbers = #tpu.dot_dimension_numbers<[1], [0], [0], [1], [0, 0, 1, 1], [], []>, precision = #tpu.contract_precision<fp32>} : vector<8x32xf32>, vector<32x64xf32>, vector<8x64xf32> -> vector<8x64xf32>
    %95 = vector.broadcast %93 : f32 to vector<8x64xf32>
    %96 = arith.mulf %95, %8 : vector<8x64xf32>
    %97 = arith.addf %94, %96 : vector<8x64xf32>
    %98 = arith.addf %97, %11 : vector<8x64xf32>
    %cst_37 = arith.constant 0.000000e+00 : f32
    %99 = vector.broadcast %cst_37 : f32 to vector<8x64xf32>
    %100 = arith.cmpf ogt, %98, %99 : vector<8x64xf32>
    %cst_38 = arith.constant 0.000000e+00 : f32
    %101 = vector.broadcast %cst_38 : f32 to vector<8x64xf32>
    %102 = arith.minimumf %98, %101 : vector<8x64xf32>
    %103 = math.exp %102 : vector<8x64xf32>
    %cst_39 = arith.constant 1.000000e+00 : f32
    %104 = vector.broadcast %cst_39 : f32 to vector<8x64xf32>
    %105 = arith.subf %103, %104 : vector<8x64xf32>
    %106 = arith.select %100, %98, %105 : vector<8x64xi1>, vector<8x64xf32>
    %cst_40 = arith.constant dense<0.000000e+00> : vector<8x64xf32>
    %107 = tpu.matmul %106, %4, %cst_40 {dimension_numbers = #tpu.dot_dimension_numbers<[1], [0], [0], [1], [0, 0, 1, 1], [], []>, precision = #tpu.contract_precision<fp32>} : vector<8x64xf32>, vector<64x64xf32>, vector<8x64xf32> -> vector<8x64xf32>
    %108 = arith.addf %107, %14 : vector<8x64xf32>
    %cst_41 = arith.constant 0.000000e+00 : f32
    %109 = vector.broadcast %cst_41 : f32 to vector<8x64xf32>
    %110 = arith.cmpf ogt, %108, %109 : vector<8x64xf32>
    %cst_42 = arith.constant 0.000000e+00 : f32
    %111 = vector.broadcast %cst_42 : f32 to vector<8x64xf32>
    %112 = arith.minimumf %108, %111 : vector<8x64xf32>
    %113 = math.exp %112 : vector<8x64xf32>
    %cst_43 = arith.constant 1.000000e+00 : f32
    %114 = vector.broadcast %cst_43 : f32 to vector<8x64xf32>
    %115 = arith.subf %113, %114 : vector<8x64xf32>
    %116 = arith.select %110, %108, %115 : vector<8x64xi1>, vector<8x64xf32>
    %cst_44 = arith.constant dense<0.000000e+00> : vector<8x32xf32>
    %117 = tpu.matmul %116, %5, %cst_44 {dimension_numbers = #tpu.dot_dimension_numbers<[1], [0], [0], [1], [0, 0, 1, 1], [], []>, precision = #tpu.contract_precision<fp32>} : vector<8x64xf32>, vector<64x32xf32>, vector<8x32xf32> -> vector<8x32xf32>
    %118 = arith.addf %117, %17 : vector<8x32xf32>
    %119 = arith.cmpi slt, %c2_i32, %23 : i32
    %cst_45 = arith.constant 0.000000e+00 : f32
    %120 = arith.select %119, %21, %cst_45 : f32
    %121 = vector.broadcast %120 : f32 to vector<8x32xf32>
    %122 = arith.mulf %121, %118 : vector<8x32xf32>
    %123 = arith.addf %90, %122 : vector<8x32xf32>
    %c3_i32 = arith.constant 3 : i32
    %124 = arith.sitofp %c3_i32 : i32 to f32
    %125 = arith.mulf %21, %124 : f32
    %126 = arith.addf %19, %125 : f32
    %cst_46 = arith.constant dense<0.000000e+00> : vector<8x64xf32>
    %127 = tpu.matmul %123, %3, %cst_46 {dimension_numbers = #tpu.dot_dimension_numbers<[1], [0], [0], [1], [0, 0, 1, 1], [], []>, precision = #tpu.contract_precision<fp32>} : vector<8x32xf32>, vector<32x64xf32>, vector<8x64xf32> -> vector<8x64xf32>
    %128 = vector.broadcast %126 : f32 to vector<8x64xf32>
    %129 = arith.mulf %128, %8 : vector<8x64xf32>
    %130 = arith.addf %127, %129 : vector<8x64xf32>
    %131 = arith.addf %130, %11 : vector<8x64xf32>
    %cst_47 = arith.constant 0.000000e+00 : f32
    %132 = vector.broadcast %cst_47 : f32 to vector<8x64xf32>
    %133 = arith.cmpf ogt, %131, %132 : vector<8x64xf32>
    %cst_48 = arith.constant 0.000000e+00 : f32
    %134 = vector.broadcast %cst_48 : f32 to vector<8x64xf32>
    %135 = arith.minimumf %131, %134 : vector<8x64xf32>
    %136 = math.exp %135 : vector<8x64xf32>
    %cst_49 = arith.constant 1.000000e+00 : f32
    %137 = vector.broadcast %cst_49 : f32 to vector<8x64xf32>
    %138 = arith.subf %136, %137 : vector<8x64xf32>
    %139 = arith.select %133, %131, %138 : vector<8x64xi1>, vector<8x64xf32>
    %cst_50 = arith.constant dense<0.000000e+00> : vector<8x64xf32>
    %140 = tpu.matmul %139, %4, %cst_50 {dimension_numbers = #tpu.dot_dimension_numbers<[1], [0], [0], [1], [0, 0, 1, 1], [], []>, precision = #tpu.contract_precision<fp32>} : vector<8x64xf32>, vector<64x64xf32>, vector<8x64xf32> -> vector<8x64xf32>
    %141 = arith.addf %140, %14 : vector<8x64xf32>
    %cst_51 = arith.constant 0.000000e+00 : f32
    %142 = vector.broadcast %cst_51 : f32 to vector<8x64xf32>
    %143 = arith.cmpf ogt, %141, %142 : vector<8x64xf32>
    %cst_52 = arith.constant 0.000000e+00 : f32
    %144 = vector.broadcast %cst_52 : f32 to vector<8x64xf32>
    %145 = arith.minimumf %141, %144 : vector<8x64xf32>
    %146 = math.exp %145 : vector<8x64xf32>
    %cst_53 = arith.constant 1.000000e+00 : f32
    %147 = vector.broadcast %cst_53 : f32 to vector<8x64xf32>
    %148 = arith.subf %146, %147 : vector<8x64xf32>
    %149 = arith.select %143, %141, %148 : vector<8x64xi1>, vector<8x64xf32>
    %cst_54 = arith.constant dense<0.000000e+00> : vector<8x32xf32>
    %150 = tpu.matmul %149, %5, %cst_54 {dimension_numbers = #tpu.dot_dimension_numbers<[1], [0], [0], [1], [0, 0, 1, 1], [], []>, precision = #tpu.contract_precision<fp32>} : vector<8x64xf32>, vector<64x32xf32>, vector<8x32xf32> -> vector<8x32xf32>
    %151 = arith.addf %150, %17 : vector<8x32xf32>
    %152 = arith.cmpi slt, %c3_i32, %23 : i32
    %cst_55 = arith.constant 0.000000e+00 : f32
    %153 = arith.select %152, %21, %cst_55 : f32
    %154 = vector.broadcast %153 : f32 to vector<8x32xf32>
    %155 = arith.mulf %154, %151 : vector<8x32xf32>
    %156 = arith.addf %123, %155 : vector<8x32xf32>
    %c4_i32 = arith.constant 4 : i32
    %157 = arith.sitofp %c4_i32 : i32 to f32
    %158 = arith.mulf %21, %157 : f32
    %159 = arith.addf %19, %158 : f32
    %cst_56 = arith.constant dense<0.000000e+00> : vector<8x64xf32>
    %160 = tpu.matmul %156, %3, %cst_56 {dimension_numbers = #tpu.dot_dimension_numbers<[1], [0], [0], [1], [0, 0, 1, 1], [], []>, precision = #tpu.contract_precision<fp32>} : vector<8x32xf32>, vector<32x64xf32>, vector<8x64xf32> -> vector<8x64xf32>
    %161 = vector.broadcast %159 : f32 to vector<8x64xf32>
    %162 = arith.mulf %161, %8 : vector<8x64xf32>
    %163 = arith.addf %160, %162 : vector<8x64xf32>
    %164 = arith.addf %163, %11 : vector<8x64xf32>
    %cst_57 = arith.constant 0.000000e+00 : f32
    %165 = vector.broadcast %cst_57 : f32 to vector<8x64xf32>
    %166 = arith.cmpf ogt, %164, %165 : vector<8x64xf32>
    %cst_58 = arith.constant 0.000000e+00 : f32
    %167 = vector.broadcast %cst_58 : f32 to vector<8x64xf32>
    %168 = arith.minimumf %164, %167 : vector<8x64xf32>
    %169 = math.exp %168 : vector<8x64xf32>
    %cst_59 = arith.constant 1.000000e+00 : f32
    %170 = vector.broadcast %cst_59 : f32 to vector<8x64xf32>
    %171 = arith.subf %169, %170 : vector<8x64xf32>
    %172 = arith.select %166, %164, %171 : vector<8x64xi1>, vector<8x64xf32>
    %cst_60 = arith.constant dense<0.000000e+00> : vector<8x64xf32>
    %173 = tpu.matmul %172, %4, %cst_60 {dimension_numbers = #tpu.dot_dimension_numbers<[1], [0], [0], [1], [0, 0, 1, 1], [], []>, precision = #tpu.contract_precision<fp32>} : vector<8x64xf32>, vector<64x64xf32>, vector<8x64xf32> -> vector<8x64xf32>
    %174 = arith.addf %173, %14 : vector<8x64xf32>
    %cst_61 = arith.constant 0.000000e+00 : f32
    %175 = vector.broadcast %cst_61 : f32 to vector<8x64xf32>
    %176 = arith.cmpf ogt, %174, %175 : vector<8x64xf32>
    %cst_62 = arith.constant 0.000000e+00 : f32
    %177 = vector.broadcast %cst_62 : f32 to vector<8x64xf32>
    %178 = arith.minimumf %174, %177 : vector<8x64xf32>
    %179 = math.exp %178 : vector<8x64xf32>
    %cst_63 = arith.constant 1.000000e+00 : f32
    %180 = vector.broadcast %cst_63 : f32 to vector<8x64xf32>
    %181 = arith.subf %179, %180 : vector<8x64xf32>
    %182 = arith.select %176, %174, %181 : vector<8x64xi1>, vector<8x64xf32>
    %cst_64 = arith.constant dense<0.000000e+00> : vector<8x32xf32>
    %183 = tpu.matmul %182, %5, %cst_64 {dimension_numbers = #tpu.dot_dimension_numbers<[1], [0], [0], [1], [0, 0, 1, 1], [], []>, precision = #tpu.contract_precision<fp32>} : vector<8x64xf32>, vector<64x32xf32>, vector<8x32xf32> -> vector<8x32xf32>
    %184 = arith.addf %183, %17 : vector<8x32xf32>
    %185 = arith.cmpi slt, %c4_i32, %23 : i32
    %cst_65 = arith.constant 0.000000e+00 : f32
    %186 = arith.select %185, %21, %cst_65 : f32
    %187 = vector.broadcast %186 : f32 to vector<8x32xf32>
    %188 = arith.mulf %187, %184 : vector<8x32xf32>
    %189 = arith.addf %156, %188 : vector<8x32xf32>
    %c5_i32 = arith.constant 5 : i32
    %190 = arith.sitofp %c5_i32 : i32 to f32
    %191 = arith.mulf %21, %190 : f32
    %192 = arith.addf %19, %191 : f32
    %cst_66 = arith.constant dense<0.000000e+00> : vector<8x64xf32>
    %193 = tpu.matmul %189, %3, %cst_66 {dimension_numbers = #tpu.dot_dimension_numbers<[1], [0], [0], [1], [0, 0, 1, 1], [], []>, precision = #tpu.contract_precision<fp32>} : vector<8x32xf32>, vector<32x64xf32>, vector<8x64xf32> -> vector<8x64xf32>
    %194 = vector.broadcast %192 : f32 to vector<8x64xf32>
    %195 = arith.mulf %194, %8 : vector<8x64xf32>
    %196 = arith.addf %193, %195 : vector<8x64xf32>
    %197 = arith.addf %196, %11 : vector<8x64xf32>
    %cst_67 = arith.constant 0.000000e+00 : f32
    %198 = vector.broadcast %cst_67 : f32 to vector<8x64xf32>
    %199 = arith.cmpf ogt, %197, %198 : vector<8x64xf32>
    %cst_68 = arith.constant 0.000000e+00 : f32
    %200 = vector.broadcast %cst_68 : f32 to vector<8x64xf32>
    %201 = arith.minimumf %197, %200 : vector<8x64xf32>
    %202 = math.exp %201 : vector<8x64xf32>
    %cst_69 = arith.constant 1.000000e+00 : f32
    %203 = vector.broadcast %cst_69 : f32 to vector<8x64xf32>
    %204 = arith.subf %202, %203 : vector<8x64xf32>
    %205 = arith.select %199, %197, %204 : vector<8x64xi1>, vector<8x64xf32>
    %cst_70 = arith.constant dense<0.000000e+00> : vector<8x64xf32>
    %206 = tpu.matmul %205, %4, %cst_70 {dimension_numbers = #tpu.dot_dimension_numbers<[1], [0], [0], [1], [0, 0, 1, 1], [], []>, precision = #tpu.contract_precision<fp32>} : vector<8x64xf32>, vector<64x64xf32>, vector<8x64xf32> -> vector<8x64xf32>
    %207 = arith.addf %206, %14 : vector<8x64xf32>
    %cst_71 = arith.constant 0.000000e+00 : f32
    %208 = vector.broadcast %cst_71 : f32 to vector<8x64xf32>
    %209 = arith.cmpf ogt, %207, %208 : vector<8x64xf32>
    %cst_72 = arith.constant 0.000000e+00 : f32
    %210 = vector.broadcast %cst_72 : f32 to vector<8x64xf32>
    %211 = arith.minimumf %207, %210 : vector<8x64xf32>
    %212 = math.exp %211 : vector<8x64xf32>
    %cst_73 = arith.constant 1.000000e+00 : f32
    %213 = vector.broadcast %cst_73 : f32 to vector<8x64xf32>
    %214 = arith.subf %212, %213 : vector<8x64xf32>
    %215 = arith.select %209, %207, %214 : vector<8x64xi1>, vector<8x64xf32>
    %cst_74 = arith.constant dense<0.000000e+00> : vector<8x32xf32>
    %216 = tpu.matmul %215, %5, %cst_74 {dimension_numbers = #tpu.dot_dimension_numbers<[1], [0], [0], [1], [0, 0, 1, 1], [], []>, precision = #tpu.contract_precision<fp32>} : vector<8x64xf32>, vector<64x32xf32>, vector<8x32xf32> -> vector<8x32xf32>
    %217 = arith.addf %216, %17 : vector<8x32xf32>
    %218 = arith.cmpi slt, %c5_i32, %23 : i32
    %cst_75 = arith.constant 0.000000e+00 : f32
    %219 = arith.select %218, %21, %cst_75 : f32
    %220 = vector.broadcast %219 : f32 to vector<8x32xf32>
    %221 = arith.mulf %220, %217 : vector<8x32xf32>
    %222 = arith.addf %189, %221 : vector<8x32xf32>
    %c6_i32 = arith.constant 6 : i32
    %223 = arith.sitofp %c6_i32 : i32 to f32
    %224 = arith.mulf %21, %223 : f32
    %225 = arith.addf %19, %224 : f32
    %cst_76 = arith.constant dense<0.000000e+00> : vector<8x64xf32>
    %226 = tpu.matmul %222, %3, %cst_76 {dimension_numbers = #tpu.dot_dimension_numbers<[1], [0], [0], [1], [0, 0, 1, 1], [], []>, precision = #tpu.contract_precision<fp32>} : vector<8x32xf32>, vector<32x64xf32>, vector<8x64xf32> -> vector<8x64xf32>
    %227 = vector.broadcast %225 : f32 to vector<8x64xf32>
    %228 = arith.mulf %227, %8 : vector<8x64xf32>
    %229 = arith.addf %226, %228 : vector<8x64xf32>
    %230 = arith.addf %229, %11 : vector<8x64xf32>
    %cst_77 = arith.constant 0.000000e+00 : f32
    %231 = vector.broadcast %cst_77 : f32 to vector<8x64xf32>
    %232 = arith.cmpf ogt, %230, %231 : vector<8x64xf32>
    %cst_78 = arith.constant 0.000000e+00 : f32
    %233 = vector.broadcast %cst_78 : f32 to vector<8x64xf32>
    %234 = arith.minimumf %230, %233 : vector<8x64xf32>
    %235 = math.exp %234 : vector<8x64xf32>
    %cst_79 = arith.constant 1.000000e+00 : f32
    %236 = vector.broadcast %cst_79 : f32 to vector<8x64xf32>
    %237 = arith.subf %235, %236 : vector<8x64xf32>
    %238 = arith.select %232, %230, %237 : vector<8x64xi1>, vector<8x64xf32>
    %cst_80 = arith.constant dense<0.000000e+00> : vector<8x64xf32>
    %239 = tpu.matmul %238, %4, %cst_80 {dimension_numbers = #tpu.dot_dimension_numbers<[1], [0], [0], [1], [0, 0, 1, 1], [], []>, precision = #tpu.contract_precision<fp32>} : vector<8x64xf32>, vector<64x64xf32>, vector<8x64xf32> -> vector<8x64xf32>
    %240 = arith.addf %239, %14 : vector<8x64xf32>
    %cst_81 = arith.constant 0.000000e+00 : f32
    %241 = vector.broadcast %cst_81 : f32 to vector<8x64xf32>
    %242 = arith.cmpf ogt, %240, %241 : vector<8x64xf32>
    %cst_82 = arith.constant 0.000000e+00 : f32
    %243 = vector.broadcast %cst_82 : f32 to vector<8x64xf32>
    %244 = arith.minimumf %240, %243 : vector<8x64xf32>
    %245 = math.exp %244 : vector<8x64xf32>
    %cst_83 = arith.constant 1.000000e+00 : f32
    %246 = vector.broadcast %cst_83 : f32 to vector<8x64xf32>
    %247 = arith.subf %245, %246 : vector<8x64xf32>
    %248 = arith.select %242, %240, %247 : vector<8x64xi1>, vector<8x64xf32>
    %cst_84 = arith.constant dense<0.000000e+00> : vector<8x32xf32>
    %249 = tpu.matmul %248, %5, %cst_84 {dimension_numbers = #tpu.dot_dimension_numbers<[1], [0], [0], [1], [0, 0, 1, 1], [], []>, precision = #tpu.contract_precision<fp32>} : vector<8x64xf32>, vector<64x32xf32>, vector<8x32xf32> -> vector<8x32xf32>
    %250 = arith.addf %249, %17 : vector<8x32xf32>
    %251 = arith.cmpi slt, %c6_i32, %23 : i32
    %cst_85 = arith.constant 0.000000e+00 : f32
    %252 = arith.select %251, %21, %cst_85 : f32
    %253 = vector.broadcast %252 : f32 to vector<8x32xf32>
    %254 = arith.mulf %253, %250 : vector<8x32xf32>
    %255 = arith.addf %222, %254 : vector<8x32xf32>
    %c7_i32 = arith.constant 7 : i32
    %256 = arith.sitofp %c7_i32 : i32 to f32
    %257 = arith.mulf %21, %256 : f32
    %258 = arith.addf %19, %257 : f32
    %cst_86 = arith.constant dense<0.000000e+00> : vector<8x64xf32>
    %259 = tpu.matmul %255, %3, %cst_86 {dimension_numbers = #tpu.dot_dimension_numbers<[1], [0], [0], [1], [0, 0, 1, 1], [], []>, precision = #tpu.contract_precision<fp32>} : vector<8x32xf32>, vector<32x64xf32>, vector<8x64xf32> -> vector<8x64xf32>
    %260 = vector.broadcast %258 : f32 to vector<8x64xf32>
    %261 = arith.mulf %260, %8 : vector<8x64xf32>
    %262 = arith.addf %259, %261 : vector<8x64xf32>
    %263 = arith.addf %262, %11 : vector<8x64xf32>
    %cst_87 = arith.constant 0.000000e+00 : f32
    %264 = vector.broadcast %cst_87 : f32 to vector<8x64xf32>
    %265 = arith.cmpf ogt, %263, %264 : vector<8x64xf32>
    %cst_88 = arith.constant 0.000000e+00 : f32
    %266 = vector.broadcast %cst_88 : f32 to vector<8x64xf32>
    %267 = arith.minimumf %263, %266 : vector<8x64xf32>
    %268 = math.exp %267 : vector<8x64xf32>
    %cst_89 = arith.constant 1.000000e+00 : f32
    %269 = vector.broadcast %cst_89 : f32 to vector<8x64xf32>
    %270 = arith.subf %268, %269 : vector<8x64xf32>
    %271 = arith.select %265, %263, %270 : vector<8x64xi1>, vector<8x64xf32>
    %cst_90 = arith.constant dense<0.000000e+00> : vector<8x64xf32>
    %272 = tpu.matmul %271, %4, %cst_90 {dimension_numbers = #tpu.dot_dimension_numbers<[1], [0], [0], [1], [0, 0, 1, 1], [], []>, precision = #tpu.contract_precision<fp32>} : vector<8x64xf32>, vector<64x64xf32>, vector<8x64xf32> -> vector<8x64xf32>
    %273 = arith.addf %272, %14 : vector<8x64xf32>
    %cst_91 = arith.constant 0.000000e+00 : f32
    %274 = vector.broadcast %cst_91 : f32 to vector<8x64xf32>
    %275 = arith.cmpf ogt, %273, %274 : vector<8x64xf32>
    %cst_92 = arith.constant 0.000000e+00 : f32
    %276 = vector.broadcast %cst_92 : f32 to vector<8x64xf32>
    %277 = arith.minimumf %273, %276 : vector<8x64xf32>
    %278 = math.exp %277 : vector<8x64xf32>
    %cst_93 = arith.constant 1.000000e+00 : f32
    %279 = vector.broadcast %cst_93 : f32 to vector<8x64xf32>
    %280 = arith.subf %278, %279 : vector<8x64xf32>
    %281 = arith.select %275, %273, %280 : vector<8x64xi1>, vector<8x64xf32>
    %cst_94 = arith.constant dense<0.000000e+00> : vector<8x32xf32>
    %282 = tpu.matmul %281, %5, %cst_94 {dimension_numbers = #tpu.dot_dimension_numbers<[1], [0], [0], [1], [0, 0, 1, 1], [], []>, precision = #tpu.contract_precision<fp32>} : vector<8x64xf32>, vector<64x32xf32>, vector<8x32xf32> -> vector<8x32xf32>
    %283 = arith.addf %282, %17 : vector<8x32xf32>
    %284 = arith.cmpi slt, %c7_i32, %23 : i32
    %cst_95 = arith.constant 0.000000e+00 : f32
    %285 = arith.select %284, %21, %cst_95 : f32
    %286 = vector.broadcast %285 : f32 to vector<8x32xf32>
    %287 = arith.mulf %286, %283 : vector<8x32xf32>
    %288 = arith.addf %255, %287 : vector<8x32xf32>
    %c8_i32 = arith.constant 8 : i32
    %289 = arith.sitofp %c8_i32 : i32 to f32
    %290 = arith.mulf %21, %289 : f32
    %291 = arith.addf %19, %290 : f32
    %cst_96 = arith.constant dense<0.000000e+00> : vector<8x64xf32>
    %292 = tpu.matmul %288, %3, %cst_96 {dimension_numbers = #tpu.dot_dimension_numbers<[1], [0], [0], [1], [0, 0, 1, 1], [], []>, precision = #tpu.contract_precision<fp32>} : vector<8x32xf32>, vector<32x64xf32>, vector<8x64xf32> -> vector<8x64xf32>
    %293 = vector.broadcast %291 : f32 to vector<8x64xf32>
    %294 = arith.mulf %293, %8 : vector<8x64xf32>
    %295 = arith.addf %292, %294 : vector<8x64xf32>
    %296 = arith.addf %295, %11 : vector<8x64xf32>
    %cst_97 = arith.constant 0.000000e+00 : f32
    %297 = vector.broadcast %cst_97 : f32 to vector<8x64xf32>
    %298 = arith.cmpf ogt, %296, %297 : vector<8x64xf32>
    %cst_98 = arith.constant 0.000000e+00 : f32
    %299 = vector.broadcast %cst_98 : f32 to vector<8x64xf32>
    %300 = arith.minimumf %296, %299 : vector<8x64xf32>
    %301 = math.exp %300 : vector<8x64xf32>
    %cst_99 = arith.constant 1.000000e+00 : f32
    %302 = vector.broadcast %cst_99 : f32 to vector<8x64xf32>
    %303 = arith.subf %301, %302 : vector<8x64xf32>
    %304 = arith.select %298, %296, %303 : vector<8x64xi1>, vector<8x64xf32>
    %cst_100 = arith.constant dense<0.000000e+00> : vector<8x64xf32>
    %305 = tpu.matmul %304, %4, %cst_100 {dimension_numbers = #tpu.dot_dimension_numbers<[1], [0], [0], [1], [0, 0, 1, 1], [], []>, precision = #tpu.contract_precision<fp32>} : vector<8x64xf32>, vector<64x64xf32>, vector<8x64xf32> -> vector<8x64xf32>
    %306 = arith.addf %305, %14 : vector<8x64xf32>
    %cst_101 = arith.constant 0.000000e+00 : f32
    %307 = vector.broadcast %cst_101 : f32 to vector<8x64xf32>
    %308 = arith.cmpf ogt, %306, %307 : vector<8x64xf32>
    %cst_102 = arith.constant 0.000000e+00 : f32
    %309 = vector.broadcast %cst_102 : f32 to vector<8x64xf32>
    %310 = arith.minimumf %306, %309 : vector<8x64xf32>
    %311 = math.exp %310 : vector<8x64xf32>
    %cst_103 = arith.constant 1.000000e+00 : f32
    %312 = vector.broadcast %cst_103 : f32 to vector<8x64xf32>
    %313 = arith.subf %311, %312 : vector<8x64xf32>
    %314 = arith.select %308, %306, %313 : vector<8x64xi1>, vector<8x64xf32>
    %cst_104 = arith.constant dense<0.000000e+00> : vector<8x32xf32>
    %315 = tpu.matmul %314, %5, %cst_104 {dimension_numbers = #tpu.dot_dimension_numbers<[1], [0], [0], [1], [0, 0, 1, 1], [], []>, precision = #tpu.contract_precision<fp32>} : vector<8x64xf32>, vector<64x32xf32>, vector<8x32xf32> -> vector<8x32xf32>
    %316 = arith.addf %315, %17 : vector<8x32xf32>
    %317 = arith.cmpi slt, %c8_i32, %23 : i32
    %cst_105 = arith.constant 0.000000e+00 : f32
    %318 = arith.select %317, %21, %cst_105 : f32
    %319 = vector.broadcast %318 : f32 to vector<8x32xf32>
    %320 = arith.mulf %319, %316 : vector<8x32xf32>
    %321 = arith.addf %288, %320 : vector<8x32xf32>
    %c9_i32 = arith.constant 9 : i32
    %322 = arith.sitofp %c9_i32 : i32 to f32
    %323 = arith.mulf %21, %322 : f32
    %324 = arith.addf %19, %323 : f32
    %cst_106 = arith.constant dense<0.000000e+00> : vector<8x64xf32>
    %325 = tpu.matmul %321, %3, %cst_106 {dimension_numbers = #tpu.dot_dimension_numbers<[1], [0], [0], [1], [0, 0, 1, 1], [], []>, precision = #tpu.contract_precision<fp32>} : vector<8x32xf32>, vector<32x64xf32>, vector<8x64xf32> -> vector<8x64xf32>
    %326 = vector.broadcast %324 : f32 to vector<8x64xf32>
    %327 = arith.mulf %326, %8 : vector<8x64xf32>
    %328 = arith.addf %325, %327 : vector<8x64xf32>
    %329 = arith.addf %328, %11 : vector<8x64xf32>
    %cst_107 = arith.constant 0.000000e+00 : f32
    %330 = vector.broadcast %cst_107 : f32 to vector<8x64xf32>
    %331 = arith.cmpf ogt, %329, %330 : vector<8x64xf32>
    %cst_108 = arith.constant 0.000000e+00 : f32
    %332 = vector.broadcast %cst_108 : f32 to vector<8x64xf32>
    %333 = arith.minimumf %329, %332 : vector<8x64xf32>
    %334 = math.exp %333 : vector<8x64xf32>
    %cst_109 = arith.constant 1.000000e+00 : f32
    %335 = vector.broadcast %cst_109 : f32 to vector<8x64xf32>
    %336 = arith.subf %334, %335 : vector<8x64xf32>
    %337 = arith.select %331, %329, %336 : vector<8x64xi1>, vector<8x64xf32>
    %cst_110 = arith.constant dense<0.000000e+00> : vector<8x64xf32>
    %338 = tpu.matmul %337, %4, %cst_110 {dimension_numbers = #tpu.dot_dimension_numbers<[1], [0], [0], [1], [0, 0, 1, 1], [], []>, precision = #tpu.contract_precision<fp32>} : vector<8x64xf32>, vector<64x64xf32>, vector<8x64xf32> -> vector<8x64xf32>
    %339 = arith.addf %338, %14 : vector<8x64xf32>
    %cst_111 = arith.constant 0.000000e+00 : f32
    %340 = vector.broadcast %cst_111 : f32 to vector<8x64xf32>
    %341 = arith.cmpf ogt, %339, %340 : vector<8x64xf32>
    %cst_112 = arith.constant 0.000000e+00 : f32
    %342 = vector.broadcast %cst_112 : f32 to vector<8x64xf32>
    %343 = arith.minimumf %339, %342 : vector<8x64xf32>
    %344 = math.exp %343 : vector<8x64xf32>
    %cst_113 = arith.constant 1.000000e+00 : f32
    %345 = vector.broadcast %cst_113 : f32 to vector<8x64xf32>
    %346 = arith.subf %344, %345 : vector<8x64xf32>
    %347 = arith.select %341, %339, %346 : vector<8x64xi1>, vector<8x64xf32>
    %cst_114 = arith.constant dense<0.000000e+00> : vector<8x32xf32>
    %348 = tpu.matmul %347, %5, %cst_114 {dimension_numbers = #tpu.dot_dimension_numbers<[1], [0], [0], [1], [0, 0, 1, 1], [], []>, precision = #tpu.contract_precision<fp32>} : vector<8x64xf32>, vector<64x32xf32>, vector<8x32xf32> -> vector<8x32xf32>
    %349 = arith.addf %348, %17 : vector<8x32xf32>
    %350 = arith.cmpi slt, %c9_i32, %23 : i32
    %cst_115 = arith.constant 0.000000e+00 : f32
    %351 = arith.select %350, %21, %cst_115 : f32
    %352 = vector.broadcast %351 : f32 to vector<8x32xf32>
    %353 = arith.mulf %352, %349 : vector<8x32xf32>
    %354 = arith.addf %321, %353 : vector<8x32xf32>
    %c10_i32 = arith.constant 10 : i32
    %355 = arith.sitofp %c10_i32 : i32 to f32
    %356 = arith.mulf %21, %355 : f32
    %357 = arith.addf %19, %356 : f32
    %cst_116 = arith.constant dense<0.000000e+00> : vector<8x64xf32>
    %358 = tpu.matmul %354, %3, %cst_116 {dimension_numbers = #tpu.dot_dimension_numbers<[1], [0], [0], [1], [0, 0, 1, 1], [], []>, precision = #tpu.contract_precision<fp32>} : vector<8x32xf32>, vector<32x64xf32>, vector<8x64xf32> -> vector<8x64xf32>
    %359 = vector.broadcast %357 : f32 to vector<8x64xf32>
    %360 = arith.mulf %359, %8 : vector<8x64xf32>
    %361 = arith.addf %358, %360 : vector<8x64xf32>
    %362 = arith.addf %361, %11 : vector<8x64xf32>
    %cst_117 = arith.constant 0.000000e+00 : f32
    %363 = vector.broadcast %cst_117 : f32 to vector<8x64xf32>
    %364 = arith.cmpf ogt, %362, %363 : vector<8x64xf32>
    %cst_118 = arith.constant 0.000000e+00 : f32
    %365 = vector.broadcast %cst_118 : f32 to vector<8x64xf32>
    %366 = arith.minimumf %362, %365 : vector<8x64xf32>
    %367 = math.exp %366 : vector<8x64xf32>
    %cst_119 = arith.constant 1.000000e+00 : f32
    %368 = vector.broadcast %cst_119 : f32 to vector<8x64xf32>
    %369 = arith.subf %367, %368 : vector<8x64xf32>
    %370 = arith.select %364, %362, %369 : vector<8x64xi1>, vector<8x64xf32>
    %cst_120 = arith.constant dense<0.000000e+00> : vector<8x64xf32>
    %371 = tpu.matmul %370, %4, %cst_120 {dimension_numbers = #tpu.dot_dimension_numbers<[1], [0], [0], [1], [0, 0, 1, 1], [], []>, precision = #tpu.contract_precision<fp32>} : vector<8x64xf32>, vector<64x64xf32>, vector<8x64xf32> -> vector<8x64xf32>
    %372 = arith.addf %371, %14 : vector<8x64xf32>
    %cst_121 = arith.constant 0.000000e+00 : f32
    %373 = vector.broadcast %cst_121 : f32 to vector<8x64xf32>
    %374 = arith.cmpf ogt, %372, %373 : vector<8x64xf32>
    %cst_122 = arith.constant 0.000000e+00 : f32
    %375 = vector.broadcast %cst_122 : f32 to vector<8x64xf32>
    %376 = arith.minimumf %372, %375 : vector<8x64xf32>
    %377 = math.exp %376 : vector<8x64xf32>
    %cst_123 = arith.constant 1.000000e+00 : f32
    %378 = vector.broadcast %cst_123 : f32 to vector<8x64xf32>
    %379 = arith.subf %377, %378 : vector<8x64xf32>
    %380 = arith.select %374, %372, %379 : vector<8x64xi1>, vector<8x64xf32>
    %cst_124 = arith.constant dense<0.000000e+00> : vector<8x32xf32>
    %381 = tpu.matmul %380, %5, %cst_124 {dimension_numbers = #tpu.dot_dimension_numbers<[1], [0], [0], [1], [0, 0, 1, 1], [], []>, precision = #tpu.contract_precision<fp32>} : vector<8x64xf32>, vector<64x32xf32>, vector<8x32xf32> -> vector<8x32xf32>
    %382 = arith.addf %381, %17 : vector<8x32xf32>
    %383 = arith.cmpi slt, %c10_i32, %23 : i32
    %cst_125 = arith.constant 0.000000e+00 : f32
    %384 = arith.select %383, %21, %cst_125 : f32
    %385 = vector.broadcast %384 : f32 to vector<8x32xf32>
    %386 = arith.mulf %385, %382 : vector<8x32xf32>
    %387 = arith.addf %354, %386 : vector<8x32xf32>
    %c11_i32 = arith.constant 11 : i32
    %388 = arith.sitofp %c11_i32 : i32 to f32
    %389 = arith.mulf %21, %388 : f32
    %390 = arith.addf %19, %389 : f32
    %cst_126 = arith.constant dense<0.000000e+00> : vector<8x64xf32>
    %391 = tpu.matmul %387, %3, %cst_126 {dimension_numbers = #tpu.dot_dimension_numbers<[1], [0], [0], [1], [0, 0, 1, 1], [], []>, precision = #tpu.contract_precision<fp32>} : vector<8x32xf32>, vector<32x64xf32>, vector<8x64xf32> -> vector<8x64xf32>
    %392 = vector.broadcast %390 : f32 to vector<8x64xf32>
    %393 = arith.mulf %392, %8 : vector<8x64xf32>
    %394 = arith.addf %391, %393 : vector<8x64xf32>
    %395 = arith.addf %394, %11 : vector<8x64xf32>
    %cst_127 = arith.constant 0.000000e+00 : f32
    %396 = vector.broadcast %cst_127 : f32 to vector<8x64xf32>
    %397 = arith.cmpf ogt, %395, %396 : vector<8x64xf32>
    %cst_128 = arith.constant 0.000000e+00 : f32
    %398 = vector.broadcast %cst_128 : f32 to vector<8x64xf32>
    %399 = arith.minimumf %395, %398 : vector<8x64xf32>
    %400 = math.exp %399 : vector<8x64xf32>
    %cst_129 = arith.constant 1.000000e+00 : f32
    %401 = vector.broadcast %cst_129 : f32 to vector<8x64xf32>
    %402 = arith.subf %400, %401 : vector<8x64xf32>
    %403 = arith.select %397, %395, %402 : vector<8x64xi1>, vector<8x64xf32>
    %cst_130 = arith.constant dense<0.000000e+00> : vector<8x64xf32>
    %404 = tpu.matmul %403, %4, %cst_130 {dimension_numbers = #tpu.dot_dimension_numbers<[1], [0], [0], [1], [0, 0, 1, 1], [], []>, precision = #tpu.contract_precision<fp32>} : vector<8x64xf32>, vector<64x64xf32>, vector<8x64xf32> -> vector<8x64xf32>
    %405 = arith.addf %404, %14 : vector<8x64xf32>
    %cst_131 = arith.constant 0.000000e+00 : f32
    %406 = vector.broadcast %cst_131 : f32 to vector<8x64xf32>
    %407 = arith.cmpf ogt, %405, %406 : vector<8x64xf32>
    %cst_132 = arith.constant 0.000000e+00 : f32
    %408 = vector.broadcast %cst_132 : f32 to vector<8x64xf32>
    %409 = arith.minimumf %405, %408 : vector<8x64xf32>
    %410 = math.exp %409 : vector<8x64xf32>
    %cst_133 = arith.constant 1.000000e+00 : f32
    %411 = vector.broadcast %cst_133 : f32 to vector<8x64xf32>
    %412 = arith.subf %410, %411 : vector<8x64xf32>
    %413 = arith.select %407, %405, %412 : vector<8x64xi1>, vector<8x64xf32>
    %cst_134 = arith.constant dense<0.000000e+00> : vector<8x32xf32>
    %414 = tpu.matmul %413, %5, %cst_134 {dimension_numbers = #tpu.dot_dimension_numbers<[1], [0], [0], [1], [0, 0, 1, 1], [], []>, precision = #tpu.contract_precision<fp32>} : vector<8x64xf32>, vector<64x32xf32>, vector<8x32xf32> -> vector<8x32xf32>
    %415 = arith.addf %414, %17 : vector<8x32xf32>
    %416 = arith.cmpi slt, %c11_i32, %23 : i32
    %cst_135 = arith.constant 0.000000e+00 : f32
    %417 = arith.select %416, %21, %cst_135 : f32
    %418 = vector.broadcast %417 : f32 to vector<8x32xf32>
    %419 = arith.mulf %418, %415 : vector<8x32xf32>
    %420 = arith.addf %387, %419 : vector<8x32xf32>
    %c12_i32 = arith.constant 12 : i32
    %421 = arith.sitofp %c12_i32 : i32 to f32
    %422 = arith.mulf %21, %421 : f32
    %423 = arith.addf %19, %422 : f32
    %cst_136 = arith.constant dense<0.000000e+00> : vector<8x64xf32>
    %424 = tpu.matmul %420, %3, %cst_136 {dimension_numbers = #tpu.dot_dimension_numbers<[1], [0], [0], [1], [0, 0, 1, 1], [], []>, precision = #tpu.contract_precision<fp32>} : vector<8x32xf32>, vector<32x64xf32>, vector<8x64xf32> -> vector<8x64xf32>
    %425 = vector.broadcast %423 : f32 to vector<8x64xf32>
    %426 = arith.mulf %425, %8 : vector<8x64xf32>
    %427 = arith.addf %424, %426 : vector<8x64xf32>
    %428 = arith.addf %427, %11 : vector<8x64xf32>
    %cst_137 = arith.constant 0.000000e+00 : f32
    %429 = vector.broadcast %cst_137 : f32 to vector<8x64xf32>
    %430 = arith.cmpf ogt, %428, %429 : vector<8x64xf32>
    %cst_138 = arith.constant 0.000000e+00 : f32
    %431 = vector.broadcast %cst_138 : f32 to vector<8x64xf32>
    %432 = arith.minimumf %428, %431 : vector<8x64xf32>
    %433 = math.exp %432 : vector<8x64xf32>
    %cst_139 = arith.constant 1.000000e+00 : f32
    %434 = vector.broadcast %cst_139 : f32 to vector<8x64xf32>
    %435 = arith.subf %433, %434 : vector<8x64xf32>
    %436 = arith.select %430, %428, %435 : vector<8x64xi1>, vector<8x64xf32>
    %cst_140 = arith.constant dense<0.000000e+00> : vector<8x64xf32>
    %437 = tpu.matmul %436, %4, %cst_140 {dimension_numbers = #tpu.dot_dimension_numbers<[1], [0], [0], [1], [0, 0, 1, 1], [], []>, precision = #tpu.contract_precision<fp32>} : vector<8x64xf32>, vector<64x64xf32>, vector<8x64xf32> -> vector<8x64xf32>
    %438 = arith.addf %437, %14 : vector<8x64xf32>
    %cst_141 = arith.constant 0.000000e+00 : f32
    %439 = vector.broadcast %cst_141 : f32 to vector<8x64xf32>
    %440 = arith.cmpf ogt, %438, %439 : vector<8x64xf32>
    %cst_142 = arith.constant 0.000000e+00 : f32
    %441 = vector.broadcast %cst_142 : f32 to vector<8x64xf32>
    %442 = arith.minimumf %438, %441 : vector<8x64xf32>
    %443 = math.exp %442 : vector<8x64xf32>
    %cst_143 = arith.constant 1.000000e+00 : f32
    %444 = vector.broadcast %cst_143 : f32 to vector<8x64xf32>
    %445 = arith.subf %443, %444 : vector<8x64xf32>
    %446 = arith.select %440, %438, %445 : vector<8x64xi1>, vector<8x64xf32>
    %cst_144 = arith.constant dense<0.000000e+00> : vector<8x32xf32>
    %447 = tpu.matmul %446, %5, %cst_144 {dimension_numbers = #tpu.dot_dimension_numbers<[1], [0], [0], [1], [0, 0, 1, 1], [], []>, precision = #tpu.contract_precision<fp32>} : vector<8x64xf32>, vector<64x32xf32>, vector<8x32xf32> -> vector<8x32xf32>
    %448 = arith.addf %447, %17 : vector<8x32xf32>
    %449 = arith.cmpi slt, %c12_i32, %23 : i32
    %cst_145 = arith.constant 0.000000e+00 : f32
    %450 = arith.select %449, %21, %cst_145 : f32
    %451 = vector.broadcast %450 : f32 to vector<8x32xf32>
    %452 = arith.mulf %451, %448 : vector<8x32xf32>
    %453 = arith.addf %420, %452 : vector<8x32xf32>
    %c13_i32 = arith.constant 13 : i32
    %454 = arith.sitofp %c13_i32 : i32 to f32
    %455 = arith.mulf %21, %454 : f32
    %456 = arith.addf %19, %455 : f32
    %cst_146 = arith.constant dense<0.000000e+00> : vector<8x64xf32>
    %457 = tpu.matmul %453, %3, %cst_146 {dimension_numbers = #tpu.dot_dimension_numbers<[1], [0], [0], [1], [0, 0, 1, 1], [], []>, precision = #tpu.contract_precision<fp32>} : vector<8x32xf32>, vector<32x64xf32>, vector<8x64xf32> -> vector<8x64xf32>
    %458 = vector.broadcast %456 : f32 to vector<8x64xf32>
    %459 = arith.mulf %458, %8 : vector<8x64xf32>
    %460 = arith.addf %457, %459 : vector<8x64xf32>
    %461 = arith.addf %460, %11 : vector<8x64xf32>
    %cst_147 = arith.constant 0.000000e+00 : f32
    %462 = vector.broadcast %cst_147 : f32 to vector<8x64xf32>
    %463 = arith.cmpf ogt, %461, %462 : vector<8x64xf32>
    %cst_148 = arith.constant 0.000000e+00 : f32
    %464 = vector.broadcast %cst_148 : f32 to vector<8x64xf32>
    %465 = arith.minimumf %461, %464 : vector<8x64xf32>
    %466 = math.exp %465 : vector<8x64xf32>
    %cst_149 = arith.constant 1.000000e+00 : f32
    %467 = vector.broadcast %cst_149 : f32 to vector<8x64xf32>
    %468 = arith.subf %466, %467 : vector<8x64xf32>
    %469 = arith.select %463, %461, %468 : vector<8x64xi1>, vector<8x64xf32>
    %cst_150 = arith.constant dense<0.000000e+00> : vector<8x64xf32>
    %470 = tpu.matmul %469, %4, %cst_150 {dimension_numbers = #tpu.dot_dimension_numbers<[1], [0], [0], [1], [0, 0, 1, 1], [], []>, precision = #tpu.contract_precision<fp32>} : vector<8x64xf32>, vector<64x64xf32>, vector<8x64xf32> -> vector<8x64xf32>
    %471 = arith.addf %470, %14 : vector<8x64xf32>
    %cst_151 = arith.constant 0.000000e+00 : f32
    %472 = vector.broadcast %cst_151 : f32 to vector<8x64xf32>
    %473 = arith.cmpf ogt, %471, %472 : vector<8x64xf32>
    %cst_152 = arith.constant 0.000000e+00 : f32
    %474 = vector.broadcast %cst_152 : f32 to vector<8x64xf32>
    %475 = arith.minimumf %471, %474 : vector<8x64xf32>
    %476 = math.exp %475 : vector<8x64xf32>
    %cst_153 = arith.constant 1.000000e+00 : f32
    %477 = vector.broadcast %cst_153 : f32 to vector<8x64xf32>
    %478 = arith.subf %476, %477 : vector<8x64xf32>
    %479 = arith.select %473, %471, %478 : vector<8x64xi1>, vector<8x64xf32>
    %cst_154 = arith.constant dense<0.000000e+00> : vector<8x32xf32>
    %480 = tpu.matmul %479, %5, %cst_154 {dimension_numbers = #tpu.dot_dimension_numbers<[1], [0], [0], [1], [0, 0, 1, 1], [], []>, precision = #tpu.contract_precision<fp32>} : vector<8x64xf32>, vector<64x32xf32>, vector<8x32xf32> -> vector<8x32xf32>
    %481 = arith.addf %480, %17 : vector<8x32xf32>
    %482 = arith.cmpi slt, %c13_i32, %23 : i32
    %cst_155 = arith.constant 0.000000e+00 : f32
    %483 = arith.select %482, %21, %cst_155 : f32
    %484 = vector.broadcast %483 : f32 to vector<8x32xf32>
    %485 = arith.mulf %484, %481 : vector<8x32xf32>
    %486 = arith.addf %453, %485 : vector<8x32xf32>
    %c14_i32 = arith.constant 14 : i32
    %487 = arith.sitofp %c14_i32 : i32 to f32
    %488 = arith.mulf %21, %487 : f32
    %489 = arith.addf %19, %488 : f32
    %cst_156 = arith.constant dense<0.000000e+00> : vector<8x64xf32>
    %490 = tpu.matmul %486, %3, %cst_156 {dimension_numbers = #tpu.dot_dimension_numbers<[1], [0], [0], [1], [0, 0, 1, 1], [], []>, precision = #tpu.contract_precision<fp32>} : vector<8x32xf32>, vector<32x64xf32>, vector<8x64xf32> -> vector<8x64xf32>
    %491 = vector.broadcast %489 : f32 to vector<8x64xf32>
    %492 = arith.mulf %491, %8 : vector<8x64xf32>
    %493 = arith.addf %490, %492 : vector<8x64xf32>
    %494 = arith.addf %493, %11 : vector<8x64xf32>
    %cst_157 = arith.constant 0.000000e+00 : f32
    %495 = vector.broadcast %cst_157 : f32 to vector<8x64xf32>
    %496 = arith.cmpf ogt, %494, %495 : vector<8x64xf32>
    %cst_158 = arith.constant 0.000000e+00 : f32
    %497 = vector.broadcast %cst_158 : f32 to vector<8x64xf32>
    %498 = arith.minimumf %494, %497 : vector<8x64xf32>
    %499 = math.exp %498 : vector<8x64xf32>
    %cst_159 = arith.constant 1.000000e+00 : f32
    %500 = vector.broadcast %cst_159 : f32 to vector<8x64xf32>
    %501 = arith.subf %499, %500 : vector<8x64xf32>
    %502 = arith.select %496, %494, %501 : vector<8x64xi1>, vector<8x64xf32>
    %cst_160 = arith.constant dense<0.000000e+00> : vector<8x64xf32>
    %503 = tpu.matmul %502, %4, %cst_160 {dimension_numbers = #tpu.dot_dimension_numbers<[1], [0], [0], [1], [0, 0, 1, 1], [], []>, precision = #tpu.contract_precision<fp32>} : vector<8x64xf32>, vector<64x64xf32>, vector<8x64xf32> -> vector<8x64xf32>
    %504 = arith.addf %503, %14 : vector<8x64xf32>
    %cst_161 = arith.constant 0.000000e+00 : f32
    %505 = vector.broadcast %cst_161 : f32 to vector<8x64xf32>
    %506 = arith.cmpf ogt, %504, %505 : vector<8x64xf32>
    %cst_162 = arith.constant 0.000000e+00 : f32
    %507 = vector.broadcast %cst_162 : f32 to vector<8x64xf32>
    %508 = arith.minimumf %504, %507 : vector<8x64xf32>
    %509 = math.exp %508 : vector<8x64xf32>
    %cst_163 = arith.constant 1.000000e+00 : f32
    %510 = vector.broadcast %cst_163 : f32 to vector<8x64xf32>
    %511 = arith.subf %509, %510 : vector<8x64xf32>
    %512 = arith.select %506, %504, %511 : vector<8x64xi1>, vector<8x64xf32>
    %cst_164 = arith.constant dense<0.000000e+00> : vector<8x32xf32>
    %513 = tpu.matmul %512, %5, %cst_164 {dimension_numbers = #tpu.dot_dimension_numbers<[1], [0], [0], [1], [0, 0, 1, 1], [], []>, precision = #tpu.contract_precision<fp32>} : vector<8x64xf32>, vector<64x32xf32>, vector<8x32xf32> -> vector<8x32xf32>
    %514 = arith.addf %513, %17 : vector<8x32xf32>
    %515 = arith.cmpi slt, %c14_i32, %23 : i32
    %cst_165 = arith.constant 0.000000e+00 : f32
    %516 = arith.select %515, %21, %cst_165 : f32
    %517 = vector.broadcast %516 : f32 to vector<8x32xf32>
    %518 = arith.mulf %517, %514 : vector<8x32xf32>
    %519 = arith.addf %486, %518 : vector<8x32xf32>
    %c15_i32 = arith.constant 15 : i32
    %520 = arith.sitofp %c15_i32 : i32 to f32
    %521 = arith.mulf %21, %520 : f32
    %522 = arith.addf %19, %521 : f32
    %cst_166 = arith.constant dense<0.000000e+00> : vector<8x64xf32>
    %523 = tpu.matmul %519, %3, %cst_166 {dimension_numbers = #tpu.dot_dimension_numbers<[1], [0], [0], [1], [0, 0, 1, 1], [], []>, precision = #tpu.contract_precision<fp32>} : vector<8x32xf32>, vector<32x64xf32>, vector<8x64xf32> -> vector<8x64xf32>
    %524 = vector.broadcast %522 : f32 to vector<8x64xf32>
    %525 = arith.mulf %524, %8 : vector<8x64xf32>
    %526 = arith.addf %523, %525 : vector<8x64xf32>
    %527 = arith.addf %526, %11 : vector<8x64xf32>
    %cst_167 = arith.constant 0.000000e+00 : f32
    %528 = vector.broadcast %cst_167 : f32 to vector<8x64xf32>
    %529 = arith.cmpf ogt, %527, %528 : vector<8x64xf32>
    %cst_168 = arith.constant 0.000000e+00 : f32
    %530 = vector.broadcast %cst_168 : f32 to vector<8x64xf32>
    %531 = arith.minimumf %527, %530 : vector<8x64xf32>
    %532 = math.exp %531 : vector<8x64xf32>
    %cst_169 = arith.constant 1.000000e+00 : f32
    %533 = vector.broadcast %cst_169 : f32 to vector<8x64xf32>
    %534 = arith.subf %532, %533 : vector<8x64xf32>
    %535 = arith.select %529, %527, %534 : vector<8x64xi1>, vector<8x64xf32>
    %cst_170 = arith.constant dense<0.000000e+00> : vector<8x64xf32>
    %536 = tpu.matmul %535, %4, %cst_170 {dimension_numbers = #tpu.dot_dimension_numbers<[1], [0], [0], [1], [0, 0, 1, 1], [], []>, precision = #tpu.contract_precision<fp32>} : vector<8x64xf32>, vector<64x64xf32>, vector<8x64xf32> -> vector<8x64xf32>
    %537 = arith.addf %536, %14 : vector<8x64xf32>
    %cst_171 = arith.constant 0.000000e+00 : f32
    %538 = vector.broadcast %cst_171 : f32 to vector<8x64xf32>
    %539 = arith.cmpf ogt, %537, %538 : vector<8x64xf32>
    %cst_172 = arith.constant 0.000000e+00 : f32
    %540 = vector.broadcast %cst_172 : f32 to vector<8x64xf32>
    %541 = arith.minimumf %537, %540 : vector<8x64xf32>
    %542 = math.exp %541 : vector<8x64xf32>
    %cst_173 = arith.constant 1.000000e+00 : f32
    %543 = vector.broadcast %cst_173 : f32 to vector<8x64xf32>
    %544 = arith.subf %542, %543 : vector<8x64xf32>
    %545 = arith.select %539, %537, %544 : vector<8x64xi1>, vector<8x64xf32>
    %cst_174 = arith.constant dense<0.000000e+00> : vector<8x32xf32>
    %546 = tpu.matmul %545, %5, %cst_174 {dimension_numbers = #tpu.dot_dimension_numbers<[1], [0], [0], [1], [0, 0, 1, 1], [], []>, precision = #tpu.contract_precision<fp32>} : vector<8x64xf32>, vector<64x32xf32>, vector<8x32xf32> -> vector<8x32xf32>
    %547 = arith.addf %546, %17 : vector<8x32xf32>
    %548 = arith.cmpi slt, %c15_i32, %23 : i32
    %cst_175 = arith.constant 0.000000e+00 : f32
    %549 = arith.select %548, %21, %cst_175 : f32
    %550 = vector.broadcast %549 : f32 to vector<8x32xf32>
    %551 = arith.mulf %550, %547 : vector<8x32xf32>
    %552 = arith.addf %519, %551 : vector<8x32xf32>
    %c16_i32 = arith.constant 16 : i32
    %553 = arith.sitofp %c16_i32 : i32 to f32
    %554 = arith.mulf %21, %553 : f32
    %555 = arith.addf %19, %554 : f32
    %cst_176 = arith.constant dense<0.000000e+00> : vector<8x64xf32>
    %556 = tpu.matmul %552, %3, %cst_176 {dimension_numbers = #tpu.dot_dimension_numbers<[1], [0], [0], [1], [0, 0, 1, 1], [], []>, precision = #tpu.contract_precision<fp32>} : vector<8x32xf32>, vector<32x64xf32>, vector<8x64xf32> -> vector<8x64xf32>
    %557 = vector.broadcast %555 : f32 to vector<8x64xf32>
    %558 = arith.mulf %557, %8 : vector<8x64xf32>
    %559 = arith.addf %556, %558 : vector<8x64xf32>
    %560 = arith.addf %559, %11 : vector<8x64xf32>
    %cst_177 = arith.constant 0.000000e+00 : f32
    %561 = vector.broadcast %cst_177 : f32 to vector<8x64xf32>
    %562 = arith.cmpf ogt, %560, %561 : vector<8x64xf32>
    %cst_178 = arith.constant 0.000000e+00 : f32
    %563 = vector.broadcast %cst_178 : f32 to vector<8x64xf32>
    %564 = arith.minimumf %560, %563 : vector<8x64xf32>
    %565 = math.exp %564 : vector<8x64xf32>
    %cst_179 = arith.constant 1.000000e+00 : f32
    %566 = vector.broadcast %cst_179 : f32 to vector<8x64xf32>
    %567 = arith.subf %565, %566 : vector<8x64xf32>
    %568 = arith.select %562, %560, %567 : vector<8x64xi1>, vector<8x64xf32>
    %cst_180 = arith.constant dense<0.000000e+00> : vector<8x64xf32>
    %569 = tpu.matmul %568, %4, %cst_180 {dimension_numbers = #tpu.dot_dimension_numbers<[1], [0], [0], [1], [0, 0, 1, 1], [], []>, precision = #tpu.contract_precision<fp32>} : vector<8x64xf32>, vector<64x64xf32>, vector<8x64xf32> -> vector<8x64xf32>
    %570 = arith.addf %569, %14 : vector<8x64xf32>
    %cst_181 = arith.constant 0.000000e+00 : f32
    %571 = vector.broadcast %cst_181 : f32 to vector<8x64xf32>
    %572 = arith.cmpf ogt, %570, %571 : vector<8x64xf32>
    %cst_182 = arith.constant 0.000000e+00 : f32
    %573 = vector.broadcast %cst_182 : f32 to vector<8x64xf32>
    %574 = arith.minimumf %570, %573 : vector<8x64xf32>
    %575 = math.exp %574 : vector<8x64xf32>
    %cst_183 = arith.constant 1.000000e+00 : f32
    %576 = vector.broadcast %cst_183 : f32 to vector<8x64xf32>
    %577 = arith.subf %575, %576 : vector<8x64xf32>
    %578 = arith.select %572, %570, %577 : vector<8x64xi1>, vector<8x64xf32>
    %cst_184 = arith.constant dense<0.000000e+00> : vector<8x32xf32>
    %579 = tpu.matmul %578, %5, %cst_184 {dimension_numbers = #tpu.dot_dimension_numbers<[1], [0], [0], [1], [0, 0, 1, 1], [], []>, precision = #tpu.contract_precision<fp32>} : vector<8x64xf32>, vector<64x32xf32>, vector<8x32xf32> -> vector<8x32xf32>
    %580 = arith.addf %579, %17 : vector<8x32xf32>
    %581 = arith.cmpi slt, %c16_i32, %23 : i32
    %cst_185 = arith.constant 0.000000e+00 : f32
    %582 = arith.select %581, %21, %cst_185 : f32
    %583 = vector.broadcast %582 : f32 to vector<8x32xf32>
    %584 = arith.mulf %583, %580 : vector<8x32xf32>
    %585 = arith.addf %552, %584 : vector<8x32xf32>
    %c17_i32 = arith.constant 17 : i32
    %586 = arith.sitofp %c17_i32 : i32 to f32
    %587 = arith.mulf %21, %586 : f32
    %588 = arith.addf %19, %587 : f32
    %cst_186 = arith.constant dense<0.000000e+00> : vector<8x64xf32>
    %589 = tpu.matmul %585, %3, %cst_186 {dimension_numbers = #tpu.dot_dimension_numbers<[1], [0], [0], [1], [0, 0, 1, 1], [], []>, precision = #tpu.contract_precision<fp32>} : vector<8x32xf32>, vector<32x64xf32>, vector<8x64xf32> -> vector<8x64xf32>
    %590 = vector.broadcast %588 : f32 to vector<8x64xf32>
    %591 = arith.mulf %590, %8 : vector<8x64xf32>
    %592 = arith.addf %589, %591 : vector<8x64xf32>
    %593 = arith.addf %592, %11 : vector<8x64xf32>
    %cst_187 = arith.constant 0.000000e+00 : f32
    %594 = vector.broadcast %cst_187 : f32 to vector<8x64xf32>
    %595 = arith.cmpf ogt, %593, %594 : vector<8x64xf32>
    %cst_188 = arith.constant 0.000000e+00 : f32
    %596 = vector.broadcast %cst_188 : f32 to vector<8x64xf32>
    %597 = arith.minimumf %593, %596 : vector<8x64xf32>
    %598 = math.exp %597 : vector<8x64xf32>
    %cst_189 = arith.constant 1.000000e+00 : f32
    %599 = vector.broadcast %cst_189 : f32 to vector<8x64xf32>
    %600 = arith.subf %598, %599 : vector<8x64xf32>
    %601 = arith.select %595, %593, %600 : vector<8x64xi1>, vector<8x64xf32>
    %cst_190 = arith.constant dense<0.000000e+00> : vector<8x64xf32>
    %602 = tpu.matmul %601, %4, %cst_190 {dimension_numbers = #tpu.dot_dimension_numbers<[1], [0], [0], [1], [0, 0, 1, 1], [], []>, precision = #tpu.contract_precision<fp32>} : vector<8x64xf32>, vector<64x64xf32>, vector<8x64xf32> -> vector<8x64xf32>
    %603 = arith.addf %602, %14 : vector<8x64xf32>
    %cst_191 = arith.constant 0.000000e+00 : f32
    %604 = vector.broadcast %cst_191 : f32 to vector<8x64xf32>
    %605 = arith.cmpf ogt, %603, %604 : vector<8x64xf32>
    %cst_192 = arith.constant 0.000000e+00 : f32
    %606 = vector.broadcast %cst_192 : f32 to vector<8x64xf32>
    %607 = arith.minimumf %603, %606 : vector<8x64xf32>
    %608 = math.exp %607 : vector<8x64xf32>
    %cst_193 = arith.constant 1.000000e+00 : f32
    %609 = vector.broadcast %cst_193 : f32 to vector<8x64xf32>
    %610 = arith.subf %608, %609 : vector<8x64xf32>
    %611 = arith.select %605, %603, %610 : vector<8x64xi1>, vector<8x64xf32>
    %cst_194 = arith.constant dense<0.000000e+00> : vector<8x32xf32>
    %612 = tpu.matmul %611, %5, %cst_194 {dimension_numbers = #tpu.dot_dimension_numbers<[1], [0], [0], [1], [0, 0, 1, 1], [], []>, precision = #tpu.contract_precision<fp32>} : vector<8x64xf32>, vector<64x32xf32>, vector<8x32xf32> -> vector<8x32xf32>
    %613 = arith.addf %612, %17 : vector<8x32xf32>
    %614 = arith.cmpi slt, %c17_i32, %23 : i32
    %cst_195 = arith.constant 0.000000e+00 : f32
    %615 = arith.select %614, %21, %cst_195 : f32
    %616 = vector.broadcast %615 : f32 to vector<8x32xf32>
    %617 = arith.mulf %616, %613 : vector<8x32xf32>
    %618 = arith.addf %585, %617 : vector<8x32xf32>
    %c18_i32 = arith.constant 18 : i32
    %619 = arith.sitofp %c18_i32 : i32 to f32
    %620 = arith.mulf %21, %619 : f32
    %621 = arith.addf %19, %620 : f32
    %cst_196 = arith.constant dense<0.000000e+00> : vector<8x64xf32>
    %622 = tpu.matmul %618, %3, %cst_196 {dimension_numbers = #tpu.dot_dimension_numbers<[1], [0], [0], [1], [0, 0, 1, 1], [], []>, precision = #tpu.contract_precision<fp32>} : vector<8x32xf32>, vector<32x64xf32>, vector<8x64xf32> -> vector<8x64xf32>
    %623 = vector.broadcast %621 : f32 to vector<8x64xf32>
    %624 = arith.mulf %623, %8 : vector<8x64xf32>
    %625 = arith.addf %622, %624 : vector<8x64xf32>
    %626 = arith.addf %625, %11 : vector<8x64xf32>
    %cst_197 = arith.constant 0.000000e+00 : f32
    %627 = vector.broadcast %cst_197 : f32 to vector<8x64xf32>
    %628 = arith.cmpf ogt, %626, %627 : vector<8x64xf32>
    %cst_198 = arith.constant 0.000000e+00 : f32
    %629 = vector.broadcast %cst_198 : f32 to vector<8x64xf32>
    %630 = arith.minimumf %626, %629 : vector<8x64xf32>
    %631 = math.exp %630 : vector<8x64xf32>
    %cst_199 = arith.constant 1.000000e+00 : f32
    %632 = vector.broadcast %cst_199 : f32 to vector<8x64xf32>
    %633 = arith.subf %631, %632 : vector<8x64xf32>
    %634 = arith.select %628, %626, %633 : vector<8x64xi1>, vector<8x64xf32>
    %cst_200 = arith.constant dense<0.000000e+00> : vector<8x64xf32>
    %635 = tpu.matmul %634, %4, %cst_200 {dimension_numbers = #tpu.dot_dimension_numbers<[1], [0], [0], [1], [0, 0, 1, 1], [], []>, precision = #tpu.contract_precision<fp32>} : vector<8x64xf32>, vector<64x64xf32>, vector<8x64xf32> -> vector<8x64xf32>
    %636 = arith.addf %635, %14 : vector<8x64xf32>
    %cst_201 = arith.constant 0.000000e+00 : f32
    %637 = vector.broadcast %cst_201 : f32 to vector<8x64xf32>
    %638 = arith.cmpf ogt, %636, %637 : vector<8x64xf32>
    %cst_202 = arith.constant 0.000000e+00 : f32
    %639 = vector.broadcast %cst_202 : f32 to vector<8x64xf32>
    %640 = arith.minimumf %636, %639 : vector<8x64xf32>
    %641 = math.exp %640 : vector<8x64xf32>
    %cst_203 = arith.constant 1.000000e+00 : f32
    %642 = vector.broadcast %cst_203 : f32 to vector<8x64xf32>
    %643 = arith.subf %641, %642 : vector<8x64xf32>
    %644 = arith.select %638, %636, %643 : vector<8x64xi1>, vector<8x64xf32>
    %cst_204 = arith.constant dense<0.000000e+00> : vector<8x32xf32>
    %645 = tpu.matmul %644, %5, %cst_204 {dimension_numbers = #tpu.dot_dimension_numbers<[1], [0], [0], [1], [0, 0, 1, 1], [], []>, precision = #tpu.contract_precision<fp32>} : vector<8x64xf32>, vector<64x32xf32>, vector<8x32xf32> -> vector<8x32xf32>
    %646 = arith.addf %645, %17 : vector<8x32xf32>
    %647 = arith.cmpi slt, %c18_i32, %23 : i32
    %cst_205 = arith.constant 0.000000e+00 : f32
    %648 = arith.select %647, %21, %cst_205 : f32
    %649 = vector.broadcast %648 : f32 to vector<8x32xf32>
    %650 = arith.mulf %649, %646 : vector<8x32xf32>
    %651 = arith.addf %618, %650 : vector<8x32xf32>
    %c19_i32 = arith.constant 19 : i32
    %652 = arith.sitofp %c19_i32 : i32 to f32
    %653 = arith.mulf %21, %652 : f32
    %654 = arith.addf %19, %653 : f32
    %cst_206 = arith.constant dense<0.000000e+00> : vector<8x64xf32>
    %655 = tpu.matmul %651, %3, %cst_206 {dimension_numbers = #tpu.dot_dimension_numbers<[1], [0], [0], [1], [0, 0, 1, 1], [], []>, precision = #tpu.contract_precision<fp32>} : vector<8x32xf32>, vector<32x64xf32>, vector<8x64xf32> -> vector<8x64xf32>
    %656 = vector.broadcast %654 : f32 to vector<8x64xf32>
    %657 = arith.mulf %656, %8 : vector<8x64xf32>
    %658 = arith.addf %655, %657 : vector<8x64xf32>
    %659 = arith.addf %658, %11 : vector<8x64xf32>
    %cst_207 = arith.constant 0.000000e+00 : f32
    %660 = vector.broadcast %cst_207 : f32 to vector<8x64xf32>
    %661 = arith.cmpf ogt, %659, %660 : vector<8x64xf32>
    %cst_208 = arith.constant 0.000000e+00 : f32
    %662 = vector.broadcast %cst_208 : f32 to vector<8x64xf32>
    %663 = arith.minimumf %659, %662 : vector<8x64xf32>
    %664 = math.exp %663 : vector<8x64xf32>
    %cst_209 = arith.constant 1.000000e+00 : f32
    %665 = vector.broadcast %cst_209 : f32 to vector<8x64xf32>
    %666 = arith.subf %664, %665 : vector<8x64xf32>
    %667 = arith.select %661, %659, %666 : vector<8x64xi1>, vector<8x64xf32>
    %cst_210 = arith.constant dense<0.000000e+00> : vector<8x64xf32>
    %668 = tpu.matmul %667, %4, %cst_210 {dimension_numbers = #tpu.dot_dimension_numbers<[1], [0], [0], [1], [0, 0, 1, 1], [], []>, precision = #tpu.contract_precision<fp32>} : vector<8x64xf32>, vector<64x64xf32>, vector<8x64xf32> -> vector<8x64xf32>
    %669 = arith.addf %668, %14 : vector<8x64xf32>
    %cst_211 = arith.constant 0.000000e+00 : f32
    %670 = vector.broadcast %cst_211 : f32 to vector<8x64xf32>
    %671 = arith.cmpf ogt, %669, %670 : vector<8x64xf32>
    %cst_212 = arith.constant 0.000000e+00 : f32
    %672 = vector.broadcast %cst_212 : f32 to vector<8x64xf32>
    %673 = arith.minimumf %669, %672 : vector<8x64xf32>
    %674 = math.exp %673 : vector<8x64xf32>
    %cst_213 = arith.constant 1.000000e+00 : f32
    %675 = vector.broadcast %cst_213 : f32 to vector<8x64xf32>
    %676 = arith.subf %674, %675 : vector<8x64xf32>
    %677 = arith.select %671, %669, %676 : vector<8x64xi1>, vector<8x64xf32>
    %cst_214 = arith.constant dense<0.000000e+00> : vector<8x32xf32>
    %678 = tpu.matmul %677, %5, %cst_214 {dimension_numbers = #tpu.dot_dimension_numbers<[1], [0], [0], [1], [0, 0, 1, 1], [], []>, precision = #tpu.contract_precision<fp32>} : vector<8x64xf32>, vector<64x32xf32>, vector<8x32xf32> -> vector<8x32xf32>
    %679 = arith.addf %678, %17 : vector<8x32xf32>
    %680 = arith.cmpi slt, %c19_i32, %23 : i32
    %cst_215 = arith.constant 0.000000e+00 : f32
    %681 = arith.select %680, %21, %cst_215 : f32
    %682 = vector.broadcast %681 : f32 to vector<8x32xf32>
    %683 = arith.mulf %682, %679 : vector<8x32xf32>
    %684 = arith.addf %651, %683 : vector<8x32xf32>
    %c20_i32 = arith.constant 20 : i32
    %c0_216 = arith.constant 0 : index
    %c0_217 = arith.constant 0 : index
    %685 = vector.load %arg13[%c0_216, %c0_217] : memref<8x32xf32, #tpu.memory_space<vmem>>, vector<8x32xf32>
    tpu.vector_store %arg13[%c0_216, %c0_217], %684 {strides = array<i32>} : memref<8x32xf32, #tpu.memory_space<vmem>>, vector<8x32xf32>,
    %c0_218 = arith.constant 0 : index
    %c0_219 = arith.constant 0 : index
    %c0_220 = arith.constant 0 : index
    %686 = vector.load %arg12[%c0_218, %c0_219, %c0_220] : memref<1x8x32xf32, #tpu.memory_space<vmem>>, vector<1x8x32xf32>
    %687 = vector.shape_cast %686 : vector<1x8x32xf32> to vector<8x32xf32>
    %688 = vector.shape_cast %684 : vector<8x32xf32> to vector<1x8x32xf32>
    tpu.vector_store %arg12[%c0_218, %c0_219, %c0_220], %688 {strides = array<i32>} : memref<1x8x32xf32, #tpu.memory_space<vmem>>, vector<1x8x32xf32>,
    return
  }
  func.func @transform_0(%arg0: i32) -> i32 {
    %c0_i32 = arith.constant 0 : i32
    %c0_i32_0 = arith.constant 0 : i32
    return %c0_i32 : i32
  }
  func.func @transform_1(%arg0: i32) -> i32 {
    %c0_i32 = arith.constant 0 : i32
    %c0_i32_0 = arith.constant 0 : i32
    return %c0_i32 : i32
  }
  func.func @transform_2(%arg0: i32) -> i32 {
    %c0_i32 = arith.constant 0 : i32
    %c0_i32_0 = arith.constant 0 : i32
    return %c0_i32 : i32
  }
  func.func @transform_3(%arg0: i32) -> (i32, i32) {
    %c0_i32 = arith.constant 0 : i32
    %c0_i32_0 = arith.constant 0 : i32
    %c0_i32_1 = arith.constant 0 : i32
    return %c0_i32, %c0_i32_0 : i32, i32
  }
  func.func @transform_4(%arg0: i32) -> (i32, i32) {
    %c0_i32 = arith.constant 0 : i32
    %c0_i32_0 = arith.constant 0 : i32
    %c0_i32_1 = arith.constant 0 : i32
    return %c0_i32, %c0_i32_0 : i32, i32
  }
  func.func @transform_5(%arg0: i32) -> (i32, i32) {
    %c0_i32 = arith.constant 0 : i32
    %c0_i32_0 = arith.constant 0 : i32
    %c0_i32_1 = arith.constant 0 : i32
    return %c0_i32, %c0_i32_0 : i32, i32
  }
  func.func @transform_6(%arg0: i32) -> (i32, i32) {
    %c0_i32 = arith.constant 0 : i32
    %c0_i32_0 = arith.constant 0 : i32
    %c0_i32_1 = arith.constant 0 : i32
    return %c0_i32, %c0_i32_0 : i32, i32
  }
  func.func @transform_7(%arg0: i32) -> (i32, i32) {
    %c0_i32 = arith.constant 0 : i32
    %c0_i32_0 = arith.constant 0 : i32
    %c0_i32_1 = arith.constant 0 : i32
    return %c0_i32, %c0_i32_0 : i32, i32
  }
  func.func @transform_8(%arg0: i32) -> (i32, i32) {
    %c0_i32 = arith.constant 0 : i32
    %c0_i32_0 = arith.constant 0 : i32
    %c0_i32_1 = arith.constant 0 : i32
    return %c0_i32, %c0_i32_0 : i32, i32
  }
  func.func @transform_9(%arg0: i32) -> (i32, i32) {
    %c0_i32 = arith.constant 0 : i32
    %c0_i32_0 = arith.constant 0 : i32
    %c0_i32_1 = arith.constant 0 : i32
    return %c0_i32, %c0_i32_0 : i32, i32
  }
  func.func @transform_10(%arg0: i32) -> (i32, i32) {
    %c0_i32 = arith.constant 0 : i32
    %c0_i32_0 = arith.constant 0 : i32
    %c0_i32_1 = arith.constant 0 : i32
    return %c0_i32, %c0_i32_0 : i32, i32
  }
  func.func @transform_11(%arg0: i32) -> (i32, i32, i32) {
    %c0_i32 = arith.constant 0 : i32
    %c0_i32_0 = arith.constant 0 : i32
    %c0_i32_1 = arith.constant 0 : i32
    return %arg0, %c0_i32, %c0_i32_0 : i32, i32, i32
  }
}

</mosaic_0001>

<bundles_post_ra>
// kernel: tpu_custom_call.1
= control target key start
LH: loop header
LB: loop body
LE: loop exit
PB: predicated region body
PF: predicated region fallthrough
CT: control target
= control target key end

     0   :  { %19 = vsyncpa [#allocation7], 0  ;;  %s49068_s0 = inlined_call_operand.<no memory space> [shape: f32[1], index: 0, kind: input, shape index: {}]   ;;  %s49069_s1 = inlined_call_operand.<no memory space> [shape: f32[1], index: 1, kind: input, shape index: {}]   ;;  %s49070_s2 = inlined_call_operand.<no memory space> [shape: s32[1], index: 2, kind: input, shape index: {}]   ;;  %s49071_s3 = inlined_call_operand.hbm [shape: f32[8,32], index: 3, kind: input, shape index: {}]   ;;  %s49072_s4 = inlined_call_operand.vmem [shape: f32[32,64], index: 4, kind: input, shape index: {}]   ;;  %s49073_s5 = inlined_call_operand.vmem [shape: f32[1,64], index: 5, kind: input, shape index: {}]   ;;  %s49074_s6 = inlined_call_operand.vmem [shape: f32[1,64], index: 6, kind: input, shape index: {}]   ;;  %s49075_s7 = inlined_call_operand.vmem [shape: f32[64,64], index: 7, kind: input, shape index: {}]   ;;  %s49076_s8 = inlined_call_operand.hbm [shape: f32[1,64], index: 8, kind: input, shape index: {}]   ;;  %s49077_s9 = inlined_call_operand.vmem [shape: f32[64,32], index: 9, kind: input, shape index: {}]   ;;  %s49078_s10 = inlined_call_operand.vmem [shape: f32[1,32], index: 10, kind: input, shape index: {}]   ;;  %s49079_s11 = inlined_call_operand.hbm [shape: f32[1,8,32], index: 11, kind: output, shape index: {}]  }
   0x1   :  { %20 = vsyncpa [#allocation10], 0 }
   0x2   :  { %21 = vsyncpa [#allocation8], 0  ;;  %s44850_s17 = smov [#allocation6]   ;;  %s44851_s19 = smov [#allocation9]  }
   0x3   :  { %s34_s18 = sshll.u32 %s44850_s17, 4  ;;  %s52_s20 = sshll.u32 %s44851_s19, 4  ;;  %s35_s18 = int_to_ptr.vmem [resolvable:$true] %s34_s18  ;;  %s53_s20 = int_to_ptr.vmem [resolvable:$true] %s52_s20 }
   0x4   :  { %s44778_s23 = scalar_lea.hbm %s49071_s3, 128 }
   0x5   :  { %p44779_p0 = scmp.ne.s32.totalorder %s49071_s3, %s44778_s23  ;;  %p44782_p1 = scmp.lt.u32.totalorder %s44778_s23, %s49071_s3 }
   0x7   :  { %p44784_p2 = pnand %p44782_p1, %p44779_p0 }
   0x9   :  { %44787 = shalt.err (!%p44784_p2)
}
   0xa   :  { %s44788_s28 = scalar_lea.vmem %s35_s18, 128  ;;  %p44793_p4 = scmp.lt.s32.totalorder %s35_s18, %s35_s18 }
   0xb   :  { %p44789_p3 = scmp.ne.s32.totalorder %s35_s18, %s44788_s28  ;;  %p44794_p5 = scmp.lt.s32.totalorder %s44788_s28, %s44788_s28 }
   0xd   :  { %p44795_p6 = por %p44794_p5, %p44793_p4 }
   0xf   :  { %p44796_p7 = pnand %p44795_p6, %p44789_p3 }
  0x11   :  { %44799 = shalt.err (!%p44796_p7)
}
  0x12   :  { %37 = dma.hbm_to_vmem [thread:$0]  %s49071_s3, 128, %s35_s18, [#allocation7]  }
  0x13   :  { %s44800_s14 = scalar_lea.hbm %s49076_s8, 16 }
  0x14   :  { %p44801_p8 = scmp.ne.s32.totalorder %s49076_s8, %s44800_s14  ;;  %p44804_p9 = scmp.lt.u32.totalorder %s44800_s14, %s49076_s8 }
  0x16   :  { %p44806_p10 = pnand %p44804_p9, %p44801_p8 }
  0x18   :  { %44809 = shalt.err (!%p44806_p10)
}
  0x19   :  { %s44810_s21 = scalar_lea.vmem %s53_s20, 16  ;;  %s44814_s22 = scalar_lea.vmem %s53_s20, 32 }
  0x1a   :  { %p44811_p11 = scmp.ne.s32.totalorder %s53_s20, %s44810_s21  ;;  %p44815_p12 = scmp.lt.s32.totalorder %s53_s20, %s53_s20 }
  0x1b   :  { %p44816_p13 = scmp.lt.s32.totalorder %s44814_s22, %s44810_s21 }
  0x1d   :  { %p44817_p0 = por %p44816_p13, %p44815_p12 }
  0x1f   :  { %p44818_p1 = pnand %p44817_p0, %p44811_p11 }
  0x21   :  { %44821 = shalt.err (!%p44818_p1)
}
  0x22   :  { %55 = dma.hbm_to_vmem [thread:$0]  %s49076_s8, 16, %s53_s20, [#allocation10]  }
  0x23   :  { %44844 = dma.done.wait [#allocation7], 128  }
  0x24   :  { %44845 = vsyncadd [#allocation7], 4294967168 }
  0x25   :  { %44846 = dma.done.wait [#allocation10], 16  }
  0x26   :  { %44847 = vsyncadd [#allocation10], 4294967280  ;;  %v49089_v0 = vmov 0.0|0.0   ;;  %vm44853_vm0 = vmmov 0   ;;  %v49091_v1 = vmov 0.0   ;;  %v73_v2 = vld [vmem:[%s49072_s4] sm:$0xff]  ;;  %s1717_s16 = sadd.f32 %s49069_s1, %s49068_s0 }
  0x27   :  { %40628 = vmatprep.subr.bf16.mxu0 %v49089_v0  ;;  %40634 = vmatprep.subr.bf16.mxu1 %v49089_v0  ;;  %v74_v3 = vld [vmem:[%s49072_s4 + $0x8] sm:$0xff]  ;;  %v75_v4 = vld [vmem:[%s49072_s4 + $0x10] sm:$0xff]  ;;  %v76_v5 = vld [vmem:[%s49072_s4 + $0x18] sm:$0xff]  ;;  %v134_v6 = vand.u32 4294901760, %v73_v2  ;;  %vm71_vm1 = vcmask 261120   ;;  %s125_s21 = smul.f32 0.0, %s49069_s1 }
  0x28   :  { %34756 = vmatprep.mubr.msk.f32.mxu0 %vm44853_vm0, %v49091_v1  ;;  %34767 = vmatprep.mubr.msk.f32.mxu1 %vm44853_vm0, %v49091_v1  ;;  %v137_v7 = vand.u32 4294901760, %v74_v3  ;;  %v140_v9 = vand.u32 4294901760, %v75_v4  ;;  %v143_v10 = vand.u32 4294901760, %v76_v5  ;;  %v70_v12 = vld [vmem:[#allocation6] sm:$0xff]  ;;  %v44999_v40 = vld [vmem:[%s49077_s9] sm:$0xff]  ;;  %v45027_v47 = vld [vmem:[%s49077_s9 + $0x10] sm:$0xff] }
  0x29   :  { %72 = vst.msk [vmem:[#allocation2] sm:$0xff] %vm71_vm1, %v70_v12  ;;  %v214_v13 = vsub.f32 %v73_v2, %v134_v6  ;;  %v45004_v41 = vld [vmem:[%s49077_s9 + $0x8] sm:$0xff]  ;;  %v45013_v43 = vld [vmem:[%s49075_s7] sm:$0xff]  ;;  %v1176_v45 = vand.u32 4294901760, %v44999_v40  ;;  %v45032_v48 = vld [vmem:[%s49077_s9 + $0x18] sm:$0xff]  ;;  %v49085_v55 = vand.u32 4294901760, %v45027_v47  ;;  %s126_s18 = sadd.f32 %s125_s21, %s49068_s0 }
  0x2a   :  { %v44958_v8 = vpack.c.bf16 %v137_v7, %v134_v6  ;;  %v44960_v11 = vpack.c.bf16 %v143_v10, %v140_v9  ;;  %v221_v14 = vsub.f32 %v74_v3, %v137_v7  ;;  %v228_v15 = vsub.f32 %v75_v4, %v140_v9  ;;  %v45018_v44 = vld [vmem:[%s49075_s7 + $0x8] sm:$0xff]  ;;  %v45043_v52 = vld [vmem:[%s49075_s7 + $0x10] sm:$0xff]  ;;  %v45048_v53 = vld [vmem:[%s49075_s7 + $0x18] sm:$0xff]  ;;  %p1712_p2 = scmp.gt.s32.totalorder %s49070_s2, 0  ;;  %p3301_p3 = scmp.gt.s32.totalorder %s49070_s2, 1 }
  0x2b   :  { %v235_v16 = vsub.f32 %v76_v5, %v143_v10  ;;  %v215_v17 = vand.u32 4294901760, %v214_v13  ;;  %v49086_v46 = vand.u32 4294901760, %v45004_v41  ;;  %v630_v49 = vand.u32 4294901760, %v45013_v43  ;;  %v45067_v57 = vld [vmem:[%s49077_s9 + $0x20] sm:$0xff]  ;;  %v45072_v58 = vld [vmem:[%s49077_s9 + $0x28] sm:$0xff]  ;;  %v45109_v5 = vld [vmem:[%s49077_s9 + $0x30] sm:$0xff] }
  0x2c   :  { %40630 = vmatpush3.bf16.msra.mxu0 %v44958_v8  ;;  %v222_v18 = vand.u32 4294901760, %v221_v14  ;;  %v229_v19 = vand.u32 4294901760, %v228_v15  ;;  %v44981_v37 = vpack.c.bf16 %v221_v14, %v214_v13  ;;  %v633_v50 = vand.u32 4294901760, %v45018_v44  ;;  %v45087_v62 = vld [vmem:[%s49075_s7 + $0x20] sm:$0xff]  ;;  %v45092_v63 = vld [vmem:[%s49075_s7 + $0x28] sm:$0xff]  ;;  %v45114_v6 = vld [vmem:[%s49077_s9 + $0x38] sm:$0xff] }
  0x2d   :  { %40631 = vmatprep.subr.bf16.mxu0 %v49089_v0  ;;  %v236_v20 = vand.u32 4294901760, %v235_v16  ;;  %v216_v21 = vsub.f32 %v214_v13, %v215_v17  ;;  %v44987_v39 = vpack.c.bf16 %v235_v16, %v228_v15  ;;  %v45059_v54 = vpack.c.bf16 %v49086_v46, %v1176_v45  ;;  %v45130_v12 = vld [vmem:[%s49075_s7 + $0x30] sm:$0xff]  ;;  %v45135_v13 = vld [vmem:[%s49075_s7 + $0x38] sm:$0xff]  ;;  %s1713_s4 = scalar_select %p1712_p2, %s49069_s1, 0.0 }
  0x2e   :  { %v223_v22 = vsub.f32 %v221_v14, %v222_v18  ;;  %v230_v23 = vsub.f32 %v228_v15, %v229_v19  ;;  %49121 = vst [vmem:[#allocation15_spill] sm:$0xff] %v44981_v37  ;;  %v45007_v42 = vpack.c.bf16 %v222_v18, %v215_v17  ;;  %v49084_v56 = vand.u32 4294901760, %v45032_v48  ;;  %s3302_s21 = scalar_select %p3301_p3, %s49069_s1, 0.0 }
  0x2f   :  { %v237_v24 = vsub.f32 %v235_v16, %v236_v20  ;;  %v217_v25 = vand.u32 4294901760, %v216_v21  ;;  %49122 = vst [vmem:[#allocation16_spill] sm:$0xff] %v44987_v39  ;;  %v45037_v51 = vpack.c.bf16 %v236_v20, %v229_v19  ;;  %v45078_v59 = vpack.c.bf16 %v633_v50, %v630_v49  ;;  %p4891_p4 = scmp.gt.s32.totalorder %s49070_s2, 2  ;;  %s4896_s15 = smul.f32 3.0, %s49069_s1 }
  0x30   :  { %40633 = vmatpush3.bf16.msra.mxu0 %v44960_v11  ;;  %v224_v26 = vand.u32 4294901760, %v223_v22  ;;  %v44967_v27 = vld [vmem:[#allocation2] sm:$0xff]  ;;  %v231_v28 = vand.u32 4294901760, %v230_v23  ;;  %49123 = vst [vmem:[#allocation17_spill] sm:$0xff] %v45007_v42  ;;  %v636_v60 = vand.u32 4294901760, %v45043_v52  ;;  %v639_v61 = vand.u32 4294901760, %v45048_v53 }
  0x31   :  { %40640 = vmatprep.subr.bf16.mxu0 %v49089_v0  ;;  %v238_v29 = vand.u32 4294901760, %v237_v24  ;;  %v131_v30 = vsel %vm71_vm1, %v44967_v27, 0  ;;  %49124 = vst [vmem:[#allocation18_spill] sm:$0xff] %v45037_v51  ;;  %v45100_v2 = vpack.c.bf16 %v49084_v56, %v49085_v55  ;;  %v49083_v3 = vand.u32 4294901760, %v45067_v57  ;;  %v45190_v22 = vld [vmem:[%s49073_s5] ss:$0 sm:$0xff]  ;;  %s4897_s17 = sadd.f32 %s4896_s15, %s49068_s0 }
  0x32   :  { %v44971_v31 = vpack.c.bf16 %v224_v26, %v217_v25  ;;  %v44973_v32 = vand.u32 4294901760, %v131_v30  ;;  %v49082_v4 = vand.u32 4294901760, %v45072_v58  ;;  %v45120_v7 = vpack.c.bf16 %v639_v61, %v636_v60  ;;  %s4892_s12 = scalar_select %p4891_p4, %s49069_s1, 0.0 }
  0x33   :  { %v44976_v33 = vpack.c.bf16 %v238_v29, %v231_v28  ;;  %v642_v9 = vand.u32 4294901760, %v45087_v62  ;;  %v645_v10 = vand.u32 4294901760, %v45092_v63  ;;  %v49081_v15 = vand.u32 4294901760, %v45109_v5  ;;  %p6481_p5 = scmp.gt.s32.totalorder %s49070_s2, 3  ;;  %s6486_s20 = smul.f32 4.0, %s49069_s1 }
  0x34   :  { %40636 = vmatpush3.bf16.msra.mxu1 %v44971_v31  ;;  %v203_v34 = vsub.f32 %v131_v30, %v44973_v32  ;;  %v45145_v14 = vpack.c.bf16 %v49082_v4, %v49083_v3  ;;  %v49080_v16 = vand.u32 4294901760, %v45114_v6  ;;  %v648_v18 = vand.u32 4294901760, %v45130_v12  ;;  %p8071_p6 = scmp.gt.s32.totalorder %s49070_s2, 4  ;;  %s8076_s15 = smul.f32 5.0, %s49069_s1 }
  0x35   :  { %40637 = vmatprep.subr.bf16.mxu1 %v49089_v0  ;;  %v45154_v17 = vpack.c.bf16 %v645_v10, %v642_v9  ;;  %v651_v19 = vand.u32 4294901760, %v45135_v13  ;;  %v127_v23 = vstv %s126_s18  ;;  %vm625_vm2 = vcmask 523264   ;;  %s3306_s18 = smul.f32 2.0, %s49069_s1  ;;  %s6487_s27 = sadd.f32 %s6486_s20, %s49068_s0 }
  0x36   :  { %v204_v35 = vand.u32 4294901760, %v203_v34  ;;  %v45165_v20 = vpack.c.bf16 %v49080_v16, %v49081_v15  ;;  %v128_v24 = vmul.f32 %v45190_v22, %v127_v23  ;;  %v45196_v23 = vld [vmem:[%s49074_s6] ss:$0 sm:$0xff]  ;;  %s6482_s3 = scalar_select %p6481_p5, %s49069_s1, 0.0 }
  0x37   :  { %v45172_v21 = vpack.c.bf16 %v651_v19, %v648_v18  ;;  %s3307_s8 = sadd.f32 %s3306_s18, %s49068_s0  ;;  %p9661_p7 = scmp.gt.s32.totalorder %s49070_s2, 5 }
  0x38   :  { %40639 = vmatpush3.bf16.msra.mxu1 %v44976_v33  ;;  %v205_v36 = vsub.f32 %v203_v34, %v204_v35  ;;  %s9666_s26 = smul.f32 6.0, %s49069_s1  ;;  %p11251_p8 = scmp.gt.s32.totalorder %s49070_s2, 6 }
  0x39   :  { %40646 = vmatprep.subr.bf16.mxu1 %v49089_v0  ;;  %s11256_s7 = smul.f32 7.0, %s49069_s1  ;;  %p12841_p9 = scmp.gt.s32.totalorder %s49070_s2, 7 }
  0x3a   :  { %v206_v38 = vand.u32 4294901760, %v205_v36  ;;  %s11252_s14 = scalar_select %p11251_p8, %s49069_s1, 0.0 }
  0x3b   :  { %34768 = vmatmul.mubr.f32.vlgmr.msra.gmra.mrb[0].mxu1 %v44973_v32  ;;  %s11257_s22 = sadd.f32 %s11256_s7, %s49068_s0  ;;  %p14431_p10 = scmp.gt.s32.totalorder %s49070_s2, 8 }
  0x3c   :  { %34757 = vmatmul.mubr.f32.vlgmr.msra.gmra.mrb[0].mxu0 %v206_v38  ;;  %40648 = vmatpush3.bf16.msra.mxu1 %v44958_v8  ;;  %p16021_p11 = scmp.gt.s32.totalorder %s49070_s2, 9  ;;  %s16026_s29 = smul.f32 10.0, %s49069_s1 }
  0x3d   :  { %40642 = vmatpush3.bf16.msra.mxu0 %v44981_v37  ;;  %40649 = vmatprep.subr.bf16.mxu1 %v49089_v0  ;;  %p17611_p12 = scmp.gt.s32.totalorder %s49070_s2, 10  ;;  %p19201_p13 = scmp.gt.s32.totalorder %s49070_s2, 11 }
  0x3e   :  { %40643 = vmatprep.subr.bf16.mxu0 %v49089_v0  ;;  %34778 = vmatprep.mubr.msk.f32.mxu0 %vm44853_vm0, %v49091_v1  ;;  %s16022_s25 = scalar_select %p16021_p11, %s49069_s1, 0.0 }
  0x3f   :  { %34789 = vmatprep.mubr.msk.f32.mxu1 %vm44853_vm0, %v49091_v1  ;;  %s16027_s13 = sadd.f32 %s16026_s29, %s49068_s0  ;;  %p20791_p0 = scmp.gt.s32.totalorder %s49070_s2, 12 }
  0x40   :  { %40651 = vmatpush3.bf16.msra.mxu1 %v44960_v11  ;;  %s20796_s23 = smul.f32 13.0, %s49069_s1  ;;  %p22381_p1 = scmp.gt.s32.totalorder %s49070_s2, 13 }
  0x41   :  { %40645 = vmatpush3.bf16.msra.mxu0 %v44987_v39  ;;  %40658 = vmatprep.subr.bf16.mxu1 %v49089_v0  ;;  %s20792_s19 = scalar_select %p20791_p0, %s49069_s1, 0.0 }
  0x42   :  { %40652 = vmatprep.subr.bf16.mxu0 %v49089_v0  ;;  %s20797_s20 = sadd.f32 %s20796_s23, %s49068_s0  ;;  %p23971_p2 = scmp.gt.s32.totalorder %s49070_s2, 14 }
  0x43   :  { %34790 = vmatmul.mubr.f32.vlgmr.msra.gmra.mrb[2].mxu1 %v204_v35  ;;  %p25561_p3 = scmp.gt.s32.totalorder %s49070_s2, 15  ;;  %p27151_p4 = scmp.gt.s32.totalorder %s49070_s2, 16 }
  0x44   :  { %34779 = vmatmul.mubr.f32.vlgmr.msra.gmra.mrb[2].mxu0 %v203_v34  ;;  %40660 = vmatpush3.bf16.msra.mxu1 %v44958_v8  ;;  %p28741_p5 = scmp.gt.s32.totalorder %s49070_s2, 17 }
  0x45   :  { %40654 = vmatpush3.bf16.msra.mxu0 %v45007_v42  ;;  %40661 = vmatprep.subr.bf16.mxu1 %v49089_v0  ;;  %s25562_s30 = scalar_select %p25561_p3, %s49069_s1, 0.0 }
  0x46   :  { %40655 = vmatprep.subr.bf16.mxu0 %v49089_v0  ;;  %34800 = vmatprep.mubr.msk.f32.mxu0 %vm44853_vm0, %v49091_v1 }
  0x47   :  { %34811 = vmatprep.mubr.msk.f32.mxu1 %vm44853_vm0, %v49091_v1 }
  0x48   :  { %40663 = vmatpush3.bf16.msra.mxu1 %v44960_v11 }
  0x49   :  { %40657 = vmatpush3.bf16.msra.mxu0 %v45037_v51  ;;  %40736 = vmatprep.subr.bf16.mxu1 %v49089_v0 }
  0x4a   :  { %40664 = vmatprep.subr.bf16.mxu0 %v49089_v0 }
  0x4b   :  { %34812 = vmatmul.mubr.f32.vlgmr.msra.gmra.mrb[4].mxu1 %v44973_v32 }
  0x4c   :  { %34801 = vmatmul.mubr.f32.vlgmr.msra.gmra.mrb[4].mxu0 %v44973_v32  ;;  %40738 = vmatpush3.bf16.msra.mxu1 %v45059_v54 }
  0x4d   :  { %40666 = vmatpush3.bf16.msra.mxu0 %v45078_v59  ;;  %34830 = vmatprep.mubr.msk.f32.mxu0 %vm44853_vm0, %v49091_v1 }
  0x4e   :  { %40667 = vmatprep.subr.bf16.mxu0 %v49089_v0  ;;  %40739 = vmatprep.subr.bf16.mxu1 %v49089_v0 }
  0x4f   :  { %34944 = vmatprep.mubr.msk.f32.mxu1 %vm44853_vm0, %v49091_v1 }
  0x50   :  { %40741 = vmatpush3.bf16.msra.mxu1 %v45100_v2 }
  0x51   :  { %40669 = vmatpush3.bf16.msra.mxu0 %v45120_v7  ;;  %40742 = vmatprep.subr.bf16.mxu1 %v49089_v0 }
  0x52   :  { %40670 = vmatprep.subr.bf16.mxu0 %v49089_v0 }
  0x54   :  { %40744 = vmatpush3.bf16.msra.mxu1 %v45145_v14 }
  0x55   :  { %40672 = vmatpush3.bf16.msra.mxu0 %v45154_v17  ;;  %40745 = vmatprep.subr.bf16.mxu1 %v49089_v0 }
  0x56   :  { %40673 = vmatprep.subr.bf16.mxu0 %v49089_v0 }
  0x58   :  { %40747 = vmatpush3.bf16.msra.mxu1 %v45165_v20 }
  0x59   :  { %40675 = vmatpush3.bf16.msra.mxu0 %v45172_v21  ;;  %40748 = vmatprep.subr.bf16.mxu1 %v49089_v0 }
  0x5a   :  { %40676 = vmatprep.subr.bf16.mxu0 %v49089_v0 }
 0x10e   :  { %v299_v25 = vpop.f32.mrb[0].mxu1 }
 0x10f   :  { %v208_v26 = vpop.f32.mrb[0].mxu0  ;;  %v34769_v28 = vpop.f32.mrb[1].mxu1 }
 0x110   :  { %v209_v29 = vadd.f32 %v208_v26, %v128_v24  ;;  %v34758_v30 = vpop.f32.mrb[1].mxu0 }
 0x112   :  { %v300_v32 = vadd.f32 %v299_v25, %v209_v29  ;;  %v45238_v29 = vsub.f32 %v45092_v63, %v645_v10  ;;  %v45254_v63 = vsub.f32 %v45130_v12, %v648_v18  ;;  %v45259_v10 = vsub.f32 %v45135_v13, %v651_v19 }
 0x114   :  { %v757_v18 = vand.u32 4294901760, %v45254_v63 }
 0x116   :  { %v456_v34 = vpop.f32.mrb[2].mxu1 }
 0x117   :  { %v379_v35 = vpop.f32.mrb[2].mxu0  ;;  %v34791_v36 = vpop.f32.mrb[3].mxu1 }
 0x118   :  { %v380_v38 = vadd.f32 %v379_v35, %v300_v32  ;;  %v34780_v16 = vpop.f32.mrb[3].mxu0 }
 0x119   :  { %v45202_v16 = vsub.f32 %v45013_v43, %v630_v49 }
 0x11a   :  { %v457_v15 = vadd.f32 %v456_v34, %v380_v38  ;;  %v750_v38 = vand.u32 4294901760, %v45238_v29 }
 0x11c   :  { %v751_v12 = vsub.f32 %v45238_v29, %v750_v38 }
 0x11e   :  { %v614_v4 = vpop.f32.mrb[4].mxu1 }
 0x11f   :  { %v539_v3 = vpop.f32.mrb[4].mxu0  ;;  %v34813_v56 = vpop.f32.mrb[5].mxu1 }
 0x120   :  { %v540_v55 = vadd.f32 %v539_v3, %v457_v15  ;;  %v34802_v46 = vpop.f32.mrb[5].mxu0  ;;  %v715_v56 = vand.u32 4294901760, %v45202_v16 }
 0x121   :  { %v45207_v46 = vsub.f32 %v45018_v44, %v633_v50 }
 0x122   :  { %v615_v28 = vadd.f32 %v614_v4, %v540_v55  ;;  %v45214_v55 = vsub.f32 %v45043_v52, %v636_v60  ;;  %v45219_v4 = vsub.f32 %v45048_v53, %v639_v61  ;;  %v716_v44 = vsub.f32 %v45202_v16, %v715_v56 }
 0x123   :  { %v722_v3 = vand.u32 4294901760, %v45207_v46  ;;  %v45233_v61 = vsub.f32 %v45087_v62, %v642_v9 }
 0x124   :  { %v618_v24 = vadd.f32 %v45196_v23, %v615_v28  ;;  %v729_v52 = vand.u32 4294901760, %v45214_v55  ;;  %v736_v60 = vand.u32 4294901760, %v45219_v4  ;;  %v717_v32 = vand.u32 4294901760, %v716_v44 }
 0x125   :  { %v723_v15 = vsub.f32 %v45207_v46, %v722_v3  ;;  %v743_v9 = vand.u32 4294901760, %v45233_v61  ;;  %v764_v44 = vand.u32 4294901760, %v45259_v10 }
 0x126   :  { %v620_v25 = vmin.f32 %v618_v24, 0.0  ;;  %vm619_vm3 = vcmp.gt.f32.partialorder %v618_v24, 0.0  ;;  %v730_v36 = vsub.f32 %v45214_v55, %v729_v52  ;;  %v737_v62 = vsub.f32 %v45219_v4, %v736_v60 }
 0x127   :  { %v724_v35 = vand.u32 4294901760, %v723_v15  ;;  %v752_v15 = vand.u32 4294901760, %v751_v12  ;;  %v45311_v12 = vpack.c.bf16 %v45259_v10, %v45254_v63 }
 0x128   :  { %v621_v26 = vmul.f32 1.442695, %v620_v25 }
 0x129   :  { %v45261_v25 = vpack.c.bf16 %v724_v35, %v717_v32  ;;  %v765_v32 = vsub.f32 %v45259_v10, %v764_v44  ;;  %v49126_v10 = vand.u32 4294901760, %v45027_v47 }
 0x12a   :  { %44674 = vpow2.f32 %v621_v26  ;;  %v731_v26 = vand.u32 4294901760, %v730_v36 }
 0x134   :  { %v44675_v43 = vpop.eup %44674 }
 0x135   :  { %v31948_v49 = vadd.f32 -1.0, %v44675_v43  ;;  %v738_v43 = vand.u32 4294901760, %v737_v62  ;;  %v766_v62 = vand.u32 4294901760, %v765_v32 }
 0x137   :  { %v624_v50 = vsel %vm619_vm3, %v618_v24, %v31948_v49  ;;  %v744_v49 = vsub.f32 %v45233_v61, %v743_v9  ;;  %v45271_v19 = vpack.c.bf16 %v738_v43, %v731_v26  ;;  %v45290_v26 = vpack.c.bf16 %v45207_v46, %v45202_v16 }
 0x138   :  { %v627_v53 = vsel %vm625_vm2, %v624_v50, 0  ;;  %v45297_v43 = vpack.c.bf16 %v45219_v4, %v45214_v55  ;;  %v45347_v16 = vpack.c.bf16 %v750_v38, %v743_v9  ;;  %v45351_v46 = vpack.c.bf16 %v764_v44, %v757_v18 }
 0x139   :  { %v45240_v30 = vand.u32 4294901760, %v627_v53  ;;  %v745_v50 = vand.u32 4294901760, %v744_v49  ;;  %v45305_v49 = vpack.c.bf16 %v45238_v29, %v45233_v61  ;;  %v45380_v61 = vsub.f32 %v44999_v40, %v1176_v45 }
 0x13a   :  { %v49125_v29 = vand.u32 4294901760, %v45004_v41 }
 0x13b   :  { %v703_v34 = vsub.f32 %v627_v53, %v45240_v30  ;;  %v758_v53 = vsub.f32 %v45254_v63, %v757_v18  ;;  %v45280_v35 = vpack.c.bf16 %v752_v15, %v745_v50  ;;  %v45337_v63 = vpack.c.bf16 %v736_v60, %v729_v52 }
 0x13c   :  { %v1261_v9 = vand.u32 4294901760, %v45380_v61  ;;  %v49127_v18 = vand.u32 4294901760, %v45032_v48 }
 0x13d   :  { %v704_v28 = vand.u32 4294901760, %v703_v34  ;;  %v759_v36 = vand.u32 4294901760, %v758_v53 }
 0x13e   :  { %v45397_v44 = vsub.f32 %v45032_v48, %v49127_v18  ;;  %v49128_v48 = vand.u32 4294901760, %v45067_v57 }
 0x13f   :  { %v705_v24 = vsub.f32 %v703_v34, %v704_v28 }
 0x140   :  { %v49087_v15 = vand.u32 4294901760, %v45397_v44  ;;  %v45411_v32 = vsub.f32 %v45067_v57, %v49128_v48 }
 0x141   :  { %v706_v13 = vand.u32 4294901760, %v705_v24  ;;  %v45284_v24 = vpack.c.bf16 %v766_v62, %v759_v36  ;;  %v49129_v36 = vand.u32 4294901760, %v45072_v58 }
 0x142   :  { %v1283_v57 = vsub.f32 %v45397_v44, %v49087_v15 }
 0x143   :  { %34831 = vmatmul.mubr.f32.vlgmr.msra.gmra.mrb[6].mxu0 %v706_v13  ;;  %v45416_v62 = vsub.f32 %v45072_v58, %v49129_v36  ;;  %v49130_v58 = vand.u32 4294901760, %v45109_v5 }
 0x144   :  { %40678 = vmatpush3.bf16.msra.mxu0 %v45261_v25  ;;  %34849 = vmatprep.mubr.msk.f32.mxu0 %vm44853_vm0, %v49091_v1  ;;  %v1284_v48 = vand.u32 4294901760, %v1283_v57 }
 0x145   :  { %40679 = vmatprep.subr.bf16.mxu0 %v49089_v0  ;;  %v45432_v18 = vsub.f32 %v45109_v5, %v49130_v58 }
 0x147   :  { %v1303_v58 = vand.u32 4294901760, %v45432_v18 }
 0x148   :  { %40681 = vmatpush3.bf16.msra.mxu0 %v45271_v19 }
 0x149   :  { %40682 = vmatprep.subr.bf16.mxu0 %v49089_v0 }
 0x14c   :  { %40684 = vmatpush3.bf16.msra.mxu0 %v45280_v35 }
 0x14d   :  { %40685 = vmatprep.subr.bf16.mxu0 %v49089_v0 }
 0x150   :  { %40687 = vmatpush3.bf16.msra.mxu0 %v45284_v24 }
 0x151   :  { %40688 = vmatprep.subr.bf16.mxu0 %v49089_v0 }
 0x153   :  { %34850 = vmatmul.mubr.f32.vlgmr.msra.gmra.mrb[6].mxu0 %v45240_v30 }
 0x154   :  { %40690 = vmatpush3.bf16.msra.mxu0 %v45290_v26  ;;  %34868 = vmatprep.mubr.msk.f32.mxu0 %vm44853_vm0, %v49091_v1 }
 0x155   :  { %40691 = vmatprep.subr.bf16.mxu0 %v49089_v0 }
 0x158   :  { %40693 = vmatpush3.bf16.msra.mxu0 %v45297_v43 }
 0x159   :  { %40694 = vmatprep.subr.bf16.mxu0 %v49089_v0 }
 0x15c   :  { %40696 = vmatpush3.bf16.msra.mxu0 %v45305_v49 }
 0x15d   :  { %40697 = vmatprep.subr.bf16.mxu0 %v49089_v0 }
 0x160   :  { %40699 = vmatpush3.bf16.msra.mxu0 %v45311_v12 }
 0x161   :  { %40700 = vmatprep.subr.bf16.mxu0 %v49089_v0 }
 0x163   :  { %34869 = vmatmul.mubr.f32.vlgmr.msra.gmra.mrb[6].mxu0 %v703_v34  ;;  %v45329_v34 = vpack.c.bf16 %v722_v3, %v715_v56  ;;  %v45374_v56 = vld [vmem:[#allocation9] ss:$0 sm:$0xff] }
 0x164   :  { %40702 = vmatpush3.bf16.msra.mxu0 %v45078_v59  ;;  %34887 = vmatprep.mubr.msk.f32.mxu0 %vm44853_vm0, %v49091_v1 }
 0x165   :  { %40703 = vmatprep.subr.bf16.mxu0 %v49089_v0 }
 0x168   :  { %40705 = vmatpush3.bf16.msra.mxu0 %v45120_v7 }
 0x169   :  { %40706 = vmatprep.subr.bf16.mxu0 %v49089_v0 }
 0x16c   :  { %40708 = vmatpush3.bf16.msra.mxu0 %v45154_v17 }
 0x16d   :  { %40709 = vmatprep.subr.bf16.mxu0 %v49089_v0 }
 0x170   :  { %40711 = vmatpush3.bf16.msra.mxu0 %v45172_v21 }
 0x171   :  { %40712 = vmatprep.subr.bf16.mxu0 %v49089_v0 }
 0x173   :  { %34888 = vmatmul.mubr.f32.vlgmr.msra.gmra.mrb[6].mxu0 %v704_v28  ;;  %v45392_v28 = vsub.f32 %v45027_v47, %v49126_v10  ;;  %v49088_v10 = vand.u32 4294901760, %v45416_v62 }
 0x174   :  { %40714 = vmatpush3.bf16.msra.mxu0 %v45329_v34  ;;  %34906 = vmatprep.mubr.msk.f32.mxu0 %vm44853_vm0, %v49091_v1 }
 0x175   :  { %40715 = vmatprep.subr.bf16.mxu0 %v49089_v0  ;;  %v1275_v47 = vand.u32 4294901760, %v45392_v28  ;;  %v1297_v5 = vsub.f32 %v45416_v62, %v49088_v10 }
 0x178   :  { %40717 = vmatpush3.bf16.msra.mxu0 %v45337_v63 }
 0x179   :  { %40718 = vmatprep.subr.bf16.mxu0 %v49089_v0 }
 0x17c   :  { %40720 = vmatpush3.bf16.msra.mxu0 %v45347_v16 }
 0x17d   :  { %40721 = vmatprep.subr.bf16.mxu0 %v49089_v0 }
 0x180   :  { %40723 = vmatpush3.bf16.msra.mxu0 %v45351_v46 }
 0x181   :  { %40724 = vmatprep.subr.bf16.mxu0 %v49089_v0 }
 0x183   :  { %34907 = vmatmul.mubr.f32.vlgmr.msra.gmra.mrb[6].mxu0 %v45240_v30 }
 0x184   :  { %40726 = vmatpush3.bf16.msra.mxu0 %v45078_v59  ;;  %34925 = vmatprep.mubr.msk.f32.mxu0 %vm44853_vm0, %v49091_v1 }
 0x185   :  { %40727 = vmatprep.subr.bf16.mxu0 %v49089_v0 }
 0x188   :  { %40729 = vmatpush3.bf16.msra.mxu0 %v45120_v7 }
 0x189   :  { %40730 = vmatprep.subr.bf16.mxu0 %v49089_v0 }
 0x18c   :  { %40732 = vmatpush3.bf16.msra.mxu0 %v45154_v17 }
 0x18d   :  { %40733 = vmatprep.subr.bf16.mxu0 %v49089_v0 }
 0x190   :  { %40735 = vmatpush3.bf16.msra.mxu0 %v45172_v21 }
 0x191   :  { %40808 = vmatprep.subr.bf16.mxu0 %v49089_v0 }
 0x193   :  { %34926 = vmatmul.mubr.f32.vlgmr.msra.gmra.mrb[6].mxu0 %v45240_v30  ;;  %v45385_v30 = vsub.f32 %v45004_v41, %v49125_v29  ;;  %v1262_v41 = vsub.f32 %v45380_v61, %v1261_v9  ;;  %v1289_v29 = vand.u32 4294901760, %v45411_v32 }
 0x194   :  { %40810 = vmatpush3.bf16.msra.mxu0 %v44958_v8  ;;  %35050 = vmatprep.mubr.msk.f32.mxu0 %vm44853_vm0, %v49091_v1 }
 0x195   :  { %40811 = vmatprep.subr.bf16.mxu0 %v49089_v0  ;;  %v1268_v38 = vand.u32 4294901760, %v45385_v30  ;;  %v1290_v36 = vsub.f32 %v45411_v32, %v1289_v29 }
 0x197   :  { %v1269_v50 = vsub.f32 %v45385_v30, %v1268_v38 }
 0x198   :  { %40813 = vmatpush3.bf16.msra.mxu0 %v44960_v11 }
 0x199   :  { %40820 = vmatprep.subr.bf16.mxu0 %v49089_v0 }
 0x266   :  { %v1162_v3 = vpop.f32.mrb[6].mxu0 }
 0x267   :  { %v44228_v55 = vadd.f32 %v45374_v56, %v1162_v3  ;;  %v34927_v4 = vpop.f32.mrb[7].mxu0 }
 0x269   :  { %v1167_v52 = vmin.f32 %v44228_v55, 0.0  ;;  %vm1166_vm4 = vcmp.gt.f32.partialorder %v44228_v55, 0.0 }
 0x26b   :  { %v1168_v60 = vmul.f32 1.442695, %v1167_v52  ;;  %v1270_v52 = vand.u32 4294901760, %v1269_v50 }
 0x26d   :  { %44676 = vpow2.f32 %v1168_v60  ;;  %v1276_v60 = vsub.f32 %v45392_v28, %v1275_v47 }
 0x277   :  { %v44677_v40 = vpop.eup %44676 }
 0x278   :  { %v31949_v45 = vadd.f32 -1.0, %v44677_v40  ;;  %v49131_v40 = vand.u32 4294901760, %v45114_v6 }
 0x27a   :  { %v1171_v13 = vsel %vm1166_vm4, %v44228_v55, %v31949_v45  ;;  %v1263_v55 = vand.u32 4294901760, %v1262_v41  ;;  %v45437_v45 = vsub.f32 %v45114_v6, %v49131_v40 }
 0x27b   :  { %v1173_v53 = vsel %vm625_vm2, %v1171_v13, 0 }
 0x27c   :  { %v45418_v3 = vand.u32 4294901760, %v1173_v53  ;;  %v45439_v50 = vpack.c.bf16 %v1270_v52, %v1263_v55  ;;  %v1310_v15 = vand.u32 4294901760, %v45437_v45  ;;  %v1291_v55 = vand.u32 4294901760, %v1290_v36 }
 0x27d   :  { %v1298_v52 = vand.u32 4294901760, %v1297_v5  ;;  %v45468_v36 = vpack.c.bf16 %v45385_v30, %v45380_v61  ;;  %v45475_v5 = vpack.c.bf16 %v45397_v44, %v45392_v28  ;;  %v49133_v61 = vand.u32 4294901760, %v45416_v62 }
 0x27e   :  { %v1249_v4 = vsub.f32 %v1173_v53, %v45418_v3  ;;  %v1277_v53 = vand.u32 4294901760, %v1276_v60  ;;  %v1304_v60 = vsub.f32 %v45432_v18, %v1303_v58  ;;  %v1311_v57 = vsub.f32 %v45437_v45, %v1310_v15 }
 0x27f   :  { %v45458_v10 = vpack.c.bf16 %v1298_v52, %v1291_v55  ;;  %v45489_v55 = vpack.c.bf16 %v45437_v45, %v45432_v18  ;;  %v49132_v18 = vand.u32 4294901760, %v45397_v44  ;;  %v45525_v30 = vpack.c.bf16 %v49133_v61, %v1289_v29 }
 0x280   :  { %v1250_v41 = vand.u32 4294901760, %v1249_v4  ;;  %v45449_v40 = vpack.c.bf16 %v1284_v48, %v1277_v53  ;;  %v1312_v53 = vand.u32 4294901760, %v1311_v57  ;;  %v1714_v44 = vstv %s1713_s4  ;;  %s9667_s4 = sadd.f32 %s9666_s26, %s49068_s0  ;;  %s12846_s26 = smul.f32 8.0, %s49069_s1 }
 0x281   :  { %v45515_v45 = vpack.c.bf16 %v49132_v18, %v1275_v47 }
 0x282   :  { %v1251_v13 = vsub.f32 %v1249_v4, %v1250_v41 }
 0x284   :  { %v1252_v6 = vand.u32 4294901760, %v1251_v13  ;;  %v1305_v13 = vand.u32 4294901760, %v1304_v60 }
 0x286   :  { %34945 = vmatmul.mubr.f32.vlgmr.msra.gmra.mrb[6].mxu1 %v1252_v6  ;;  %v45462_v48 = vpack.c.bf16 %v1312_v53, %v1305_v13  ;;  %v45483_v6 = vpack.c.bf16 %v45416_v62, %v45411_v32  ;;  %v1718_v13 = vstv %s1717_s16  ;;  %s25566_s16 = smul.f32 16.0, %s49069_s1 }
 0x287   :  { %40750 = vmatpush3.bf16.msra.mxu1 %v45439_v50  ;;  %34963 = vmatprep.mubr.msk.f32.mxu1 %vm44853_vm0, %v49091_v1  ;;  %v1719_v53 = vmul.f32 %v45190_v22, %v1718_v13 }
 0x288   :  { %40751 = vmatprep.subr.bf16.mxu1 %v49089_v0  ;;  %s25567_s7 = sadd.f32 %s25566_s16, %s49068_s0  ;;  %s28746_s16 = smul.f32 18.0, %s49069_s1 }
 0x28b   :  { %40753 = vmatpush3.bf16.msra.mxu1 %v45449_v40 }
 0x28c   :  { %40754 = vmatprep.subr.bf16.mxu1 %v49089_v0 }
 0x28f   :  { %40756 = vmatpush3.bf16.msra.mxu1 %v45458_v10 }
 0x290   :  { %40757 = vmatprep.subr.bf16.mxu1 %v49089_v0 }
 0x293   :  { %40759 = vmatpush3.bf16.msra.mxu1 %v45462_v48 }
 0x294   :  { %40760 = vmatprep.subr.bf16.mxu1 %v49089_v0 }
 0x296   :  { %34964 = vmatmul.mubr.f32.vlgmr.msra.gmra.mrb[6].mxu1 %v45418_v3 }
 0x297   :  { %40762 = vmatpush3.bf16.msra.mxu1 %v45468_v36  ;;  %34982 = vmatprep.mubr.msk.f32.mxu1 %vm44853_vm0, %v49091_v1 }
 0x298   :  { %40763 = vmatprep.subr.bf16.mxu1 %v49089_v0 }
 0x29b   :  { %40765 = vmatpush3.bf16.msra.mxu1 %v45475_v5 }
 0x29c   :  { %40766 = vmatprep.subr.bf16.mxu1 %v49089_v0 }
 0x29f   :  { %40768 = vmatpush3.bf16.msra.mxu1 %v45483_v6 }
 0x2a0   :  { %40769 = vmatprep.subr.bf16.mxu1 %v49089_v0 }
 0x2a3   :  { %40771 = vmatpush3.bf16.msra.mxu1 %v45489_v55 }
 0x2a4   :  { %40772 = vmatprep.subr.bf16.mxu1 %v49089_v0 }
 0x2a6   :  { %34983 = vmatmul.mubr.f32.vlgmr.msra.gmra.mrb[6].mxu1 %v1249_v4  ;;  %v45507_v4 = vpack.c.bf16 %v1268_v38, %v1261_v9  ;;  %v45529_v9 = vpack.c.bf16 %v1310_v15, %v1303_v58  ;;  %v45561_v38 = vld [vmem:[%s49078_s10] ss:$0 sm:$0xff] }
 0x2a7   :  { %40774 = vmatpush3.bf16.msra.mxu1 %v45059_v54  ;;  %35001 = vmatprep.mubr.msk.f32.mxu1 %vm44853_vm0, %v49091_v1 }
 0x2a8   :  { %40775 = vmatprep.subr.bf16.mxu1 %v49089_v0 }
 0x2ab   :  { %40777 = vmatpush3.bf16.msra.mxu1 %v45100_v2 }
 0x2ac   :  { %40778 = vmatprep.subr.bf16.mxu1 %v49089_v0 }
 0x2af   :  { %40780 = vmatpush3.bf16.msra.mxu1 %v45145_v14 }
 0x2b0   :  { %40781 = vmatprep.subr.bf16.mxu1 %v49089_v0 }
 0x2b3   :  { %40783 = vmatpush3.bf16.msra.mxu1 %v45165_v20 }
 0x2b4   :  { %40784 = vmatprep.subr.bf16.mxu1 %v49089_v0 }
 0x2b6   :  { %35002 = vmatmul.mubr.f32.vlgmr.msra.gmra.mrb[6].mxu1 %v1250_v41 }
 0x2b7   :  { %40786 = vmatpush3.bf16.msra.mxu1 %v45507_v4  ;;  %35020 = vmatprep.mubr.msk.f32.mxu1 %vm44853_vm0, %v49091_v1 }
 0x2b8   :  { %40787 = vmatprep.subr.bf16.mxu1 %v49089_v0 }
 0x2bb   :  { %40789 = vmatpush3.bf16.msra.mxu1 %v45515_v45 }
 0x2bc   :  { %40790 = vmatprep.subr.bf16.mxu1 %v49089_v0 }
 0x2bf   :  { %40792 = vmatpush3.bf16.msra.mxu1 %v45525_v30 }
 0x2c0   :  { %40793 = vmatprep.subr.bf16.mxu1 %v49089_v0 }
 0x2c3   :  { %40795 = vmatpush3.bf16.msra.mxu1 %v45529_v9 }
 0x2c4   :  { %40796 = vmatprep.subr.bf16.mxu1 %v49089_v0 }
 0x2c6   :  { %35021 = vmatmul.mubr.f32.vlgmr.msra.gmra.mrb[6].mxu1 %v45418_v3 }
 0x2c7   :  { %40798 = vmatpush3.bf16.msra.mxu1 %v45059_v54  ;;  %35039 = vmatprep.mubr.msk.f32.mxu1 %vm44853_vm0, %v49091_v1 }
 0x2c8   :  { %40799 = vmatprep.subr.bf16.mxu1 %v49089_v0 }
 0x2cb   :  { %40801 = vmatpush3.bf16.msra.mxu1 %v45100_v2 }
 0x2cc   :  { %40802 = vmatprep.subr.bf16.mxu1 %v49089_v0 }
 0x2cf   :  { %40804 = vmatpush3.bf16.msra.mxu1 %v45145_v14 }
 0x2d0   :  { %40805 = vmatprep.subr.bf16.mxu1 %v49089_v0 }
 0x2d3   :  { %40807 = vmatpush3.bf16.msra.mxu1 %v45165_v20 }
 0x2d4   :  { %40814 = vmatprep.subr.bf16.mxu1 %v49089_v0 }
 0x2d6   :  { %35040 = vmatmul.mubr.f32.vlgmr.msra.gmra.mrb[6].mxu1 %v45418_v3 }
 0x2d7   :  { %40816 = vmatpush3.bf16.msra.mxu1 %v44971_v31  ;;  %35061 = vmatprep.mubr.msk.f32.mxu1 %vm44853_vm0, %v49091_v1 }
 0x2d8   :  { %40817 = vmatprep.subr.bf16.mxu1 %v49089_v0 }
 0x2db   :  { %40819 = vmatpush3.bf16.msra.mxu1 %v44976_v33 }
 0x2dc   :  { %40826 = vmatprep.subr.bf16.mxu1 %v49089_v0 }
 0x3a9   :  { %v1708_v28 = vpop.f32.mrb[6].mxu1 }
 0x3aa   :  { %v44229_v47 = vadd.f32 %v45561_v38, %v1708_v28  ;;  %v35041_v15 = vpop.f32.mrb[7].mxu1 }
 0x3ac   :  { %v1715_v32 = vmul.f32 %v44229_v47, %v1714_v44 }
 0x3ae   :  { %v45565_v62 = vadd.f32 %v1715_v32, %v44967_v27 }
 0x3b0   :  { %v1721_v3 = vsel %vm71_vm1, %v45565_v62, 0 }
 0x3b1   :  { %v1792_v29 = vand.u32 4294901760, %v1721_v3 }
 0x3b3   :  { %v1793_v41 = vsub.f32 %v1721_v3, %v1792_v29  ;;  %35062 = vmatmul.mubr.f32.vlgmr.msra.gmra.mrb[8].mxu1 %v1792_v29 }
 0x3b4   :  { %40828 = vmatpush3.bf16.msra.mxu1 %v44958_v8  ;;  %35083 = vmatprep.mubr.msk.f32.mxu1 %vm44853_vm0, %v49091_v1 }
 0x3b5   :  { %40829 = vmatprep.subr.bf16.mxu1 %v49089_v0  ;;  %v1794_v58 = vand.u32 4294901760, %v1793_v41 }
 0x3b7   :  { %v1795_v52 = vsub.f32 %v1793_v41, %v1794_v58 }
 0x3b8   :  { %40831 = vmatpush3.bf16.msra.mxu1 %v44960_v11 }
 0x3b9   :  { %40838 = vmatprep.subr.bf16.mxu1 %v49089_v0  ;;  %v1796_v27 = vand.u32 4294901760, %v1795_v52 }
 0x3bb   :  { %35084 = vmatmul.mubr.f32.vlgmr.msra.gmra.mrb[10].mxu1 %v1794_v58  ;;  %35051 = vmatmul.mubr.f32.vlgmr.msra.gmra.mrb[8].mxu0 %v1796_v27 }
 0x3bc   :  { %40822 = vmatpush3.bf16.msra.mxu0 %v44981_v37  ;;  %40840 = vmatpush3.bf16.msra.mxu1 %v44958_v8 }
 0x3bd   :  { %40823 = vmatprep.subr.bf16.mxu0 %v49089_v0  ;;  %40841 = vmatprep.subr.bf16.mxu1 %v49089_v0 }
 0x3be   :  { %35072 = vmatprep.mubr.msk.f32.mxu0 %vm44853_vm0, %v49091_v1  ;;  %35105 = vmatprep.mubr.msk.f32.mxu1 %vm44853_vm0, %v49091_v1 }
 0x3c0   :  { %40825 = vmatpush3.bf16.msra.mxu0 %v44987_v39  ;;  %40843 = vmatpush3.bf16.msra.mxu1 %v44960_v11 }
 0x3c1   :  { %40832 = vmatprep.subr.bf16.mxu0 %v49089_v0  ;;  %40916 = vmatprep.subr.bf16.mxu1 %v49089_v0 }
 0x3c3   :  { %35073 = vmatmul.mubr.f32.vlgmr.msra.gmra.mrb[10].mxu0 %v1793_v41  ;;  %35106 = vmatmul.mubr.f32.vlgmr.msra.gmra.mrb[12].mxu1 %v1792_v29 }
 0x3c4   :  { %40834 = vmatpush3.bf16.msra.mxu0 %v45007_v42  ;;  %35094 = vmatprep.mubr.msk.f32.mxu0 %vm44853_vm0, %v49091_v1 }
 0x3c5   :  { %40835 = vmatprep.subr.bf16.mxu0 %v49089_v0  ;;  %40918 = vmatpush3.bf16.msra.mxu1 %v45059_v54 }
 0x3c6   :  { %40919 = vmatprep.subr.bf16.mxu1 %v49089_v0  ;;  %35238 = vmatprep.mubr.msk.f32.mxu1 %vm44853_vm0, %v49091_v1 }
 0x3c8   :  { %40837 = vmatpush3.bf16.msra.mxu0 %v45037_v51 }
 0x3c9   :  { %40844 = vmatprep.subr.bf16.mxu0 %v49089_v0  ;;  %40921 = vmatpush3.bf16.msra.mxu1 %v45100_v2 }
 0x3ca   :  { %40922 = vmatprep.subr.bf16.mxu1 %v49089_v0 }
 0x3cb   :  { %35095 = vmatmul.mubr.f32.vlgmr.msra.gmra.mrb[12].mxu0 %v1792_v29 }
 0x3cc   :  { %40846 = vmatpush3.bf16.msra.mxu0 %v45078_v59  ;;  %35124 = vmatprep.mubr.msk.f32.mxu0 %vm44853_vm0, %v49091_v1 }
 0x3cd   :  { %40847 = vmatprep.subr.bf16.mxu0 %v49089_v0  ;;  %40924 = vmatpush3.bf16.msra.mxu1 %v45145_v14 }
 0x3ce   :  { %40925 = vmatprep.subr.bf16.mxu1 %v49089_v0 }
 0x3d0   :  { %40849 = vmatpush3.bf16.msra.mxu0 %v45120_v7 }
 0x3d1   :  { %40850 = vmatprep.subr.bf16.mxu0 %v49089_v0  ;;  %40927 = vmatpush3.bf16.msra.mxu1 %v45165_v20 }
 0x3d2   :  { %40928 = vmatprep.subr.bf16.mxu1 %v49089_v0 }
 0x3d4   :  { %40852 = vmatpush3.bf16.msra.mxu0 %v45154_v17 }
 0x3d5   :  { %40853 = vmatprep.subr.bf16.mxu0 %v49089_v0 }
 0x3d8   :  { %40855 = vmatpush3.bf16.msra.mxu0 %v45172_v21 }
 0x3d9   :  { %40856 = vmatprep.subr.bf16.mxu0 %v49089_v0 }
 0x486   :  { %v1889_v60 = vpop.f32.mrb[8].mxu1 }
 0x487   :  { %v35063_v57 = vpop.f32.mrb[9].mxu1 }
 0x48e   :  { %v2046_v18 = vpop.f32.mrb[10].mxu1  ;;  %v1798_v61 = vpop.f32.mrb[8].mxu0 }
 0x48f   :  { %v1799_v28 = vadd.f32 %v1798_v61, %v1719_v53  ;;  %v35085_v44 = vpop.f32.mrb[11].mxu1  ;;  %v35052_v47 = vpop.f32.mrb[9].mxu0 }
 0x491   :  { %v1890_v15 = vadd.f32 %v1889_v60, %v1799_v28 }
 0x496   :  { %v1969_v32 = vpop.f32.mrb[10].mxu0  ;;  %v2204_v3 = vpop.f32.mrb[12].mxu1 }
 0x497   :  { %v1970_v29 = vadd.f32 %v1969_v32, %v1890_v15  ;;  %v35074_v41 = vpop.f32.mrb[11].mxu0  ;;  %v35107_v58 = vpop.f32.mrb[13].mxu1 }
 0x499   :  { %v2047_v52 = vadd.f32 %v2046_v18, %v1970_v29 }
 0x49e   :  { %v2129_v27 = vpop.f32.mrb[12].mxu0 }
 0x49f   :  { %v2130_v0 = vadd.f32 %v2129_v27, %v2047_v52  ;;  %v35096_v1 = vpop.f32.mrb[13].mxu0 }
 0x4a0   :  { %v49135_v1 = vmov 0.0|0.0  }
 0x4a1   :  { %v2205_v51 = vadd.f32 %v2204_v3, %v2130_v0  ;;  %v49134_v0 = vmov 0.0  }
 0x4a3   :  { %v2208_v57 = vadd.f32 %v45196_v23, %v2205_v51 }
 0x4a5   :  { %v2210_v42 = vmin.f32 %v2208_v57, 0.0  ;;  %vm2209_vm5 = vcmp.gt.f32.partialorder %v2208_v57, 0.0 }
 0x4a7   :  { %v2211_v22 = vmul.f32 1.442695, %v2210_v42 }
 0x4a9   :  { %44678 = vpow2.f32 %v2211_v22 }
 0x4b3   :  { %v44679_v13 = vpop.eup %44678 }
 0x4b4   :  { %v31950_v53 = vadd.f32 -1.0, %v44679_v13 }
 0x4b6   :  { %v2214_v61 = vsel %vm2209_vm5, %v2208_v57, %v31950_v53 }
 0x4b7   :  { %v2216_v60 = vsel %vm625_vm2, %v2214_v61, 0 }
 0x4b8   :  { %v2291_v28 = vand.u32 4294901760, %v2216_v60 }
 0x4ba   :  { %v2292_v44 = vsub.f32 %v2216_v60, %v2291_v28  ;;  %v3303_v60 = vstv %s3302_s21  ;;  %s14436_s21 = smul.f32 9.0, %s49069_s1 }
 0x4bc   :  { %v2293_v47 = vand.u32 4294901760, %v2292_v44  ;;  %s14437_s18 = sadd.f32 %s14436_s21, %s49068_s0  ;;  %s17616_s21 = smul.f32 11.0, %s49069_s1 }
 0x4be   :  { %v2294_v15 = vsub.f32 %v2292_v44, %v2293_v47 }
 0x4c0   :  { %v2295_v18 = vand.u32 4294901760, %v2294_v15 }
 0x4c2   :  { %35125 = vmatmul.mubr.f32.vlgmr.msra.gmra.mrb[14].mxu0 %v2295_v18 }
 0x4c3   :  { %40858 = vmatpush3.bf16.msra.mxu0 %v45261_v25  ;;  %35143 = vmatprep.mubr.msk.f32.mxu0 %vm44853_vm0, %v49134_v0 }
 0x4c4   :  { %40859 = vmatprep.subr.bf16.mxu0 %v49135_v1 }
 0x4c7   :  { %40861 = vmatpush3.bf16.msra.mxu0 %v45271_v19 }
 0x4c8   :  { %40862 = vmatprep.subr.bf16.mxu0 %v49135_v1 }
 0x4cb   :  { %40864 = vmatpush3.bf16.msra.mxu0 %v45280_v35 }
 0x4cc   :  { %40865 = vmatprep.subr.bf16.mxu0 %v49135_v1 }
 0x4cf   :  { %40867 = vmatpush3.bf16.msra.mxu0 %v45284_v24 }
 0x4d0   :  { %40868 = vmatprep.subr.bf16.mxu0 %v49135_v1 }
 0x4d2   :  { %35144 = vmatmul.mubr.f32.vlgmr.msra.gmra.mrb[14].mxu0 %v2291_v28 }
 0x4d3   :  { %40870 = vmatpush3.bf16.msra.mxu0 %v45290_v26  ;;  %35162 = vmatprep.mubr.msk.f32.mxu0 %vm44853_vm0, %v49134_v0 }
 0x4d4   :  { %40871 = vmatprep.subr.bf16.mxu0 %v49135_v1 }
 0x4d7   :  { %40873 = vmatpush3.bf16.msra.mxu0 %v45297_v43 }
 0x4d8   :  { %40874 = vmatprep.subr.bf16.mxu0 %v49135_v1 }
 0x4db   :  { %40876 = vmatpush3.bf16.msra.mxu0 %v45305_v49 }
 0x4dc   :  { %40877 = vmatprep.subr.bf16.mxu0 %v49135_v1 }
 0x4df   :  { %40879 = vmatpush3.bf16.msra.mxu0 %v45311_v12 }
 0x4e0   :  { %40880 = vmatprep.subr.bf16.mxu0 %v49135_v1 }
 0x4e2   :  { %35163 = vmatmul.mubr.f32.vlgmr.msra.gmra.mrb[14].mxu0 %v2292_v44 }
 0x4e3   :  { %40882 = vmatpush3.bf16.msra.mxu0 %v45078_v59  ;;  %35181 = vmatprep.mubr.msk.f32.mxu0 %vm44853_vm0, %v49134_v0 }
 0x4e4   :  { %40883 = vmatprep.subr.bf16.mxu0 %v49135_v1 }
 0x4e7   :  { %40885 = vmatpush3.bf16.msra.mxu0 %v45120_v7 }
 0x4e8   :  { %40886 = vmatprep.subr.bf16.mxu0 %v49135_v1 }
 0x4eb   :  { %40888 = vmatpush3.bf16.msra.mxu0 %v45154_v17 }
 0x4ec   :  { %40889 = vmatprep.subr.bf16.mxu0 %v49135_v1 }
 0x4ef   :  { %40891 = vmatpush3.bf16.msra.mxu0 %v45172_v21 }
 0x4f0   :  { %40892 = vmatprep.subr.bf16.mxu0 %v49135_v1 }
 0x4f2   :  { %35182 = vmatmul.mubr.f32.vlgmr.msra.gmra.mrb[14].mxu0 %v2293_v47 }
 0x4f3   :  { %40894 = vmatpush3.bf16.msra.mxu0 %v45329_v34  ;;  %35200 = vmatprep.mubr.msk.f32.mxu0 %vm44853_vm0, %v49134_v0 }
 0x4f4   :  { %40895 = vmatprep.subr.bf16.mxu0 %v49135_v1 }
 0x4f7   :  { %40897 = vmatpush3.bf16.msra.mxu0 %v45337_v63 }
 0x4f8   :  { %40898 = vmatprep.subr.bf16.mxu0 %v49135_v1 }
 0x4fb   :  { %40900 = vmatpush3.bf16.msra.mxu0 %v45347_v16 }
 0x4fc   :  { %40901 = vmatprep.subr.bf16.mxu0 %v49135_v1 }
 0x4ff   :  { %40903 = vmatpush3.bf16.msra.mxu0 %v45351_v46 }
 0x500   :  { %40904 = vmatprep.subr.bf16.mxu0 %v49135_v1 }
 0x502   :  { %35201 = vmatmul.mubr.f32.vlgmr.msra.gmra.mrb[14].mxu0 %v2291_v28 }
 0x503   :  { %40906 = vmatpush3.bf16.msra.mxu0 %v45078_v59  ;;  %35219 = vmatprep.mubr.msk.f32.mxu0 %vm44853_vm0, %v49134_v0 }
 0x504   :  { %40907 = vmatprep.subr.bf16.mxu0 %v49135_v1 }
 0x507   :  { %40909 = vmatpush3.bf16.msra.mxu0 %v45120_v7 }
 0x508   :  { %40910 = vmatprep.subr.bf16.mxu0 %v49135_v1 }
 0x50b   :  { %40912 = vmatpush3.bf16.msra.mxu0 %v45154_v17 }
 0x50c   :  { %40913 = vmatprep.subr.bf16.mxu0 %v49135_v1 }
 0x50f   :  { %40915 = vmatpush3.bf16.msra.mxu0 %v45172_v21 }
 0x510   :  { %40988 = vmatprep.subr.bf16.mxu0 %v49135_v1 }
 0x512   :  { %35220 = vmatmul.mubr.f32.vlgmr.msra.gmra.mrb[14].mxu0 %v2291_v28 }
 0x513   :  { %40990 = vmatpush3.bf16.msra.mxu0 %v44958_v8  ;;  %35344 = vmatprep.mubr.msk.f32.mxu0 %vm44853_vm0, %v49134_v0 }
 0x514   :  { %40991 = vmatprep.subr.bf16.mxu0 %v49135_v1 }
 0x517   :  { %40993 = vmatpush3.bf16.msra.mxu0 %v44960_v11 }
 0x518   :  { %41000 = vmatprep.subr.bf16.mxu0 %v49135_v1 }
 0x5e5   :  { %v2751_v42 = vpop.f32.mrb[14].mxu0 }
 0x5e6   :  { %v44230_v51 = vadd.f32 %v45374_v56, %v2751_v42  ;;  %v35221_v23 = vpop.f32.mrb[15].mxu0 }
 0x5e8   :  { %v2756_v32 = vmin.f32 %v44230_v51, 0.0  ;;  %vm2755_vm6 = vcmp.gt.f32.partialorder %v44230_v51, 0.0 }
 0x5ea   :  { %v2757_v3 = vmul.f32 1.442695, %v2756_v32 }
 0x5ec   :  { %44680 = vpow2.f32 %v2757_v3  ;;  %v49136_v3 = vld [vmem:[#allocation17_spill] sm:$0xff] }
 0x5f6   :  { %v44681_v29 = vpop.eup %44680 }
 0x5f7   :  { %v31951_v41 = vadd.f32 -1.0, %v44681_v29  ;;  %v49137_v29 = vld [vmem:[#allocation18_spill] sm:$0xff] }
 0x5f9   :  { %v2760_v58 = vsel %vm2755_vm6, %v44230_v51, %v31951_v41 }
 0x5fa   :  { %v2762_v52 = vsel %vm625_vm2, %v2760_v58, 0 }
 0x5fb   :  { %v2837_v27 = vand.u32 4294901760, %v2762_v52 }
 0x5fd   :  { %v2838_v57 = vsub.f32 %v2762_v52, %v2837_v27  ;;  %v3308_v52 = vstv %s3307_s8  ;;  %s9662_s8 = scalar_select %p9661_p7, %s49069_s1, 0.0 }
 0x5fe   :  { %p31921_p7 = scmp.gt.s32.totalorder %s49070_s2, 19 }
 0x5ff   :  { %v2839_v22 = vand.u32 4294901760, %v2838_v57 }
 0x601   :  { %v2840_v13 = vsub.f32 %v2838_v57, %v2839_v22 }
 0x603   :  { %v2841_v53 = vand.u32 4294901760, %v2840_v13 }
 0x605   :  { %35239 = vmatmul.mubr.f32.vlgmr.msra.gmra.mrb[14].mxu1 %v2841_v53 }
 0x606   :  { %40930 = vmatpush3.bf16.msra.mxu1 %v45439_v50  ;;  %35257 = vmatprep.mubr.msk.f32.mxu1 %vm44853_vm0, %v49134_v0 }
 0x607   :  { %40931 = vmatprep.subr.bf16.mxu1 %v49135_v1 }
 0x60a   :  { %40933 = vmatpush3.bf16.msra.mxu1 %v45449_v40 }
 0x60b   :  { %40934 = vmatprep.subr.bf16.mxu1 %v49135_v1 }
 0x60e   :  { %40936 = vmatpush3.bf16.msra.mxu1 %v45458_v10 }
 0x60f   :  { %40937 = vmatprep.subr.bf16.mxu1 %v49135_v1 }
 0x612   :  { %40939 = vmatpush3.bf16.msra.mxu1 %v45462_v48 }
 0x613   :  { %40940 = vmatprep.subr.bf16.mxu1 %v49135_v1 }
 0x615   :  { %35258 = vmatmul.mubr.f32.vlgmr.msra.gmra.mrb[14].mxu1 %v2837_v27 }
 0x616   :  { %40942 = vmatpush3.bf16.msra.mxu1 %v45468_v36  ;;  %35276 = vmatprep.mubr.msk.f32.mxu1 %vm44853_vm0, %v49134_v0 }
 0x617   :  { %40943 = vmatprep.subr.bf16.mxu1 %v49135_v1 }
 0x61a   :  { %40945 = vmatpush3.bf16.msra.mxu1 %v45475_v5 }
 0x61b   :  { %40946 = vmatprep.subr.bf16.mxu1 %v49135_v1 }
 0x61e   :  { %40948 = vmatpush3.bf16.msra.mxu1 %v45483_v6 }
 0x61f   :  { %40949 = vmatprep.subr.bf16.mxu1 %v49135_v1 }
 0x622   :  { %40951 = vmatpush3.bf16.msra.mxu1 %v45489_v55 }
 0x623   :  { %40952 = vmatprep.subr.bf16.mxu1 %v49135_v1 }
 0x625   :  { %35277 = vmatmul.mubr.f32.vlgmr.msra.gmra.mrb[14].mxu1 %v2838_v57 }
 0x626   :  { %40954 = vmatpush3.bf16.msra.mxu1 %v45059_v54  ;;  %35295 = vmatprep.mubr.msk.f32.mxu1 %vm44853_vm0, %v49134_v0 }
 0x627   :  { %40955 = vmatprep.subr.bf16.mxu1 %v49135_v1 }
 0x62a   :  { %40957 = vmatpush3.bf16.msra.mxu1 %v45100_v2 }
 0x62b   :  { %40958 = vmatprep.subr.bf16.mxu1 %v49135_v1 }
 0x62e   :  { %40960 = vmatpush3.bf16.msra.mxu1 %v45145_v14 }
 0x62f   :  { %40961 = vmatprep.subr.bf16.mxu1 %v49135_v1 }
 0x632   :  { %40963 = vmatpush3.bf16.msra.mxu1 %v45165_v20 }
 0x633   :  { %40964 = vmatprep.subr.bf16.mxu1 %v49135_v1 }
 0x635   :  { %35296 = vmatmul.mubr.f32.vlgmr.msra.gmra.mrb[14].mxu1 %v2839_v22 }
 0x636   :  { %40966 = vmatpush3.bf16.msra.mxu1 %v45507_v4  ;;  %35314 = vmatprep.mubr.msk.f32.mxu1 %vm44853_vm0, %v49134_v0 }
 0x637   :  { %40967 = vmatprep.subr.bf16.mxu1 %v49135_v1 }
 0x63a   :  { %40969 = vmatpush3.bf16.msra.mxu1 %v45515_v45 }
 0x63b   :  { %40970 = vmatprep.subr.bf16.mxu1 %v49135_v1 }
 0x63e   :  { %40972 = vmatpush3.bf16.msra.mxu1 %v45525_v30 }
 0x63f   :  { %40973 = vmatprep.subr.bf16.mxu1 %v49135_v1 }
 0x642   :  { %40975 = vmatpush3.bf16.msra.mxu1 %v45529_v9 }
 0x643   :  { %40976 = vmatprep.subr.bf16.mxu1 %v49135_v1 }
 0x645   :  { %35315 = vmatmul.mubr.f32.vlgmr.msra.gmra.mrb[14].mxu1 %v2837_v27 }
 0x646   :  { %40978 = vmatpush3.bf16.msra.mxu1 %v45059_v54  ;;  %35333 = vmatprep.mubr.msk.f32.mxu1 %vm44853_vm0, %v49134_v0 }
 0x647   :  { %40979 = vmatprep.subr.bf16.mxu1 %v49135_v1 }
 0x64a   :  { %40981 = vmatpush3.bf16.msra.mxu1 %v45100_v2 }
 0x64b   :  { %40982 = vmatprep.subr.bf16.mxu1 %v49135_v1 }
 0x64e   :  { %40984 = vmatpush3.bf16.msra.mxu1 %v45145_v14 }
 0x64f   :  { %40985 = vmatprep.subr.bf16.mxu1 %v49135_v1 }
 0x652   :  { %40987 = vmatpush3.bf16.msra.mxu1 %v45165_v20 }
 0x653   :  { %40994 = vmatprep.subr.bf16.mxu1 %v49135_v1 }
 0x655   :  { %35334 = vmatmul.mubr.f32.vlgmr.msra.gmra.mrb[14].mxu1 %v2837_v27  ;;  %v45801_v27 = vld [vmem:[%s49073_s5] ss:$0 sm:$0xff] }
 0x656   :  { %40996 = vmatpush3.bf16.msra.mxu1 %v44971_v31  ;;  %35355 = vmatprep.mubr.msk.f32.mxu1 %vm44853_vm0, %v49134_v0  ;;  %49138 = vst [vmem:[#allocation19_spill] sm:$0xff] %v45801_v27  ;;  %v3309_v57 = vmul.f32 %v45801_v27, %v3308_v52  ;;  %v45807_v52 = vld [vmem:[%s49074_s6] ss:$0 sm:$0xff] }
 0x657   :  { %40997 = vmatprep.subr.bf16.mxu1 %v49135_v1 }
 0x65a   :  { %40999 = vmatpush3.bf16.msra.mxu1 %v44976_v33 }
 0x65b   :  { %41006 = vmatprep.subr.bf16.mxu1 %v49135_v1 }
 0x728   :  { %v3297_v61 = vpop.f32.mrb[14].mxu1 }
 0x729   :  { %v44231_v28 = vadd.f32 %v45561_v38, %v3297_v61  ;;  %v35335_v44 = vpop.f32.mrb[15].mxu1 }
 0x72b   :  { %v3304_v47 = vmul.f32 %v44231_v28, %v3303_v60 }
 0x72d   :  { %v45744_v15 = vadd.f32 %v3304_v47, %v45565_v62 }
 0x72f   :  { %v3311_v18 = vsel %vm71_vm1, %v45744_v15, 0 }
 0x730   :  { %v3382_v42 = vand.u32 4294901760, %v3311_v18 }
 0x732   :  { %v3383_v51 = vsub.f32 %v3311_v18, %v3382_v42  ;;  %35356 = vmatmul.mubr.f32.vlgmr.msra.gmra.mrb[16].mxu1 %v3382_v42 }
 0x733   :  { %41008 = vmatpush3.bf16.msra.mxu1 %v44958_v8  ;;  %35377 = vmatprep.mubr.msk.f32.mxu1 %vm44853_vm0, %v49134_v0 }
 0x734   :  { %41009 = vmatprep.subr.bf16.mxu1 %v49135_v1  ;;  %v3384_v23 = vand.u32 4294901760, %v3383_v51 }
 0x736   :  { %v3385_v32 = vsub.f32 %v3383_v51, %v3384_v23 }
 0x737   :  { %41011 = vmatpush3.bf16.msra.mxu1 %v44960_v11 }
 0x738   :  { %41018 = vmatprep.subr.bf16.mxu1 %v49135_v1  ;;  %v3386_v62 = vand.u32 4294901760, %v3385_v32 }
 0x73a   :  { %35378 = vmatmul.mubr.f32.vlgmr.msra.gmra.mrb[18].mxu1 %v3384_v23  ;;  %35345 = vmatmul.mubr.f32.vlgmr.msra.gmra.mrb[16].mxu0 %v3386_v62 }
 0x73b   :  { %41002 = vmatpush3.bf16.msra.mxu0 %v44981_v37  ;;  %41020 = vmatpush3.bf16.msra.mxu1 %v44958_v8 }
 0x73c   :  { %41003 = vmatprep.subr.bf16.mxu0 %v49135_v1  ;;  %41021 = vmatprep.subr.bf16.mxu1 %v49135_v1 }
 0x73d   :  { %35366 = vmatprep.mubr.msk.f32.mxu0 %vm44853_vm0, %v49134_v0  ;;  %35399 = vmatprep.mubr.msk.f32.mxu1 %vm44853_vm0, %v49134_v0 }
 0x73f   :  { %41005 = vmatpush3.bf16.msra.mxu0 %v44987_v39  ;;  %41023 = vmatpush3.bf16.msra.mxu1 %v44960_v11 }
 0x740   :  { %41012 = vmatprep.subr.bf16.mxu0 %v49135_v1  ;;  %41096 = vmatprep.subr.bf16.mxu1 %v49135_v1 }
 0x742   :  { %35367 = vmatmul.mubr.f32.vlgmr.msra.gmra.mrb[18].mxu0 %v3383_v51  ;;  %35400 = vmatmul.mubr.f32.vlgmr.msra.gmra.mrb[20].mxu1 %v3382_v42 }
 0x743   :  { %41014 = vmatpush3.bf16.msra.mxu0 %v49136_v3  ;;  %35388 = vmatprep.mubr.msk.f32.mxu0 %vm44853_vm0, %v49134_v0 }
 0x744   :  { %41015 = vmatprep.subr.bf16.mxu0 %v49135_v1  ;;  %41098 = vmatpush3.bf16.msra.mxu1 %v45059_v54 }
 0x745   :  { %41099 = vmatprep.subr.bf16.mxu1 %v49135_v1  ;;  %35532 = vmatprep.mubr.msk.f32.mxu1 %vm44853_vm0, %v49134_v0 }
 0x747   :  { %41017 = vmatpush3.bf16.msra.mxu0 %v49137_v29 }
 0x748   :  { %41024 = vmatprep.subr.bf16.mxu0 %v49135_v1  ;;  %41101 = vmatpush3.bf16.msra.mxu1 %v45100_v2 }
 0x749   :  { %41102 = vmatprep.subr.bf16.mxu1 %v49135_v1 }
 0x74a   :  { %35389 = vmatmul.mubr.f32.vlgmr.msra.gmra.mrb[20].mxu0 %v3382_v42 }
 0x74b   :  { %41026 = vmatpush3.bf16.msra.mxu0 %v45078_v59  ;;  %35418 = vmatprep.mubr.msk.f32.mxu0 %vm44853_vm0, %v49134_v0 }
 0x74c   :  { %41027 = vmatprep.subr.bf16.mxu0 %v49135_v1  ;;  %41104 = vmatpush3.bf16.msra.mxu1 %v45145_v14 }
 0x74d   :  { %41105 = vmatprep.subr.bf16.mxu1 %v49135_v1 }
 0x74f   :  { %41029 = vmatpush3.bf16.msra.mxu0 %v45120_v7 }
 0x750   :  { %41030 = vmatprep.subr.bf16.mxu0 %v49135_v1  ;;  %41107 = vmatpush3.bf16.msra.mxu1 %v45165_v20 }
 0x751   :  { %41108 = vmatprep.subr.bf16.mxu1 %v49135_v1 }
 0x753   :  { %41032 = vmatpush3.bf16.msra.mxu0 %v45154_v17 }
 0x754   :  { %41033 = vmatprep.subr.bf16.mxu0 %v49135_v1 }
 0x757   :  { %41035 = vmatpush3.bf16.msra.mxu0 %v45172_v21 }
 0x758   :  { %41036 = vmatprep.subr.bf16.mxu0 %v49135_v1 }
 0x805   :  { %v3479_v41 = vpop.f32.mrb[16].mxu1 }
 0x806   :  { %v35357_v58 = vpop.f32.mrb[17].mxu1 }
 0x80d   :  { %v3636_v22 = vpop.f32.mrb[18].mxu1  ;;  %v3388_v13 = vpop.f32.mrb[16].mxu0 }
 0x80e   :  { %v3389_v53 = vadd.f32 %v3388_v13, %v3309_v57  ;;  %v35379_v61 = vpop.f32.mrb[19].mxu1  ;;  %v35346_v60 = vpop.f32.mrb[17].mxu0 }
 0x810   :  { %v3480_v28 = vadd.f32 %v3479_v41, %v3389_v53 }
 0x815   :  { %v3559_v44 = vpop.f32.mrb[18].mxu0  ;;  %v3794_v47 = vpop.f32.mrb[20].mxu1 }
 0x816   :  { %v3560_v18 = vadd.f32 %v3559_v44, %v3480_v28  ;;  %v35368_v42 = vpop.f32.mrb[19].mxu0  ;;  %v35401_v51 = vpop.f32.mrb[21].mxu1 }
 0x818   :  { %v3637_v23 = vadd.f32 %v3636_v22, %v3560_v18 }
 0x81d   :  { %v3719_v32 = vpop.f32.mrb[20].mxu0 }
 0x81e   :  { %v3720_v62 = vadd.f32 %v3719_v32, %v3637_v23  ;;  %v35390_v58 = vpop.f32.mrb[21].mxu0 }
 0x820   :  { %v3795_v29 = vadd.f32 %v3794_v47, %v3720_v62 }
 0x822   :  { %v3798_v57 = vadd.f32 %v45807_v52, %v3795_v29 }
 0x824   :  { %v3800_v13 = vmin.f32 %v3798_v57, 0.0  ;;  %vm3799_vm7 = vcmp.gt.f32.partialorder %v3798_v57, 0.0 }
 0x826   :  { %v3801_v61 = vmul.f32 1.442695, %v3800_v13 }
 0x828   :  { %44682 = vpow2.f32 %v3801_v61 }
 0x832   :  { %v44683_v41 = vpop.eup %44682 }
 0x833   :  { %v31952_v53 = vadd.f32 -1.0, %v44683_v41 }
 0x835   :  { %v3804_v60 = vsel %vm3799_vm7, %v3798_v57, %v31952_v53 }
 0x836   :  { %v3806_v22 = vsel %vm625_vm2, %v3804_v60, 0 }
 0x837   :  { %v3881_v28 = vand.u32 4294901760, %v3806_v22 }
 0x839   :  { %v3882_v44 = vsub.f32 %v3806_v22, %v3881_v28 }
 0x83b   :  { %v3883_v18 = vand.u32 4294901760, %v3882_v44 }
 0x83d   :  { %v3884_v47 = vsub.f32 %v3882_v44, %v3883_v18 }
 0x83f   :  { %v3885_v42 = vand.u32 4294901760, %v3884_v47 }
 0x841   :  { %35419 = vmatmul.mubr.f32.vlgmr.msra.gmra.mrb[22].mxu0 %v3885_v42 }
 0x842   :  { %41038 = vmatpush3.bf16.msra.mxu0 %v45261_v25  ;;  %35437 = vmatprep.mubr.msk.f32.mxu0 %vm44853_vm0, %v49134_v0 }
 0x843   :  { %41039 = vmatprep.subr.bf16.mxu0 %v49135_v1 }
 0x846   :  { %41041 = vmatpush3.bf16.msra.mxu0 %v45271_v19 }
 0x847   :  { %41042 = vmatprep.subr.bf16.mxu0 %v49135_v1 }
 0x84a   :  { %41044 = vmatpush3.bf16.msra.mxu0 %v45280_v35 }
 0x84b   :  { %41045 = vmatprep.subr.bf16.mxu0 %v49135_v1 }
 0x84e   :  { %41047 = vmatpush3.bf16.msra.mxu0 %v45284_v24 }
 0x84f   :  { %41048 = vmatprep.subr.bf16.mxu0 %v49135_v1 }
 0x851   :  { %35438 = vmatmul.mubr.f32.vlgmr.msra.gmra.mrb[22].mxu0 %v3881_v28 }
 0x852   :  { %41050 = vmatpush3.bf16.msra.mxu0 %v45290_v26  ;;  %35456 = vmatprep.mubr.msk.f32.mxu0 %vm44853_vm0, %v49134_v0 }
 0x853   :  { %41051 = vmatprep.subr.bf16.mxu0 %v49135_v1 }
 0x856   :  { %41053 = vmatpush3.bf16.msra.mxu0 %v45297_v43 }
 0x857   :  { %41054 = vmatprep.subr.bf16.mxu0 %v49135_v1 }
 0x85a   :  { %41056 = vmatpush3.bf16.msra.mxu0 %v45305_v49 }
 0x85b   :  { %41057 = vmatprep.subr.bf16.mxu0 %v49135_v1 }
 0x85e   :  { %41059 = vmatpush3.bf16.msra.mxu0 %v45311_v12 }
 0x85f   :  { %41060 = vmatprep.subr.bf16.mxu0 %v49135_v1 }
 0x861   :  { %35457 = vmatmul.mubr.f32.vlgmr.msra.gmra.mrb[22].mxu0 %v3882_v44  ;;  %v4893_v44 = vstv %s4892_s12  ;;  %s8072_s12 = scalar_select %p8071_p6, %s49069_s1, 0.0 }
 0x862   :  { %41062 = vmatpush3.bf16.msra.mxu0 %v45078_v59  ;;  %35475 = vmatprep.mubr.msk.f32.mxu0 %vm44853_vm0, %v49134_v0  ;;  %p30331_p6 = scmp.gt.s32.totalorder %s49070_s2, 18 }
 0x863   :  { %41063 = vmatprep.subr.bf16.mxu0 %v49135_v1 }
 0x866   :  { %41065 = vmatpush3.bf16.msra.mxu0 %v45120_v7 }
 0x867   :  { %41066 = vmatprep.subr.bf16.mxu0 %v49135_v1 }
 0x86a   :  { %41068 = vmatpush3.bf16.msra.mxu0 %v45154_v17 }
 0x86b   :  { %41069 = vmatprep.subr.bf16.mxu0 %v49135_v1 }
 0x86e   :  { %41071 = vmatpush3.bf16.msra.mxu0 %v45172_v21 }
 0x86f   :  { %41072 = vmatprep.subr.bf16.mxu0 %v49135_v1 }
 0x871   :  { %35476 = vmatmul.mubr.f32.vlgmr.msra.gmra.mrb[22].mxu0 %v3883_v18 }
 0x872   :  { %41074 = vmatpush3.bf16.msra.mxu0 %v45329_v34  ;;  %35494 = vmatprep.mubr.msk.f32.mxu0 %vm44853_vm0, %v49134_v0 }
 0x873   :  { %41075 = vmatprep.subr.bf16.mxu0 %v49135_v1 }
 0x876   :  { %41077 = vmatpush3.bf16.msra.mxu0 %v45337_v63 }
 0x877   :  { %41078 = vmatprep.subr.bf16.mxu0 %v49135_v1 }
 0x87a   :  { %41080 = vmatpush3.bf16.msra.mxu0 %v45347_v16 }
 0x87b   :  { %41081 = vmatprep.subr.bf16.mxu0 %v49135_v1 }
 0x87e   :  { %41083 = vmatpush3.bf16.msra.mxu0 %v45351_v46 }
 0x87f   :  { %41084 = vmatprep.subr.bf16.mxu0 %v49135_v1 }
 0x881   :  { %35495 = vmatmul.mubr.f32.vlgmr.msra.gmra.mrb[22].mxu0 %v3881_v28 }
 0x882   :  { %41086 = vmatpush3.bf16.msra.mxu0 %v45078_v59  ;;  %35513 = vmatprep.mubr.msk.f32.mxu0 %vm44853_vm0, %v49134_v0 }
 0x883   :  { %41087 = vmatprep.subr.bf16.mxu0 %v49135_v1 }
 0x886   :  { %41089 = vmatpush3.bf16.msra.mxu0 %v45120_v7 }
 0x887   :  { %41090 = vmatprep.subr.bf16.mxu0 %v49135_v1 }
 0x88a   :  { %41092 = vmatpush3.bf16.msra.mxu0 %v45154_v17 }
 0x88b   :  { %41093 = vmatprep.subr.bf16.mxu0 %v49135_v1 }
 0x88e   :  { %41095 = vmatpush3.bf16.msra.mxu0 %v45172_v21 }
 0x88f   :  { %41168 = vmatprep.subr.bf16.mxu0 %v49135_v1 }
 0x891   :  { %35514 = vmatmul.mubr.f32.vlgmr.msra.gmra.mrb[22].mxu0 %v3881_v28 }
 0x892   :  { %41170 = vmatpush3.bf16.msra.mxu0 %v44958_v8  ;;  %35638 = vmatprep.mubr.msk.f32.mxu0 %vm44853_vm0, %v49134_v0 }
 0x893   :  { %41171 = vmatprep.subr.bf16.mxu0 %v49135_v1 }
 0x896   :  { %41173 = vmatpush3.bf16.msra.mxu0 %v44960_v11 }
 0x897   :  { %41180 = vmatprep.subr.bf16.mxu0 %v49135_v1 }
 0x964   :  { %v4341_v29 = vpop.f32.mrb[22].mxu0 }
 0x965   :  { %v44232_v51 = vadd.f32 %v45374_v56, %v4341_v29  ;;  %v35515_v23 = vpop.f32.mrb[23].mxu0 }
 0x967   :  { %v4346_v32 = vmin.f32 %v44232_v51, 0.0  ;;  %vm4345_vm8 = vcmp.gt.f32.partialorder %v44232_v51, 0.0 }
 0x969   :  { %v4347_v62 = vmul.f32 1.442695, %v4346_v32 }
 0x96b   :  { %44684 = vpow2.f32 %v4347_v62 }
 0x975   :  { %v44685_v58 = vpop.eup %44684 }
 0x976   :  { %v31953_v57 = vadd.f32 -1.0, %v44685_v58  ;;  %v49139_v58 = vld [vmem:[#allocation18_spill] sm:$0xff] }
 0x978   :  { %v4350_v13 = vsel %vm4345_vm8, %v44232_v51, %v31953_v57 }
 0x979   :  { %v4352_v61 = vsel %vm625_vm2, %v4350_v13, 0 }
 0x97a   :  { %v4427_v41 = vand.u32 4294901760, %v4352_v61 }
 0x97c   :  { %v4428_v53 = vsub.f32 %v4352_v61, %v4427_v41  ;;  %v4898_v61 = vstv %s4897_s17  ;;  %s8077_s17 = sadd.f32 %s8076_s15, %s49068_s0 }
 0x97e   :  { %v4429_v60 = vand.u32 4294901760, %v4428_v53 }
 0x980   :  { %v4430_v22 = vsub.f32 %v4428_v53, %v4429_v60 }
 0x982   :  { %v4431_v28 = vand.u32 4294901760, %v4430_v22 }
 0x984   :  { %35533 = vmatmul.mubr.f32.vlgmr.msra.gmra.mrb[22].mxu1 %v4431_v28 }
 0x985   :  { %41110 = vmatpush3.bf16.msra.mxu1 %v45439_v50  ;;  %35551 = vmatprep.mubr.msk.f32.mxu1 %vm44853_vm0, %v49134_v0 }
 0x986   :  { %41111 = vmatprep.subr.bf16.mxu1 %v49135_v1 }
 0x989   :  { %41113 = vmatpush3.bf16.msra.mxu1 %v45449_v40 }
 0x98a   :  { %41114 = vmatprep.subr.bf16.mxu1 %v49135_v1 }
 0x98d   :  { %41116 = vmatpush3.bf16.msra.mxu1 %v45458_v10 }
 0x98e   :  { %41117 = vmatprep.subr.bf16.mxu1 %v49135_v1 }
 0x991   :  { %41119 = vmatpush3.bf16.msra.mxu1 %v45462_v48 }
 0x992   :  { %41120 = vmatprep.subr.bf16.mxu1 %v49135_v1 }
 0x994   :  { %35552 = vmatmul.mubr.f32.vlgmr.msra.gmra.mrb[22].mxu1 %v4427_v41 }
 0x995   :  { %41122 = vmatpush3.bf16.msra.mxu1 %v45468_v36  ;;  %35570 = vmatprep.mubr.msk.f32.mxu1 %vm44853_vm0, %v49134_v0 }
 0x996   :  { %41123 = vmatprep.subr.bf16.mxu1 %v49135_v1 }
 0x999   :  { %41125 = vmatpush3.bf16.msra.mxu1 %v45475_v5 }
 0x99a   :  { %41126 = vmatprep.subr.bf16.mxu1 %v49135_v1 }
 0x99d   :  { %41128 = vmatpush3.bf16.msra.mxu1 %v45483_v6 }
 0x99e   :  { %41129 = vmatprep.subr.bf16.mxu1 %v49135_v1 }
 0x9a1   :  { %41131 = vmatpush3.bf16.msra.mxu1 %v45489_v55 }
 0x9a2   :  { %41132 = vmatprep.subr.bf16.mxu1 %v49135_v1 }
 0x9a4   :  { %35571 = vmatmul.mubr.f32.vlgmr.msra.gmra.mrb[22].mxu1 %v4428_v53 }
 0x9a5   :  { %41134 = vmatpush3.bf16.msra.mxu1 %v45059_v54  ;;  %35589 = vmatprep.mubr.msk.f32.mxu1 %vm44853_vm0, %v49134_v0 }
 0x9a6   :  { %41135 = vmatprep.subr.bf16.mxu1 %v49135_v1 }
 0x9a9   :  { %41137 = vmatpush3.bf16.msra.mxu1 %v45100_v2 }
 0x9aa   :  { %41138 = vmatprep.subr.bf16.mxu1 %v49135_v1 }
 0x9ad   :  { %41140 = vmatpush3.bf16.msra.mxu1 %v45145_v14 }
 0x9ae   :  { %41141 = vmatprep.subr.bf16.mxu1 %v49135_v1 }
 0x9b1   :  { %41143 = vmatpush3.bf16.msra.mxu1 %v45165_v20 }
 0x9b2   :  { %41144 = vmatprep.subr.bf16.mxu1 %v49135_v1 }
 0x9b4   :  { %35590 = vmatmul.mubr.f32.vlgmr.msra.gmra.mrb[22].mxu1 %v4429_v60 }
 0x9b5   :  { %41146 = vmatpush3.bf16.msra.mxu1 %v45507_v4  ;;  %35608 = vmatprep.mubr.msk.f32.mxu1 %vm44853_vm0, %v49134_v0 }
 0x9b6   :  { %41147 = vmatprep.subr.bf16.mxu1 %v49135_v1 }
 0x9b9   :  { %41149 = vmatpush3.bf16.msra.mxu1 %v45515_v45 }
 0x9ba   :  { %41150 = vmatprep.subr.bf16.mxu1 %v49135_v1 }
 0x9bd   :  { %41152 = vmatpush3.bf16.msra.mxu1 %v45525_v30 }
 0x9be   :  { %41153 = vmatprep.subr.bf16.mxu1 %v49135_v1 }
 0x9c1   :  { %41155 = vmatpush3.bf16.msra.mxu1 %v45529_v9 }
 0x9c2   :  { %41156 = vmatprep.subr.bf16.mxu1 %v49135_v1 }
 0x9c4   :  { %35609 = vmatmul.mubr.f32.vlgmr.msra.gmra.mrb[22].mxu1 %v4427_v41 }
 0x9c5   :  { %41158 = vmatpush3.bf16.msra.mxu1 %v45059_v54  ;;  %35627 = vmatprep.mubr.msk.f32.mxu1 %vm44853_vm0, %v49134_v0 }
 0x9c6   :  { %41159 = vmatprep.subr.bf16.mxu1 %v49135_v1 }
 0x9c9   :  { %41161 = vmatpush3.bf16.msra.mxu1 %v45100_v2 }
 0x9ca   :  { %41162 = vmatprep.subr.bf16.mxu1 %v49135_v1 }
 0x9cd   :  { %41164 = vmatpush3.bf16.msra.mxu1 %v45145_v14 }
 0x9ce   :  { %41165 = vmatprep.subr.bf16.mxu1 %v49135_v1 }
 0x9d1   :  { %41167 = vmatpush3.bf16.msra.mxu1 %v45165_v20 }
 0x9d2   :  { %41174 = vmatprep.subr.bf16.mxu1 %v49135_v1 }
 0x9d4   :  { %35628 = vmatmul.mubr.f32.vlgmr.msra.gmra.mrb[22].mxu1 %v4427_v41  ;;  %v4899_v41 = vmul.f32 %v45801_v27, %v4898_v61 }
 0x9d5   :  { %41176 = vmatpush3.bf16.msra.mxu1 %v44971_v31  ;;  %35649 = vmatprep.mubr.msk.f32.mxu1 %vm44853_vm0, %v49134_v0 }
 0x9d6   :  { %41177 = vmatprep.subr.bf16.mxu1 %v49135_v1 }
 0x9d9   :  { %41179 = vmatpush3.bf16.msra.mxu1 %v44976_v33 }
 0x9da   :  { %41186 = vmatprep.subr.bf16.mxu1 %v49135_v1 }
 0xaa7   :  { %v4887_v56 = vpop.f32.mrb[22].mxu1 }
 0xaa8   :  { %v44233_v18 = vadd.f32 %v45561_v38, %v4887_v56  ;;  %v35629_v47 = vpop.f32.mrb[23].mxu1 }
 0xaaa   :  { %v4894_v42 = vmul.f32 %v44233_v18, %v4893_v44 }
 0xaac   :  { %v45933_v29 = vadd.f32 %v4894_v42, %v45744_v15 }
 0xaae   :  { %v4901_v51 = vsel %vm71_vm1, %v45933_v29, 0 }
 0xaaf   :  { %v4972_v23 = vand.u32 4294901760, %v4901_v51 }
 0xab1   :  { %v4973_v32 = vsub.f32 %v4901_v51, %v4972_v23  ;;  %35650 = vmatmul.mubr.f32.vlgmr.msra.gmra.mrb[24].mxu1 %v4972_v23 }
 0xab2   :  { %41188 = vmatpush3.bf16.msra.mxu1 %v44958_v8  ;;  %35671 = vmatprep.mubr.msk.f32.mxu1 %vm44853_vm0, %v49134_v0 }
 0xab3   :  { %41189 = vmatprep.subr.bf16.mxu1 %v49135_v1  ;;  %v4974_v62 = vand.u32 4294901760, %v4973_v32 }
 0xab5   :  { %v4975_v38 = vsub.f32 %v4973_v32, %v4974_v62 }
 0xab6   :  { %41191 = vmatpush3.bf16.msra.mxu1 %v44960_v11 }
 0xab7   :  { %41198 = vmatprep.subr.bf16.mxu1 %v49135_v1  ;;  %v4976_v15 = vand.u32 4294901760, %v4975_v38 }
 0xab9   :  { %35672 = vmatmul.mubr.f32.vlgmr.msra.gmra.mrb[26].mxu1 %v4974_v62  ;;  %35639 = vmatmul.mubr.f32.vlgmr.msra.gmra.mrb[24].mxu0 %v4976_v15 }
 0xaba   :  { %41182 = vmatpush3.bf16.msra.mxu0 %v44981_v37  ;;  %41200 = vmatpush3.bf16.msra.mxu1 %v44958_v8 }
 0xabb   :  { %41183 = vmatprep.subr.bf16.mxu0 %v49135_v1  ;;  %41201 = vmatprep.subr.bf16.mxu1 %v49135_v1 }
 0xabc   :  { %35660 = vmatprep.mubr.msk.f32.mxu0 %vm44853_vm0, %v49134_v0  ;;  %35693 = vmatprep.mubr.msk.f32.mxu1 %vm44853_vm0, %v49134_v0 }
 0xabe   :  { %41185 = vmatpush3.bf16.msra.mxu0 %v44987_v39  ;;  %41203 = vmatpush3.bf16.msra.mxu1 %v44960_v11 }
 0xabf   :  { %41192 = vmatprep.subr.bf16.mxu0 %v49135_v1  ;;  %41276 = vmatprep.subr.bf16.mxu1 %v49135_v1 }
 0xac1   :  { %35661 = vmatmul.mubr.f32.vlgmr.msra.gmra.mrb[26].mxu0 %v4973_v32  ;;  %35694 = vmatmul.mubr.f32.vlgmr.msra.gmra.mrb[28].mxu1 %v4972_v23 }
 0xac2   :  { %41194 = vmatpush3.bf16.msra.mxu0 %v49136_v3  ;;  %35682 = vmatprep.mubr.msk.f32.mxu0 %vm44853_vm0, %v49134_v0 }
 0xac3   :  { %41195 = vmatprep.subr.bf16.mxu0 %v49135_v1  ;;  %41278 = vmatpush3.bf16.msra.mxu1 %v45059_v54 }
 0xac4   :  { %41279 = vmatprep.subr.bf16.mxu1 %v49135_v1  ;;  %35826 = vmatprep.mubr.msk.f32.mxu1 %vm44853_vm0, %v49134_v0 }
 0xac6   :  { %41197 = vmatpush3.bf16.msra.mxu0 %v49139_v58 }
 0xac7   :  { %41204 = vmatprep.subr.bf16.mxu0 %v49135_v1  ;;  %41281 = vmatpush3.bf16.msra.mxu1 %v45100_v2 }
 0xac8   :  { %41282 = vmatprep.subr.bf16.mxu1 %v49135_v1 }
 0xac9   :  { %35683 = vmatmul.mubr.f32.vlgmr.msra.gmra.mrb[28].mxu0 %v4972_v23 }
 0xaca   :  { %41206 = vmatpush3.bf16.msra.mxu0 %v45078_v59  ;;  %35712 = vmatprep.mubr.msk.f32.mxu0 %vm44853_vm0, %v49134_v0 }
 0xacb   :  { %41207 = vmatprep.subr.bf16.mxu0 %v49135_v1  ;;  %41284 = vmatpush3.bf16.msra.mxu1 %v45145_v14 }
 0xacc   :  { %41285 = vmatprep.subr.bf16.mxu1 %v49135_v1 }
 0xace   :  { %41209 = vmatpush3.bf16.msra.mxu0 %v45120_v7 }
 0xacf   :  { %41210 = vmatprep.subr.bf16.mxu0 %v49135_v1  ;;  %41287 = vmatpush3.bf16.msra.mxu1 %v45165_v20 }
 0xad0   :  { %41288 = vmatprep.subr.bf16.mxu1 %v49135_v1 }
 0xad2   :  { %41212 = vmatpush3.bf16.msra.mxu0 %v45154_v17 }
 0xad3   :  { %41213 = vmatprep.subr.bf16.mxu0 %v49135_v1 }
 0xad6   :  { %41215 = vmatpush3.bf16.msra.mxu0 %v45172_v21 }
 0xad7   :  { %41216 = vmatprep.subr.bf16.mxu0 %v49135_v1 }
 0xb84   :  { %v5069_v57 = vpop.f32.mrb[24].mxu1 }
 0xb85   :  { %v35651_v13 = vpop.f32.mrb[25].mxu1 }
 0xb8c   :  { %v5226_v53 = vpop.f32.mrb[26].mxu1  ;;  %v4978_v60 = vpop.f32.mrb[24].mxu0 }
 0xb8d   :  { %v4979_v22 = vadd.f32 %v4978_v60, %v4899_v41  ;;  %v35673_v28 = vpop.f32.mrb[27].mxu1  ;;  %v35640_v56 = vpop.f32.mrb[25].mxu0 }
 0xb8f   :  { %v5070_v44 = vadd.f32 %v5069_v57, %v4979_v22 }
 0xb94   :  { %v5149_v18 = vpop.f32.mrb[26].mxu0  ;;  %v5384_v47 = vpop.f32.mrb[28].mxu1 }
 0xb95   :  { %v5150_v42 = vadd.f32 %v5149_v18, %v5070_v44  ;;  %v35662_v51 = vpop.f32.mrb[27].mxu0  ;;  %v35695_v23 = vpop.f32.mrb[29].mxu1 }
 0xb97   :  { %v5227_v32 = vadd.f32 %v5226_v53, %v5150_v42 }
 0xb9c   :  { %v5309_v62 = vpop.f32.mrb[28].mxu0 }
 0xb9d   :  { %v5310_v38 = vadd.f32 %v5309_v62, %v5227_v32  ;;  %v35684_v15 = vpop.f32.mrb[29].mxu0 }
 0xb9f   :  { %v5385_v58 = vadd.f32 %v5384_v47, %v5310_v38 }
 0xba1   :  { %v5388_v13 = vadd.f32 %v45807_v52, %v5385_v58 }
 0xba3   :  { %v5390_v3 = vmin.f32 %v5388_v13, 0.0  ;;  %vm5389_vm9 = vcmp.gt.f32.partialorder %v5388_v13, 0.0 }
 0xba5   :  { %v5391_v61 = vmul.f32 1.442695, %v5390_v3 }
 0xba7   :  { %44686 = vpow2.f32 %v5391_v61 }
 0xbb1   :  { %v44687_v27 = vpop.eup %44686 }
 0xbb2   :  { %v31954_v41 = vadd.f32 -1.0, %v44687_v27  ;;  %v46046_v27 = vld [vmem:[#allocation9] ss:$0 sm:$0xff] }
 0xbb4   :  { %v5394_v60 = vsel %vm5389_vm9, %v5388_v13, %v31954_v41 }
 0xbb5   :  { %v5396_v57 = vsel %vm625_vm2, %v5394_v60, 0 }
 0xbb6   :  { %v5471_v22 = vand.u32 4294901760, %v5396_v57 }
 0xbb8   :  { %v5472_v28 = vsub.f32 %v5396_v57, %v5471_v22  ;;  %v6483_v57 = vstv %s6482_s3 }
 0xbba   :  { %v5473_v56 = vand.u32 4294901760, %v5472_v28 }
 0xbbc   :  { %v5474_v44 = vsub.f32 %v5472_v28, %v5473_v56 }
 0xbbe   :  { %v5475_v53 = vand.u32 4294901760, %v5474_v44 }
 0xbc0   :  { %35713 = vmatmul.mubr.f32.vlgmr.msra.gmra.mrb[30].mxu0 %v5475_v53 }
 0xbc1   :  { %41218 = vmatpush3.bf16.msra.mxu0 %v45261_v25  ;;  %35731 = vmatprep.mubr.msk.f32.mxu0 %vm44853_vm0, %v49134_v0 }
 0xbc2   :  { %41219 = vmatprep.subr.bf16.mxu0 %v49135_v1 }
 0xbc5   :  { %41221 = vmatpush3.bf16.msra.mxu0 %v45271_v19 }
 0xbc6   :  { %41222 = vmatprep.subr.bf16.mxu0 %v49135_v1 }
 0xbc9   :  { %41224 = vmatpush3.bf16.msra.mxu0 %v45280_v35 }
 0xbca   :  { %41225 = vmatprep.subr.bf16.mxu0 %v49135_v1 }
 0xbcd   :  { %41227 = vmatpush3.bf16.msra.mxu0 %v45284_v24 }
 0xbce   :  { %41228 = vmatprep.subr.bf16.mxu0 %v49135_v1 }
 0xbd0   :  { %35732 = vmatmul.mubr.f32.vlgmr.msra.gmra.mrb[30].mxu0 %v5471_v22 }
 0xbd1   :  { %41230 = vmatpush3.bf16.msra.mxu0 %v45290_v26  ;;  %35750 = vmatprep.mubr.msk.f32.mxu0 %vm44853_vm0, %v49134_v0 }
 0xbd2   :  { %41231 = vmatprep.subr.bf16.mxu0 %v49135_v1 }
 0xbd5   :  { %41233 = vmatpush3.bf16.msra.mxu0 %v45297_v43 }
 0xbd6   :  { %41234 = vmatprep.subr.bf16.mxu0 %v49135_v1 }
 0xbd9   :  { %41236 = vmatpush3.bf16.msra.mxu0 %v45305_v49 }
 0xbda   :  { %41237 = vmatprep.subr.bf16.mxu0 %v49135_v1 }
 0xbdd   :  { %41239 = vmatpush3.bf16.msra.mxu0 %v45311_v12 }
 0xbde   :  { %41240 = vmatprep.subr.bf16.mxu0 %v49135_v1 }
 0xbe0   :  { %35751 = vmatmul.mubr.f32.vlgmr.msra.gmra.mrb[30].mxu0 %v5472_v28 }
 0xbe1   :  { %41242 = vmatpush3.bf16.msra.mxu0 %v45078_v59  ;;  %35769 = vmatprep.mubr.msk.f32.mxu0 %vm44853_vm0, %v49134_v0 }
 0xbe2   :  { %41243 = vmatprep.subr.bf16.mxu0 %v49135_v1 }
 0xbe5   :  { %41245 = vmatpush3.bf16.msra.mxu0 %v45120_v7 }
 0xbe6   :  { %41246 = vmatprep.subr.bf16.mxu0 %v49135_v1 }
 0xbe9   :  { %41248 = vmatpush3.bf16.msra.mxu0 %v45154_v17 }
 0xbea   :  { %41249 = vmatprep.subr.bf16.mxu0 %v49135_v1 }
 0xbed   :  { %41251 = vmatpush3.bf16.msra.mxu0 %v45172_v21 }
 0xbee   :  { %41252 = vmatprep.subr.bf16.mxu0 %v49135_v1 }
 0xbf0   :  { %35770 = vmatmul.mubr.f32.vlgmr.msra.gmra.mrb[30].mxu0 %v5473_v56 }
 0xbf1   :  { %41254 = vmatpush3.bf16.msra.mxu0 %v45329_v34  ;;  %35788 = vmatprep.mubr.msk.f32.mxu0 %vm44853_vm0, %v49134_v0 }
 0xbf2   :  { %41255 = vmatprep.subr.bf16.mxu0 %v49135_v1 }
 0xbf5   :  { %41257 = vmatpush3.bf16.msra.mxu0 %v45337_v63 }
 0xbf6   :  { %41258 = vmatprep.subr.bf16.mxu0 %v49135_v1 }
 0xbf9   :  { %41260 = vmatpush3.bf16.msra.mxu0 %v45347_v16 }
 0xbfa   :  { %41261 = vmatprep.subr.bf16.mxu0 %v49135_v1 }
 0xbfd   :  { %41263 = vmatpush3.bf16.msra.mxu0 %v45351_v46 }
 0xbfe   :  { %41264 = vmatprep.subr.bf16.mxu0 %v49135_v1 }
 0xc00   :  { %35789 = vmatmul.mubr.f32.vlgmr.msra.gmra.mrb[30].mxu0 %v5471_v22 }
 0xc01   :  { %41266 = vmatpush3.bf16.msra.mxu0 %v45078_v59  ;;  %35807 = vmatprep.mubr.msk.f32.mxu0 %vm44853_vm0, %v49134_v0 }
 0xc02   :  { %41267 = vmatprep.subr.bf16.mxu0 %v49135_v1 }
 0xc05   :  { %41269 = vmatpush3.bf16.msra.mxu0 %v45120_v7 }
 0xc06   :  { %41270 = vmatprep.subr.bf16.mxu0 %v49135_v1 }
 0xc09   :  { %41272 = vmatpush3.bf16.msra.mxu0 %v45154_v17 }
 0xc0a   :  { %41273 = vmatprep.subr.bf16.mxu0 %v49135_v1 }
 0xc0d   :  { %41275 = vmatpush3.bf16.msra.mxu0 %v45172_v21 }
 0xc0e   :  { %41348 = vmatprep.subr.bf16.mxu0 %v49135_v1 }
 0xc10   :  { %35808 = vmatmul.mubr.f32.vlgmr.msra.gmra.mrb[30].mxu0 %v5471_v22  ;;  %v46115_v22 = vld [vmem:[%s49078_s10] ss:$0 sm:$0xff] }
 0xc11   :  { %41350 = vmatpush3.bf16.msra.mxu0 %v44958_v8  ;;  %35932 = vmatprep.mubr.msk.f32.mxu0 %vm44853_vm0, %v49134_v0 }
 0xc12   :  { %41351 = vmatprep.subr.bf16.mxu0 %v49135_v1 }
 0xc15   :  { %41353 = vmatpush3.bf16.msra.mxu0 %v44960_v11 }
 0xc16   :  { %41360 = vmatprep.subr.bf16.mxu0 %v49135_v1 }
 0xce3   :  { %v5931_v3 = vpop.f32.mrb[30].mxu0 }
 0xce4   :  { %v44234_v58 = vadd.f32 %v46046_v27, %v5931_v3  ;;  %v35809_v18 = vpop.f32.mrb[31].mxu0 }
 0xce6   :  { %v5936_v47 = vmin.f32 %v44234_v58, 0.0  ;;  %vm5935_vm10 = vcmp.gt.f32.partialorder %v44234_v58, 0.0 }
 0xce8   :  { %v5937_v42 = vmul.f32 1.442695, %v5936_v47 }
 0xcea   :  { %44688 = vpow2.f32 %v5937_v42 }
 0xcf4   :  { %v44689_v51 = vpop.eup %44688 }
 0xcf5   :  { %v31955_v23 = vadd.f32 -1.0, %v44689_v51  ;;  %v49140_v51 = vld [vmem:[#allocation17_spill] sm:$0xff] }
 0xcf7   :  { %v5940_v32 = vsel %vm5935_vm10, %v44234_v58, %v31955_v23  ;;  %v49141_v23 = vld [vmem:[#allocation18_spill] sm:$0xff] }
 0xcf8   :  { %v5942_v62 = vsel %vm625_vm2, %v5940_v32, 0 }
 0xcf9   :  { %v6017_v38 = vand.u32 4294901760, %v5942_v62 }
 0xcfb   :  { %v6018_v15 = vsub.f32 %v5942_v62, %v6017_v38 }
 0xcfd   :  { %v6019_v13 = vand.u32 4294901760, %v6018_v15 }
 0xcff   :  { %v6020_v61 = vsub.f32 %v6018_v15, %v6019_v13 }
 0xd01   :  { %v6021_v41 = vand.u32 4294901760, %v6020_v61 }
 0xd03   :  { %35827 = vmatmul.mubr.f32.vlgmr.msra.gmra.mrb[30].mxu1 %v6021_v41 }
 0xd04   :  { %41290 = vmatpush3.bf16.msra.mxu1 %v45439_v50  ;;  %35845 = vmatprep.mubr.msk.f32.mxu1 %vm44853_vm0, %v49134_v0 }
 0xd05   :  { %41291 = vmatprep.subr.bf16.mxu1 %v49135_v1 }
 0xd08   :  { %41293 = vmatpush3.bf16.msra.mxu1 %v45449_v40 }
 0xd09   :  { %41294 = vmatprep.subr.bf16.mxu1 %v49135_v1 }
 0xd0c   :  { %41296 = vmatpush3.bf16.msra.mxu1 %v45458_v10 }
 0xd0d   :  { %41297 = vmatprep.subr.bf16.mxu1 %v49135_v1 }
 0xd10   :  { %41299 = vmatpush3.bf16.msra.mxu1 %v45462_v48 }
 0xd11   :  { %41300 = vmatprep.subr.bf16.mxu1 %v49135_v1 }
 0xd13   :  { %35846 = vmatmul.mubr.f32.vlgmr.msra.gmra.mrb[30].mxu1 %v6017_v38 }
 0xd14   :  { %41302 = vmatpush3.bf16.msra.mxu1 %v45468_v36  ;;  %35864 = vmatprep.mubr.msk.f32.mxu1 %vm44853_vm0, %v49134_v0 }
 0xd15   :  { %41303 = vmatprep.subr.bf16.mxu1 %v49135_v1 }
 0xd18   :  { %41305 = vmatpush3.bf16.msra.mxu1 %v45475_v5 }
 0xd19   :  { %41306 = vmatprep.subr.bf16.mxu1 %v49135_v1 }
 0xd1c   :  { %41308 = vmatpush3.bf16.msra.mxu1 %v45483_v6 }
 0xd1d   :  { %41309 = vmatprep.subr.bf16.mxu1 %v49135_v1 }
 0xd20   :  { %41311 = vmatpush3.bf16.msra.mxu1 %v45489_v55 }
 0xd21   :  { %41312 = vmatprep.subr.bf16.mxu1 %v49135_v1 }
 0xd23   :  { %35865 = vmatmul.mubr.f32.vlgmr.msra.gmra.mrb[30].mxu1 %v6018_v15  ;;  %v49142_v15 = vld [vmem:[#allocation19_spill] sm:$0xff] }
 0xd24   :  { %41314 = vmatpush3.bf16.msra.mxu1 %v45059_v54  ;;  %35883 = vmatprep.mubr.msk.f32.mxu1 %vm44853_vm0, %v49134_v0 }
 0xd25   :  { %41315 = vmatprep.subr.bf16.mxu1 %v49135_v1 }
 0xd28   :  { %41317 = vmatpush3.bf16.msra.mxu1 %v45100_v2 }
 0xd29   :  { %41318 = vmatprep.subr.bf16.mxu1 %v49135_v1 }
 0xd2c   :  { %41320 = vmatpush3.bf16.msra.mxu1 %v45145_v14 }
 0xd2d   :  { %41321 = vmatprep.subr.bf16.mxu1 %v49135_v1 }
 0xd30   :  { %41323 = vmatpush3.bf16.msra.mxu1 %v45165_v20 }
 0xd31   :  { %41324 = vmatprep.subr.bf16.mxu1 %v49135_v1 }
 0xd33   :  { %35884 = vmatmul.mubr.f32.vlgmr.msra.gmra.mrb[30].mxu1 %v6019_v13 }
 0xd34   :  { %41326 = vmatpush3.bf16.msra.mxu1 %v45507_v4  ;;  %35902 = vmatprep.mubr.msk.f32.mxu1 %vm44853_vm0, %v49134_v0 }
 0xd35   :  { %41327 = vmatprep.subr.bf16.mxu1 %v49135_v1 }
 0xd38   :  { %41329 = vmatpush3.bf16.msra.mxu1 %v45515_v45 }
 0xd39   :  { %41330 = vmatprep.subr.bf16.mxu1 %v49135_v1 }
 0xd3c   :  { %41332 = vmatpush3.bf16.msra.mxu1 %v45525_v30 }
 0xd3d   :  { %41333 = vmatprep.subr.bf16.mxu1 %v49135_v1 }
 0xd40   :  { %41335 = vmatpush3.bf16.msra.mxu1 %v45529_v9 }
 0xd41   :  { %41336 = vmatprep.subr.bf16.mxu1 %v49135_v1 }
 0xd43   :  { %35903 = vmatmul.mubr.f32.vlgmr.msra.gmra.mrb[30].mxu1 %v6017_v38 }
 0xd44   :  { %41338 = vmatpush3.bf16.msra.mxu1 %v45059_v54  ;;  %35921 = vmatprep.mubr.msk.f32.mxu1 %vm44853_vm0, %v49134_v0 }
 0xd45   :  { %41339 = vmatprep.subr.bf16.mxu1 %v49135_v1 }
 0xd48   :  { %41341 = vmatpush3.bf16.msra.mxu1 %v45100_v2 }
 0xd49   :  { %41342 = vmatprep.subr.bf16.mxu1 %v49135_v1 }
 0xd4c   :  { %41344 = vmatpush3.bf16.msra.mxu1 %v45145_v14 }
 0xd4d   :  { %41345 = vmatprep.subr.bf16.mxu1 %v49135_v1 }
 0xd50   :  { %41347 = vmatpush3.bf16.msra.mxu1 %v45165_v20 }
 0xd51   :  { %41354 = vmatprep.subr.bf16.mxu1 %v49135_v1 }
 0xd53   :  { %35922 = vmatmul.mubr.f32.vlgmr.msra.gmra.mrb[30].mxu1 %v6017_v38  ;;  %v6488_v38 = vstv %s6487_s27 }
 0xd54   :  { %41356 = vmatpush3.bf16.msra.mxu1 %v44971_v31  ;;  %35943 = vmatprep.mubr.msk.f32.mxu1 %vm44853_vm0, %v49134_v0  ;;  %v6489_v13 = vmul.f32 %v49142_v15, %v6488_v38 }
 0xd55   :  { %41357 = vmatprep.subr.bf16.mxu1 %v49135_v1 }
 0xd58   :  { %41359 = vmatpush3.bf16.msra.mxu1 %v44976_v33 }
 0xd59   :  { %41366 = vmatprep.subr.bf16.mxu1 %v49135_v1 }
 0xe26   :  { %v6477_v60 = vpop.f32.mrb[30].mxu1 }
 0xe27   :  { %v44235_v28 = vadd.f32 %v46115_v22, %v6477_v60  ;;  %v35923_v56 = vpop.f32.mrb[31].mxu1 }
 0xe29   :  { %v6484_v44 = vmul.f32 %v44235_v28, %v6483_v57 }
 0xe2b   :  { %v46119_v53 = vadd.f32 %v6484_v44, %v45933_v29 }
 0xe2d   :  { %v6491_v3 = vsel %vm71_vm1, %v46119_v53, 0 }
 0xe2e   :  { %v6562_v58 = vand.u32 4294901760, %v6491_v3 }
 0xe30   :  { %v6563_v18 = vsub.f32 %v6491_v3, %v6562_v58  ;;  %35944 = vmatmul.mubr.f32.vlgmr.msra.gmra.mrb[32].mxu1 %v6562_v58 }
 0xe31   :  { %41368 = vmatpush3.bf16.msra.mxu1 %v44958_v8  ;;  %35965 = vmatprep.mubr.msk.f32.mxu1 %vm44853_vm0, %v49134_v0 }
 0xe32   :  { %41369 = vmatprep.subr.bf16.mxu1 %v49135_v1  ;;  %v6564_v47 = vand.u32 4294901760, %v6563_v18 }
 0xe34   :  { %v6565_v42 = vsub.f32 %v6563_v18, %v6564_v47 }
 0xe35   :  { %41371 = vmatpush3.bf16.msra.mxu1 %v44960_v11 }
 0xe36   :  { %41378 = vmatprep.subr.bf16.mxu1 %v49135_v1  ;;  %v6566_v29 = vand.u32 4294901760, %v6565_v42 }
 0xe38   :  { %35966 = vmatmul.mubr.f32.vlgmr.msra.gmra.mrb[34].mxu1 %v6564_v47  ;;  %35933 = vmatmul.mubr.f32.vlgmr.msra.gmra.mrb[32].mxu0 %v6566_v29 }
 0xe39   :  { %41362 = vmatpush3.bf16.msra.mxu0 %v44981_v37  ;;  %41380 = vmatpush3.bf16.msra.mxu1 %v44958_v8 }
 0xe3a   :  { %41363 = vmatprep.subr.bf16.mxu0 %v49135_v1  ;;  %41381 = vmatprep.subr.bf16.mxu1 %v49135_v1 }
 0xe3b   :  { %35954 = vmatprep.mubr.msk.f32.mxu0 %vm44853_vm0, %v49134_v0  ;;  %35987 = vmatprep.mubr.msk.f32.mxu1 %vm44853_vm0, %v49134_v0 }
 0xe3d   :  { %41365 = vmatpush3.bf16.msra.mxu0 %v44987_v39  ;;  %41383 = vmatpush3.bf16.msra.mxu1 %v44960_v11 }
 0xe3e   :  { %41372 = vmatprep.subr.bf16.mxu0 %v49135_v1  ;;  %41456 = vmatprep.subr.bf16.mxu1 %v49135_v1 }
 0xe40   :  { %35955 = vmatmul.mubr.f32.vlgmr.msra.gmra.mrb[34].mxu0 %v6563_v18  ;;  %35988 = vmatmul.mubr.f32.vlgmr.msra.gmra.mrb[36].mxu1 %v6562_v58 }
 0xe41   :  { %41374 = vmatpush3.bf16.msra.mxu0 %v49140_v51  ;;  %35976 = vmatprep.mubr.msk.f32.mxu0 %vm44853_vm0, %v49134_v0 }
 0xe42   :  { %41375 = vmatprep.subr.bf16.mxu0 %v49135_v1  ;;  %41458 = vmatpush3.bf16.msra.mxu1 %v45059_v54 }
 0xe43   :  { %41459 = vmatprep.subr.bf16.mxu1 %v49135_v1  ;;  %36120 = vmatprep.mubr.msk.f32.mxu1 %vm44853_vm0, %v49134_v0 }
 0xe45   :  { %41377 = vmatpush3.bf16.msra.mxu0 %v49141_v23 }
 0xe46   :  { %41384 = vmatprep.subr.bf16.mxu0 %v49135_v1  ;;  %41461 = vmatpush3.bf16.msra.mxu1 %v45100_v2 }
 0xe47   :  { %41462 = vmatprep.subr.bf16.mxu1 %v49135_v1 }
 0xe48   :  { %35977 = vmatmul.mubr.f32.vlgmr.msra.gmra.mrb[36].mxu0 %v6562_v58 }
 0xe49   :  { %41386 = vmatpush3.bf16.msra.mxu0 %v45078_v59  ;;  %36006 = vmatprep.mubr.msk.f32.mxu0 %vm44853_vm0, %v49134_v0 }
 0xe4a   :  { %41387 = vmatprep.subr.bf16.mxu0 %v49135_v1  ;;  %41464 = vmatpush3.bf16.msra.mxu1 %v45145_v14 }
 0xe4b   :  { %41465 = vmatprep.subr.bf16.mxu1 %v49135_v1 }
 0xe4d   :  { %41389 = vmatpush3.bf16.msra.mxu0 %v45120_v7 }
 0xe4e   :  { %41390 = vmatprep.subr.bf16.mxu0 %v49135_v1  ;;  %41467 = vmatpush3.bf16.msra.mxu1 %v45165_v20 }
 0xe4f   :  { %41468 = vmatprep.subr.bf16.mxu1 %v49135_v1 }
 0xe51   :  { %41392 = vmatpush3.bf16.msra.mxu0 %v45154_v17 }
 0xe52   :  { %41393 = vmatprep.subr.bf16.mxu0 %v49135_v1 }
 0xe55   :  { %41395 = vmatpush3.bf16.msra.mxu0 %v45172_v21 }
 0xe56   :  { %41396 = vmatprep.subr.bf16.mxu0 %v49135_v1 }
 0xf03   :  { %v6659_v32 = vpop.f32.mrb[32].mxu1 }
 0xf04   :  { %v35945_v62 = vpop.f32.mrb[33].mxu1 }
 0xf0b   :  { %v6816_v61 = vpop.f32.mrb[34].mxu1  ;;  %v6568_v41 = vpop.f32.mrb[32].mxu0 }
 0xf0c   :  { %v6569_v60 = vadd.f32 %v6568_v41, %v6489_v13  ;;  %v35967_v57 = vpop.f32.mrb[35].mxu1  ;;  %v35934_v28 = vpop.f32.mrb[33].mxu0 }
 0xf0e   :  { %v6660_v56 = vadd.f32 %v6659_v32, %v6569_v60 }
 0xf13   :  { %v6739_v44 = vpop.f32.mrb[34].mxu0  ;;  %v6974_v3 = vpop.f32.mrb[36].mxu1 }
 0xf14   :  { %v6740_v58 = vadd.f32 %v6739_v44, %v6660_v56  ;;  %v35956_v18 = vpop.f32.mrb[35].mxu0  ;;  %v35989_v47 = vpop.f32.mrb[37].mxu1 }
 0xf16   :  { %v6817_v42 = vadd.f32 %v6816_v61, %v6740_v58 }
 0xf1b   :  { %v6899_v29 = vpop.f32.mrb[36].mxu0 }
 0xf1c   :  { %v6900_v23 = vadd.f32 %v6899_v29, %v6817_v42  ;;  %v35978_v51 = vpop.f32.mrb[37].mxu0 }
 0xf1e   :  { %v6975_v39 = vadd.f32 %v6974_v3, %v6900_v23 }
 0xf20   :  { %v6978_v62 = vadd.f32 %v45807_v52, %v6975_v39 }
 0xf22   :  { %v6980_v37 = vmin.f32 %v6978_v62, 0.0  ;;  %vm6979_vm11 = vcmp.gt.f32.partialorder %v6978_v62, 0.0 }
 0xf24   :  { %v6981_v38 = vmul.f32 1.442695, %v6980_v37 }
 0xf26   :  { %44690 = vpow2.f32 %v6981_v38 }
 0xf30   :  { %v44691_v15 = vpop.eup %44690 }
 0xf31   :  { %v31956_v13 = vadd.f32 -1.0, %v44691_v15 }
 0xf33   :  { %v6984_v41 = vsel %vm6979_vm11, %v6978_v62, %v31956_v13  ;;  %v8073_v13 = vstv %s8072_s12  ;;  %s19206_s12 = smul.f32 12.0, %s49069_s1 }
 0xf34   :  { %v6986_v32 = vsel %vm625_vm2, %v6984_v41, 0 }
 0xf35   :  { %v7061_v60 = vand.u32 4294901760, %v6986_v32  ;;  %s19207_s15 = sadd.f32 %s19206_s12, %s49068_s0  ;;  %s22386_s12 = smul.f32 14.0, %s49069_s1 }
 0xf37   :  { %v7062_v57 = vsub.f32 %v6986_v32, %v7061_v60 }
 0xf39   :  { %v7063_v28 = vand.u32 4294901760, %v7062_v57 }
 0xf3b   :  { %v7064_v56 = vsub.f32 %v7062_v57, %v7063_v28 }
 0xf3d   :  { %v7065_v61 = vand.u32 4294901760, %v7064_v56 }
 0xf3f   :  { %36007 = vmatmul.mubr.f32.vlgmr.msra.gmra.mrb[38].mxu0 %v7065_v61 }
 0xf40   :  { %41398 = vmatpush3.bf16.msra.mxu0 %v45261_v25  ;;  %36025 = vmatprep.mubr.msk.f32.mxu0 %vm44853_vm0, %v49134_v0 }
 0xf41   :  { %41399 = vmatprep.subr.bf16.mxu0 %v49135_v1 }
 0xf44   :  { %41401 = vmatpush3.bf16.msra.mxu0 %v45271_v19 }
 0xf45   :  { %41402 = vmatprep.subr.bf16.mxu0 %v49135_v1 }
 0xf48   :  { %41404 = vmatpush3.bf16.msra.mxu0 %v45280_v35 }
 0xf49   :  { %41405 = vmatprep.subr.bf16.mxu0 %v49135_v1 }
 0xf4c   :  { %41407 = vmatpush3.bf16.msra.mxu0 %v45284_v24 }
 0xf4d   :  { %41408 = vmatprep.subr.bf16.mxu0 %v49135_v1 }
 0xf4f   :  { %36026 = vmatmul.mubr.f32.vlgmr.msra.gmra.mrb[38].mxu0 %v7061_v60 }
 0xf50   :  { %41410 = vmatpush3.bf16.msra.mxu0 %v45290_v26  ;;  %36044 = vmatprep.mubr.msk.f32.mxu0 %vm44853_vm0, %v49134_v0 }
 0xf51   :  { %41411 = vmatprep.subr.bf16.mxu0 %v49135_v1 }
 0xf54   :  { %41413 = vmatpush3.bf16.msra.mxu0 %v45297_v43 }
 0xf55   :  { %41414 = vmatprep.subr.bf16.mxu0 %v49135_v1 }
 0xf58   :  { %41416 = vmatpush3.bf16.msra.mxu0 %v45305_v49 }
 0xf59   :  { %41417 = vmatprep.subr.bf16.mxu0 %v49135_v1 }
 0xf5c   :  { %41419 = vmatpush3.bf16.msra.mxu0 %v45311_v12 }
 0xf5d   :  { %41420 = vmatprep.subr.bf16.mxu0 %v49135_v1 }
 0xf5f   :  { %36045 = vmatmul.mubr.f32.vlgmr.msra.gmra.mrb[38].mxu0 %v7062_v57 }
 0xf60   :  { %41422 = vmatpush3.bf16.msra.mxu0 %v45078_v59  ;;  %36063 = vmatprep.mubr.msk.f32.mxu0 %vm44853_vm0, %v49134_v0 }
 0xf61   :  { %41423 = vmatprep.subr.bf16.mxu0 %v49135_v1 }
 0xf64   :  { %41425 = vmatpush3.bf16.msra.mxu0 %v45120_v7 }
 0xf65   :  { %41426 = vmatprep.subr.bf16.mxu0 %v49135_v1 }
 0xf68   :  { %41428 = vmatpush3.bf16.msra.mxu0 %v45154_v17 }
 0xf69   :  { %41429 = vmatprep.subr.bf16.mxu0 %v49135_v1 }
 0xf6c   :  { %41431 = vmatpush3.bf16.msra.mxu0 %v45172_v21 }
 0xf6d   :  { %41432 = vmatprep.subr.bf16.mxu0 %v49135_v1 }
 0xf6f   :  { %36064 = vmatmul.mubr.f32.vlgmr.msra.gmra.mrb[38].mxu0 %v7063_v28 }
 0xf70   :  { %41434 = vmatpush3.bf16.msra.mxu0 %v45329_v34  ;;  %36082 = vmatprep.mubr.msk.f32.mxu0 %vm44853_vm0, %v49134_v0 }
 0xf71   :  { %41435 = vmatprep.subr.bf16.mxu0 %v49135_v1 }
 0xf74   :  { %41437 = vmatpush3.bf16.msra.mxu0 %v45337_v63 }
 0xf75   :  { %41438 = vmatprep.subr.bf16.mxu0 %v49135_v1 }
 0xf78   :  { %41440 = vmatpush3.bf16.msra.mxu0 %v45347_v16 }
 0xf79   :  { %41441 = vmatprep.subr.bf16.mxu0 %v49135_v1 }
 0xf7c   :  { %41443 = vmatpush3.bf16.msra.mxu0 %v45351_v46 }
 0xf7d   :  { %41444 = vmatprep.subr.bf16.mxu0 %v49135_v1 }
 0xf7f   :  { %36083 = vmatmul.mubr.f32.vlgmr.msra.gmra.mrb[38].mxu0 %v7061_v60 }
 0xf80   :  { %41446 = vmatpush3.bf16.msra.mxu0 %v45078_v59  ;;  %36101 = vmatprep.mubr.msk.f32.mxu0 %vm44853_vm0, %v49134_v0 }
 0xf81   :  { %41447 = vmatprep.subr.bf16.mxu0 %v49135_v1 }
 0xf84   :  { %41449 = vmatpush3.bf16.msra.mxu0 %v45120_v7 }
 0xf85   :  { %41450 = vmatprep.subr.bf16.mxu0 %v49135_v1 }
 0xf88   :  { %41452 = vmatpush3.bf16.msra.mxu0 %v45154_v17 }
 0xf89   :  { %41453 = vmatprep.subr.bf16.mxu0 %v49135_v1 }
 0xf8c   :  { %41455 = vmatpush3.bf16.msra.mxu0 %v45172_v21 }
 0xf8d   :  { %41528 = vmatprep.subr.bf16.mxu0 %v49135_v1 }
 0xf8f   :  { %36102 = vmatmul.mubr.f32.vlgmr.msra.gmra.mrb[38].mxu0 %v7061_v60 }
 0xf90   :  { %41530 = vmatpush3.bf16.msra.mxu0 %v44958_v8  ;;  %36226 = vmatprep.mubr.msk.f32.mxu0 %vm44853_vm0, %v49134_v0 }
 0xf91   :  { %41531 = vmatprep.subr.bf16.mxu0 %v49135_v1 }
 0xf94   :  { %41533 = vmatpush3.bf16.msra.mxu0 %v44960_v11 }
 0xf95   :  { %41540 = vmatprep.subr.bf16.mxu0 %v49135_v1 }
0x1062   :  { %v7521_v37 = vpop.f32.mrb[38].mxu0 }
0x1063   :  { %v44236_v39 = vadd.f32 %v46046_v27, %v7521_v37  ;;  %v36103_v52 = vpop.f32.mrb[39].mxu0 }
0x1064   :  { %v49143_v52 = vld [vmem:[#allocation15_spill] sm:$0xff] }
0x1065   :  { %v7526_v51 = vmin.f32 %v44236_v39, 0.0  ;;  %vm7525_vm12 = vcmp.gt.f32.partialorder %v44236_v39, 0.0 }
0x1067   :  { %v7527_v23 = vmul.f32 1.442695, %v7526_v51  ;;  %v49144_v51 = vld [vmem:[#allocation16_spill] sm:$0xff] }
0x1069   :  { %44692 = vpow2.f32 %v7527_v23  ;;  %v49145_v23 = vld [vmem:[#allocation17_spill] sm:$0xff] }
0x1073   :  { %v44693_v44 = vpop.eup %44692 }
0x1074   :  { %v31957_v3 = vadd.f32 -1.0, %v44693_v44  ;;  %v49146_v44 = vld [vmem:[#allocation18_spill] sm:$0xff] }
0x1076   :  { %v7530_v58 = vsel %vm7525_vm12, %v44236_v39, %v31957_v3 }
0x1077   :  { %v7532_v18 = vsel %vm625_vm2, %v7530_v58, 0 }
0x1078   :  { %v7607_v47 = vand.u32 4294901760, %v7532_v18 }
0x107a   :  { %v7608_v42 = vsub.f32 %v7532_v18, %v7607_v47  ;;  %v8078_v18 = vstv %s8077_s17  ;;  %s14432_s17 = scalar_select %p14431_p10, %s49069_s1, 0.0 }
0x107c   :  { %v7609_v29 = vand.u32 4294901760, %v7608_v42 }
0x107e   :  { %v7610_v62 = vsub.f32 %v7608_v42, %v7609_v29 }
0x1080   :  { %v7611_v38 = vand.u32 4294901760, %v7610_v62 }
0x1082   :  { %36121 = vmatmul.mubr.f32.vlgmr.msra.gmra.mrb[38].mxu1 %v7611_v38 }
0x1083   :  { %41470 = vmatpush3.bf16.msra.mxu1 %v45439_v50  ;;  %36139 = vmatprep.mubr.msk.f32.mxu1 %vm44853_vm0, %v49134_v0 }
0x1084   :  { %41471 = vmatprep.subr.bf16.mxu1 %v49135_v1 }
0x1087   :  { %41473 = vmatpush3.bf16.msra.mxu1 %v45449_v40 }
0x1088   :  { %41474 = vmatprep.subr.bf16.mxu1 %v49135_v1 }
0x108b   :  { %41476 = vmatpush3.bf16.msra.mxu1 %v45458_v10 }
0x108c   :  { %41477 = vmatprep.subr.bf16.mxu1 %v49135_v1 }
0x108f   :  { %41479 = vmatpush3.bf16.msra.mxu1 %v45462_v48 }
0x1090   :  { %41480 = vmatprep.subr.bf16.mxu1 %v49135_v1 }
0x1092   :  { %36140 = vmatmul.mubr.f32.vlgmr.msra.gmra.mrb[38].mxu1 %v7607_v47 }
0x1093   :  { %41482 = vmatpush3.bf16.msra.mxu1 %v45468_v36  ;;  %36158 = vmatprep.mubr.msk.f32.mxu1 %vm44853_vm0, %v49134_v0 }
0x1094   :  { %41483 = vmatprep.subr.bf16.mxu1 %v49135_v1 }
0x1097   :  { %41485 = vmatpush3.bf16.msra.mxu1 %v45475_v5 }
0x1098   :  { %41486 = vmatprep.subr.bf16.mxu1 %v49135_v1 }
0x109b   :  { %41488 = vmatpush3.bf16.msra.mxu1 %v45483_v6 }
0x109c   :  { %41489 = vmatprep.subr.bf16.mxu1 %v49135_v1 }
0x109f   :  { %41491 = vmatpush3.bf16.msra.mxu1 %v45489_v55 }
0x10a0   :  { %41492 = vmatprep.subr.bf16.mxu1 %v49135_v1 }
0x10a2   :  { %36159 = vmatmul.mubr.f32.vlgmr.msra.gmra.mrb[38].mxu1 %v7608_v42 }
0x10a3   :  { %41494 = vmatpush3.bf16.msra.mxu1 %v45059_v54  ;;  %36177 = vmatprep.mubr.msk.f32.mxu1 %vm44853_vm0, %v49134_v0 }
0x10a4   :  { %41495 = vmatprep.subr.bf16.mxu1 %v49135_v1 }
0x10a7   :  { %41497 = vmatpush3.bf16.msra.mxu1 %v45100_v2 }
0x10a8   :  { %41498 = vmatprep.subr.bf16.mxu1 %v49135_v1 }
0x10ab   :  { %41500 = vmatpush3.bf16.msra.mxu1 %v45145_v14 }
0x10ac   :  { %41501 = vmatprep.subr.bf16.mxu1 %v49135_v1 }
0x10af   :  { %41503 = vmatpush3.bf16.msra.mxu1 %v45165_v20 }
0x10b0   :  { %41504 = vmatprep.subr.bf16.mxu1 %v49135_v1 }
0x10b2   :  { %36178 = vmatmul.mubr.f32.vlgmr.msra.gmra.mrb[38].mxu1 %v7609_v29 }
0x10b3   :  { %41506 = vmatpush3.bf16.msra.mxu1 %v45507_v4  ;;  %36196 = vmatprep.mubr.msk.f32.mxu1 %vm44853_vm0, %v49134_v0 }
0x10b4   :  { %41507 = vmatprep.subr.bf16.mxu1 %v49135_v1 }
0x10b7   :  { %41509 = vmatpush3.bf16.msra.mxu1 %v45515_v45 }
0x10b8   :  { %41510 = vmatprep.subr.bf16.mxu1 %v49135_v1 }
0x10bb   :  { %41512 = vmatpush3.bf16.msra.mxu1 %v45525_v30 }
0x10bc   :  { %41513 = vmatprep.subr.bf16.mxu1 %v49135_v1 }
0x10bf   :  { %41515 = vmatpush3.bf16.msra.mxu1 %v45529_v9 }
0x10c0   :  { %41516 = vmatprep.subr.bf16.mxu1 %v49135_v1 }
0x10c2   :  { %36197 = vmatmul.mubr.f32.vlgmr.msra.gmra.mrb[38].mxu1 %v7607_v47 }
0x10c3   :  { %41518 = vmatpush3.bf16.msra.mxu1 %v45059_v54  ;;  %36215 = vmatprep.mubr.msk.f32.mxu1 %vm44853_vm0, %v49134_v0 }
0x10c4   :  { %41519 = vmatprep.subr.bf16.mxu1 %v49135_v1 }
0x10c7   :  { %41521 = vmatpush3.bf16.msra.mxu1 %v45100_v2 }
0x10c8   :  { %41522 = vmatprep.subr.bf16.mxu1 %v49135_v1 }
0x10cb   :  { %41524 = vmatpush3.bf16.msra.mxu1 %v45145_v14 }
0x10cc   :  { %41525 = vmatprep.subr.bf16.mxu1 %v49135_v1 }
0x10cf   :  { %41527 = vmatpush3.bf16.msra.mxu1 %v45165_v20 }
0x10d0   :  { %41534 = vmatprep.subr.bf16.mxu1 %v49135_v1 }
0x10d2   :  { %36216 = vmatmul.mubr.f32.vlgmr.msra.gmra.mrb[38].mxu1 %v7607_v47  ;;  %v46355_v47 = vld [vmem:[%s49073_s5] ss:$0 sm:$0xff] }
0x10d3   :  { %41536 = vmatpush3.bf16.msra.mxu1 %v44971_v31  ;;  %36237 = vmatprep.mubr.msk.f32.mxu1 %vm44853_vm0, %v49134_v0  ;;  %49147 = vst [vmem:[#allocation19_spill] sm:$0xff] %v46355_v47  ;;  %v8079_v42 = vmul.f32 %v46355_v47, %v8078_v18  ;;  %v46361_v18 = vld [vmem:[%s49074_s6] ss:$0 sm:$0xff] }
0x10d4   :  { %41537 = vmatprep.subr.bf16.mxu1 %v49135_v1 }
0x10d7   :  { %41539 = vmatpush3.bf16.msra.mxu1 %v44976_v33 }
0x10d8   :  { %41546 = vmatprep.subr.bf16.mxu1 %v49135_v1 }
0x11a5   :  { %v8067_v15 = vpop.f32.mrb[38].mxu1 }
0x11a6   :  { %v44237_v41 = vadd.f32 %v46115_v22, %v8067_v15  ;;  %v36217_v32 = vpop.f32.mrb[39].mxu1 }
0x11a8   :  { %v8074_v60 = vmul.f32 %v44237_v41, %v8073_v13 }
0x11aa   :  { %v46298_v57 = vadd.f32 %v8074_v60, %v46119_v53 }
0x11ac   :  { %v8081_v28 = vsel %vm71_vm1, %v46298_v57, 0 }
0x11ad   :  { %v8152_v56 = vand.u32 4294901760, %v8081_v28 }
0x11af   :  { %v8153_v61 = vsub.f32 %v8081_v28, %v8152_v56  ;;  %36238 = vmatmul.mubr.f32.vlgmr.msra.gmra.mrb[40].mxu1 %v8152_v56 }
0x11b0   :  { %41548 = vmatpush3.bf16.msra.mxu1 %v44958_v8  ;;  %36259 = vmatprep.mubr.msk.f32.mxu1 %vm44853_vm0, %v49134_v0 }
0x11b1   :  { %41549 = vmatprep.subr.bf16.mxu1 %v49135_v1  ;;  %v8154_v37 = vand.u32 4294901760, %v8153_v61 }
0x11b3   :  { %v8155_v39 = vsub.f32 %v8153_v61, %v8154_v37 }
0x11b4   :  { %41551 = vmatpush3.bf16.msra.mxu1 %v44960_v11 }
0x11b5   :  { %41558 = vmatprep.subr.bf16.mxu1 %v49135_v1  ;;  %v8156_v53 = vand.u32 4294901760, %v8155_v39 }
0x11b7   :  { %36260 = vmatmul.mubr.f32.vlgmr.msra.gmra.mrb[42].mxu1 %v8154_v37  ;;  %36227 = vmatmul.mubr.f32.vlgmr.msra.gmra.mrb[40].mxu0 %v8156_v53 }
0x11b8   :  { %41542 = vmatpush3.bf16.msra.mxu0 %v49143_v52  ;;  %41560 = vmatpush3.bf16.msra.mxu1 %v44958_v8 }
0x11b9   :  { %41543 = vmatprep.subr.bf16.mxu0 %v49135_v1  ;;  %41561 = vmatprep.subr.bf16.mxu1 %v49135_v1 }
0x11ba   :  { %36248 = vmatprep.mubr.msk.f32.mxu0 %vm44853_vm0, %v49134_v0  ;;  %36281 = vmatprep.mubr.msk.f32.mxu1 %vm44853_vm0, %v49134_v0 }
0x11bc   :  { %41545 = vmatpush3.bf16.msra.mxu0 %v49144_v51  ;;  %41563 = vmatpush3.bf16.msra.mxu1 %v44960_v11 }
0x11bd   :  { %41552 = vmatprep.subr.bf16.mxu0 %v49135_v1  ;;  %41636 = vmatprep.subr.bf16.mxu1 %v49135_v1 }
0x11bf   :  { %36249 = vmatmul.mubr.f32.vlgmr.msra.gmra.mrb[42].mxu0 %v8153_v61  ;;  %36282 = vmatmul.mubr.f32.vlgmr.msra.gmra.mrb[44].mxu1 %v8152_v56 }
0x11c0   :  { %41554 = vmatpush3.bf16.msra.mxu0 %v49145_v23  ;;  %36270 = vmatprep.mubr.msk.f32.mxu0 %vm44853_vm0, %v49134_v0 }
0x11c1   :  { %41555 = vmatprep.subr.bf16.mxu0 %v49135_v1  ;;  %41638 = vmatpush3.bf16.msra.mxu1 %v45059_v54 }
0x11c2   :  { %41639 = vmatprep.subr.bf16.mxu1 %v49135_v1  ;;  %36414 = vmatprep.mubr.msk.f32.mxu1 %vm44853_vm0, %v49134_v0 }
0x11c4   :  { %41557 = vmatpush3.bf16.msra.mxu0 %v49146_v44 }
0x11c5   :  { %41564 = vmatprep.subr.bf16.mxu0 %v49135_v1  ;;  %41641 = vmatpush3.bf16.msra.mxu1 %v45100_v2 }
0x11c6   :  { %41642 = vmatprep.subr.bf16.mxu1 %v49135_v1 }
0x11c7   :  { %36271 = vmatmul.mubr.f32.vlgmr.msra.gmra.mrb[44].mxu0 %v8152_v56 }
0x11c8   :  { %41566 = vmatpush3.bf16.msra.mxu0 %v45078_v59  ;;  %36300 = vmatprep.mubr.msk.f32.mxu0 %vm44853_vm0, %v49134_v0 }
0x11c9   :  { %41567 = vmatprep.subr.bf16.mxu0 %v49135_v1  ;;  %41644 = vmatpush3.bf16.msra.mxu1 %v45145_v14 }
0x11ca   :  { %41645 = vmatprep.subr.bf16.mxu1 %v49135_v1 }
0x11cc   :  { %41569 = vmatpush3.bf16.msra.mxu0 %v45120_v7 }
0x11cd   :  { %41570 = vmatprep.subr.bf16.mxu0 %v49135_v1  ;;  %41647 = vmatpush3.bf16.msra.mxu1 %v45165_v20 }
0x11ce   :  { %41648 = vmatprep.subr.bf16.mxu1 %v49135_v1 }
0x11d0   :  { %41572 = vmatpush3.bf16.msra.mxu0 %v45154_v17 }
0x11d1   :  { %41573 = vmatprep.subr.bf16.mxu0 %v49135_v1 }
0x11d4   :  { %41575 = vmatpush3.bf16.msra.mxu0 %v45172_v21 }
0x11d5   :  { %41576 = vmatprep.subr.bf16.mxu0 %v49135_v1 }
0x1282   :  { %v8249_v3 = vpop.f32.mrb[40].mxu1 }
0x1283   :  { %v36239_v58 = vpop.f32.mrb[41].mxu1 }
0x128a   :  { %v8406_v29 = vpop.f32.mrb[42].mxu1  ;;  %v8158_v62 = vpop.f32.mrb[40].mxu0 }
0x128b   :  { %v8159_v38 = vadd.f32 %v8158_v62, %v8079_v42  ;;  %v36261_v15 = vpop.f32.mrb[43].mxu1  ;;  %v36228_v13 = vpop.f32.mrb[41].mxu0 }
0x128d   :  { %v8250_v41 = vadd.f32 %v8249_v3, %v8159_v38 }
0x1292   :  { %v8329_v32 = vpop.f32.mrb[42].mxu0  ;;  %v8564_v60 = vpop.f32.mrb[44].mxu1 }
0x1293   :  { %v8330_v28 = vadd.f32 %v8329_v32, %v8250_v41  ;;  %v36250_v56 = vpop.f32.mrb[43].mxu0  ;;  %v36283_v61 = vpop.f32.mrb[45].mxu1 }
0x1295   :  { %v8407_v37 = vadd.f32 %v8406_v29, %v8330_v28 }
0x129a   :  { %v8489_v39 = vpop.f32.mrb[44].mxu0 }
0x129b   :  { %v8490_v53 = vadd.f32 %v8489_v39, %v8407_v37  ;;  %v36272_v58 = vpop.f32.mrb[45].mxu0 }
0x129d   :  { %v8565_v44 = vadd.f32 %v8564_v60, %v8490_v53 }
0x129f   :  { %v8568_v42 = vadd.f32 %v46361_v18, %v8565_v44 }
0x12a1   :  { %v8570_v62 = vmin.f32 %v8568_v42, 0.0  ;;  %vm8569_vm13 = vcmp.gt.f32.partialorder %v8568_v42, 0.0 }
0x12a3   :  { %v8571_v15 = vmul.f32 1.442695, %v8570_v62 }
0x12a5   :  { %44694 = vpow2.f32 %v8571_v15 }
0x12af   :  { %v44695_v3 = vpop.eup %44694 }
0x12b0   :  { %v31958_v38 = vadd.f32 -1.0, %v44695_v3 }
0x12b2   :  { %v8574_v13 = vsel %vm8569_vm13, %v8568_v42, %v31958_v38 }
0x12b3   :  { %v8576_v29 = vsel %vm625_vm2, %v8574_v13, 0 }
0x12b4   :  { %v8651_v41 = vand.u32 4294901760, %v8576_v29 }
0x12b6   :  { %v8652_v32 = vsub.f32 %v8576_v29, %v8651_v41 }
0x12b8   :  { %v8653_v28 = vand.u32 4294901760, %v8652_v32 }
0x12ba   :  { %v8654_v60 = vsub.f32 %v8652_v32, %v8653_v28 }
0x12bc   :  { %v8655_v56 = vand.u32 4294901760, %v8654_v60 }
0x12be   :  { %36301 = vmatmul.mubr.f32.vlgmr.msra.gmra.mrb[46].mxu0 %v8655_v56 }
0x12bf   :  { %41578 = vmatpush3.bf16.msra.mxu0 %v45261_v25  ;;  %36319 = vmatprep.mubr.msk.f32.mxu0 %vm44853_vm0, %v49134_v0 }
0x12c0   :  { %41579 = vmatprep.subr.bf16.mxu0 %v49135_v1 }
0x12c3   :  { %41581 = vmatpush3.bf16.msra.mxu0 %v45271_v19 }
0x12c4   :  { %41582 = vmatprep.subr.bf16.mxu0 %v49135_v1 }
0x12c7   :  { %41584 = vmatpush3.bf16.msra.mxu0 %v45280_v35 }
0x12c8   :  { %41585 = vmatprep.subr.bf16.mxu0 %v49135_v1 }
0x12cb   :  { %41587 = vmatpush3.bf16.msra.mxu0 %v45284_v24 }
0x12cc   :  { %41588 = vmatprep.subr.bf16.mxu0 %v49135_v1 }
0x12ce   :  { %36320 = vmatmul.mubr.f32.vlgmr.msra.gmra.mrb[46].mxu0 %v8651_v41 }
0x12cf   :  { %41590 = vmatpush3.bf16.msra.mxu0 %v45290_v26  ;;  %36338 = vmatprep.mubr.msk.f32.mxu0 %vm44853_vm0, %v49134_v0 }
0x12d0   :  { %41591 = vmatprep.subr.bf16.mxu0 %v49135_v1 }
0x12d3   :  { %41593 = vmatpush3.bf16.msra.mxu0 %v45297_v43 }
0x12d4   :  { %41594 = vmatprep.subr.bf16.mxu0 %v49135_v1 }
0x12d7   :  { %41596 = vmatpush3.bf16.msra.mxu0 %v45305_v49 }
0x12d8   :  { %41597 = vmatprep.subr.bf16.mxu0 %v49135_v1 }
0x12db   :  { %41599 = vmatpush3.bf16.msra.mxu0 %v45311_v12 }
0x12dc   :  { %41600 = vmatprep.subr.bf16.mxu0 %v49135_v1 }
0x12de   :  { %36339 = vmatmul.mubr.f32.vlgmr.msra.gmra.mrb[46].mxu0 %v8652_v32  ;;  %v9663_v32 = vstv %s9662_s8  ;;  %s12842_s8 = scalar_select %p12841_p9, %s49069_s1, 0.0 }
0x12df   :  { %41602 = vmatpush3.bf16.msra.mxu0 %v45078_v59  ;;  %36357 = vmatprep.mubr.msk.f32.mxu0 %vm44853_vm0, %v49134_v0 }
0x12e0   :  { %41603 = vmatprep.subr.bf16.mxu0 %v49135_v1 }
0x12e3   :  { %41605 = vmatpush3.bf16.msra.mxu0 %v45120_v7 }
0x12e4   :  { %41606 = vmatprep.subr.bf16.mxu0 %v49135_v1 }
0x12e7   :  { %41608 = vmatpush3.bf16.msra.mxu0 %v45154_v17 }
0x12e8   :  { %41609 = vmatprep.subr.bf16.mxu0 %v49135_v1 }
0x12eb   :  { %41611 = vmatpush3.bf16.msra.mxu0 %v45172_v21 }
0x12ec   :  { %41612 = vmatprep.subr.bf16.mxu0 %v49135_v1 }
0x12ee   :  { %36358 = vmatmul.mubr.f32.vlgmr.msra.gmra.mrb[46].mxu0 %v8653_v28 }
0x12ef   :  { %41614 = vmatpush3.bf16.msra.mxu0 %v45329_v34  ;;  %36376 = vmatprep.mubr.msk.f32.mxu0 %vm44853_vm0, %v49134_v0 }
0x12f0   :  { %41615 = vmatprep.subr.bf16.mxu0 %v49135_v1 }
0x12f3   :  { %41617 = vmatpush3.bf16.msra.mxu0 %v45337_v63 }
0x12f4   :  { %41618 = vmatprep.subr.bf16.mxu0 %v49135_v1 }
0x12f7   :  { %41620 = vmatpush3.bf16.msra.mxu0 %v45347_v16 }
0x12f8   :  { %41621 = vmatprep.subr.bf16.mxu0 %v49135_v1 }
0x12fb   :  { %41623 = vmatpush3.bf16.msra.mxu0 %v45351_v46 }
0x12fc   :  { %41624 = vmatprep.subr.bf16.mxu0 %v49135_v1 }
0x12fe   :  { %36377 = vmatmul.mubr.f32.vlgmr.msra.gmra.mrb[46].mxu0 %v8651_v41 }
0x12ff   :  { %41626 = vmatpush3.bf16.msra.mxu0 %v45078_v59  ;;  %36395 = vmatprep.mubr.msk.f32.mxu0 %vm44853_vm0, %v49134_v0 }
0x1300   :  { %41627 = vmatprep.subr.bf16.mxu0 %v49135_v1 }
0x1303   :  { %41629 = vmatpush3.bf16.msra.mxu0 %v45120_v7 }
0x1304   :  { %41630 = vmatprep.subr.bf16.mxu0 %v49135_v1 }
0x1307   :  { %41632 = vmatpush3.bf16.msra.mxu0 %v45154_v17 }
0x1308   :  { %41633 = vmatprep.subr.bf16.mxu0 %v49135_v1 }
0x130b   :  { %41635 = vmatpush3.bf16.msra.mxu0 %v45172_v21 }
0x130c   :  { %41708 = vmatprep.subr.bf16.mxu0 %v49135_v1 }
0x130e   :  { %36396 = vmatmul.mubr.f32.vlgmr.msra.gmra.mrb[46].mxu0 %v8651_v41 }
0x130f   :  { %41710 = vmatpush3.bf16.msra.mxu0 %v44958_v8  ;;  %36520 = vmatprep.mubr.msk.f32.mxu0 %vm44853_vm0, %v49134_v0 }
0x1310   :  { %41711 = vmatprep.subr.bf16.mxu0 %v49135_v1 }
0x1313   :  { %41713 = vmatpush3.bf16.msra.mxu0 %v44960_v11 }
0x1314   :  { %41720 = vmatprep.subr.bf16.mxu0 %v49135_v1 }
0x13e1   :  { %v9111_v44 = vpop.f32.mrb[46].mxu0 }
0x13e2   :  { %v44238_v61 = vadd.f32 %v46046_v27, %v9111_v44  ;;  %v36397_v37 = vpop.f32.mrb[47].mxu0 }
0x13e4   :  { %v9116_v39 = vmin.f32 %v44238_v61, 0.0  ;;  %vm9115_vm14 = vcmp.gt.f32.partialorder %v44238_v61, 0.0 }
0x13e6   :  { %v9117_v53 = vmul.f32 1.442695, %v9116_v39 }
0x13e8   :  { %44696 = vpow2.f32 %v9117_v53 }
0x13f2   :  { %v44697_v58 = vpop.eup %44696 }
0x13f3   :  { %v31959_v42 = vadd.f32 -1.0, %v44697_v58  ;;  %v49148_v58 = vld [vmem:[#allocation18_spill] sm:$0xff] }
0x13f5   :  { %v9120_v62 = vsel %vm9115_vm14, %v44238_v61, %v31959_v42 }
0x13f6   :  { %v9122_v15 = vsel %vm625_vm2, %v9120_v62, 0 }
0x13f7   :  { %v9197_v3 = vand.u32 4294901760, %v9122_v15 }
0x13f9   :  { %v9198_v38 = vsub.f32 %v9122_v15, %v9197_v3  ;;  %v9668_v15 = vstv %s9667_s4  ;;  %s12847_s4 = sadd.f32 %s12846_s26, %s49068_s0 }
0x13fb   :  { %v9199_v13 = vand.u32 4294901760, %v9198_v38 }
0x13fd   :  { %v9200_v29 = vsub.f32 %v9198_v38, %v9199_v13 }
0x13ff   :  { %v9201_v41 = vand.u32 4294901760, %v9200_v29 }
0x1401   :  { %36415 = vmatmul.mubr.f32.vlgmr.msra.gmra.mrb[46].mxu1 %v9201_v41 }
0x1402   :  { %41650 = vmatpush3.bf16.msra.mxu1 %v45439_v50  ;;  %36433 = vmatprep.mubr.msk.f32.mxu1 %vm44853_vm0, %v49134_v0 }
0x1403   :  { %41651 = vmatprep.subr.bf16.mxu1 %v49135_v1 }
0x1406   :  { %41653 = vmatpush3.bf16.msra.mxu1 %v45449_v40 }
0x1407   :  { %41654 = vmatprep.subr.bf16.mxu1 %v49135_v1 }
0x140a   :  { %41656 = vmatpush3.bf16.msra.mxu1 %v45458_v10 }
0x140b   :  { %41657 = vmatprep.subr.bf16.mxu1 %v49135_v1 }
0x140e   :  { %41659 = vmatpush3.bf16.msra.mxu1 %v45462_v48 }
0x140f   :  { %41660 = vmatprep.subr.bf16.mxu1 %v49135_v1 }
0x1411   :  { %36434 = vmatmul.mubr.f32.vlgmr.msra.gmra.mrb[46].mxu1 %v9197_v3 }
0x1412   :  { %41662 = vmatpush3.bf16.msra.mxu1 %v45468_v36  ;;  %36452 = vmatprep.mubr.msk.f32.mxu1 %vm44853_vm0, %v49134_v0 }
0x1413   :  { %41663 = vmatprep.subr.bf16.mxu1 %v49135_v1 }
0x1416   :  { %41665 = vmatpush3.bf16.msra.mxu1 %v45475_v5 }
0x1417   :  { %41666 = vmatprep.subr.bf16.mxu1 %v49135_v1 }
0x141a   :  { %41668 = vmatpush3.bf16.msra.mxu1 %v45483_v6 }
0x141b   :  { %41669 = vmatprep.subr.bf16.mxu1 %v49135_v1 }
0x141e   :  { %41671 = vmatpush3.bf16.msra.mxu1 %v45489_v55 }
0x141f   :  { %41672 = vmatprep.subr.bf16.mxu1 %v49135_v1 }
0x1421   :  { %36453 = vmatmul.mubr.f32.vlgmr.msra.gmra.mrb[46].mxu1 %v9198_v38 }
0x1422   :  { %41674 = vmatpush3.bf16.msra.mxu1 %v45059_v54  ;;  %36471 = vmatprep.mubr.msk.f32.mxu1 %vm44853_vm0, %v49134_v0 }
0x1423   :  { %41675 = vmatprep.subr.bf16.mxu1 %v49135_v1 }
0x1426   :  { %41677 = vmatpush3.bf16.msra.mxu1 %v45100_v2 }
0x1427   :  { %41678 = vmatprep.subr.bf16.mxu1 %v49135_v1 }
0x142a   :  { %41680 = vmatpush3.bf16.msra.mxu1 %v45145_v14 }
0x142b   :  { %41681 = vmatprep.subr.bf16.mxu1 %v49135_v1 }
0x142e   :  { %41683 = vmatpush3.bf16.msra.mxu1 %v45165_v20 }
0x142f   :  { %41684 = vmatprep.subr.bf16.mxu1 %v49135_v1 }
0x1431   :  { %36472 = vmatmul.mubr.f32.vlgmr.msra.gmra.mrb[46].mxu1 %v9199_v13 }
0x1432   :  { %41686 = vmatpush3.bf16.msra.mxu1 %v45507_v4  ;;  %36490 = vmatprep.mubr.msk.f32.mxu1 %vm44853_vm0, %v49134_v0 }
0x1433   :  { %41687 = vmatprep.subr.bf16.mxu1 %v49135_v1 }
0x1436   :  { %41689 = vmatpush3.bf16.msra.mxu1 %v45515_v45 }
0x1437   :  { %41690 = vmatprep.subr.bf16.mxu1 %v49135_v1 }
0x143a   :  { %41692 = vmatpush3.bf16.msra.mxu1 %v45525_v30 }
0x143b   :  { %41693 = vmatprep.subr.bf16.mxu1 %v49135_v1 }
0x143e   :  { %41695 = vmatpush3.bf16.msra.mxu1 %v45529_v9 }
0x143f   :  { %41696 = vmatprep.subr.bf16.mxu1 %v49135_v1 }
0x1441   :  { %36491 = vmatmul.mubr.f32.vlgmr.msra.gmra.mrb[46].mxu1 %v9197_v3 }
0x1442   :  { %41698 = vmatpush3.bf16.msra.mxu1 %v45059_v54  ;;  %36509 = vmatprep.mubr.msk.f32.mxu1 %vm44853_vm0, %v49134_v0 }
0x1443   :  { %41699 = vmatprep.subr.bf16.mxu1 %v49135_v1 }
0x1446   :  { %41701 = vmatpush3.bf16.msra.mxu1 %v45100_v2 }
0x1447   :  { %41702 = vmatprep.subr.bf16.mxu1 %v49135_v1 }
0x144a   :  { %41704 = vmatpush3.bf16.msra.mxu1 %v45145_v14 }
0x144b   :  { %41705 = vmatprep.subr.bf16.mxu1 %v49135_v1 }
0x144e   :  { %41707 = vmatpush3.bf16.msra.mxu1 %v45165_v20 }
0x144f   :  { %41714 = vmatprep.subr.bf16.mxu1 %v49135_v1 }
0x1451   :  { %36510 = vmatmul.mubr.f32.vlgmr.msra.gmra.mrb[46].mxu1 %v9197_v3  ;;  %v9669_v3 = vmul.f32 %v46355_v47, %v9668_v15 }
0x1452   :  { %41716 = vmatpush3.bf16.msra.mxu1 %v44971_v31  ;;  %36531 = vmatprep.mubr.msk.f32.mxu1 %vm44853_vm0, %v49134_v0 }
0x1453   :  { %41717 = vmatprep.subr.bf16.mxu1 %v49135_v1 }
0x1456   :  { %41719 = vmatpush3.bf16.msra.mxu1 %v44976_v33 }
0x1457   :  { %41726 = vmatprep.subr.bf16.mxu1 %v49135_v1 }
0x1524   :  { %v9657_v27 = vpop.f32.mrb[46].mxu1 }
0x1525   :  { %v44239_v28 = vadd.f32 %v46115_v22, %v9657_v27  ;;  %v36511_v60 = vpop.f32.mrb[47].mxu1 }
0x1527   :  { %v9664_v56 = vmul.f32 %v44239_v28, %v9663_v32 }
0x1529   :  { %v46487_v44 = vadd.f32 %v9664_v56, %v46298_v57 }
0x152b   :  { %v9671_v61 = vsel %vm71_vm1, %v46487_v44, 0 }
0x152c   :  { %v9742_v37 = vand.u32 4294901760, %v9671_v61 }
0x152e   :  { %v9743_v39 = vsub.f32 %v9671_v61, %v9742_v37  ;;  %36532 = vmatmul.mubr.f32.vlgmr.msra.gmra.mrb[48].mxu1 %v9742_v37 }
0x152f   :  { %41728 = vmatpush3.bf16.msra.mxu1 %v44958_v8  ;;  %36553 = vmatprep.mubr.msk.f32.mxu1 %vm44853_vm0, %v49134_v0 }
0x1530   :  { %41729 = vmatprep.subr.bf16.mxu1 %v49135_v1  ;;  %v9744_v53 = vand.u32 4294901760, %v9743_v39 }
0x1532   :  { %v9745_v22 = vsub.f32 %v9743_v39, %v9744_v53 }
0x1533   :  { %41731 = vmatpush3.bf16.msra.mxu1 %v44960_v11 }
0x1534   :  { %41738 = vmatprep.subr.bf16.mxu1 %v49135_v1  ;;  %v9746_v57 = vand.u32 4294901760, %v9745_v22 }
0x1536   :  { %36554 = vmatmul.mubr.f32.vlgmr.msra.gmra.mrb[50].mxu1 %v9744_v53  ;;  %36521 = vmatmul.mubr.f32.vlgmr.msra.gmra.mrb[48].mxu0 %v9746_v57 }
0x1537   :  { %41722 = vmatpush3.bf16.msra.mxu0 %v49143_v52  ;;  %41740 = vmatpush3.bf16.msra.mxu1 %v44958_v8 }
0x1538   :  { %41723 = vmatprep.subr.bf16.mxu0 %v49135_v1  ;;  %41741 = vmatprep.subr.bf16.mxu1 %v49135_v1 }
0x1539   :  { %36542 = vmatprep.mubr.msk.f32.mxu0 %vm44853_vm0, %v49134_v0  ;;  %36575 = vmatprep.mubr.msk.f32.mxu1 %vm44853_vm0, %v49134_v0 }
0x153b   :  { %41725 = vmatpush3.bf16.msra.mxu0 %v49144_v51  ;;  %41743 = vmatpush3.bf16.msra.mxu1 %v44960_v11 }
0x153c   :  { %41732 = vmatprep.subr.bf16.mxu0 %v49135_v1  ;;  %41816 = vmatprep.subr.bf16.mxu1 %v49135_v1 }
0x153e   :  { %36543 = vmatmul.mubr.f32.vlgmr.msra.gmra.mrb[50].mxu0 %v9743_v39  ;;  %36576 = vmatmul.mubr.f32.vlgmr.msra.gmra.mrb[52].mxu1 %v9742_v37 }
0x153f   :  { %41734 = vmatpush3.bf16.msra.mxu0 %v49145_v23  ;;  %36564 = vmatprep.mubr.msk.f32.mxu0 %vm44853_vm0, %v49134_v0 }
0x1540   :  { %41735 = vmatprep.subr.bf16.mxu0 %v49135_v1  ;;  %41818 = vmatpush3.bf16.msra.mxu1 %v45059_v54 }
0x1541   :  { %41819 = vmatprep.subr.bf16.mxu1 %v49135_v1  ;;  %36708 = vmatprep.mubr.msk.f32.mxu1 %vm44853_vm0, %v49134_v0 }
0x1543   :  { %41737 = vmatpush3.bf16.msra.mxu0 %v49148_v58 }
0x1544   :  { %41744 = vmatprep.subr.bf16.mxu0 %v49135_v1  ;;  %41821 = vmatpush3.bf16.msra.mxu1 %v45100_v2 }
0x1545   :  { %41822 = vmatprep.subr.bf16.mxu1 %v49135_v1 }
0x1546   :  { %36565 = vmatmul.mubr.f32.vlgmr.msra.gmra.mrb[52].mxu0 %v9742_v37 }
0x1547   :  { %41746 = vmatpush3.bf16.msra.mxu0 %v45078_v59  ;;  %36594 = vmatprep.mubr.msk.f32.mxu0 %vm44853_vm0, %v49134_v0 }
0x1548   :  { %41747 = vmatprep.subr.bf16.mxu0 %v49135_v1  ;;  %41824 = vmatpush3.bf16.msra.mxu1 %v45145_v14 }
0x1549   :  { %41825 = vmatprep.subr.bf16.mxu1 %v49135_v1 }
0x154b   :  { %41749 = vmatpush3.bf16.msra.mxu0 %v45120_v7 }
0x154c   :  { %41750 = vmatprep.subr.bf16.mxu0 %v49135_v1  ;;  %41827 = vmatpush3.bf16.msra.mxu1 %v45165_v20 }
0x154d   :  { %41828 = vmatprep.subr.bf16.mxu1 %v49135_v1 }
0x154f   :  { %41752 = vmatpush3.bf16.msra.mxu0 %v45154_v17 }
0x1550   :  { %41753 = vmatprep.subr.bf16.mxu0 %v49135_v1 }
0x1553   :  { %41755 = vmatpush3.bf16.msra.mxu0 %v45172_v21 }
0x1554   :  { %41756 = vmatprep.subr.bf16.mxu0 %v49135_v1 }
0x1601   :  { %v9839_v42 = vpop.f32.mrb[48].mxu1 }
0x1602   :  { %v36533_v62 = vpop.f32.mrb[49].mxu1 }
0x1609   :  { %v9996_v38 = vpop.f32.mrb[50].mxu1  ;;  %v9748_v13 = vpop.f32.mrb[48].mxu0 }
0x160a   :  { %v9749_v29 = vadd.f32 %v9748_v13, %v9669_v3  ;;  %v36555_v41 = vpop.f32.mrb[51].mxu1  ;;  %v36522_v27 = vpop.f32.mrb[49].mxu0 }
0x160c   :  { %v9840_v32 = vadd.f32 %v9839_v42, %v9749_v29 }
0x1611   :  { %v9919_v28 = vpop.f32.mrb[50].mxu0  ;;  %v10154_v60 = vpop.f32.mrb[52].mxu1 }
0x1612   :  { %v9920_v56 = vadd.f32 %v9919_v28, %v9840_v32  ;;  %v36544_v61 = vpop.f32.mrb[51].mxu0  ;;  %v36577_v37 = vpop.f32.mrb[53].mxu1 }
0x1614   :  { %v9997_v39 = vadd.f32 %v9996_v38, %v9920_v56 }
0x1619   :  { %v10079_v53 = vpop.f32.mrb[52].mxu0 }
0x161a   :  { %v10080_v22 = vadd.f32 %v10079_v53, %v9997_v39  ;;  %v36566_v57 = vpop.f32.mrb[53].mxu0 }
0x161c   :  { %v10155_v58 = vadd.f32 %v10154_v60, %v10080_v22 }
0x161e   :  { %v10158_v62 = vadd.f32 %v46361_v18, %v10155_v58 }
0x1620   :  { %v10160_v23 = vmin.f32 %v10158_v62, 0.0  ;;  %vm10159_vm15 = vcmp.gt.f32.partialorder %v10158_v62, 0.0 }
0x1622   :  { %v10161_v15 = vmul.f32 1.442695, %v10160_v23 }
0x1624   :  { %44698 = vpow2.f32 %v10161_v15 }
0x162e   :  { %v44699_v47 = vpop.eup %44698 }
0x162f   :  { %v31960_v3 = vadd.f32 -1.0, %v44699_v47  ;;  %v46600_v47 = vld [vmem:[#allocation9] ss:$0 sm:$0xff] }
0x1631   :  { %v10164_v13 = vsel %vm10159_vm15, %v10158_v62, %v31960_v3 }
0x1632   :  { %v10166_v42 = vsel %vm625_vm2, %v10164_v13, 0 }
0x1633   :  { %v10241_v29 = vand.u32 4294901760, %v10166_v42 }
0x1635   :  { %v10242_v41 = vsub.f32 %v10166_v42, %v10241_v29  ;;  %v11253_v42 = vstv %s11252_s14 }
0x1637   :  { %v10243_v27 = vand.u32 4294901760, %v10242_v41 }
0x1639   :  { %v10244_v32 = vsub.f32 %v10242_v41, %v10243_v27 }
0x163b   :  { %v10245_v38 = vand.u32 4294901760, %v10244_v32 }
0x163d   :  { %36595 = vmatmul.mubr.f32.vlgmr.msra.gmra.mrb[54].mxu0 %v10245_v38 }
0x163e   :  { %41758 = vmatpush3.bf16.msra.mxu0 %v45261_v25  ;;  %36613 = vmatprep.mubr.msk.f32.mxu0 %vm44853_vm0, %v49134_v0 }
0x163f   :  { %41759 = vmatprep.subr.bf16.mxu0 %v49135_v1 }
0x1642   :  { %41761 = vmatpush3.bf16.msra.mxu0 %v45271_v19 }
0x1643   :  { %41762 = vmatprep.subr.bf16.mxu0 %v49135_v1 }
0x1646   :  { %41764 = vmatpush3.bf16.msra.mxu0 %v45280_v35 }
0x1647   :  { %41765 = vmatprep.subr.bf16.mxu0 %v49135_v1 }
0x164a   :  { %41767 = vmatpush3.bf16.msra.mxu0 %v45284_v24 }
0x164b   :  { %41768 = vmatprep.subr.bf16.mxu0 %v49135_v1 }
0x164d   :  { %36614 = vmatmul.mubr.f32.vlgmr.msra.gmra.mrb[54].mxu0 %v10241_v29 }
0x164e   :  { %41770 = vmatpush3.bf16.msra.mxu0 %v45290_v26  ;;  %36632 = vmatprep.mubr.msk.f32.mxu0 %vm44853_vm0, %v49134_v0 }
0x164f   :  { %41771 = vmatprep.subr.bf16.mxu0 %v49135_v1 }
0x1652   :  { %41773 = vmatpush3.bf16.msra.mxu0 %v45297_v43 }
0x1653   :  { %41774 = vmatprep.subr.bf16.mxu0 %v49135_v1 }
0x1656   :  { %41776 = vmatpush3.bf16.msra.mxu0 %v45305_v49 }
0x1657   :  { %41777 = vmatprep.subr.bf16.mxu0 %v49135_v1 }
0x165a   :  { %41779 = vmatpush3.bf16.msra.mxu0 %v45311_v12 }
0x165b   :  { %41780 = vmatprep.subr.bf16.mxu0 %v49135_v1 }
0x165d   :  { %36633 = vmatmul.mubr.f32.vlgmr.msra.gmra.mrb[54].mxu0 %v10242_v41 }
0x165e   :  { %41782 = vmatpush3.bf16.msra.mxu0 %v45078_v59  ;;  %36651 = vmatprep.mubr.msk.f32.mxu0 %vm44853_vm0, %v49134_v0 }
0x165f   :  { %41783 = vmatprep.subr.bf16.mxu0 %v49135_v1 }
0x1662   :  { %41785 = vmatpush3.bf16.msra.mxu0 %v45120_v7 }
0x1663   :  { %41786 = vmatprep.subr.bf16.mxu0 %v49135_v1 }
0x1666   :  { %41788 = vmatpush3.bf16.msra.mxu0 %v45154_v17 }
0x1667   :  { %41789 = vmatprep.subr.bf16.mxu0 %v49135_v1 }
0x166a   :  { %41791 = vmatpush3.bf16.msra.mxu0 %v45172_v21 }
0x166b   :  { %41792 = vmatprep.subr.bf16.mxu0 %v49135_v1 }
0x166d   :  { %36652 = vmatmul.mubr.f32.vlgmr.msra.gmra.mrb[54].mxu0 %v10243_v27 }
0x166e   :  { %41794 = vmatpush3.bf16.msra.mxu0 %v45329_v34  ;;  %36670 = vmatprep.mubr.msk.f32.mxu0 %vm44853_vm0, %v49134_v0 }
0x166f   :  { %41795 = vmatprep.subr.bf16.mxu0 %v49135_v1 }
0x1672   :  { %41797 = vmatpush3.bf16.msra.mxu0 %v45337_v63 }
0x1673   :  { %41798 = vmatprep.subr.bf16.mxu0 %v49135_v1 }
0x1676   :  { %41800 = vmatpush3.bf16.msra.mxu0 %v45347_v16 }
0x1677   :  { %41801 = vmatprep.subr.bf16.mxu0 %v49135_v1 }
0x167a   :  { %41803 = vmatpush3.bf16.msra.mxu0 %v45351_v46 }
0x167b   :  { %41804 = vmatprep.subr.bf16.mxu0 %v49135_v1 }
0x167d   :  { %36671 = vmatmul.mubr.f32.vlgmr.msra.gmra.mrb[54].mxu0 %v10241_v29 }
0x167e   :  { %41806 = vmatpush3.bf16.msra.mxu0 %v45078_v59  ;;  %36689 = vmatprep.mubr.msk.f32.mxu0 %vm44853_vm0, %v49134_v0 }
0x167f   :  { %41807 = vmatprep.subr.bf16.mxu0 %v49135_v1 }
0x1682   :  { %41809 = vmatpush3.bf16.msra.mxu0 %v45120_v7 }
0x1683   :  { %41810 = vmatprep.subr.bf16.mxu0 %v49135_v1 }
0x1686   :  { %41812 = vmatpush3.bf16.msra.mxu0 %v45154_v17 }
0x1687   :  { %41813 = vmatprep.subr.bf16.mxu0 %v49135_v1 }
0x168a   :  { %41815 = vmatpush3.bf16.msra.mxu0 %v45172_v21 }
0x168b   :  { %41888 = vmatprep.subr.bf16.mxu0 %v49135_v1 }
0x168d   :  { %36690 = vmatmul.mubr.f32.vlgmr.msra.gmra.mrb[54].mxu0 %v10241_v29  ;;  %v46669_v29 = vld [vmem:[%s49078_s10] ss:$0 sm:$0xff] }
0x168e   :  { %41890 = vmatpush3.bf16.msra.mxu0 %v44958_v8  ;;  %36814 = vmatprep.mubr.msk.f32.mxu0 %vm44853_vm0, %v49134_v0 }
0x168f   :  { %41891 = vmatprep.subr.bf16.mxu0 %v49135_v1 }
0x1692   :  { %41893 = vmatpush3.bf16.msra.mxu0 %v44960_v11 }
0x1693   :  { %41900 = vmatprep.subr.bf16.mxu0 %v49135_v1 }
0x1760   :  { %v10701_v23 = vpop.f32.mrb[54].mxu0 }
0x1761   :  { %v44240_v58 = vadd.f32 %v46600_v47, %v10701_v23  ;;  %v36691_v28 = vpop.f32.mrb[55].mxu0 }
0x1763   :  { %v10706_v60 = vmin.f32 %v44240_v58, 0.0  ;;  %vm10705_vm3 = vcmp.gt.f32.partialorder %v44240_v58, 0.0 }
0x1765   :  { %v10707_v56 = vmul.f32 1.442695, %v10706_v60 }
0x1767   :  { %44700 = vpow2.f32 %v10707_v56 }
0x1771   :  { %v44701_v61 = vpop.eup %44700 }
0x1772   :  { %v31961_v37 = vadd.f32 -1.0, %v44701_v61  ;;  %v49149_v61 = vld [vmem:[#allocation17_spill] sm:$0xff] }
0x1774   :  { %v10710_v39 = vsel %vm10705_vm3, %v44240_v58, %v31961_v37  ;;  %v49150_v37 = vld [vmem:[#allocation18_spill] sm:$0xff] }
0x1775   :  { %v10712_v53 = vsel %vm625_vm2, %v10710_v39, 0 }
0x1776   :  { %v10787_v22 = vand.u32 4294901760, %v10712_v53 }
0x1778   :  { %v10788_v57 = vsub.f32 %v10712_v53, %v10787_v22 }
0x177a   :  { %v10789_v62 = vand.u32 4294901760, %v10788_v57 }
0x177c   :  { %v10790_v15 = vsub.f32 %v10788_v57, %v10789_v62 }
0x177e   :  { %v10791_v3 = vand.u32 4294901760, %v10790_v15 }
0x1780   :  { %36709 = vmatmul.mubr.f32.vlgmr.msra.gmra.mrb[54].mxu1 %v10791_v3 }
0x1781   :  { %41830 = vmatpush3.bf16.msra.mxu1 %v45439_v50  ;;  %36727 = vmatprep.mubr.msk.f32.mxu1 %vm44853_vm0, %v49134_v0 }
0x1782   :  { %41831 = vmatprep.subr.bf16.mxu1 %v49135_v1 }
0x1785   :  { %41833 = vmatpush3.bf16.msra.mxu1 %v45449_v40 }
0x1786   :  { %41834 = vmatprep.subr.bf16.mxu1 %v49135_v1 }
0x1789   :  { %41836 = vmatpush3.bf16.msra.mxu1 %v45458_v10 }
0x178a   :  { %41837 = vmatprep.subr.bf16.mxu1 %v49135_v1 }
0x178d   :  { %41839 = vmatpush3.bf16.msra.mxu1 %v45462_v48 }
0x178e   :  { %41840 = vmatprep.subr.bf16.mxu1 %v49135_v1 }
0x1790   :  { %36728 = vmatmul.mubr.f32.vlgmr.msra.gmra.mrb[54].mxu1 %v10787_v22 }
0x1791   :  { %41842 = vmatpush3.bf16.msra.mxu1 %v45468_v36  ;;  %36746 = vmatprep.mubr.msk.f32.mxu1 %vm44853_vm0, %v49134_v0 }
0x1792   :  { %41843 = vmatprep.subr.bf16.mxu1 %v49135_v1 }
0x1795   :  { %41845 = vmatpush3.bf16.msra.mxu1 %v45475_v5 }
0x1796   :  { %41846 = vmatprep.subr.bf16.mxu1 %v49135_v1 }
0x1799   :  { %41848 = vmatpush3.bf16.msra.mxu1 %v45483_v6 }
0x179a   :  { %41849 = vmatprep.subr.bf16.mxu1 %v49135_v1 }
0x179d   :  { %41851 = vmatpush3.bf16.msra.mxu1 %v45489_v55 }
0x179e   :  { %41852 = vmatprep.subr.bf16.mxu1 %v49135_v1 }
0x17a0   :  { %36747 = vmatmul.mubr.f32.vlgmr.msra.gmra.mrb[54].mxu1 %v10788_v57  ;;  %v49151_v57 = vld [vmem:[#allocation19_spill] sm:$0xff] }
0x17a1   :  { %41854 = vmatpush3.bf16.msra.mxu1 %v45059_v54  ;;  %36765 = vmatprep.mubr.msk.f32.mxu1 %vm44853_vm0, %v49134_v0 }
0x17a2   :  { %41855 = vmatprep.subr.bf16.mxu1 %v49135_v1 }
0x17a5   :  { %41857 = vmatpush3.bf16.msra.mxu1 %v45100_v2 }
0x17a6   :  { %41858 = vmatprep.subr.bf16.mxu1 %v49135_v1 }
0x17a9   :  { %41860 = vmatpush3.bf16.msra.mxu1 %v45145_v14 }
0x17aa   :  { %41861 = vmatprep.subr.bf16.mxu1 %v49135_v1 }
0x17ad   :  { %41863 = vmatpush3.bf16.msra.mxu1 %v45165_v20 }
0x17ae   :  { %41864 = vmatprep.subr.bf16.mxu1 %v49135_v1 }
0x17b0   :  { %36766 = vmatmul.mubr.f32.vlgmr.msra.gmra.mrb[54].mxu1 %v10789_v62 }
0x17b1   :  { %41866 = vmatpush3.bf16.msra.mxu1 %v45507_v4  ;;  %36784 = vmatprep.mubr.msk.f32.mxu1 %vm44853_vm0, %v49134_v0 }
0x17b2   :  { %41867 = vmatprep.subr.bf16.mxu1 %v49135_v1 }
0x17b5   :  { %41869 = vmatpush3.bf16.msra.mxu1 %v45515_v45 }
0x17b6   :  { %41870 = vmatprep.subr.bf16.mxu1 %v49135_v1 }
0x17b9   :  { %41872 = vmatpush3.bf16.msra.mxu1 %v45525_v30 }
0x17ba   :  { %41873 = vmatprep.subr.bf16.mxu1 %v49135_v1 }
0x17bd   :  { %41875 = vmatpush3.bf16.msra.mxu1 %v45529_v9 }
0x17be   :  { %41876 = vmatprep.subr.bf16.mxu1 %v49135_v1 }
0x17c0   :  { %36785 = vmatmul.mubr.f32.vlgmr.msra.gmra.mrb[54].mxu1 %v10787_v22 }
0x17c1   :  { %41878 = vmatpush3.bf16.msra.mxu1 %v45059_v54  ;;  %36803 = vmatprep.mubr.msk.f32.mxu1 %vm44853_vm0, %v49134_v0 }
0x17c2   :  { %41879 = vmatprep.subr.bf16.mxu1 %v49135_v1 }
0x17c5   :  { %41881 = vmatpush3.bf16.msra.mxu1 %v45100_v2 }
0x17c6   :  { %41882 = vmatprep.subr.bf16.mxu1 %v49135_v1 }
0x17c9   :  { %41884 = vmatpush3.bf16.msra.mxu1 %v45145_v14 }
0x17ca   :  { %41885 = vmatprep.subr.bf16.mxu1 %v49135_v1 }
0x17cd   :  { %41887 = vmatpush3.bf16.msra.mxu1 %v45165_v20 }
0x17ce   :  { %41894 = vmatprep.subr.bf16.mxu1 %v49135_v1 }
0x17d0   :  { %36804 = vmatmul.mubr.f32.vlgmr.msra.gmra.mrb[54].mxu1 %v10787_v22  ;;  %v11258_v22 = vstv %s11257_s22 }
0x17d1   :  { %41896 = vmatpush3.bf16.msra.mxu1 %v44971_v31  ;;  %36825 = vmatprep.mubr.msk.f32.mxu1 %vm44853_vm0, %v49134_v0  ;;  %v11259_v62 = vmul.f32 %v49151_v57, %v11258_v22 }
0x17d2   :  { %41897 = vmatprep.subr.bf16.mxu1 %v49135_v1 }
0x17d5   :  { %41899 = vmatpush3.bf16.msra.mxu1 %v44976_v33 }
0x17d6   :  { %41906 = vmatprep.subr.bf16.mxu1 %v49135_v1 }
0x18a3   :  { %v11247_v13 = vpop.f32.mrb[54].mxu1 }
0x18a4   :  { %v44241_v41 = vadd.f32 %v46669_v29, %v11247_v13  ;;  %v36805_v27 = vpop.f32.mrb[55].mxu1 }
0x18a6   :  { %v11254_v32 = vmul.f32 %v44241_v41, %v11253_v42 }
0x18a8   :  { %v46673_v38 = vadd.f32 %v11254_v32, %v46487_v44 }
0x18aa   :  { %v11261_v23 = vsel %vm71_vm1, %v46673_v38, 0 }
0x18ab   :  { %v11332_v58 = vand.u32 4294901760, %v11261_v23 }
0x18ad   :  { %v11333_v28 = vsub.f32 %v11261_v23, %v11332_v58  ;;  %36826 = vmatmul.mubr.f32.vlgmr.msra.gmra.mrb[56].mxu1 %v11332_v58 }
0x18ae   :  { %41908 = vmatpush3.bf16.msra.mxu1 %v44958_v8  ;;  %36847 = vmatprep.mubr.msk.f32.mxu1 %vm44853_vm0, %v49134_v0 }
0x18af   :  { %41909 = vmatprep.subr.bf16.mxu1 %v49135_v1  ;;  %v11334_v60 = vand.u32 4294901760, %v11333_v28 }
0x18b1   :  { %v11335_v56 = vsub.f32 %v11333_v28, %v11334_v60 }
0x18b2   :  { %41911 = vmatpush3.bf16.msra.mxu1 %v44960_v11 }
0x18b3   :  { %41918 = vmatprep.subr.bf16.mxu1 %v49135_v1  ;;  %v11336_v44 = vand.u32 4294901760, %v11335_v56 }
0x18b5   :  { %36848 = vmatmul.mubr.f32.vlgmr.msra.gmra.mrb[58].mxu1 %v11334_v60  ;;  %36815 = vmatmul.mubr.f32.vlgmr.msra.gmra.mrb[56].mxu0 %v11336_v44 }
0x18b6   :  { %41902 = vmatpush3.bf16.msra.mxu0 %v49143_v52  ;;  %41920 = vmatpush3.bf16.msra.mxu1 %v44958_v8 }
0x18b7   :  { %41903 = vmatprep.subr.bf16.mxu0 %v49135_v1  ;;  %41921 = vmatprep.subr.bf16.mxu1 %v49135_v1 }
0x18b8   :  { %36836 = vmatprep.mubr.msk.f32.mxu0 %vm44853_vm0, %v49134_v0  ;;  %36869 = vmatprep.mubr.msk.f32.mxu1 %vm44853_vm0, %v49134_v0 }
0x18ba   :  { %41905 = vmatpush3.bf16.msra.mxu0 %v49144_v51  ;;  %41923 = vmatpush3.bf16.msra.mxu1 %v44960_v11 }
0x18bb   :  { %41912 = vmatprep.subr.bf16.mxu0 %v49135_v1  ;;  %41996 = vmatprep.subr.bf16.mxu1 %v49135_v1 }
0x18bd   :  { %36837 = vmatmul.mubr.f32.vlgmr.msra.gmra.mrb[58].mxu0 %v11333_v28  ;;  %36870 = vmatmul.mubr.f32.vlgmr.msra.gmra.mrb[60].mxu1 %v11332_v58 }
0x18be   :  { %41914 = vmatpush3.bf16.msra.mxu0 %v49149_v61  ;;  %36858 = vmatprep.mubr.msk.f32.mxu0 %vm44853_vm0, %v49134_v0 }
0x18bf   :  { %41915 = vmatprep.subr.bf16.mxu0 %v49135_v1  ;;  %41998 = vmatpush3.bf16.msra.mxu1 %v45059_v54 }
0x18c0   :  { %41999 = vmatprep.subr.bf16.mxu1 %v49135_v1  ;;  %37002 = vmatprep.mubr.msk.f32.mxu1 %vm44853_vm0, %v49134_v0 }
0x18c2   :  { %41917 = vmatpush3.bf16.msra.mxu0 %v49150_v37 }
0x18c3   :  { %41924 = vmatprep.subr.bf16.mxu0 %v49135_v1  ;;  %42001 = vmatpush3.bf16.msra.mxu1 %v45100_v2 }
0x18c4   :  { %42002 = vmatprep.subr.bf16.mxu1 %v49135_v1 }
0x18c5   :  { %36859 = vmatmul.mubr.f32.vlgmr.msra.gmra.mrb[60].mxu0 %v11332_v58 }
0x18c6   :  { %41926 = vmatpush3.bf16.msra.mxu0 %v45078_v59  ;;  %36888 = vmatprep.mubr.msk.f32.mxu0 %vm44853_vm0, %v49134_v0 }
0x18c7   :  { %41927 = vmatprep.subr.bf16.mxu0 %v49135_v1  ;;  %42004 = vmatpush3.bf16.msra.mxu1 %v45145_v14 }
0x18c8   :  { %42005 = vmatprep.subr.bf16.mxu1 %v49135_v1 }
0x18ca   :  { %41929 = vmatpush3.bf16.msra.mxu0 %v45120_v7 }
0x18cb   :  { %41930 = vmatprep.subr.bf16.mxu0 %v49135_v1  ;;  %42007 = vmatpush3.bf16.msra.mxu1 %v45165_v20 }
0x18cc   :  { %42008 = vmatprep.subr.bf16.mxu1 %v49135_v1 }
0x18ce   :  { %41932 = vmatpush3.bf16.msra.mxu0 %v45154_v17 }
0x18cf   :  { %41933 = vmatprep.subr.bf16.mxu0 %v49135_v1 }
0x18d2   :  { %41935 = vmatpush3.bf16.msra.mxu0 %v45172_v21 }
0x18d3   :  { %41936 = vmatprep.subr.bf16.mxu0 %v49135_v1 }
0x1980   :  { %v11429_v39 = vpop.f32.mrb[56].mxu1 }
0x1981   :  { %v36827_v53 = vpop.f32.mrb[57].mxu1 }
0x1988   :  { %v11586_v15 = vpop.f32.mrb[58].mxu1  ;;  %v11338_v3 = vpop.f32.mrb[56].mxu0 }
0x1989   :  { %v11339_v13 = vadd.f32 %v11338_v3, %v11259_v62  ;;  %v36849_v42 = vpop.f32.mrb[59].mxu1  ;;  %v36816_v41 = vpop.f32.mrb[57].mxu0 }
0x198b   :  { %v11430_v27 = vadd.f32 %v11429_v39, %v11339_v13 }
0x1990   :  { %v11509_v32 = vpop.f32.mrb[58].mxu0  ;;  %v11744_v23 = vpop.f32.mrb[60].mxu1 }
0x1991   :  { %v11510_v58 = vadd.f32 %v11509_v32, %v11430_v27  ;;  %v36838_v28 = vpop.f32.mrb[59].mxu0  ;;  %v36871_v60 = vpop.f32.mrb[61].mxu1 }
0x1993   :  { %v11587_v56 = vadd.f32 %v11586_v15, %v11510_v58 }
0x1998   :  { %v11669_v44 = vpop.f32.mrb[60].mxu0 }
0x1999   :  { %v11670_v37 = vadd.f32 %v11669_v44, %v11587_v56  ;;  %v36860_v61 = vpop.f32.mrb[61].mxu0 }
0x199b   :  { %v11745_v51 = vadd.f32 %v11744_v23, %v11670_v37 }
0x199d   :  { %v11748_v53 = vadd.f32 %v46361_v18, %v11745_v51 }
0x199f   :  { %v11750_v52 = vmin.f32 %v11748_v53, 0.0  ;;  %vm11749_vm4 = vcmp.gt.f32.partialorder %v11748_v53, 0.0 }
0x19a1   :  { %v11751_v22 = vmul.f32 1.442695, %v11750_v52 }
0x19a3   :  { %44702 = vpow2.f32 %v11751_v22 }
0x19ad   :  { %v44703_v57 = vpop.eup %44702 }
0x19ae   :  { %v31962_v62 = vadd.f32 -1.0, %v44703_v57 }
0x19b0   :  { %v11754_v3 = vsel %vm11749_vm4, %v11748_v53, %v31962_v62  ;;  %v12843_v62 = vstv %s12842_s8  ;;  %s23976_s8 = smul.f32 15.0, %s49069_s1 }
0x19b1   :  { %v11756_v39 = vsel %vm625_vm2, %v11754_v3, 0 }
0x19b2   :  { %v11831_v13 = vand.u32 4294901760, %v11756_v39  ;;  %s23977_s26 = sadd.f32 %s23976_s8, %s49068_s0  ;;  %s27156_s8 = smul.f32 17.0, %s49069_s1 }
0x19b4   :  { %v11832_v42 = vsub.f32 %v11756_v39, %v11831_v13 }
0x19b6   :  { %v11833_v41 = vand.u32 4294901760, %v11832_v42 }
0x19b8   :  { %v11834_v27 = vsub.f32 %v11832_v42, %v11833_v41 }
0x19ba   :  { %v11835_v15 = vand.u32 4294901760, %v11834_v27 }
0x19bc   :  { %36889 = vmatmul.mubr.f32.vlgmr.msra.gmra.mrb[62].mxu0 %v11835_v15 }
0x19bd   :  { %41938 = vmatpush3.bf16.msra.mxu0 %v45261_v25  ;;  %36907 = vmatprep.mubr.msk.f32.mxu0 %vm44853_vm0, %v49134_v0 }
0x19be   :  { %41939 = vmatprep.subr.bf16.mxu0 %v49135_v1 }
0x19c1   :  { %41941 = vmatpush3.bf16.msra.mxu0 %v45271_v19 }
0x19c2   :  { %41942 = vmatprep.subr.bf16.mxu0 %v49135_v1 }
0x19c5   :  { %41944 = vmatpush3.bf16.msra.mxu0 %v45280_v35 }
0x19c6   :  { %41945 = vmatprep.subr.bf16.mxu0 %v49135_v1 }
0x19c9   :  { %41947 = vmatpush3.bf16.msra.mxu0 %v45284_v24 }
0x19ca   :  { %41948 = vmatprep.subr.bf16.mxu0 %v49135_v1 }
0x19cc   :  { %36908 = vmatmul.mubr.f32.vlgmr.msra.gmra.mrb[62].mxu0 %v11831_v13 }
0x19cd   :  { %41950 = vmatpush3.bf16.msra.mxu0 %v45290_v26  ;;  %36926 = vmatprep.mubr.msk.f32.mxu0 %vm44853_vm0, %v49134_v0 }
0x19ce   :  { %41951 = vmatprep.subr.bf16.mxu0 %v49135_v1 }
0x19d1   :  { %41953 = vmatpush3.bf16.msra.mxu0 %v45297_v43 }
0x19d2   :  { %41954 = vmatprep.subr.bf16.mxu0 %v49135_v1 }
0x19d5   :  { %41956 = vmatpush3.bf16.msra.mxu0 %v45305_v49 }
0x19d6   :  { %41957 = vmatprep.subr.bf16.mxu0 %v49135_v1 }
0x19d9   :  { %41959 = vmatpush3.bf16.msra.mxu0 %v45311_v12 }
0x19da   :  { %41960 = vmatprep.subr.bf16.mxu0 %v49135_v1 }
0x19dc   :  { %36927 = vmatmul.mubr.f32.vlgmr.msra.gmra.mrb[62].mxu0 %v11832_v42 }
0x19dd   :  { %41962 = vmatpush3.bf16.msra.mxu0 %v45078_v59  ;;  %36945 = vmatprep.mubr.msk.f32.mxu0 %vm44853_vm0, %v49134_v0 }
0x19de   :  { %41963 = vmatprep.subr.bf16.mxu0 %v49135_v1 }
0x19e1   :  { %41965 = vmatpush3.bf16.msra.mxu0 %v45120_v7 }
0x19e2   :  { %41966 = vmatprep.subr.bf16.mxu0 %v49135_v1 }
0x19e5   :  { %41968 = vmatpush3.bf16.msra.mxu0 %v45154_v17 }
0x19e6   :  { %41969 = vmatprep.subr.bf16.mxu0 %v49135_v1 }
0x19e9   :  { %41971 = vmatpush3.bf16.msra.mxu0 %v45172_v21 }
0x19ea   :  { %41972 = vmatprep.subr.bf16.mxu0 %v49135_v1 }
0x19ec   :  { %36946 = vmatmul.mubr.f32.vlgmr.msra.gmra.mrb[62].mxu0 %v11833_v41 }
0x19ed   :  { %41974 = vmatpush3.bf16.msra.mxu0 %v45329_v34  ;;  %36964 = vmatprep.mubr.msk.f32.mxu0 %vm44853_vm0, %v49134_v0 }
0x19ee   :  { %41975 = vmatprep.subr.bf16.mxu0 %v49135_v1 }
0x19f1   :  { %41977 = vmatpush3.bf16.msra.mxu0 %v45337_v63 }
0x19f2   :  { %41978 = vmatprep.subr.bf16.mxu0 %v49135_v1 }
0x19f5   :  { %41980 = vmatpush3.bf16.msra.mxu0 %v45347_v16 }
0x19f6   :  { %41981 = vmatprep.subr.bf16.mxu0 %v49135_v1 }
0x19f9   :  { %41983 = vmatpush3.bf16.msra.mxu0 %v45351_v46 }
0x19fa   :  { %41984 = vmatprep.subr.bf16.mxu0 %v49135_v1 }
0x19fc   :  { %36965 = vmatmul.mubr.f32.vlgmr.msra.gmra.mrb[62].mxu0 %v11831_v13 }
0x19fd   :  { %41986 = vmatpush3.bf16.msra.mxu0 %v45078_v59  ;;  %36983 = vmatprep.mubr.msk.f32.mxu0 %vm44853_vm0, %v49134_v0 }
0x19fe   :  { %41987 = vmatprep.subr.bf16.mxu0 %v49135_v1 }
0x1a01   :  { %41989 = vmatpush3.bf16.msra.mxu0 %v45120_v7 }
0x1a02   :  { %41990 = vmatprep.subr.bf16.mxu0 %v49135_v1 }
0x1a05   :  { %41992 = vmatpush3.bf16.msra.mxu0 %v45154_v17 }
0x1a06   :  { %41993 = vmatprep.subr.bf16.mxu0 %v49135_v1 }
0x1a09   :  { %41995 = vmatpush3.bf16.msra.mxu0 %v45172_v21 }
0x1a0a   :  { %42068 = vmatprep.subr.bf16.mxu0 %v49135_v1 }
0x1a0c   :  { %36984 = vmatmul.mubr.f32.vlgmr.msra.gmra.mrb[62].mxu0 %v11831_v13 }
0x1a0d   :  { %42070 = vmatpush3.bf16.msra.mxu0 %v44958_v8  ;;  %37108 = vmatprep.mubr.msk.f32.mxu0 %vm44853_vm0, %v49134_v0 }
0x1a0e   :  { %42071 = vmatprep.subr.bf16.mxu0 %v49135_v1 }
0x1a11   :  { %42073 = vmatpush3.bf16.msra.mxu0 %v44960_v11 }
0x1a12   :  { %42080 = vmatprep.subr.bf16.mxu0 %v49135_v1 }
0x1adf   :  { %v12291_v52 = vpop.f32.mrb[62].mxu0 }
0x1ae0   :  { %v44242_v51 = vadd.f32 %v46600_v47, %v12291_v52  ;;  %v36985_v18 = vpop.f32.mrb[63].mxu0 }
0x1ae1   :  { %v49152_v18 = vld [vmem:[#allocation15_spill] sm:$0xff] }
0x1ae2   :  { %v12296_v61 = vmin.f32 %v44242_v51, 0.0  ;;  %vm12295_vm5 = vcmp.gt.f32.partialorder %v44242_v51, 0.0 }
0x1ae4   :  { %v12297_v37 = vmul.f32 1.442695, %v12296_v61  ;;  %v49153_v61 = vld [vmem:[#allocation16_spill] sm:$0xff] }
0x1ae6   :  { %44704 = vpow2.f32 %v12297_v37  ;;  %v49154_v37 = vld [vmem:[#allocation17_spill] sm:$0xff] }
0x1af0   :  { %v44705_v32 = vpop.eup %44704 }
0x1af1   :  { %v31963_v23 = vadd.f32 -1.0, %v44705_v32  ;;  %v49155_v32 = vld [vmem:[#allocation18_spill] sm:$0xff] }
0x1af3   :  { %v12300_v58 = vsel %vm12295_vm5, %v44242_v51, %v31963_v23 }
0x1af4   :  { %v12302_v28 = vsel %vm625_vm2, %v12300_v58, 0 }
0x1af5   :  { %v12377_v60 = vand.u32 4294901760, %v12302_v28 }
0x1af7   :  { %v12378_v56 = vsub.f32 %v12302_v28, %v12377_v60  ;;  %v12848_v28 = vstv %s12847_s4  ;;  %s19202_s4 = scalar_select %p19201_p13, %s49069_s1, 0.0 }
0x1af9   :  { %v12379_v44 = vand.u32 4294901760, %v12378_v56 }
0x1afb   :  { %v12380_v53 = vsub.f32 %v12378_v56, %v12379_v44 }
0x1afd   :  { %v12381_v22 = vand.u32 4294901760, %v12380_v53 }
0x1aff   :  { %37003 = vmatmul.mubr.f32.vlgmr.msra.gmra.mrb[62].mxu1 %v12381_v22 }
0x1b00   :  { %42010 = vmatpush3.bf16.msra.mxu1 %v45439_v50  ;;  %37021 = vmatprep.mubr.msk.f32.mxu1 %vm44853_vm0, %v49134_v0 }
0x1b01   :  { %42011 = vmatprep.subr.bf16.mxu1 %v49135_v1 }
0x1b04   :  { %42013 = vmatpush3.bf16.msra.mxu1 %v45449_v40 }
0x1b05   :  { %42014 = vmatprep.subr.bf16.mxu1 %v49135_v1 }
0x1b08   :  { %42016 = vmatpush3.bf16.msra.mxu1 %v45458_v10 }
0x1b09   :  { %42017 = vmatprep.subr.bf16.mxu1 %v49135_v1 }
0x1b0c   :  { %42019 = vmatpush3.bf16.msra.mxu1 %v45462_v48 }
0x1b0d   :  { %42020 = vmatprep.subr.bf16.mxu1 %v49135_v1 }
0x1b0f   :  { %37022 = vmatmul.mubr.f32.vlgmr.msra.gmra.mrb[62].mxu1 %v12377_v60 }
0x1b10   :  { %42022 = vmatpush3.bf16.msra.mxu1 %v45468_v36  ;;  %37040 = vmatprep.mubr.msk.f32.mxu1 %vm44853_vm0, %v49134_v0 }
0x1b11   :  { %42023 = vmatprep.subr.bf16.mxu1 %v49135_v1 }
0x1b14   :  { %42025 = vmatpush3.bf16.msra.mxu1 %v45475_v5 }
0x1b15   :  { %42026 = vmatprep.subr.bf16.mxu1 %v49135_v1 }
0x1b18   :  { %42028 = vmatpush3.bf16.msra.mxu1 %v45483_v6 }
0x1b19   :  { %42029 = vmatprep.subr.bf16.mxu1 %v49135_v1 }
0x1b1c   :  { %42031 = vmatpush3.bf16.msra.mxu1 %v45489_v55 }
0x1b1d   :  { %42032 = vmatprep.subr.bf16.mxu1 %v49135_v1 }
0x1b1f   :  { %37041 = vmatmul.mubr.f32.vlgmr.msra.gmra.mrb[62].mxu1 %v12378_v56 }
0x1b20   :  { %42034 = vmatpush3.bf16.msra.mxu1 %v45059_v54  ;;  %37059 = vmatprep.mubr.msk.f32.mxu1 %vm44853_vm0, %v49134_v0 }
0x1b21   :  { %42035 = vmatprep.subr.bf16.mxu1 %v49135_v1 }
0x1b24   :  { %42037 = vmatpush3.bf16.msra.mxu1 %v45100_v2 }
0x1b25   :  { %42038 = vmatprep.subr.bf16.mxu1 %v49135_v1 }
0x1b28   :  { %42040 = vmatpush3.bf16.msra.mxu1 %v45145_v14 }
0x1b29   :  { %42041 = vmatprep.subr.bf16.mxu1 %v49135_v1 }
0x1b2c   :  { %42043 = vmatpush3.bf16.msra.mxu1 %v45165_v20 }
0x1b2d   :  { %42044 = vmatprep.subr.bf16.mxu1 %v49135_v1 }
0x1b2f   :  { %37060 = vmatmul.mubr.f32.vlgmr.msra.gmra.mrb[62].mxu1 %v12379_v44 }
0x1b30   :  { %42046 = vmatpush3.bf16.msra.mxu1 %v45507_v4  ;;  %37078 = vmatprep.mubr.msk.f32.mxu1 %vm44853_vm0, %v49134_v0 }
0x1b31   :  { %42047 = vmatprep.subr.bf16.mxu1 %v49135_v1 }
0x1b34   :  { %42049 = vmatpush3.bf16.msra.mxu1 %v45515_v45 }
0x1b35   :  { %42050 = vmatprep.subr.bf16.mxu1 %v49135_v1 }
0x1b38   :  { %42052 = vmatpush3.bf16.msra.mxu1 %v45525_v30 }
0x1b39   :  { %42053 = vmatprep.subr.bf16.mxu1 %v49135_v1 }
0x1b3c   :  { %42055 = vmatpush3.bf16.msra.mxu1 %v45529_v9 }
0x1b3d   :  { %42056 = vmatprep.subr.bf16.mxu1 %v49135_v1 }
0x1b3f   :  { %37079 = vmatmul.mubr.f32.vlgmr.msra.gmra.mrb[62].mxu1 %v12377_v60 }
0x1b40   :  { %42058 = vmatpush3.bf16.msra.mxu1 %v45059_v54  ;;  %37097 = vmatprep.mubr.msk.f32.mxu1 %vm44853_vm0, %v49134_v0 }
0x1b41   :  { %42059 = vmatprep.subr.bf16.mxu1 %v49135_v1 }
0x1b44   :  { %42061 = vmatpush3.bf16.msra.mxu1 %v45100_v2 }
0x1b45   :  { %42062 = vmatprep.subr.bf16.mxu1 %v49135_v1 }
0x1b48   :  { %42064 = vmatpush3.bf16.msra.mxu1 %v45145_v14 }
0x1b49   :  { %42065 = vmatprep.subr.bf16.mxu1 %v49135_v1 }
0x1b4c   :  { %42067 = vmatpush3.bf16.msra.mxu1 %v45165_v20 }
0x1b4d   :  { %42074 = vmatprep.subr.bf16.mxu1 %v49135_v1 }
0x1b4f   :  { %37098 = vmatmul.mubr.f32.vlgmr.msra.gmra.mrb[62].mxu1 %v12377_v60  ;;  %v46909_v60 = vld [vmem:[%s49073_s5] ss:$0 sm:$0xff] }
0x1b50   :  { %42076 = vmatpush3.bf16.msra.mxu1 %v44971_v31  ;;  %37119 = vmatprep.mubr.msk.f32.mxu1 %vm44853_vm0, %v49134_v0  ;;  %49156 = vst [vmem:[#allocation19_spill] sm:$0xff] %v46909_v60  ;;  %v12849_v56 = vmul.f32 %v46909_v60, %v12848_v28  ;;  %v46915_v28 = vld [vmem:[%s49074_s6] ss:$0 sm:$0xff] }
0x1b51   :  { %42077 = vmatprep.subr.bf16.mxu1 %v49135_v1 }
0x1b54   :  { %42079 = vmatpush3.bf16.msra.mxu1 %v44976_v33 }
0x1b55   :  { %42086 = vmatprep.subr.bf16.mxu1 %v49135_v1 }
0x1c22   :  { %v12837_v57 = vpop.f32.mrb[62].mxu1 }
0x1c23   :  { %v44243_v3 = vadd.f32 %v46669_v29, %v12837_v57  ;;  %v37099_v39 = vpop.f32.mrb[63].mxu1 }
0x1c25   :  { %v12844_v13 = vmul.f32 %v44243_v3, %v12843_v62 }
0x1c27   :  { %v46852_v42 = vadd.f32 %v12844_v13, %v46673_v38 }
0x1c29   :  { %v12851_v41 = vsel %vm71_vm1, %v46852_v42, 0 }
0x1c2a   :  { %v12922_v27 = vand.u32 4294901760, %v12851_v41 }
0x1c2c   :  { %v12923_v15 = vsub.f32 %v12851_v41, %v12922_v27  ;;  %37120 = vmatmul.mubr.f32.vlgmr.msra.gmra.mrb[64].mxu1 %v12922_v27 }
0x1c2d   :  { %42088 = vmatpush3.bf16.msra.mxu1 %v44958_v8  ;;  %37141 = vmatprep.mubr.msk.f32.mxu1 %vm44853_vm0, %v49134_v0 }
0x1c2e   :  { %42089 = vmatprep.subr.bf16.mxu1 %v49135_v1  ;;  %v12924_v52 = vand.u32 4294901760, %v12923_v15 }
0x1c30   :  { %v12925_v51 = vsub.f32 %v12923_v15, %v12924_v52 }
0x1c31   :  { %42091 = vmatpush3.bf16.msra.mxu1 %v44960_v11 }
0x1c32   :  { %42098 = vmatprep.subr.bf16.mxu1 %v49135_v1  ;;  %v12926_v38 = vand.u32 4294901760, %v12925_v51 }
0x1c34   :  { %37142 = vmatmul.mubr.f32.vlgmr.msra.gmra.mrb[66].mxu1 %v12924_v52  ;;  %37109 = vmatmul.mubr.f32.vlgmr.msra.gmra.mrb[64].mxu0 %v12926_v38 }
0x1c35   :  { %42082 = vmatpush3.bf16.msra.mxu0 %v49152_v18  ;;  %42100 = vmatpush3.bf16.msra.mxu1 %v44958_v8 }
0x1c36   :  { %42083 = vmatprep.subr.bf16.mxu0 %v49135_v1  ;;  %42101 = vmatprep.subr.bf16.mxu1 %v49135_v1 }
0x1c37   :  { %37130 = vmatprep.mubr.msk.f32.mxu0 %vm44853_vm0, %v49134_v0  ;;  %37163 = vmatprep.mubr.msk.f32.mxu1 %vm44853_vm0, %v49134_v0 }
0x1c39   :  { %42085 = vmatpush3.bf16.msra.mxu0 %v49153_v61  ;;  %42103 = vmatpush3.bf16.msra.mxu1 %v44960_v11 }
0x1c3a   :  { %42092 = vmatprep.subr.bf16.mxu0 %v49135_v1  ;;  %42176 = vmatprep.subr.bf16.mxu1 %v49135_v1 }
0x1c3c   :  { %37131 = vmatmul.mubr.f32.vlgmr.msra.gmra.mrb[66].mxu0 %v12923_v15  ;;  %37164 = vmatmul.mubr.f32.vlgmr.msra.gmra.mrb[68].mxu1 %v12922_v27 }
0x1c3d   :  { %42094 = vmatpush3.bf16.msra.mxu0 %v49154_v37  ;;  %37152 = vmatprep.mubr.msk.f32.mxu0 %vm44853_vm0, %v49134_v0 }
0x1c3e   :  { %42095 = vmatprep.subr.bf16.mxu0 %v49135_v1  ;;  %42178 = vmatpush3.bf16.msra.mxu1 %v45059_v54 }
0x1c3f   :  { %42179 = vmatprep.subr.bf16.mxu1 %v49135_v1  ;;  %37296 = vmatprep.mubr.msk.f32.mxu1 %vm44853_vm0, %v49134_v0 }
0x1c41   :  { %42097 = vmatpush3.bf16.msra.mxu0 %v49155_v32 }
0x1c42   :  { %42104 = vmatprep.subr.bf16.mxu0 %v49135_v1  ;;  %42181 = vmatpush3.bf16.msra.mxu1 %v45100_v2 }
0x1c43   :  { %42182 = vmatprep.subr.bf16.mxu1 %v49135_v1 }
0x1c44   :  { %37153 = vmatmul.mubr.f32.vlgmr.msra.gmra.mrb[68].mxu0 %v12922_v27 }
0x1c45   :  { %42106 = vmatpush3.bf16.msra.mxu0 %v45078_v59  ;;  %37182 = vmatprep.mubr.msk.f32.mxu0 %vm44853_vm0, %v49134_v0 }
0x1c46   :  { %42107 = vmatprep.subr.bf16.mxu0 %v49135_v1  ;;  %42184 = vmatpush3.bf16.msra.mxu1 %v45145_v14 }
0x1c47   :  { %42185 = vmatprep.subr.bf16.mxu1 %v49135_v1 }
0x1c49   :  { %42109 = vmatpush3.bf16.msra.mxu0 %v45120_v7 }
0x1c4a   :  { %42110 = vmatprep.subr.bf16.mxu0 %v49135_v1  ;;  %42187 = vmatpush3.bf16.msra.mxu1 %v45165_v20 }
0x1c4b   :  { %42188 = vmatprep.subr.bf16.mxu1 %v49135_v1 }
0x1c4d   :  { %42112 = vmatpush3.bf16.msra.mxu0 %v45154_v17 }
0x1c4e   :  { %42113 = vmatprep.subr.bf16.mxu0 %v49135_v1 }
0x1c51   :  { %42115 = vmatpush3.bf16.msra.mxu0 %v45172_v21 }
0x1c52   :  { %42116 = vmatprep.subr.bf16.mxu0 %v49135_v1 }
0x1cff   :  { %v13019_v23 = vpop.f32.mrb[64].mxu1 }
0x1d00   :  { %v37121_v58 = vpop.f32.mrb[65].mxu1 }
0x1d07   :  { %v13176_v44 = vpop.f32.mrb[66].mxu1  ;;  %v12928_v53 = vpop.f32.mrb[64].mxu0 }
0x1d08   :  { %v12929_v22 = vadd.f32 %v12928_v53, %v12849_v56  ;;  %v37143_v57 = vpop.f32.mrb[67].mxu1  ;;  %v37110_v62 = vpop.f32.mrb[65].mxu0 }
0x1d0a   :  { %v13020_v3 = vadd.f32 %v13019_v23, %v12929_v22 }
0x1d0f   :  { %v13099_v39 = vpop.f32.mrb[66].mxu0  ;;  %v13334_v13 = vpop.f32.mrb[68].mxu1 }
0x1d10   :  { %v13100_v41 = vadd.f32 %v13099_v39, %v13020_v3  ;;  %v37132_v27 = vpop.f32.mrb[67].mxu0  ;;  %v37165_v15 = vpop.f32.mrb[69].mxu1 }
0x1d12   :  { %v13177_v52 = vadd.f32 %v13176_v44, %v13100_v41 }
0x1d17   :  { %v13259_v51 = vpop.f32.mrb[68].mxu0 }
0x1d18   :  { %v13260_v38 = vadd.f32 %v13259_v51, %v13177_v52  ;;  %v37154_v58 = vpop.f32.mrb[69].mxu0 }
0x1d1a   :  { %v13335_v32 = vadd.f32 %v13334_v13, %v13260_v38 }
0x1d1c   :  { %v13338_v56 = vadd.f32 %v46915_v28, %v13335_v32 }
0x1d1e   :  { %v13340_v53 = vmin.f32 %v13338_v56, 0.0  ;;  %vm13339_vm6 = vcmp.gt.f32.partialorder %v13338_v56, 0.0 }
0x1d20   :  { %v13341_v57 = vmul.f32 1.442695, %v13340_v53 }
0x1d22   :  { %44706 = vpow2.f32 %v13341_v57 }
0x1d2c   :  { %v44707_v23 = vpop.eup %44706 }
0x1d2d   :  { %v31964_v22 = vadd.f32 -1.0, %v44707_v23 }
0x1d2f   :  { %v13344_v62 = vsel %vm13339_vm6, %v13338_v56, %v31964_v22 }
0x1d30   :  { %v13346_v44 = vsel %vm625_vm2, %v13344_v62, 0 }
0x1d31   :  { %v13421_v3 = vand.u32 4294901760, %v13346_v44 }
0x1d33   :  { %v13422_v39 = vsub.f32 %v13346_v44, %v13421_v3 }
0x1d35   :  { %v13423_v41 = vand.u32 4294901760, %v13422_v39 }
0x1d37   :  { %v13424_v13 = vsub.f32 %v13422_v39, %v13423_v41 }
0x1d39   :  { %v13425_v27 = vand.u32 4294901760, %v13424_v13 }
0x1d3b   :  { %37183 = vmatmul.mubr.f32.vlgmr.msra.gmra.mrb[70].mxu0 %v13425_v27 }
0x1d3c   :  { %42118 = vmatpush3.bf16.msra.mxu0 %v45261_v25  ;;  %37201 = vmatprep.mubr.msk.f32.mxu0 %vm44853_vm0, %v49134_v0 }
0x1d3d   :  { %42119 = vmatprep.subr.bf16.mxu0 %v49135_v1 }
0x1d40   :  { %42121 = vmatpush3.bf16.msra.mxu0 %v45271_v19 }
0x1d41   :  { %42122 = vmatprep.subr.bf16.mxu0 %v49135_v1 }
0x1d44   :  { %42124 = vmatpush3.bf16.msra.mxu0 %v45280_v35 }
0x1d45   :  { %42125 = vmatprep.subr.bf16.mxu0 %v49135_v1 }
0x1d48   :  { %42127 = vmatpush3.bf16.msra.mxu0 %v45284_v24 }
0x1d49   :  { %42128 = vmatprep.subr.bf16.mxu0 %v49135_v1 }
0x1d4b   :  { %37202 = vmatmul.mubr.f32.vlgmr.msra.gmra.mrb[70].mxu0 %v13421_v3 }
0x1d4c   :  { %42130 = vmatpush3.bf16.msra.mxu0 %v45290_v26  ;;  %37220 = vmatprep.mubr.msk.f32.mxu0 %vm44853_vm0, %v49134_v0 }
0x1d4d   :  { %42131 = vmatprep.subr.bf16.mxu0 %v49135_v1 }
0x1d50   :  { %42133 = vmatpush3.bf16.msra.mxu0 %v45297_v43 }
0x1d51   :  { %42134 = vmatprep.subr.bf16.mxu0 %v49135_v1 }
0x1d54   :  { %42136 = vmatpush3.bf16.msra.mxu0 %v45305_v49 }
0x1d55   :  { %42137 = vmatprep.subr.bf16.mxu0 %v49135_v1 }
0x1d58   :  { %42139 = vmatpush3.bf16.msra.mxu0 %v45311_v12 }
0x1d59   :  { %42140 = vmatprep.subr.bf16.mxu0 %v49135_v1 }
0x1d5b   :  { %37221 = vmatmul.mubr.f32.vlgmr.msra.gmra.mrb[70].mxu0 %v13422_v39  ;;  %v14433_v39 = vstv %s14432_s17  ;;  %s17612_s17 = scalar_select %p17611_p12, %s49069_s1, 0.0 }
0x1d5c   :  { %42142 = vmatpush3.bf16.msra.mxu0 %v45078_v59  ;;  %37239 = vmatprep.mubr.msk.f32.mxu0 %vm44853_vm0, %v49134_v0 }
0x1d5d   :  { %42143 = vmatprep.subr.bf16.mxu0 %v49135_v1 }
0x1d60   :  { %42145 = vmatpush3.bf16.msra.mxu0 %v45120_v7 }
0x1d61   :  { %42146 = vmatprep.subr.bf16.mxu0 %v49135_v1 }
0x1d64   :  { %42148 = vmatpush3.bf16.msra.mxu0 %v45154_v17 }
0x1d65   :  { %42149 = vmatprep.subr.bf16.mxu0 %v49135_v1 }
0x1d68   :  { %42151 = vmatpush3.bf16.msra.mxu0 %v45172_v21 }
0x1d69   :  { %42152 = vmatprep.subr.bf16.mxu0 %v49135_v1 }
0x1d6b   :  { %37240 = vmatmul.mubr.f32.vlgmr.msra.gmra.mrb[70].mxu0 %v13423_v41 }
0x1d6c   :  { %42154 = vmatpush3.bf16.msra.mxu0 %v45329_v34  ;;  %37258 = vmatprep.mubr.msk.f32.mxu0 %vm44853_vm0, %v49134_v0 }
0x1d6d   :  { %42155 = vmatprep.subr.bf16.mxu0 %v49135_v1 }
0x1d70   :  { %42157 = vmatpush3.bf16.msra.mxu0 %v45337_v63 }
0x1d71   :  { %42158 = vmatprep.subr.bf16.mxu0 %v49135_v1 }
0x1d74   :  { %42160 = vmatpush3.bf16.msra.mxu0 %v45347_v16 }
0x1d75   :  { %42161 = vmatprep.subr.bf16.mxu0 %v49135_v1 }
0x1d78   :  { %42163 = vmatpush3.bf16.msra.mxu0 %v45351_v46 }
0x1d79   :  { %42164 = vmatprep.subr.bf16.mxu0 %v49135_v1 }
0x1d7b   :  { %37259 = vmatmul.mubr.f32.vlgmr.msra.gmra.mrb[70].mxu0 %v13421_v3 }
0x1d7c   :  { %42166 = vmatpush3.bf16.msra.mxu0 %v45078_v59  ;;  %37277 = vmatprep.mubr.msk.f32.mxu0 %vm44853_vm0, %v49134_v0 }
0x1d7d   :  { %42167 = vmatprep.subr.bf16.mxu0 %v49135_v1 }
0x1d80   :  { %42169 = vmatpush3.bf16.msra.mxu0 %v45120_v7 }
0x1d81   :  { %42170 = vmatprep.subr.bf16.mxu0 %v49135_v1 }
0x1d84   :  { %42172 = vmatpush3.bf16.msra.mxu0 %v45154_v17 }
0x1d85   :  { %42173 = vmatprep.subr.bf16.mxu0 %v49135_v1 }
0x1d88   :  { %42175 = vmatpush3.bf16.msra.mxu0 %v45172_v21 }
0x1d89   :  { %42248 = vmatprep.subr.bf16.mxu0 %v49135_v1 }
0x1d8b   :  { %37278 = vmatmul.mubr.f32.vlgmr.msra.gmra.mrb[70].mxu0 %v13421_v3 }
0x1d8c   :  { %42250 = vmatpush3.bf16.msra.mxu0 %v44958_v8  ;;  %37402 = vmatprep.mubr.msk.f32.mxu0 %vm44853_vm0, %v49134_v0 }
0x1d8d   :  { %42251 = vmatprep.subr.bf16.mxu0 %v49135_v1 }
0x1d90   :  { %42253 = vmatpush3.bf16.msra.mxu0 %v44960_v11 }
0x1d91   :  { %42260 = vmatprep.subr.bf16.mxu0 %v49135_v1 }
0x1e5e   :  { %v13881_v32 = vpop.f32.mrb[70].mxu0 }
0x1e5f   :  { %v44244_v15 = vadd.f32 %v46600_v47, %v13881_v32  ;;  %v37279_v52 = vpop.f32.mrb[71].mxu0 }
0x1e61   :  { %v13886_v51 = vmin.f32 %v44244_v15, 0.0  ;;  %vm13885_vm7 = vcmp.gt.f32.partialorder %v44244_v15, 0.0 }
0x1e63   :  { %v13887_v38 = vmul.f32 1.442695, %v13886_v51 }
0x1e65   :  { %44708 = vpow2.f32 %v13887_v38 }
0x1e6f   :  { %v44709_v58 = vpop.eup %44708 }
0x1e70   :  { %v31965_v56 = vadd.f32 -1.0, %v44709_v58  ;;  %v49157_v58 = vld [vmem:[#allocation18_spill] sm:$0xff] }
0x1e72   :  { %v13890_v53 = vsel %vm13885_vm7, %v44244_v15, %v31965_v56 }
0x1e73   :  { %v13892_v57 = vsel %vm625_vm2, %v13890_v53, 0 }
0x1e74   :  { %v13967_v23 = vand.u32 4294901760, %v13892_v57 }
0x1e76   :  { %v13968_v22 = vsub.f32 %v13892_v57, %v13967_v23  ;;  %v14438_v57 = vstv %s14437_s18  ;;  %s17617_s18 = sadd.f32 %s17616_s21, %s49068_s0 }
0x1e78   :  { %v13969_v62 = vand.u32 4294901760, %v13968_v22 }
0x1e7a   :  { %v13970_v44 = vsub.f32 %v13968_v22, %v13969_v62 }
0x1e7c   :  { %v13971_v3 = vand.u32 4294901760, %v13970_v44 }
0x1e7e   :  { %37297 = vmatmul.mubr.f32.vlgmr.msra.gmra.mrb[70].mxu1 %v13971_v3 }
0x1e7f   :  { %42190 = vmatpush3.bf16.msra.mxu1 %v45439_v50  ;;  %37315 = vmatprep.mubr.msk.f32.mxu1 %vm44853_vm0, %v49134_v0 }
0x1e80   :  { %42191 = vmatprep.subr.bf16.mxu1 %v49135_v1 }
0x1e83   :  { %42193 = vmatpush3.bf16.msra.mxu1 %v45449_v40 }
0x1e84   :  { %42194 = vmatprep.subr.bf16.mxu1 %v49135_v1 }
0x1e87   :  { %42196 = vmatpush3.bf16.msra.mxu1 %v45458_v10 }
0x1e88   :  { %42197 = vmatprep.subr.bf16.mxu1 %v49135_v1 }
0x1e8b   :  { %42199 = vmatpush3.bf16.msra.mxu1 %v45462_v48 }
0x1e8c   :  { %42200 = vmatprep.subr.bf16.mxu1 %v49135_v1 }
0x1e8e   :  { %37316 = vmatmul.mubr.f32.vlgmr.msra.gmra.mrb[70].mxu1 %v13967_v23 }
0x1e8f   :  { %42202 = vmatpush3.bf16.msra.mxu1 %v45468_v36  ;;  %37334 = vmatprep.mubr.msk.f32.mxu1 %vm44853_vm0, %v49134_v0 }
0x1e90   :  { %42203 = vmatprep.subr.bf16.mxu1 %v49135_v1 }
0x1e93   :  { %42205 = vmatpush3.bf16.msra.mxu1 %v45475_v5 }
0x1e94   :  { %42206 = vmatprep.subr.bf16.mxu1 %v49135_v1 }
0x1e97   :  { %42208 = vmatpush3.bf16.msra.mxu1 %v45483_v6 }
0x1e98   :  { %42209 = vmatprep.subr.bf16.mxu1 %v49135_v1 }
0x1e9b   :  { %42211 = vmatpush3.bf16.msra.mxu1 %v45489_v55 }
0x1e9c   :  { %42212 = vmatprep.subr.bf16.mxu1 %v49135_v1 }
0x1e9e   :  { %37335 = vmatmul.mubr.f32.vlgmr.msra.gmra.mrb[70].mxu1 %v13968_v22 }
0x1e9f   :  { %42214 = vmatpush3.bf16.msra.mxu1 %v45059_v54  ;;  %37353 = vmatprep.mubr.msk.f32.mxu1 %vm44853_vm0, %v49134_v0 }
0x1ea0   :  { %42215 = vmatprep.subr.bf16.mxu1 %v49135_v1 }
0x1ea3   :  { %42217 = vmatpush3.bf16.msra.mxu1 %v45100_v2 }
0x1ea4   :  { %42218 = vmatprep.subr.bf16.mxu1 %v49135_v1 }
0x1ea7   :  { %42220 = vmatpush3.bf16.msra.mxu1 %v45145_v14 }
0x1ea8   :  { %42221 = vmatprep.subr.bf16.mxu1 %v49135_v1 }
0x1eab   :  { %42223 = vmatpush3.bf16.msra.mxu1 %v45165_v20 }
0x1eac   :  { %42224 = vmatprep.subr.bf16.mxu1 %v49135_v1 }
0x1eae   :  { %37354 = vmatmul.mubr.f32.vlgmr.msra.gmra.mrb[70].mxu1 %v13969_v62 }
0x1eaf   :  { %42226 = vmatpush3.bf16.msra.mxu1 %v45507_v4  ;;  %37372 = vmatprep.mubr.msk.f32.mxu1 %vm44853_vm0, %v49134_v0 }
0x1eb0   :  { %42227 = vmatprep.subr.bf16.mxu1 %v49135_v1 }
0x1eb3   :  { %42229 = vmatpush3.bf16.msra.mxu1 %v45515_v45 }
0x1eb4   :  { %42230 = vmatprep.subr.bf16.mxu1 %v49135_v1 }
0x1eb7   :  { %42232 = vmatpush3.bf16.msra.mxu1 %v45525_v30 }
0x1eb8   :  { %42233 = vmatprep.subr.bf16.mxu1 %v49135_v1 }
0x1ebb   :  { %42235 = vmatpush3.bf16.msra.mxu1 %v45529_v9 }
0x1ebc   :  { %42236 = vmatprep.subr.bf16.mxu1 %v49135_v1 }
0x1ebe   :  { %37373 = vmatmul.mubr.f32.vlgmr.msra.gmra.mrb[70].mxu1 %v13967_v23 }
0x1ebf   :  { %42238 = vmatpush3.bf16.msra.mxu1 %v45059_v54  ;;  %37391 = vmatprep.mubr.msk.f32.mxu1 %vm44853_vm0, %v49134_v0 }
0x1ec0   :  { %42239 = vmatprep.subr.bf16.mxu1 %v49135_v1 }
0x1ec3   :  { %42241 = vmatpush3.bf16.msra.mxu1 %v45100_v2 }
0x1ec4   :  { %42242 = vmatprep.subr.bf16.mxu1 %v49135_v1 }
0x1ec7   :  { %42244 = vmatpush3.bf16.msra.mxu1 %v45145_v14 }
0x1ec8   :  { %42245 = vmatprep.subr.bf16.mxu1 %v49135_v1 }
0x1ecb   :  { %42247 = vmatpush3.bf16.msra.mxu1 %v45165_v20 }
0x1ecc   :  { %42254 = vmatprep.subr.bf16.mxu1 %v49135_v1 }
0x1ece   :  { %37392 = vmatmul.mubr.f32.vlgmr.msra.gmra.mrb[70].mxu1 %v13967_v23  ;;  %v14439_v23 = vmul.f32 %v46909_v60, %v14438_v57 }
0x1ecf   :  { %42256 = vmatpush3.bf16.msra.mxu1 %v44971_v31  ;;  %37413 = vmatprep.mubr.msk.f32.mxu1 %vm44853_vm0, %v49134_v0 }
0x1ed0   :  { %42257 = vmatprep.subr.bf16.mxu1 %v49135_v1 }
0x1ed3   :  { %42259 = vmatpush3.bf16.msra.mxu1 %v44976_v33 }
0x1ed4   :  { %42266 = vmatprep.subr.bf16.mxu1 %v49135_v1 }
0x1fa1   :  { %v14427_v47 = vpop.f32.mrb[70].mxu1 }
0x1fa2   :  { %v44245_v41 = vadd.f32 %v46669_v29, %v14427_v47  ;;  %v37393_v13 = vpop.f32.mrb[71].mxu1 }
0x1fa4   :  { %v14434_v27 = vmul.f32 %v44245_v41, %v14433_v39 }
0x1fa6   :  { %v47041_v32 = vadd.f32 %v14434_v27, %v46852_v42 }
0x1fa8   :  { %v14441_v15 = vsel %vm71_vm1, %v47041_v32, 0 }
0x1fa9   :  { %v14512_v52 = vand.u32 4294901760, %v14441_v15 }
0x1fab   :  { %v14513_v51 = vsub.f32 %v14441_v15, %v14512_v52  ;;  %37414 = vmatmul.mubr.f32.vlgmr.msra.gmra.mrb[72].mxu1 %v14512_v52 }
0x1fac   :  { %42268 = vmatpush3.bf16.msra.mxu1 %v44958_v8  ;;  %37435 = vmatprep.mubr.msk.f32.mxu1 %vm44853_vm0, %v49134_v0 }
0x1fad   :  { %42269 = vmatprep.subr.bf16.mxu1 %v49135_v1  ;;  %v14514_v38 = vand.u32 4294901760, %v14513_v51 }
0x1faf   :  { %v14515_v29 = vsub.f32 %v14513_v51, %v14514_v38 }
0x1fb0   :  { %42271 = vmatpush3.bf16.msra.mxu1 %v44960_v11 }
0x1fb1   :  { %42278 = vmatprep.subr.bf16.mxu1 %v49135_v1  ;;  %v14516_v42 = vand.u32 4294901760, %v14515_v29 }
0x1fb3   :  { %37436 = vmatmul.mubr.f32.vlgmr.msra.gmra.mrb[74].mxu1 %v14514_v38  ;;  %37403 = vmatmul.mubr.f32.vlgmr.msra.gmra.mrb[72].mxu0 %v14516_v42 }
0x1fb4   :  { %42262 = vmatpush3.bf16.msra.mxu0 %v49152_v18  ;;  %42280 = vmatpush3.bf16.msra.mxu1 %v44958_v8 }
0x1fb5   :  { %42263 = vmatprep.subr.bf16.mxu0 %v49135_v1  ;;  %42281 = vmatprep.subr.bf16.mxu1 %v49135_v1 }
0x1fb6   :  { %37424 = vmatprep.mubr.msk.f32.mxu0 %vm44853_vm0, %v49134_v0  ;;  %37457 = vmatprep.mubr.msk.f32.mxu1 %vm44853_vm0, %v49134_v0 }
0x1fb8   :  { %42265 = vmatpush3.bf16.msra.mxu0 %v49153_v61  ;;  %42283 = vmatpush3.bf16.msra.mxu1 %v44960_v11 }
0x1fb9   :  { %42272 = vmatprep.subr.bf16.mxu0 %v49135_v1  ;;  %42356 = vmatprep.subr.bf16.mxu1 %v49135_v1 }
0x1fbb   :  { %37425 = vmatmul.mubr.f32.vlgmr.msra.gmra.mrb[74].mxu0 %v14513_v51  ;;  %37458 = vmatmul.mubr.f32.vlgmr.msra.gmra.mrb[76].mxu1 %v14512_v52 }
0x1fbc   :  { %42274 = vmatpush3.bf16.msra.mxu0 %v49154_v37  ;;  %37446 = vmatprep.mubr.msk.f32.mxu0 %vm44853_vm0, %v49134_v0 }
0x1fbd   :  { %42275 = vmatprep.subr.bf16.mxu0 %v49135_v1  ;;  %42358 = vmatpush3.bf16.msra.mxu1 %v45059_v54 }
0x1fbe   :  { %42359 = vmatprep.subr.bf16.mxu1 %v49135_v1  ;;  %37590 = vmatprep.mubr.msk.f32.mxu1 %vm44853_vm0, %v49134_v0 }
0x1fc0   :  { %42277 = vmatpush3.bf16.msra.mxu0 %v49157_v58 }
0x1fc1   :  { %42284 = vmatprep.subr.bf16.mxu0 %v49135_v1  ;;  %42361 = vmatpush3.bf16.msra.mxu1 %v45100_v2 }
0x1fc2   :  { %42362 = vmatprep.subr.bf16.mxu1 %v49135_v1 }
0x1fc3   :  { %37447 = vmatmul.mubr.f32.vlgmr.msra.gmra.mrb[76].mxu0 %v14512_v52 }
0x1fc4   :  { %42286 = vmatpush3.bf16.msra.mxu0 %v45078_v59  ;;  %37476 = vmatprep.mubr.msk.f32.mxu0 %vm44853_vm0, %v49134_v0 }
0x1fc5   :  { %42287 = vmatprep.subr.bf16.mxu0 %v49135_v1  ;;  %42364 = vmatpush3.bf16.msra.mxu1 %v45145_v14 }
0x1fc6   :  { %42365 = vmatprep.subr.bf16.mxu1 %v49135_v1 }
0x1fc8   :  { %42289 = vmatpush3.bf16.msra.mxu0 %v45120_v7 }
0x1fc9   :  { %42290 = vmatprep.subr.bf16.mxu0 %v49135_v1  ;;  %42367 = vmatpush3.bf16.msra.mxu1 %v45165_v20 }
0x1fca   :  { %42368 = vmatprep.subr.bf16.mxu1 %v49135_v1 }
0x1fcc   :  { %42292 = vmatpush3.bf16.msra.mxu0 %v45154_v17 }
0x1fcd   :  { %42293 = vmatprep.subr.bf16.mxu0 %v49135_v1 }
0x1fd0   :  { %42295 = vmatpush3.bf16.msra.mxu0 %v45172_v21 }
0x1fd1   :  { %42296 = vmatprep.subr.bf16.mxu0 %v49135_v1 }
0x207e   :  { %v14609_v56 = vpop.f32.mrb[72].mxu1 }
0x207f   :  { %v37415_v53 = vpop.f32.mrb[73].mxu1 }
0x2086   :  { %v14766_v22 = vpop.f32.mrb[74].mxu1  ;;  %v14518_v62 = vpop.f32.mrb[72].mxu0 }
0x2087   :  { %v14519_v44 = vadd.f32 %v14518_v62, %v14439_v23  ;;  %v37437_v3 = vpop.f32.mrb[75].mxu1  ;;  %v37404_v47 = vpop.f32.mrb[73].mxu0 }
0x2089   :  { %v14610_v39 = vadd.f32 %v14609_v56, %v14519_v44 }
0x208e   :  { %v14689_v41 = vpop.f32.mrb[74].mxu0  ;;  %v14924_v13 = vpop.f32.mrb[76].mxu1 }
0x208f   :  { %v14690_v27 = vadd.f32 %v14689_v41, %v14610_v39  ;;  %v37426_v15 = vpop.f32.mrb[75].mxu0  ;;  %v37459_v52 = vpop.f32.mrb[77].mxu1 }
0x2091   :  { %v14767_v51 = vadd.f32 %v14766_v22, %v14690_v27 }
0x2096   :  { %v14849_v38 = vpop.f32.mrb[76].mxu0 }
0x2097   :  { %v14850_v29 = vadd.f32 %v14849_v38, %v14767_v51  ;;  %v37448_v42 = vpop.f32.mrb[77].mxu0 }
0x2099   :  { %v14925_v58 = vadd.f32 %v14924_v13, %v14850_v29 }
0x209b   :  { %v14928_v53 = vadd.f32 %v46915_v28, %v14925_v58 }
0x209d   :  { %v14930_v37 = vmin.f32 %v14928_v53, 0.0  ;;  %vm14929_vm8 = vcmp.gt.f32.partialorder %v14928_v53, 0.0 }
0x209f   :  { %v14931_v57 = vmul.f32 1.442695, %v14930_v37 }
0x20a1   :  { %44710 = vpow2.f32 %v14931_v57 }
0x20ab   :  { %v44711_v60 = vpop.eup %44710 }
0x20ac   :  { %v31966_v23 = vadd.f32 -1.0, %v44711_v60  ;;  %v47154_v60 = vld [vmem:[#allocation9] ss:$0 sm:$0xff] }
0x20ae   :  { %v14934_v62 = vsel %vm14929_vm8, %v14928_v53, %v31966_v23 }
0x20af   :  { %v14936_v56 = vsel %vm625_vm2, %v14934_v62, 0 }
0x20b0   :  { %v15011_v44 = vand.u32 4294901760, %v14936_v56 }
0x20b2   :  { %v15012_v3 = vsub.f32 %v14936_v56, %v15011_v44  ;;  %v16023_v56 = vstv %s16022_s25 }
0x20b4   :  { %v15013_v47 = vand.u32 4294901760, %v15012_v3 }
0x20b6   :  { %v15014_v39 = vsub.f32 %v15012_v3, %v15013_v47 }
0x20b8   :  { %v15015_v22 = vand.u32 4294901760, %v15014_v39 }
0x20ba   :  { %37477 = vmatmul.mubr.f32.vlgmr.msra.gmra.mrb[78].mxu0 %v15015_v22 }
0x20bb   :  { %42298 = vmatpush3.bf16.msra.mxu0 %v45261_v25  ;;  %37495 = vmatprep.mubr.msk.f32.mxu0 %vm44853_vm0, %v49134_v0 }
0x20bc   :  { %42299 = vmatprep.subr.bf16.mxu0 %v49135_v1 }
0x20bf   :  { %42301 = vmatpush3.bf16.msra.mxu0 %v45271_v19 }
0x20c0   :  { %42302 = vmatprep.subr.bf16.mxu0 %v49135_v1 }
0x20c3   :  { %42304 = vmatpush3.bf16.msra.mxu0 %v45280_v35 }
0x20c4   :  { %42305 = vmatprep.subr.bf16.mxu0 %v49135_v1 }
0x20c7   :  { %42307 = vmatpush3.bf16.msra.mxu0 %v45284_v24 }
0x20c8   :  { %42308 = vmatprep.subr.bf16.mxu0 %v49135_v1 }
0x20ca   :  { %37496 = vmatmul.mubr.f32.vlgmr.msra.gmra.mrb[78].mxu0 %v15011_v44 }
0x20cb   :  { %42310 = vmatpush3.bf16.msra.mxu0 %v45290_v26  ;;  %37514 = vmatprep.mubr.msk.f32.mxu0 %vm44853_vm0, %v49134_v0 }
0x20cc   :  { %42311 = vmatprep.subr.bf16.mxu0 %v49135_v1 }
0x20cf   :  { %42313 = vmatpush3.bf16.msra.mxu0 %v45297_v43 }
0x20d0   :  { %42314 = vmatprep.subr.bf16.mxu0 %v49135_v1 }
0x20d3   :  { %42316 = vmatpush3.bf16.msra.mxu0 %v45305_v49 }
0x20d4   :  { %42317 = vmatprep.subr.bf16.mxu0 %v49135_v1 }
0x20d7   :  { %42319 = vmatpush3.bf16.msra.mxu0 %v45311_v12 }
0x20d8   :  { %42320 = vmatprep.subr.bf16.mxu0 %v49135_v1 }
0x20da   :  { %37515 = vmatmul.mubr.f32.vlgmr.msra.gmra.mrb[78].mxu0 %v15012_v3 }
0x20db   :  { %42322 = vmatpush3.bf16.msra.mxu0 %v45078_v59  ;;  %37533 = vmatprep.mubr.msk.f32.mxu0 %vm44853_vm0, %v49134_v0 }
0x20dc   :  { %42323 = vmatprep.subr.bf16.mxu0 %v49135_v1 }
0x20df   :  { %42325 = vmatpush3.bf16.msra.mxu0 %v45120_v7 }
0x20e0   :  { %42326 = vmatprep.subr.bf16.mxu0 %v49135_v1 }
0x20e3   :  { %42328 = vmatpush3.bf16.msra.mxu0 %v45154_v17 }
0x20e4   :  { %42329 = vmatprep.subr.bf16.mxu0 %v49135_v1 }
0x20e7   :  { %42331 = vmatpush3.bf16.msra.mxu0 %v45172_v21 }
0x20e8   :  { %42332 = vmatprep.subr.bf16.mxu0 %v49135_v1 }
0x20ea   :  { %37534 = vmatmul.mubr.f32.vlgmr.msra.gmra.mrb[78].mxu0 %v15013_v47 }
0x20eb   :  { %42334 = vmatpush3.bf16.msra.mxu0 %v45329_v34  ;;  %37552 = vmatprep.mubr.msk.f32.mxu0 %vm44853_vm0, %v49134_v0 }
0x20ec   :  { %42335 = vmatprep.subr.bf16.mxu0 %v49135_v1 }
0x20ef   :  { %42337 = vmatpush3.bf16.msra.mxu0 %v45337_v63 }
0x20f0   :  { %42338 = vmatprep.subr.bf16.mxu0 %v49135_v1 }
0x20f3   :  { %42340 = vmatpush3.bf16.msra.mxu0 %v45347_v16 }
0x20f4   :  { %42341 = vmatprep.subr.bf16.mxu0 %v49135_v1 }
0x20f7   :  { %42343 = vmatpush3.bf16.msra.mxu0 %v45351_v46 }
0x20f8   :  { %42344 = vmatprep.subr.bf16.mxu0 %v49135_v1 }
0x20fa   :  { %37553 = vmatmul.mubr.f32.vlgmr.msra.gmra.mrb[78].mxu0 %v15011_v44 }
0x20fb   :  { %42346 = vmatpush3.bf16.msra.mxu0 %v45078_v59  ;;  %37571 = vmatprep.mubr.msk.f32.mxu0 %vm44853_vm0, %v49134_v0 }
0x20fc   :  { %42347 = vmatprep.subr.bf16.mxu0 %v49135_v1 }
0x20ff   :  { %42349 = vmatpush3.bf16.msra.mxu0 %v45120_v7 }
0x2100   :  { %42350 = vmatprep.subr.bf16.mxu0 %v49135_v1 }
0x2103   :  { %42352 = vmatpush3.bf16.msra.mxu0 %v45154_v17 }
0x2104   :  { %42353 = vmatprep.subr.bf16.mxu0 %v49135_v1 }
0x2107   :  { %42355 = vmatpush3.bf16.msra.mxu0 %v45172_v21 }
0x2108   :  { %42428 = vmatprep.subr.bf16.mxu0 %v49135_v1 }
0x210a   :  { %37572 = vmatmul.mubr.f32.vlgmr.msra.gmra.mrb[78].mxu0 %v15011_v44  ;;  %v47223_v44 = vld [vmem:[%s49078_s10] ss:$0 sm:$0xff] }
0x210b   :  { %42430 = vmatpush3.bf16.msra.mxu0 %v44958_v8  ;;  %37696 = vmatprep.mubr.msk.f32.mxu0 %vm44853_vm0, %v49134_v0 }
0x210c   :  { %42431 = vmatprep.subr.bf16.mxu0 %v49135_v1 }
0x210f   :  { %42433 = vmatpush3.bf16.msra.mxu0 %v44960_v11 }
0x2110   :  { %42440 = vmatprep.subr.bf16.mxu0 %v49135_v1 }
0x21dd   :  { %v15471_v37 = vpop.f32.mrb[78].mxu0 }
0x21de   :  { %v44246_v58 = vadd.f32 %v47154_v60, %v15471_v37  ;;  %v37573_v41 = vpop.f32.mrb[79].mxu0 }
0x21e0   :  { %v15476_v13 = vmin.f32 %v44246_v58, 0.0  ;;  %vm15475_vm9 = vcmp.gt.f32.partialorder %v44246_v58, 0.0 }
0x21e2   :  { %v15477_v27 = vmul.f32 1.442695, %v15476_v13 }
0x21e4   :  { %44712 = vpow2.f32 %v15477_v27 }
0x21ee   :  { %v44713_v15 = vpop.eup %44712 }
0x21ef   :  { %v31967_v52 = vadd.f32 -1.0, %v44713_v15  ;;  %v49158_v15 = vld [vmem:[#allocation17_spill] sm:$0xff] }
0x21f1   :  { %v15480_v51 = vsel %vm15475_vm9, %v44246_v58, %v31967_v52  ;;  %v49159_v52 = vld [vmem:[#allocation18_spill] sm:$0xff] }
0x21f2   :  { %v15482_v38 = vsel %vm625_vm2, %v15480_v51, 0 }
0x21f3   :  { %v15557_v29 = vand.u32 4294901760, %v15482_v38 }
0x21f5   :  { %v15558_v42 = vsub.f32 %v15482_v38, %v15557_v29 }
0x21f7   :  { %v15559_v53 = vand.u32 4294901760, %v15558_v42 }
0x21f9   :  { %v15560_v57 = vsub.f32 %v15558_v42, %v15559_v53 }
0x21fb   :  { %v15561_v23 = vand.u32 4294901760, %v15560_v57 }
0x21fd   :  { %37591 = vmatmul.mubr.f32.vlgmr.msra.gmra.mrb[78].mxu1 %v15561_v23 }
0x21fe   :  { %42370 = vmatpush3.bf16.msra.mxu1 %v45439_v50  ;;  %37609 = vmatprep.mubr.msk.f32.mxu1 %vm44853_vm0, %v49134_v0 }
0x21ff   :  { %42371 = vmatprep.subr.bf16.mxu1 %v49135_v1 }
0x2202   :  { %42373 = vmatpush3.bf16.msra.mxu1 %v45449_v40 }
0x2203   :  { %42374 = vmatprep.subr.bf16.mxu1 %v49135_v1 }
0x2206   :  { %42376 = vmatpush3.bf16.msra.mxu1 %v45458_v10 }
0x2207   :  { %42377 = vmatprep.subr.bf16.mxu1 %v49135_v1 }
0x220a   :  { %42379 = vmatpush3.bf16.msra.mxu1 %v45462_v48 }
0x220b   :  { %42380 = vmatprep.subr.bf16.mxu1 %v49135_v1 }
0x220d   :  { %37610 = vmatmul.mubr.f32.vlgmr.msra.gmra.mrb[78].mxu1 %v15557_v29 }
0x220e   :  { %42382 = vmatpush3.bf16.msra.mxu1 %v45468_v36  ;;  %37628 = vmatprep.mubr.msk.f32.mxu1 %vm44853_vm0, %v49134_v0 }
0x220f   :  { %42383 = vmatprep.subr.bf16.mxu1 %v49135_v1 }
0x2212   :  { %42385 = vmatpush3.bf16.msra.mxu1 %v45475_v5 }
0x2213   :  { %42386 = vmatprep.subr.bf16.mxu1 %v49135_v1 }
0x2216   :  { %42388 = vmatpush3.bf16.msra.mxu1 %v45483_v6 }
0x2217   :  { %42389 = vmatprep.subr.bf16.mxu1 %v49135_v1 }
0x221a   :  { %42391 = vmatpush3.bf16.msra.mxu1 %v45489_v55 }
0x221b   :  { %42392 = vmatprep.subr.bf16.mxu1 %v49135_v1 }
0x221d   :  { %37629 = vmatmul.mubr.f32.vlgmr.msra.gmra.mrb[78].mxu1 %v15558_v42  ;;  %v49160_v42 = vld [vmem:[#allocation19_spill] sm:$0xff] }
0x221e   :  { %42394 = vmatpush3.bf16.msra.mxu1 %v45059_v54  ;;  %37647 = vmatprep.mubr.msk.f32.mxu1 %vm44853_vm0, %v49134_v0 }
0x221f   :  { %42395 = vmatprep.subr.bf16.mxu1 %v49135_v1 }
0x2222   :  { %42397 = vmatpush3.bf16.msra.mxu1 %v45100_v2 }
0x2223   :  { %42398 = vmatprep.subr.bf16.mxu1 %v49135_v1 }
0x2226   :  { %42400 = vmatpush3.bf16.msra.mxu1 %v45145_v14 }
0x2227   :  { %42401 = vmatprep.subr.bf16.mxu1 %v49135_v1 }
0x222a   :  { %42403 = vmatpush3.bf16.msra.mxu1 %v45165_v20 }
0x222b   :  { %42404 = vmatprep.subr.bf16.mxu1 %v49135_v1 }
0x222d   :  { %37648 = vmatmul.mubr.f32.vlgmr.msra.gmra.mrb[78].mxu1 %v15559_v53 }
0x222e   :  { %42406 = vmatpush3.bf16.msra.mxu1 %v45507_v4  ;;  %37666 = vmatprep.mubr.msk.f32.mxu1 %vm44853_vm0, %v49134_v0 }
0x222f   :  { %42407 = vmatprep.subr.bf16.mxu1 %v49135_v1 }
0x2232   :  { %42409 = vmatpush3.bf16.msra.mxu1 %v45515_v45 }
0x2233   :  { %42410 = vmatprep.subr.bf16.mxu1 %v49135_v1 }
0x2236   :  { %42412 = vmatpush3.bf16.msra.mxu1 %v45525_v30 }
0x2237   :  { %42413 = vmatprep.subr.bf16.mxu1 %v49135_v1 }
0x223a   :  { %42415 = vmatpush3.bf16.msra.mxu1 %v45529_v9 }
0x223b   :  { %42416 = vmatprep.subr.bf16.mxu1 %v49135_v1 }
0x223d   :  { %37667 = vmatmul.mubr.f32.vlgmr.msra.gmra.mrb[78].mxu1 %v15557_v29 }
0x223e   :  { %42418 = vmatpush3.bf16.msra.mxu1 %v45059_v54  ;;  %37685 = vmatprep.mubr.msk.f32.mxu1 %vm44853_vm0, %v49134_v0 }
0x223f   :  { %42419 = vmatprep.subr.bf16.mxu1 %v49135_v1 }
0x2242   :  { %42421 = vmatpush3.bf16.msra.mxu1 %v45100_v2 }
0x2243   :  { %42422 = vmatprep.subr.bf16.mxu1 %v49135_v1 }
0x2246   :  { %42424 = vmatpush3.bf16.msra.mxu1 %v45145_v14 }
0x2247   :  { %42425 = vmatprep.subr.bf16.mxu1 %v49135_v1 }
0x224a   :  { %42427 = vmatpush3.bf16.msra.mxu1 %v45165_v20 }
0x224b   :  { %42434 = vmatprep.subr.bf16.mxu1 %v49135_v1 }
0x224d   :  { %37686 = vmatmul.mubr.f32.vlgmr.msra.gmra.mrb[78].mxu1 %v15557_v29  ;;  %v16028_v29 = vstv %s16027_s13  ;;  %s28742_s13 = scalar_select %p28741_p5, %s49069_s1, 0.0 }
0x224e   :  { %42436 = vmatpush3.bf16.msra.mxu1 %v44971_v31  ;;  %37707 = vmatprep.mubr.msk.f32.mxu1 %vm44853_vm0, %v49134_v0  ;;  %v16029_v53 = vmul.f32 %v49160_v42, %v16028_v29 }
0x224f   :  { %42437 = vmatprep.subr.bf16.mxu1 %v49135_v1 }
0x2252   :  { %42439 = vmatpush3.bf16.msra.mxu1 %v44976_v33 }
0x2253   :  { %42446 = vmatprep.subr.bf16.mxu1 %v49135_v1 }
0x2320   :  { %v16017_v62 = vpop.f32.mrb[78].mxu1 }
0x2321   :  { %v44247_v3 = vadd.f32 %v47223_v44, %v16017_v62  ;;  %v37687_v47 = vpop.f32.mrb[79].mxu1 }
0x2323   :  { %v16024_v39 = vmul.f32 %v44247_v3, %v16023_v56 }
0x2325   :  { %v47227_v22 = vadd.f32 %v16024_v39, %v47041_v32 }
0x2327   :  { %v16031_v37 = vsel %vm71_vm1, %v47227_v22, 0 }
0x2328   :  { %v16102_v58 = vand.u32 4294901760, %v16031_v37 }
0x232a   :  { %v16103_v41 = vsub.f32 %v16031_v37, %v16102_v58  ;;  %37708 = vmatmul.mubr.f32.vlgmr.msra.gmra.mrb[80].mxu1 %v16102_v58 }
0x232b   :  { %42448 = vmatpush3.bf16.msra.mxu1 %v44958_v8  ;;  %37729 = vmatprep.mubr.msk.f32.mxu1 %vm44853_vm0, %v49134_v0 }
0x232c   :  { %42449 = vmatprep.subr.bf16.mxu1 %v49135_v1  ;;  %v16104_v13 = vand.u32 4294901760, %v16103_v41 }
0x232e   :  { %v16105_v27 = vsub.f32 %v16103_v41, %v16104_v13 }
0x232f   :  { %42451 = vmatpush3.bf16.msra.mxu1 %v44960_v11 }
0x2330   :  { %42458 = vmatprep.subr.bf16.mxu1 %v49135_v1  ;;  %v16106_v32 = vand.u32 4294901760, %v16105_v27 }
0x2332   :  { %37730 = vmatmul.mubr.f32.vlgmr.msra.gmra.mrb[82].mxu1 %v16104_v13  ;;  %37697 = vmatmul.mubr.f32.vlgmr.msra.gmra.mrb[80].mxu0 %v16106_v32 }
0x2333   :  { %42442 = vmatpush3.bf16.msra.mxu0 %v49152_v18  ;;  %42460 = vmatpush3.bf16.msra.mxu1 %v44958_v8 }
0x2334   :  { %42443 = vmatprep.subr.bf16.mxu0 %v49135_v1  ;;  %42461 = vmatprep.subr.bf16.mxu1 %v49135_v1 }
0x2335   :  { %37718 = vmatprep.mubr.msk.f32.mxu0 %vm44853_vm0, %v49134_v0  ;;  %37751 = vmatprep.mubr.msk.f32.mxu1 %vm44853_vm0, %v49134_v0 }
0x2337   :  { %42445 = vmatpush3.bf16.msra.mxu0 %v49153_v61  ;;  %42463 = vmatpush3.bf16.msra.mxu1 %v44960_v11 }
0x2338   :  { %42452 = vmatprep.subr.bf16.mxu0 %v49135_v1  ;;  %42536 = vmatprep.subr.bf16.mxu1 %v49135_v1 }
0x233a   :  { %37719 = vmatmul.mubr.f32.vlgmr.msra.gmra.mrb[82].mxu0 %v16103_v41  ;;  %37752 = vmatmul.mubr.f32.vlgmr.msra.gmra.mrb[84].mxu1 %v16102_v58 }
0x233b   :  { %42454 = vmatpush3.bf16.msra.mxu0 %v49158_v15  ;;  %37740 = vmatprep.mubr.msk.f32.mxu0 %vm44853_vm0, %v49134_v0 }
0x233c   :  { %42455 = vmatprep.subr.bf16.mxu0 %v49135_v1  ;;  %42538 = vmatpush3.bf16.msra.mxu1 %v45059_v54 }
0x233d   :  { %42539 = vmatprep.subr.bf16.mxu1 %v49135_v1  ;;  %37884 = vmatprep.mubr.msk.f32.mxu1 %vm44853_vm0, %v49134_v0 }
0x233f   :  { %42457 = vmatpush3.bf16.msra.mxu0 %v49159_v52 }
0x2340   :  { %42464 = vmatprep.subr.bf16.mxu0 %v49135_v1  ;;  %42541 = vmatpush3.bf16.msra.mxu1 %v45100_v2 }
0x2341   :  { %42542 = vmatprep.subr.bf16.mxu1 %v49135_v1 }
0x2342   :  { %37741 = vmatmul.mubr.f32.vlgmr.msra.gmra.mrb[84].mxu0 %v16102_v58 }
0x2343   :  { %42466 = vmatpush3.bf16.msra.mxu0 %v45078_v59  ;;  %37770 = vmatprep.mubr.msk.f32.mxu0 %vm44853_vm0, %v49134_v0 }
0x2344   :  { %42467 = vmatprep.subr.bf16.mxu0 %v49135_v1  ;;  %42544 = vmatpush3.bf16.msra.mxu1 %v45145_v14 }
0x2345   :  { %42545 = vmatprep.subr.bf16.mxu1 %v49135_v1 }
0x2347   :  { %42469 = vmatpush3.bf16.msra.mxu0 %v45120_v7 }
0x2348   :  { %42470 = vmatprep.subr.bf16.mxu0 %v49135_v1  ;;  %42547 = vmatpush3.bf16.msra.mxu1 %v45165_v20 }
0x2349   :  { %42548 = vmatprep.subr.bf16.mxu1 %v49135_v1 }
0x234b   :  { %42472 = vmatpush3.bf16.msra.mxu0 %v45154_v17 }
0x234c   :  { %42473 = vmatprep.subr.bf16.mxu0 %v49135_v1 }
0x234f   :  { %42475 = vmatpush3.bf16.msra.mxu0 %v45172_v21 }
0x2350   :  { %42476 = vmatprep.subr.bf16.mxu0 %v49135_v1 }
0x23fd   :  { %v16199_v51 = vpop.f32.mrb[80].mxu1 }
0x23fe   :  { %v37709_v38 = vpop.f32.mrb[81].mxu1 }
0x2405   :  { %v16356_v57 = vpop.f32.mrb[82].mxu1  ;;  %v16108_v23 = vpop.f32.mrb[80].mxu0 }
0x2406   :  { %v16109_v62 = vadd.f32 %v16108_v23, %v16029_v53  ;;  %v37731_v56 = vpop.f32.mrb[83].mxu1  ;;  %v37698_v3 = vpop.f32.mrb[81].mxu0 }
0x2408   :  { %v16200_v47 = vadd.f32 %v16199_v51, %v16109_v62 }
0x240d   :  { %v16279_v39 = vpop.f32.mrb[82].mxu0  ;;  %v16514_v37 = vpop.f32.mrb[84].mxu1 }
0x240e   :  { %v16280_v58 = vadd.f32 %v16279_v39, %v16200_v47  ;;  %v37720_v41 = vpop.f32.mrb[83].mxu0  ;;  %v37753_v13 = vpop.f32.mrb[85].mxu1 }
0x2410   :  { %v16357_v27 = vadd.f32 %v16356_v57, %v16280_v58 }
0x2415   :  { %v16439_v32 = vpop.f32.mrb[84].mxu0 }
0x2416   :  { %v16440_v52 = vadd.f32 %v16439_v32, %v16357_v27  ;;  %v37742_v15 = vpop.f32.mrb[85].mxu0 }
0x2418   :  { %v16515_v61 = vadd.f32 %v16514_v37, %v16440_v52 }
0x241a   :  { %v16518_v38 = vadd.f32 %v46915_v28, %v16515_v61 }
0x241c   :  { %v16520_v18 = vmin.f32 %v16518_v38, 0.0  ;;  %vm16519_vm10 = vcmp.gt.f32.partialorder %v16518_v38, 0.0 }
0x241e   :  { %v16521_v29 = vmul.f32 1.442695, %v16520_v18 }
0x2420   :  { %44714 = vpow2.f32 %v16521_v29 }
0x242a   :  { %v44715_v42 = vpop.eup %44714 }
0x242b   :  { %v31968_v53 = vadd.f32 -1.0, %v44715_v42 }
0x242d   :  { %v16524_v23 = vsel %vm16519_vm10, %v16518_v38, %v31968_v53  ;;  %v17613_v53 = vstv %s17612_s17 }
0x242e   :  { %v16526_v51 = vsel %vm625_vm2, %v16524_v23, 0 }
0x242f   :  { %v16601_v62 = vand.u32 4294901760, %v16526_v51 }
0x2431   :  { %v16602_v56 = vsub.f32 %v16526_v51, %v16601_v62 }
0x2433   :  { %v16603_v3 = vand.u32 4294901760, %v16602_v56 }
0x2435   :  { %v16604_v47 = vsub.f32 %v16602_v56, %v16603_v3 }
0x2437   :  { %v16605_v57 = vand.u32 4294901760, %v16604_v47 }
0x2439   :  { %37771 = vmatmul.mubr.f32.vlgmr.msra.gmra.mrb[86].mxu0 %v16605_v57 }
0x243a   :  { %42478 = vmatpush3.bf16.msra.mxu0 %v45261_v25  ;;  %37789 = vmatprep.mubr.msk.f32.mxu0 %vm44853_vm0, %v49134_v0 }
0x243b   :  { %42479 = vmatprep.subr.bf16.mxu0 %v49135_v1 }
0x243e   :  { %42481 = vmatpush3.bf16.msra.mxu0 %v45271_v19 }
0x243f   :  { %42482 = vmatprep.subr.bf16.mxu0 %v49135_v1 }
0x2442   :  { %42484 = vmatpush3.bf16.msra.mxu0 %v45280_v35 }
0x2443   :  { %42485 = vmatprep.subr.bf16.mxu0 %v49135_v1 }
0x2446   :  { %42487 = vmatpush3.bf16.msra.mxu0 %v45284_v24 }
0x2447   :  { %42488 = vmatprep.subr.bf16.mxu0 %v49135_v1 }
0x2449   :  { %37790 = vmatmul.mubr.f32.vlgmr.msra.gmra.mrb[86].mxu0 %v16601_v62 }
0x244a   :  { %42490 = vmatpush3.bf16.msra.mxu0 %v45290_v26  ;;  %37808 = vmatprep.mubr.msk.f32.mxu0 %vm44853_vm0, %v49134_v0 }
0x244b   :  { %42491 = vmatprep.subr.bf16.mxu0 %v49135_v1 }
0x244e   :  { %42493 = vmatpush3.bf16.msra.mxu0 %v45297_v43 }
0x244f   :  { %42494 = vmatprep.subr.bf16.mxu0 %v49135_v1 }
0x2452   :  { %42496 = vmatpush3.bf16.msra.mxu0 %v45305_v49 }
0x2453   :  { %42497 = vmatprep.subr.bf16.mxu0 %v49135_v1 }
0x2456   :  { %42499 = vmatpush3.bf16.msra.mxu0 %v45311_v12 }
0x2457   :  { %42500 = vmatprep.subr.bf16.mxu0 %v49135_v1 }
0x2459   :  { %37809 = vmatmul.mubr.f32.vlgmr.msra.gmra.mrb[86].mxu0 %v16602_v56 }
0x245a   :  { %42502 = vmatpush3.bf16.msra.mxu0 %v45078_v59  ;;  %37827 = vmatprep.mubr.msk.f32.mxu0 %vm44853_vm0, %v49134_v0 }
0x245b   :  { %42503 = vmatprep.subr.bf16.mxu0 %v49135_v1 }
0x245e   :  { %42505 = vmatpush3.bf16.msra.mxu0 %v45120_v7 }
0x245f   :  { %42506 = vmatprep.subr.bf16.mxu0 %v49135_v1 }
0x2462   :  { %42508 = vmatpush3.bf16.msra.mxu0 %v45154_v17 }
0x2463   :  { %42509 = vmatprep.subr.bf16.mxu0 %v49135_v1 }
0x2466   :  { %42511 = vmatpush3.bf16.msra.mxu0 %v45172_v21 }
0x2467   :  { %42512 = vmatprep.subr.bf16.mxu0 %v49135_v1 }
0x2469   :  { %37828 = vmatmul.mubr.f32.vlgmr.msra.gmra.mrb[86].mxu0 %v16603_v3 }
0x246a   :  { %42514 = vmatpush3.bf16.msra.mxu0 %v45329_v34  ;;  %37846 = vmatprep.mubr.msk.f32.mxu0 %vm44853_vm0, %v49134_v0 }
0x246b   :  { %42515 = vmatprep.subr.bf16.mxu0 %v49135_v1 }
0x246e   :  { %42517 = vmatpush3.bf16.msra.mxu0 %v45337_v63 }
0x246f   :  { %42518 = vmatprep.subr.bf16.mxu0 %v49135_v1 }
0x2472   :  { %42520 = vmatpush3.bf16.msra.mxu0 %v45347_v16 }
0x2473   :  { %42521 = vmatprep.subr.bf16.mxu0 %v49135_v1 }
0x2476   :  { %42523 = vmatpush3.bf16.msra.mxu0 %v45351_v46 }
0x2477   :  { %42524 = vmatprep.subr.bf16.mxu0 %v49135_v1 }
0x2479   :  { %37847 = vmatmul.mubr.f32.vlgmr.msra.gmra.mrb[86].mxu0 %v16601_v62 }
0x247a   :  { %42526 = vmatpush3.bf16.msra.mxu0 %v45078_v59  ;;  %37865 = vmatprep.mubr.msk.f32.mxu0 %vm44853_vm0, %v49134_v0 }
0x247b   :  { %42527 = vmatprep.subr.bf16.mxu0 %v49135_v1 }
0x247e   :  { %42529 = vmatpush3.bf16.msra.mxu0 %v45120_v7 }
0x247f   :  { %42530 = vmatprep.subr.bf16.mxu0 %v49135_v1 }
0x2482   :  { %42532 = vmatpush3.bf16.msra.mxu0 %v45154_v17 }
0x2483   :  { %42533 = vmatprep.subr.bf16.mxu0 %v49135_v1 }
0x2486   :  { %42535 = vmatpush3.bf16.msra.mxu0 %v45172_v21 }
0x2487   :  { %42608 = vmatprep.subr.bf16.mxu0 %v49135_v1 }
0x2489   :  { %37866 = vmatmul.mubr.f32.vlgmr.msra.gmra.mrb[86].mxu0 %v16601_v62 }
0x248a   :  { %42610 = vmatpush3.bf16.msra.mxu0 %v44958_v8  ;;  %37990 = vmatprep.mubr.msk.f32.mxu0 %vm44853_vm0, %v49134_v0 }
0x248b   :  { %42611 = vmatprep.subr.bf16.mxu0 %v49135_v1 }
0x248e   :  { %42613 = vmatpush3.bf16.msra.mxu0 %v44960_v11 }
0x248f   :  { %42620 = vmatprep.subr.bf16.mxu0 %v49135_v1 }
0x255c   :  { %v17061_v18 = vpop.f32.mrb[86].mxu0 }
0x255d   :  { %v44248_v61 = vadd.f32 %v47154_v60, %v17061_v18  ;;  %v37867_v28 = vpop.f32.mrb[87].mxu0 }
0x255e   :  { %v49161_v28 = vld [vmem:[#allocation15_spill] sm:$0xff] }
0x255f   :  { %v17066_v15 = vmin.f32 %v44248_v61, 0.0  ;;  %vm17065_vm11 = vcmp.gt.f32.partialorder %v44248_v61, 0.0 }
0x2561   :  { %v17067_v52 = vmul.f32 1.442695, %v17066_v15  ;;  %v49162_v15 = vld [vmem:[#allocation16_spill] sm:$0xff] }
0x2563   :  { %44716 = vpow2.f32 %v17067_v52  ;;  %v49163_v52 = vld [vmem:[#allocation17_spill] sm:$0xff] }
0x256d   :  { %v44717_v39 = vpop.eup %44716 }
0x256e   :  { %v31969_v37 = vadd.f32 -1.0, %v44717_v39  ;;  %v49164_v39 = vld [vmem:[#allocation18_spill] sm:$0xff] }
0x2570   :  { %v17070_v58 = vsel %vm17065_vm11, %v44248_v61, %v31969_v37 }
0x2571   :  { %v17072_v41 = vsel %vm625_vm2, %v17070_v58, 0 }
0x2572   :  { %v17147_v13 = vand.u32 4294901760, %v17072_v41 }
0x2574   :  { %v17148_v27 = vsub.f32 %v17072_v41, %v17147_v13  ;;  %v17618_v41 = vstv %s17617_s18  ;;  %s23972_s18 = scalar_select %p23971_p2, %s49069_s1, 0.0 }
0x2576   :  { %v17149_v32 = vand.u32 4294901760, %v17148_v27 }
0x2578   :  { %v17150_v38 = vsub.f32 %v17148_v27, %v17149_v32 }
0x257a   :  { %v17151_v29 = vand.u32 4294901760, %v17150_v38 }
0x257c   :  { %37885 = vmatmul.mubr.f32.vlgmr.msra.gmra.mrb[86].mxu1 %v17151_v29 }
0x257d   :  { %42550 = vmatpush3.bf16.msra.mxu1 %v45439_v50  ;;  %37903 = vmatprep.mubr.msk.f32.mxu1 %vm44853_vm0, %v49134_v0 }
0x257e   :  { %42551 = vmatprep.subr.bf16.mxu1 %v49135_v1 }
0x2581   :  { %42553 = vmatpush3.bf16.msra.mxu1 %v45449_v40 }
0x2582   :  { %42554 = vmatprep.subr.bf16.mxu1 %v49135_v1 }
0x2585   :  { %42556 = vmatpush3.bf16.msra.mxu1 %v45458_v10 }
0x2586   :  { %42557 = vmatprep.subr.bf16.mxu1 %v49135_v1 }
0x2589   :  { %42559 = vmatpush3.bf16.msra.mxu1 %v45462_v48 }
0x258a   :  { %42560 = vmatprep.subr.bf16.mxu1 %v49135_v1 }
0x258c   :  { %37904 = vmatmul.mubr.f32.vlgmr.msra.gmra.mrb[86].mxu1 %v17147_v13 }
0x258d   :  { %42562 = vmatpush3.bf16.msra.mxu1 %v45468_v36  ;;  %37922 = vmatprep.mubr.msk.f32.mxu1 %vm44853_vm0, %v49134_v0 }
0x258e   :  { %42563 = vmatprep.subr.bf16.mxu1 %v49135_v1 }
0x2591   :  { %42565 = vmatpush3.bf16.msra.mxu1 %v45475_v5 }
0x2592   :  { %42566 = vmatprep.subr.bf16.mxu1 %v49135_v1 }
0x2595   :  { %42568 = vmatpush3.bf16.msra.mxu1 %v45483_v6 }
0x2596   :  { %42569 = vmatprep.subr.bf16.mxu1 %v49135_v1 }
0x2599   :  { %42571 = vmatpush3.bf16.msra.mxu1 %v45489_v55 }
0x259a   :  { %42572 = vmatprep.subr.bf16.mxu1 %v49135_v1 }
0x259c   :  { %37923 = vmatmul.mubr.f32.vlgmr.msra.gmra.mrb[86].mxu1 %v17148_v27 }
0x259d   :  { %42574 = vmatpush3.bf16.msra.mxu1 %v45059_v54  ;;  %37941 = vmatprep.mubr.msk.f32.mxu1 %vm44853_vm0, %v49134_v0 }
0x259e   :  { %42575 = vmatprep.subr.bf16.mxu1 %v49135_v1 }
0x25a1   :  { %42577 = vmatpush3.bf16.msra.mxu1 %v45100_v2 }
0x25a2   :  { %42578 = vmatprep.subr.bf16.mxu1 %v49135_v1 }
0x25a5   :  { %42580 = vmatpush3.bf16.msra.mxu1 %v45145_v14 }
0x25a6   :  { %42581 = vmatprep.subr.bf16.mxu1 %v49135_v1 }
0x25a9   :  { %42583 = vmatpush3.bf16.msra.mxu1 %v45165_v20 }
0x25aa   :  { %42584 = vmatprep.subr.bf16.mxu1 %v49135_v1 }
0x25ac   :  { %37942 = vmatmul.mubr.f32.vlgmr.msra.gmra.mrb[86].mxu1 %v17149_v32 }
0x25ad   :  { %42586 = vmatpush3.bf16.msra.mxu1 %v45507_v4  ;;  %37960 = vmatprep.mubr.msk.f32.mxu1 %vm44853_vm0, %v49134_v0 }
0x25ae   :  { %42587 = vmatprep.subr.bf16.mxu1 %v49135_v1 }
0x25b1   :  { %42589 = vmatpush3.bf16.msra.mxu1 %v45515_v45 }
0x25b2   :  { %42590 = vmatprep.subr.bf16.mxu1 %v49135_v1 }
0x25b5   :  { %42592 = vmatpush3.bf16.msra.mxu1 %v45525_v30 }
0x25b6   :  { %42593 = vmatprep.subr.bf16.mxu1 %v49135_v1 }
0x25b9   :  { %42595 = vmatpush3.bf16.msra.mxu1 %v45529_v9 }
0x25ba   :  { %42596 = vmatprep.subr.bf16.mxu1 %v49135_v1 }
0x25bc   :  { %37961 = vmatmul.mubr.f32.vlgmr.msra.gmra.mrb[86].mxu1 %v17147_v13 }
0x25bd   :  { %42598 = vmatpush3.bf16.msra.mxu1 %v45059_v54  ;;  %37979 = vmatprep.mubr.msk.f32.mxu1 %vm44853_vm0, %v49134_v0 }
0x25be   :  { %42599 = vmatprep.subr.bf16.mxu1 %v49135_v1 }
0x25c1   :  { %42601 = vmatpush3.bf16.msra.mxu1 %v45100_v2 }
0x25c2   :  { %42602 = vmatprep.subr.bf16.mxu1 %v49135_v1 }
0x25c5   :  { %42604 = vmatpush3.bf16.msra.mxu1 %v45145_v14 }
0x25c6   :  { %42605 = vmatprep.subr.bf16.mxu1 %v49135_v1 }
0x25c9   :  { %42607 = vmatpush3.bf16.msra.mxu1 %v45165_v20 }
0x25ca   :  { %42614 = vmatprep.subr.bf16.mxu1 %v49135_v1 }
0x25cc   :  { %37980 = vmatmul.mubr.f32.vlgmr.msra.gmra.mrb[86].mxu1 %v17147_v13  ;;  %v47463_v13 = vld [vmem:[%s49073_s5] ss:$0 sm:$0xff] }
0x25cd   :  { %42616 = vmatpush3.bf16.msra.mxu1 %v44971_v31  ;;  %38001 = vmatprep.mubr.msk.f32.mxu1 %vm44853_vm0, %v49134_v0  ;;  %49165 = vst [vmem:[#allocation19_spill] sm:$0xff] %v47463_v13  ;;  %v17619_v27 = vmul.f32 %v47463_v13, %v17618_v41  ;;  %v47469_v41 = vld [vmem:[%s49074_s6] ss:$0 sm:$0xff] }
0x25ce   :  { %42617 = vmatprep.subr.bf16.mxu1 %v49135_v1 }
0x25d1   :  { %42619 = vmatpush3.bf16.msra.mxu1 %v44976_v33 }
0x25d2   :  { %42626 = vmatprep.subr.bf16.mxu1 %v49135_v1 }
0x269f   :  { %v17607_v42 = vpop.f32.mrb[86].mxu1 }
0x26a0   :  { %v44249_v23 = vadd.f32 %v47223_v44, %v17607_v42  ;;  %v37981_v51 = vpop.f32.mrb[87].mxu1 }
0x26a2   :  { %v17614_v62 = vmul.f32 %v44249_v23, %v17613_v53 }
0x26a4   :  { %v47406_v56 = vadd.f32 %v17614_v62, %v47227_v22 }
0x26a6   :  { %v17621_v3 = vsel %vm71_vm1, %v47406_v56, 0 }
0x26a7   :  { %v17692_v47 = vand.u32 4294901760, %v17621_v3 }
0x26a9   :  { %v17693_v57 = vsub.f32 %v17621_v3, %v17692_v47  ;;  %38002 = vmatmul.mubr.f32.vlgmr.msra.gmra.mrb[88].mxu1 %v17692_v47 }
0x26aa   :  { %42628 = vmatpush3.bf16.msra.mxu1 %v44958_v8  ;;  %38023 = vmatprep.mubr.msk.f32.mxu1 %vm44853_vm0, %v49134_v0 }
0x26ab   :  { %42629 = vmatprep.subr.bf16.mxu1 %v49135_v1  ;;  %v17694_v18 = vand.u32 4294901760, %v17693_v57 }
0x26ad   :  { %v17695_v61 = vsub.f32 %v17693_v57, %v17694_v18 }
0x26ae   :  { %42631 = vmatpush3.bf16.msra.mxu1 %v44960_v11 }
0x26af   :  { %42638 = vmatprep.subr.bf16.mxu1 %v49135_v1  ;;  %v17696_v22 = vand.u32 4294901760, %v17695_v61 }
0x26b1   :  { %38024 = vmatmul.mubr.f32.vlgmr.msra.gmra.mrb[90].mxu1 %v17694_v18  ;;  %37991 = vmatmul.mubr.f32.vlgmr.msra.gmra.mrb[88].mxu0 %v17696_v22 }
0x26b2   :  { %42622 = vmatpush3.bf16.msra.mxu0 %v49161_v28  ;;  %42640 = vmatpush3.bf16.msra.mxu1 %v44958_v8 }
0x26b3   :  { %42623 = vmatprep.subr.bf16.mxu0 %v49135_v1  ;;  %42641 = vmatprep.subr.bf16.mxu1 %v49135_v1 }
0x26b4   :  { %38012 = vmatprep.mubr.msk.f32.mxu0 %vm44853_vm0, %v49134_v0  ;;  %38045 = vmatprep.mubr.msk.f32.mxu1 %vm44853_vm0, %v49134_v0 }
0x26b6   :  { %42625 = vmatpush3.bf16.msra.mxu0 %v49162_v15  ;;  %42643 = vmatpush3.bf16.msra.mxu1 %v44960_v11 }
0x26b7   :  { %42632 = vmatprep.subr.bf16.mxu0 %v49135_v1  ;;  %42716 = vmatprep.subr.bf16.mxu1 %v49135_v1 }
0x26b9   :  { %38013 = vmatmul.mubr.f32.vlgmr.msra.gmra.mrb[90].mxu0 %v17693_v57  ;;  %38046 = vmatmul.mubr.f32.vlgmr.msra.gmra.mrb[92].mxu1 %v17692_v47 }
0x26ba   :  { %42634 = vmatpush3.bf16.msra.mxu0 %v49163_v52  ;;  %38034 = vmatprep.mubr.msk.f32.mxu0 %vm44853_vm0, %v49134_v0 }
0x26bb   :  { %42635 = vmatprep.subr.bf16.mxu0 %v49135_v1  ;;  %42718 = vmatpush3.bf16.msra.mxu1 %v45059_v54 }
0x26bc   :  { %42719 = vmatprep.subr.bf16.mxu1 %v49135_v1  ;;  %38178 = vmatprep.mubr.msk.f32.mxu1 %vm44853_vm0, %v49134_v0 }
0x26be   :  { %42637 = vmatpush3.bf16.msra.mxu0 %v49164_v39 }
0x26bf   :  { %42644 = vmatprep.subr.bf16.mxu0 %v49135_v1  ;;  %42721 = vmatpush3.bf16.msra.mxu1 %v45100_v2 }
0x26c0   :  { %42722 = vmatprep.subr.bf16.mxu1 %v49135_v1 }
0x26c1   :  { %38035 = vmatmul.mubr.f32.vlgmr.msra.gmra.mrb[92].mxu0 %v17692_v47 }
0x26c2   :  { %42646 = vmatpush3.bf16.msra.mxu0 %v45078_v59  ;;  %38064 = vmatprep.mubr.msk.f32.mxu0 %vm44853_vm0, %v49134_v0 }
0x26c3   :  { %42647 = vmatprep.subr.bf16.mxu0 %v49135_v1  ;;  %42724 = vmatpush3.bf16.msra.mxu1 %v45145_v14 }
0x26c4   :  { %42725 = vmatprep.subr.bf16.mxu1 %v49135_v1 }
0x26c6   :  { %42649 = vmatpush3.bf16.msra.mxu0 %v45120_v7 }
0x26c7   :  { %42650 = vmatprep.subr.bf16.mxu0 %v49135_v1  ;;  %42727 = vmatpush3.bf16.msra.mxu1 %v45165_v20 }
0x26c8   :  { %42728 = vmatprep.subr.bf16.mxu1 %v49135_v1 }
0x26ca   :  { %42652 = vmatpush3.bf16.msra.mxu0 %v45154_v17 }
0x26cb   :  { %42653 = vmatprep.subr.bf16.mxu0 %v49135_v1 }
0x26ce   :  { %42655 = vmatpush3.bf16.msra.mxu0 %v45172_v21 }
0x26cf   :  { %42656 = vmatprep.subr.bf16.mxu0 %v49135_v1 }
0x277c   :  { %v17789_v37 = vpop.f32.mrb[88].mxu1 }
0x277d   :  { %v38003_v58 = vpop.f32.mrb[89].mxu1 }
0x2784   :  { %v17946_v32 = vpop.f32.mrb[90].mxu1  ;;  %v17698_v38 = vpop.f32.mrb[88].mxu0 }
0x2785   :  { %v17699_v29 = vadd.f32 %v17698_v38, %v17619_v27  ;;  %v38025_v42 = vpop.f32.mrb[91].mxu1  ;;  %v37992_v53 = vpop.f32.mrb[89].mxu0 }
0x2787   :  { %v17790_v23 = vadd.f32 %v17789_v37, %v17699_v29 }
0x278c   :  { %v17869_v51 = vpop.f32.mrb[90].mxu0  ;;  %v18104_v62 = vpop.f32.mrb[92].mxu1 }
0x278d   :  { %v17870_v3 = vadd.f32 %v17869_v51, %v17790_v23  ;;  %v38014_v47 = vpop.f32.mrb[91].mxu0  ;;  %v38047_v57 = vpop.f32.mrb[93].mxu1 }
0x278f   :  { %v17947_v18 = vadd.f32 %v17946_v32, %v17870_v3 }
0x2794   :  { %v18029_v61 = vpop.f32.mrb[92].mxu0 }
0x2795   :  { %v18030_v22 = vadd.f32 %v18029_v61, %v17947_v18  ;;  %v38036_v58 = vpop.f32.mrb[93].mxu0 }
0x2797   :  { %v18105_v39 = vadd.f32 %v18104_v62, %v18030_v22 }
0x2799   :  { %v18108_v27 = vadd.f32 %v47469_v41, %v18105_v39 }
0x279b   :  { %v18110_v38 = vmin.f32 %v18108_v27, 0.0  ;;  %vm18109_vm12 = vcmp.gt.f32.partialorder %v18108_v27, 0.0 }
0x279d   :  { %v18111_v42 = vmul.f32 1.442695, %v18110_v38 }
0x279f   :  { %44718 = vpow2.f32 %v18111_v42 }
0x27a9   :  { %v44719_v37 = vpop.eup %44718 }
0x27aa   :  { %v31970_v29 = vadd.f32 -1.0, %v44719_v37 }
0x27ac   :  { %v18114_v53 = vsel %vm18109_vm12, %v18108_v27, %v31970_v29 }
0x27ad   :  { %v18116_v32 = vsel %vm625_vm2, %v18114_v53, 0 }
0x27ae   :  { %v18191_v23 = vand.u32 4294901760, %v18116_v32 }
0x27b0   :  { %v18192_v51 = vsub.f32 %v18116_v32, %v18191_v23 }
0x27b2   :  { %v18193_v3 = vand.u32 4294901760, %v18192_v51 }
0x27b4   :  { %v18194_v62 = vsub.f32 %v18192_v51, %v18193_v3 }
0x27b6   :  { %v18195_v47 = vand.u32 4294901760, %v18194_v62 }
0x27b8   :  { %38065 = vmatmul.mubr.f32.vlgmr.msra.gmra.mrb[94].mxu0 %v18195_v47 }
0x27b9   :  { %42658 = vmatpush3.bf16.msra.mxu0 %v45261_v25  ;;  %38083 = vmatprep.mubr.msk.f32.mxu0 %vm44853_vm0, %v49134_v0 }
0x27ba   :  { %42659 = vmatprep.subr.bf16.mxu0 %v49135_v1 }
0x27bd   :  { %42661 = vmatpush3.bf16.msra.mxu0 %v45271_v19 }
0x27be   :  { %42662 = vmatprep.subr.bf16.mxu0 %v49135_v1 }
0x27c1   :  { %42664 = vmatpush3.bf16.msra.mxu0 %v45280_v35 }
0x27c2   :  { %42665 = vmatprep.subr.bf16.mxu0 %v49135_v1 }
0x27c5   :  { %42667 = vmatpush3.bf16.msra.mxu0 %v45284_v24 }
0x27c6   :  { %42668 = vmatprep.subr.bf16.mxu0 %v49135_v1 }
0x27c8   :  { %38084 = vmatmul.mubr.f32.vlgmr.msra.gmra.mrb[94].mxu0 %v18191_v23 }
0x27c9   :  { %42670 = vmatpush3.bf16.msra.mxu0 %v45290_v26  ;;  %38102 = vmatprep.mubr.msk.f32.mxu0 %vm44853_vm0, %v49134_v0 }
0x27ca   :  { %42671 = vmatprep.subr.bf16.mxu0 %v49135_v1 }
0x27cd   :  { %42673 = vmatpush3.bf16.msra.mxu0 %v45297_v43 }
0x27ce   :  { %42674 = vmatprep.subr.bf16.mxu0 %v49135_v1 }
0x27d1   :  { %42676 = vmatpush3.bf16.msra.mxu0 %v45305_v49 }
0x27d2   :  { %42677 = vmatprep.subr.bf16.mxu0 %v49135_v1 }
0x27d5   :  { %42679 = vmatpush3.bf16.msra.mxu0 %v45311_v12 }
0x27d6   :  { %42680 = vmatprep.subr.bf16.mxu0 %v49135_v1 }
0x27d8   :  { %38103 = vmatmul.mubr.f32.vlgmr.msra.gmra.mrb[94].mxu0 %v18192_v51  ;;  %v19203_v51 = vstv %s19202_s4  ;;  %s22382_s4 = scalar_select %p22381_p1, %s49069_s1, 0.0 }
0x27d9   :  { %42682 = vmatpush3.bf16.msra.mxu0 %v45078_v59  ;;  %38121 = vmatprep.mubr.msk.f32.mxu0 %vm44853_vm0, %v49134_v0 }
0x27da   :  { %42683 = vmatprep.subr.bf16.mxu0 %v49135_v1 }
0x27dd   :  { %42685 = vmatpush3.bf16.msra.mxu0 %v45120_v7 }
0x27de   :  { %42686 = vmatprep.subr.bf16.mxu0 %v49135_v1 }
0x27e1   :  { %42688 = vmatpush3.bf16.msra.mxu0 %v45154_v17 }
0x27e2   :  { %42689 = vmatprep.subr.bf16.mxu0 %v49135_v1 }
0x27e5   :  { %42691 = vmatpush3.bf16.msra.mxu0 %v45172_v21 }
0x27e6   :  { %42692 = vmatprep.subr.bf16.mxu0 %v49135_v1 }
0x27e8   :  { %38122 = vmatmul.mubr.f32.vlgmr.msra.gmra.mrb[94].mxu0 %v18193_v3 }
0x27e9   :  { %42694 = vmatpush3.bf16.msra.mxu0 %v45329_v34  ;;  %38140 = vmatprep.mubr.msk.f32.mxu0 %vm44853_vm0, %v49134_v0 }
0x27ea   :  { %42695 = vmatprep.subr.bf16.mxu0 %v49135_v1 }
0x27ed   :  { %42697 = vmatpush3.bf16.msra.mxu0 %v45337_v63 }
0x27ee   :  { %42698 = vmatprep.subr.bf16.mxu0 %v49135_v1 }
0x27f1   :  { %42700 = vmatpush3.bf16.msra.mxu0 %v45347_v16 }
0x27f2   :  { %42701 = vmatprep.subr.bf16.mxu0 %v49135_v1 }
0x27f5   :  { %42703 = vmatpush3.bf16.msra.mxu0 %v45351_v46 }
0x27f6   :  { %42704 = vmatprep.subr.bf16.mxu0 %v49135_v1 }
0x27f8   :  { %38141 = vmatmul.mubr.f32.vlgmr.msra.gmra.mrb[94].mxu0 %v18191_v23 }
0x27f9   :  { %42706 = vmatpush3.bf16.msra.mxu0 %v45078_v59  ;;  %38159 = vmatprep.mubr.msk.f32.mxu0 %vm44853_vm0, %v49134_v0 }
0x27fa   :  { %42707 = vmatprep.subr.bf16.mxu0 %v49135_v1 }
0x27fd   :  { %42709 = vmatpush3.bf16.msra.mxu0 %v45120_v7 }
0x27fe   :  { %42710 = vmatprep.subr.bf16.mxu0 %v49135_v1 }
0x2801   :  { %42712 = vmatpush3.bf16.msra.mxu0 %v45154_v17 }
0x2802   :  { %42713 = vmatprep.subr.bf16.mxu0 %v49135_v1 }
0x2805   :  { %42715 = vmatpush3.bf16.msra.mxu0 %v45172_v21 }
0x2806   :  { %42788 = vmatprep.subr.bf16.mxu0 %v49135_v1 }
0x2808   :  { %38160 = vmatmul.mubr.f32.vlgmr.msra.gmra.mrb[94].mxu0 %v18191_v23 }
0x2809   :  { %42790 = vmatpush3.bf16.msra.mxu0 %v44958_v8  ;;  %38284 = vmatprep.mubr.msk.f32.mxu0 %vm44853_vm0, %v49134_v0 }
0x280a   :  { %42791 = vmatprep.subr.bf16.mxu0 %v49135_v1 }
0x280d   :  { %42793 = vmatpush3.bf16.msra.mxu0 %v44960_v11 }
0x280e   :  { %42800 = vmatprep.subr.bf16.mxu0 %v49135_v1 }
0x28db   :  { %v18651_v39 = vpop.f32.mrb[94].mxu0 }
0x28dc   :  { %v44250_v57 = vadd.f32 %v47154_v60, %v18651_v39  ;;  %v38161_v18 = vpop.f32.mrb[95].mxu0 }
0x28de   :  { %v18656_v61 = vmin.f32 %v44250_v57, 0.0  ;;  %vm18655_vm13 = vcmp.gt.f32.partialorder %v44250_v57, 0.0 }
0x28e0   :  { %v18657_v22 = vmul.f32 1.442695, %v18656_v61 }
0x28e2   :  { %44720 = vpow2.f32 %v18657_v22 }
0x28ec   :  { %v44721_v58 = vpop.eup %44720 }
0x28ed   :  { %v31971_v27 = vadd.f32 -1.0, %v44721_v58  ;;  %v49166_v58 = vld [vmem:[#allocation18_spill] sm:$0xff] }
0x28ef   :  { %v18660_v38 = vsel %vm18655_vm13, %v44250_v57, %v31971_v27 }
0x28f0   :  { %v18662_v42 = vsel %vm625_vm2, %v18660_v38, 0 }
0x28f1   :  { %v18737_v37 = vand.u32 4294901760, %v18662_v42 }
0x28f3   :  { %v18738_v29 = vsub.f32 %v18662_v42, %v18737_v37  ;;  %v19208_v42 = vstv %s19207_s15  ;;  %s22387_s15 = sadd.f32 %s22386_s12, %s49068_s0 }
0x28f5   :  { %v18739_v53 = vand.u32 4294901760, %v18738_v29 }
0x28f7   :  { %v18740_v32 = vsub.f32 %v18738_v29, %v18739_v53 }
0x28f9   :  { %v18741_v23 = vand.u32 4294901760, %v18740_v32 }
0x28fb   :  { %38179 = vmatmul.mubr.f32.vlgmr.msra.gmra.mrb[94].mxu1 %v18741_v23 }
0x28fc   :  { %42730 = vmatpush3.bf16.msra.mxu1 %v45439_v50  ;;  %38197 = vmatprep.mubr.msk.f32.mxu1 %vm44853_vm0, %v49134_v0 }
0x28fd   :  { %42731 = vmatprep.subr.bf16.mxu1 %v49135_v1 }
0x2900   :  { %42733 = vmatpush3.bf16.msra.mxu1 %v45449_v40 }
0x2901   :  { %42734 = vmatprep.subr.bf16.mxu1 %v49135_v1 }
0x2904   :  { %42736 = vmatpush3.bf16.msra.mxu1 %v45458_v10 }
0x2905   :  { %42737 = vmatprep.subr.bf16.mxu1 %v49135_v1 }
0x2908   :  { %42739 = vmatpush3.bf16.msra.mxu1 %v45462_v48 }
0x2909   :  { %42740 = vmatprep.subr.bf16.mxu1 %v49135_v1 }
0x290b   :  { %38198 = vmatmul.mubr.f32.vlgmr.msra.gmra.mrb[94].mxu1 %v18737_v37 }
0x290c   :  { %42742 = vmatpush3.bf16.msra.mxu1 %v45468_v36  ;;  %38216 = vmatprep.mubr.msk.f32.mxu1 %vm44853_vm0, %v49134_v0 }
0x290d   :  { %42743 = vmatprep.subr.bf16.mxu1 %v49135_v1 }
0x2910   :  { %42745 = vmatpush3.bf16.msra.mxu1 %v45475_v5 }
0x2911   :  { %42746 = vmatprep.subr.bf16.mxu1 %v49135_v1 }
0x2914   :  { %42748 = vmatpush3.bf16.msra.mxu1 %v45483_v6 }
0x2915   :  { %42749 = vmatprep.subr.bf16.mxu1 %v49135_v1 }
0x2918   :  { %42751 = vmatpush3.bf16.msra.mxu1 %v45489_v55 }
0x2919   :  { %42752 = vmatprep.subr.bf16.mxu1 %v49135_v1 }
0x291b   :  { %38217 = vmatmul.mubr.f32.vlgmr.msra.gmra.mrb[94].mxu1 %v18738_v29 }
0x291c   :  { %42754 = vmatpush3.bf16.msra.mxu1 %v45059_v54  ;;  %38235 = vmatprep.mubr.msk.f32.mxu1 %vm44853_vm0, %v49134_v0 }
0x291d   :  { %42755 = vmatprep.subr.bf16.mxu1 %v49135_v1 }
0x2920   :  { %42757 = vmatpush3.bf16.msra.mxu1 %v45100_v2 }
0x2921   :  { %42758 = vmatprep.subr.bf16.mxu1 %v49135_v1 }
0x2924   :  { %42760 = vmatpush3.bf16.msra.mxu1 %v45145_v14 }
0x2925   :  { %42761 = vmatprep.subr.bf16.mxu1 %v49135_v1 }
0x2928   :  { %42763 = vmatpush3.bf16.msra.mxu1 %v45165_v20 }
0x2929   :  { %42764 = vmatprep.subr.bf16.mxu1 %v49135_v1 }
0x292b   :  { %38236 = vmatmul.mubr.f32.vlgmr.msra.gmra.mrb[94].mxu1 %v18739_v53 }
0x292c   :  { %42766 = vmatpush3.bf16.msra.mxu1 %v45507_v4  ;;  %38254 = vmatprep.mubr.msk.f32.mxu1 %vm44853_vm0, %v49134_v0 }
0x292d   :  { %42767 = vmatprep.subr.bf16.mxu1 %v49135_v1 }
0x2930   :  { %42769 = vmatpush3.bf16.msra.mxu1 %v45515_v45 }
0x2931   :  { %42770 = vmatprep.subr.bf16.mxu1 %v49135_v1 }
0x2934   :  { %42772 = vmatpush3.bf16.msra.mxu1 %v45525_v30 }
0x2935   :  { %42773 = vmatprep.subr.bf16.mxu1 %v49135_v1 }
0x2938   :  { %42775 = vmatpush3.bf16.msra.mxu1 %v45529_v9 }
0x2939   :  { %42776 = vmatprep.subr.bf16.mxu1 %v49135_v1 }
0x293b   :  { %38255 = vmatmul.mubr.f32.vlgmr.msra.gmra.mrb[94].mxu1 %v18737_v37 }
0x293c   :  { %42778 = vmatpush3.bf16.msra.mxu1 %v45059_v54  ;;  %38273 = vmatprep.mubr.msk.f32.mxu1 %vm44853_vm0, %v49134_v0 }
0x293d   :  { %42779 = vmatprep.subr.bf16.mxu1 %v49135_v1 }
0x2940   :  { %42781 = vmatpush3.bf16.msra.mxu1 %v45100_v2 }
0x2941   :  { %42782 = vmatprep.subr.bf16.mxu1 %v49135_v1 }
0x2944   :  { %42784 = vmatpush3.bf16.msra.mxu1 %v45145_v14 }
0x2945   :  { %42785 = vmatprep.subr.bf16.mxu1 %v49135_v1 }
0x2948   :  { %42787 = vmatpush3.bf16.msra.mxu1 %v45165_v20 }
0x2949   :  { %42794 = vmatprep.subr.bf16.mxu1 %v49135_v1 }
0x294b   :  { %38274 = vmatmul.mubr.f32.vlgmr.msra.gmra.mrb[94].mxu1 %v18737_v37  ;;  %v19209_v37 = vmul.f32 %v47463_v13, %v19208_v42 }
0x294c   :  { %42796 = vmatpush3.bf16.msra.mxu1 %v44971_v31  ;;  %38295 = vmatprep.mubr.msk.f32.mxu1 %vm44853_vm0, %v49134_v0 }
0x294d   :  { %42797 = vmatprep.subr.bf16.mxu1 %v49135_v1 }
0x2950   :  { %42799 = vmatpush3.bf16.msra.mxu1 %v44976_v33 }
0x2951   :  { %42806 = vmatprep.subr.bf16.mxu1 %v49135_v1 }
0x2a1e   :  { %v19197_v60 = vpop.f32.mrb[94].mxu1 }
0x2a1f   :  { %v44251_v3 = vadd.f32 %v47223_v44, %v19197_v60  ;;  %v38275_v62 = vpop.f32.mrb[95].mxu1 }
0x2a21   :  { %v19204_v47 = vmul.f32 %v44251_v3, %v19203_v51 }
0x2a23   :  { %v47595_v39 = vadd.f32 %v19204_v47, %v47406_v56 }
0x2a25   :  { %v19211_v57 = vsel %vm71_vm1, %v47595_v39, 0 }
0x2a26   :  { %v19282_v18 = vand.u32 4294901760, %v19211_v57 }
0x2a28   :  { %v19283_v61 = vsub.f32 %v19211_v57, %v19282_v18  ;;  %38296 = vmatmul.mubr.f32.vlgmr.msra.gmra.mrb[96].mxu1 %v19282_v18 }
0x2a29   :  { %42808 = vmatpush3.bf16.msra.mxu1 %v44958_v8  ;;  %38317 = vmatprep.mubr.msk.f32.mxu1 %vm44853_vm0, %v49134_v0 }
0x2a2a   :  { %42809 = vmatprep.subr.bf16.mxu1 %v49135_v1  ;;  %v19284_v22 = vand.u32 4294901760, %v19283_v61 }
0x2a2c   :  { %v19285_v44 = vsub.f32 %v19283_v61, %v19284_v22 }
0x2a2d   :  { %42811 = vmatpush3.bf16.msra.mxu1 %v44960_v11 }
0x2a2e   :  { %42818 = vmatprep.subr.bf16.mxu1 %v49135_v1  ;;  %v19286_v56 = vand.u32 4294901760, %v19285_v44 }
0x2a30   :  { %38318 = vmatmul.mubr.f32.vlgmr.msra.gmra.mrb[98].mxu1 %v19284_v22  ;;  %38285 = vmatmul.mubr.f32.vlgmr.msra.gmra.mrb[96].mxu0 %v19286_v56 }
0x2a31   :  { %42802 = vmatpush3.bf16.msra.mxu0 %v49161_v28  ;;  %42820 = vmatpush3.bf16.msra.mxu1 %v44958_v8 }
0x2a32   :  { %42803 = vmatprep.subr.bf16.mxu0 %v49135_v1  ;;  %42821 = vmatprep.subr.bf16.mxu1 %v49135_v1 }
0x2a33   :  { %38306 = vmatprep.mubr.msk.f32.mxu0 %vm44853_vm0, %v49134_v0  ;;  %38339 = vmatprep.mubr.msk.f32.mxu1 %vm44853_vm0, %v49134_v0 }
0x2a35   :  { %42805 = vmatpush3.bf16.msra.mxu0 %v49162_v15  ;;  %42823 = vmatpush3.bf16.msra.mxu1 %v44960_v11 }
0x2a36   :  { %42812 = vmatprep.subr.bf16.mxu0 %v49135_v1  ;;  %42896 = vmatprep.subr.bf16.mxu1 %v49135_v1 }
0x2a38   :  { %38307 = vmatmul.mubr.f32.vlgmr.msra.gmra.mrb[98].mxu0 %v19283_v61  ;;  %38340 = vmatmul.mubr.f32.vlgmr.msra.gmra.mrb[100].mxu1 %v19282_v18 }
0x2a39   :  { %42814 = vmatpush3.bf16.msra.mxu0 %v49163_v52  ;;  %38328 = vmatprep.mubr.msk.f32.mxu0 %vm44853_vm0, %v49134_v0 }
0x2a3a   :  { %42815 = vmatprep.subr.bf16.mxu0 %v49135_v1  ;;  %42898 = vmatpush3.bf16.msra.mxu1 %v45059_v54 }
0x2a3b   :  { %42899 = vmatprep.subr.bf16.mxu1 %v49135_v1  ;;  %38472 = vmatprep.mubr.msk.f32.mxu1 %vm44853_vm0, %v49134_v0 }
0x2a3d   :  { %42817 = vmatpush3.bf16.msra.mxu0 %v49166_v58 }
0x2a3e   :  { %42824 = vmatprep.subr.bf16.mxu0 %v49135_v1  ;;  %42901 = vmatpush3.bf16.msra.mxu1 %v45100_v2 }
0x2a3f   :  { %42902 = vmatprep.subr.bf16.mxu1 %v49135_v1 }
0x2a40   :  { %38329 = vmatmul.mubr.f32.vlgmr.msra.gmra.mrb[100].mxu0 %v19282_v18 }
0x2a41   :  { %42826 = vmatpush3.bf16.msra.mxu0 %v45078_v59  ;;  %38358 = vmatprep.mubr.msk.f32.mxu0 %vm44853_vm0, %v49134_v0 }
0x2a42   :  { %42827 = vmatprep.subr.bf16.mxu0 %v49135_v1  ;;  %42904 = vmatpush3.bf16.msra.mxu1 %v45145_v14 }
0x2a43   :  { %42905 = vmatprep.subr.bf16.mxu1 %v49135_v1 }
0x2a45   :  { %42829 = vmatpush3.bf16.msra.mxu0 %v45120_v7 }
0x2a46   :  { %42830 = vmatprep.subr.bf16.mxu0 %v49135_v1  ;;  %42907 = vmatpush3.bf16.msra.mxu1 %v45165_v20 }
0x2a47   :  { %42908 = vmatprep.subr.bf16.mxu1 %v49135_v1 }
0x2a49   :  { %42832 = vmatpush3.bf16.msra.mxu0 %v45154_v17 }
0x2a4a   :  { %42833 = vmatprep.subr.bf16.mxu0 %v49135_v1 }
0x2a4d   :  { %42835 = vmatpush3.bf16.msra.mxu0 %v45172_v21 }
0x2a4e   :  { %42836 = vmatprep.subr.bf16.mxu0 %v49135_v1 }
0x2afb   :  { %v19379_v27 = vpop.f32.mrb[96].mxu1 }
0x2afc   :  { %v38297_v38 = vpop.f32.mrb[97].mxu1 }
0x2b03   :  { %v19536_v29 = vpop.f32.mrb[98].mxu1  ;;  %v19288_v53 = vpop.f32.mrb[96].mxu0 }
0x2b04   :  { %v19289_v32 = vadd.f32 %v19288_v53, %v19209_v37  ;;  %v38319_v23 = vpop.f32.mrb[99].mxu1  ;;  %v38286_v60 = vpop.f32.mrb[97].mxu0 }
0x2b06   :  { %v19380_v51 = vadd.f32 %v19379_v27, %v19289_v32 }
0x2b0b   :  { %v19459_v3 = vpop.f32.mrb[98].mxu0  ;;  %v19694_v62 = vpop.f32.mrb[100].mxu1 }
0x2b0c   :  { %v19460_v47 = vadd.f32 %v19459_v3, %v19380_v51  ;;  %v38308_v57 = vpop.f32.mrb[99].mxu0  ;;  %v38341_v18 = vpop.f32.mrb[101].mxu1 }
0x2b0e   :  { %v19537_v61 = vadd.f32 %v19536_v29, %v19460_v47 }
0x2b13   :  { %v19619_v22 = vpop.f32.mrb[100].mxu0 }
0x2b14   :  { %v19620_v44 = vadd.f32 %v19619_v22, %v19537_v61  ;;  %v38330_v56 = vpop.f32.mrb[101].mxu0 }
0x2b16   :  { %v19695_v58 = vadd.f32 %v19694_v62, %v19620_v44 }
0x2b18   :  { %v19698_v38 = vadd.f32 %v47469_v41, %v19695_v58 }
0x2b1a   :  { %v19700_v52 = vmin.f32 %v19698_v38, 0.0  ;;  %vm19699_vm14 = vcmp.gt.f32.partialorder %v19698_v38, 0.0 }
0x2b1c   :  { %v19701_v42 = vmul.f32 1.442695, %v19700_v52 }
0x2b1e   :  { %44722 = vpow2.f32 %v19701_v42 }
0x2b28   :  { %v44723_v13 = vpop.eup %44722 }
0x2b29   :  { %v31972_v37 = vadd.f32 -1.0, %v44723_v13  ;;  %v47708_v13 = vld [vmem:[#allocation9] ss:$0 sm:$0xff] }
0x2b2b   :  { %v19704_v53 = vsel %vm19699_vm14, %v19698_v38, %v31972_v37 }
0x2b2c   :  { %v19706_v27 = vsel %vm625_vm2, %v19704_v53, 0 }
0x2b2d   :  { %v19781_v32 = vand.u32 4294901760, %v19706_v27 }
0x2b2f   :  { %v19782_v23 = vsub.f32 %v19706_v27, %v19781_v32  ;;  %v20793_v27 = vstv %s20792_s19 }
0x2b31   :  { %v19783_v60 = vand.u32 4294901760, %v19782_v23 }
0x2b33   :  { %v19784_v51 = vsub.f32 %v19782_v23, %v19783_v60 }
0x2b35   :  { %v19785_v29 = vand.u32 4294901760, %v19784_v51 }
0x2b37   :  { %38359 = vmatmul.mubr.f32.vlgmr.msra.gmra.mrb[102].mxu0 %v19785_v29 }
0x2b38   :  { %42838 = vmatpush3.bf16.msra.mxu0 %v45261_v25  ;;  %38377 = vmatprep.mubr.msk.f32.mxu0 %vm44853_vm0, %v49134_v0 }
0x2b39   :  { %42839 = vmatprep.subr.bf16.mxu0 %v49135_v1 }
0x2b3c   :  { %42841 = vmatpush3.bf16.msra.mxu0 %v45271_v19 }
0x2b3d   :  { %42842 = vmatprep.subr.bf16.mxu0 %v49135_v1 }
0x2b40   :  { %42844 = vmatpush3.bf16.msra.mxu0 %v45280_v35 }
0x2b41   :  { %42845 = vmatprep.subr.bf16.mxu0 %v49135_v1 }
0x2b44   :  { %42847 = vmatpush3.bf16.msra.mxu0 %v45284_v24 }
0x2b45   :  { %42848 = vmatprep.subr.bf16.mxu0 %v49135_v1 }
0x2b47   :  { %38378 = vmatmul.mubr.f32.vlgmr.msra.gmra.mrb[102].mxu0 %v19781_v32 }
0x2b48   :  { %42850 = vmatpush3.bf16.msra.mxu0 %v45290_v26  ;;  %38396 = vmatprep.mubr.msk.f32.mxu0 %vm44853_vm0, %v49134_v0 }
0x2b49   :  { %42851 = vmatprep.subr.bf16.mxu0 %v49135_v1 }
0x2b4c   :  { %42853 = vmatpush3.bf16.msra.mxu0 %v45297_v43 }
0x2b4d   :  { %42854 = vmatprep.subr.bf16.mxu0 %v49135_v1 }
0x2b50   :  { %42856 = vmatpush3.bf16.msra.mxu0 %v45305_v49 }
0x2b51   :  { %42857 = vmatprep.subr.bf16.mxu0 %v49135_v1 }
0x2b54   :  { %42859 = vmatpush3.bf16.msra.mxu0 %v45311_v12 }
0x2b55   :  { %42860 = vmatprep.subr.bf16.mxu0 %v49135_v1 }
0x2b57   :  { %38397 = vmatmul.mubr.f32.vlgmr.msra.gmra.mrb[102].mxu0 %v19782_v23 }
0x2b58   :  { %42862 = vmatpush3.bf16.msra.mxu0 %v45078_v59  ;;  %38415 = vmatprep.mubr.msk.f32.mxu0 %vm44853_vm0, %v49134_v0 }
0x2b59   :  { %42863 = vmatprep.subr.bf16.mxu0 %v49135_v1 }
0x2b5c   :  { %42865 = vmatpush3.bf16.msra.mxu0 %v45120_v7 }
0x2b5d   :  { %42866 = vmatprep.subr.bf16.mxu0 %v49135_v1 }
0x2b60   :  { %42868 = vmatpush3.bf16.msra.mxu0 %v45154_v17 }
0x2b61   :  { %42869 = vmatprep.subr.bf16.mxu0 %v49135_v1 }
0x2b64   :  { %42871 = vmatpush3.bf16.msra.mxu0 %v45172_v21 }
0x2b65   :  { %42872 = vmatprep.subr.bf16.mxu0 %v49135_v1 }
0x2b67   :  { %38416 = vmatmul.mubr.f32.vlgmr.msra.gmra.mrb[102].mxu0 %v19783_v60 }
0x2b68   :  { %42874 = vmatpush3.bf16.msra.mxu0 %v45329_v34  ;;  %38434 = vmatprep.mubr.msk.f32.mxu0 %vm44853_vm0, %v49134_v0 }
0x2b69   :  { %42875 = vmatprep.subr.bf16.mxu0 %v49135_v1 }
0x2b6c   :  { %42877 = vmatpush3.bf16.msra.mxu0 %v45337_v63 }
0x2b6d   :  { %42878 = vmatprep.subr.bf16.mxu0 %v49135_v1 }
0x2b70   :  { %42880 = vmatpush3.bf16.msra.mxu0 %v45347_v16 }
0x2b71   :  { %42881 = vmatprep.subr.bf16.mxu0 %v49135_v1 }
0x2b74   :  { %42883 = vmatpush3.bf16.msra.mxu0 %v45351_v46 }
0x2b75   :  { %42884 = vmatprep.subr.bf16.mxu0 %v49135_v1 }
0x2b77   :  { %38435 = vmatmul.mubr.f32.vlgmr.msra.gmra.mrb[102].mxu0 %v19781_v32 }
0x2b78   :  { %42886 = vmatpush3.bf16.msra.mxu0 %v45078_v59  ;;  %38453 = vmatprep.mubr.msk.f32.mxu0 %vm44853_vm0, %v49134_v0 }
0x2b79   :  { %42887 = vmatprep.subr.bf16.mxu0 %v49135_v1 }
0x2b7c   :  { %42889 = vmatpush3.bf16.msra.mxu0 %v45120_v7 }
0x2b7d   :  { %42890 = vmatprep.subr.bf16.mxu0 %v49135_v1 }
0x2b80   :  { %42892 = vmatpush3.bf16.msra.mxu0 %v45154_v17 }
0x2b81   :  { %42893 = vmatprep.subr.bf16.mxu0 %v49135_v1 }
0x2b84   :  { %42895 = vmatpush3.bf16.msra.mxu0 %v45172_v21 }
0x2b85   :  { %42968 = vmatprep.subr.bf16.mxu0 %v49135_v1 }
0x2b87   :  { %38454 = vmatmul.mubr.f32.vlgmr.msra.gmra.mrb[102].mxu0 %v19781_v32  ;;  %v47777_v32 = vld [vmem:[%s49078_s10] ss:$0 sm:$0xff] }
0x2b88   :  { %42970 = vmatpush3.bf16.msra.mxu0 %v44958_v8  ;;  %38578 = vmatprep.mubr.msk.f32.mxu0 %vm44853_vm0, %v49134_v0 }
0x2b89   :  { %42971 = vmatprep.subr.bf16.mxu0 %v49135_v1 }
0x2b8c   :  { %42973 = vmatpush3.bf16.msra.mxu0 %v44960_v11 }
0x2b8d   :  { %42980 = vmatprep.subr.bf16.mxu0 %v49135_v1 }
0x2c5a   :  { %v20241_v52 = vpop.f32.mrb[102].mxu0 }
0x2c5b   :  { %v44252_v58 = vadd.f32 %v47708_v13, %v20241_v52  ;;  %v38455_v3 = vpop.f32.mrb[103].mxu0 }
0x2c5d   :  { %v20246_v62 = vmin.f32 %v44252_v58, 0.0  ;;  %vm20245_vm15 = vcmp.gt.f32.partialorder %v44252_v58, 0.0 }
0x2c5f   :  { %v20247_v47 = vmul.f32 1.442695, %v20246_v62 }
0x2c61   :  { %44724 = vpow2.f32 %v20247_v47 }
0x2c6b   :  { %v44725_v57 = vpop.eup %44724 }
0x2c6c   :  { %v31973_v18 = vadd.f32 -1.0, %v44725_v57  ;;  %v49167_v57 = vld [vmem:[#allocation17_spill] sm:$0xff] }
0x2c6e   :  { %v20250_v61 = vsel %vm20245_vm15, %v44252_v58, %v31973_v18  ;;  %v49168_v18 = vld [vmem:[#allocation18_spill] sm:$0xff] }
0x2c6f   :  { %v20252_v22 = vsel %vm625_vm2, %v20250_v61, 0 }
0x2c70   :  { %v20327_v44 = vand.u32 4294901760, %v20252_v22 }
0x2c72   :  { %v20328_v56 = vsub.f32 %v20252_v22, %v20327_v44 }
0x2c74   :  { %v20329_v38 = vand.u32 4294901760, %v20328_v56 }
0x2c76   :  { %v20330_v42 = vsub.f32 %v20328_v56, %v20329_v38 }
0x2c78   :  { %v20331_v37 = vand.u32 4294901760, %v20330_v42 }
0x2c7a   :  { %38473 = vmatmul.mubr.f32.vlgmr.msra.gmra.mrb[102].mxu1 %v20331_v37 }
0x2c7b   :  { %42910 = vmatpush3.bf16.msra.mxu1 %v45439_v50  ;;  %38491 = vmatprep.mubr.msk.f32.mxu1 %vm44853_vm0, %v49134_v0 }
0x2c7c   :  { %42911 = vmatprep.subr.bf16.mxu1 %v49135_v1 }
0x2c7f   :  { %42913 = vmatpush3.bf16.msra.mxu1 %v45449_v40 }
0x2c80   :  { %42914 = vmatprep.subr.bf16.mxu1 %v49135_v1 }
0x2c83   :  { %42916 = vmatpush3.bf16.msra.mxu1 %v45458_v10 }
0x2c84   :  { %42917 = vmatprep.subr.bf16.mxu1 %v49135_v1 }
0x2c87   :  { %42919 = vmatpush3.bf16.msra.mxu1 %v45462_v48 }
0x2c88   :  { %42920 = vmatprep.subr.bf16.mxu1 %v49135_v1 }
0x2c8a   :  { %38492 = vmatmul.mubr.f32.vlgmr.msra.gmra.mrb[102].mxu1 %v20327_v44 }
0x2c8b   :  { %42922 = vmatpush3.bf16.msra.mxu1 %v45468_v36  ;;  %38510 = vmatprep.mubr.msk.f32.mxu1 %vm44853_vm0, %v49134_v0 }
0x2c8c   :  { %42923 = vmatprep.subr.bf16.mxu1 %v49135_v1 }
0x2c8f   :  { %42925 = vmatpush3.bf16.msra.mxu1 %v45475_v5 }
0x2c90   :  { %42926 = vmatprep.subr.bf16.mxu1 %v49135_v1 }
0x2c93   :  { %42928 = vmatpush3.bf16.msra.mxu1 %v45483_v6 }
0x2c94   :  { %42929 = vmatprep.subr.bf16.mxu1 %v49135_v1 }
0x2c97   :  { %42931 = vmatpush3.bf16.msra.mxu1 %v45489_v55 }
0x2c98   :  { %42932 = vmatprep.subr.bf16.mxu1 %v49135_v1 }
0x2c9a   :  { %38511 = vmatmul.mubr.f32.vlgmr.msra.gmra.mrb[102].mxu1 %v20328_v56  ;;  %v49169_v56 = vld [vmem:[#allocation19_spill] sm:$0xff] }
0x2c9b   :  { %42934 = vmatpush3.bf16.msra.mxu1 %v45059_v54  ;;  %38529 = vmatprep.mubr.msk.f32.mxu1 %vm44853_vm0, %v49134_v0 }
0x2c9c   :  { %42935 = vmatprep.subr.bf16.mxu1 %v49135_v1 }
0x2c9f   :  { %42937 = vmatpush3.bf16.msra.mxu1 %v45100_v2 }
0x2ca0   :  { %42938 = vmatprep.subr.bf16.mxu1 %v49135_v1 }
0x2ca3   :  { %42940 = vmatpush3.bf16.msra.mxu1 %v45145_v14 }
0x2ca4   :  { %42941 = vmatprep.subr.bf16.mxu1 %v49135_v1 }
0x2ca7   :  { %42943 = vmatpush3.bf16.msra.mxu1 %v45165_v20 }
0x2ca8   :  { %42944 = vmatprep.subr.bf16.mxu1 %v49135_v1 }
0x2caa   :  { %38530 = vmatmul.mubr.f32.vlgmr.msra.gmra.mrb[102].mxu1 %v20329_v38 }
0x2cab   :  { %42946 = vmatpush3.bf16.msra.mxu1 %v45507_v4  ;;  %38548 = vmatprep.mubr.msk.f32.mxu1 %vm44853_vm0, %v49134_v0 }
0x2cac   :  { %42947 = vmatprep.subr.bf16.mxu1 %v49135_v1 }
0x2caf   :  { %42949 = vmatpush3.bf16.msra.mxu1 %v45515_v45 }
0x2cb0   :  { %42950 = vmatprep.subr.bf16.mxu1 %v49135_v1 }
0x2cb3   :  { %42952 = vmatpush3.bf16.msra.mxu1 %v45525_v30 }
0x2cb4   :  { %42953 = vmatprep.subr.bf16.mxu1 %v49135_v1 }
0x2cb7   :  { %42955 = vmatpush3.bf16.msra.mxu1 %v45529_v9 }
0x2cb8   :  { %42956 = vmatprep.subr.bf16.mxu1 %v49135_v1 }
0x2cba   :  { %38549 = vmatmul.mubr.f32.vlgmr.msra.gmra.mrb[102].mxu1 %v20327_v44 }
0x2cbb   :  { %42958 = vmatpush3.bf16.msra.mxu1 %v45059_v54  ;;  %38567 = vmatprep.mubr.msk.f32.mxu1 %vm44853_vm0, %v49134_v0 }
0x2cbc   :  { %42959 = vmatprep.subr.bf16.mxu1 %v49135_v1 }
0x2cbf   :  { %42961 = vmatpush3.bf16.msra.mxu1 %v45100_v2 }
0x2cc0   :  { %42962 = vmatprep.subr.bf16.mxu1 %v49135_v1 }
0x2cc3   :  { %42964 = vmatpush3.bf16.msra.mxu1 %v45145_v14 }
0x2cc4   :  { %42965 = vmatprep.subr.bf16.mxu1 %v49135_v1 }
0x2cc7   :  { %42967 = vmatpush3.bf16.msra.mxu1 %v45165_v20 }
0x2cc8   :  { %42974 = vmatprep.subr.bf16.mxu1 %v49135_v1 }
0x2cca   :  { %38568 = vmatmul.mubr.f32.vlgmr.msra.gmra.mrb[102].mxu1 %v20327_v44  ;;  %v20798_v44 = vstv %s20797_s20  ;;  %s30336_s20 = smul.f32 19.0, %s49069_s1 }
0x2ccb   :  { %42976 = vmatpush3.bf16.msra.mxu1 %v44971_v31  ;;  %38589 = vmatprep.mubr.msk.f32.mxu1 %vm44853_vm0, %v49134_v0  ;;  %v20799_v38 = vmul.f32 %v49169_v56, %v20798_v44 }
0x2ccc   :  { %42977 = vmatprep.subr.bf16.mxu1 %v49135_v1  ;;  %s30337_s27 = sadd.f32 %s30336_s20, %s49068_s0 }
0x2ccf   :  { %42979 = vmatpush3.bf16.msra.mxu1 %v44976_v33 }
0x2cd0   :  { %42986 = vmatprep.subr.bf16.mxu1 %v49135_v1 }
0x2d9d   :  { %v20787_v53 = vpop.f32.mrb[102].mxu1 }
0x2d9e   :  { %v44253_v23 = vadd.f32 %v47777_v32, %v20787_v53  ;;  %v38569_v60 = vpop.f32.mrb[103].mxu1 }
0x2da0   :  { %v20794_v51 = vmul.f32 %v44253_v23, %v20793_v27 }
0x2da2   :  { %v47781_v29 = vadd.f32 %v20794_v51, %v47595_v39 }
0x2da4   :  { %v20801_v52 = vsel %vm71_vm1, %v47781_v29, 0 }
0x2da5   :  { %v20872_v58 = vand.u32 4294901760, %v20801_v52 }
0x2da7   :  { %v20873_v3 = vsub.f32 %v20801_v52, %v20872_v58  ;;  %38590 = vmatmul.mubr.f32.vlgmr.msra.gmra.mrb[104].mxu1 %v20872_v58 }
0x2da8   :  { %42988 = vmatpush3.bf16.msra.mxu1 %v44958_v8  ;;  %38611 = vmatprep.mubr.msk.f32.mxu1 %vm44853_vm0, %v49134_v0 }
0x2da9   :  { %42989 = vmatprep.subr.bf16.mxu1 %v49135_v1  ;;  %v20874_v62 = vand.u32 4294901760, %v20873_v3 }
0x2dab   :  { %v20875_v47 = vsub.f32 %v20873_v3, %v20874_v62 }
0x2dac   :  { %42991 = vmatpush3.bf16.msra.mxu1 %v44960_v11 }
0x2dad   :  { %42998 = vmatprep.subr.bf16.mxu1 %v49135_v1  ;;  %v20876_v39 = vand.u32 4294901760, %v20875_v47 }
0x2daf   :  { %38612 = vmatmul.mubr.f32.vlgmr.msra.gmra.mrb[106].mxu1 %v20874_v62  ;;  %38579 = vmatmul.mubr.f32.vlgmr.msra.gmra.mrb[104].mxu0 %v20876_v39 }
0x2db0   :  { %42982 = vmatpush3.bf16.msra.mxu0 %v49161_v28  ;;  %43000 = vmatpush3.bf16.msra.mxu1 %v44958_v8 }
0x2db1   :  { %42983 = vmatprep.subr.bf16.mxu0 %v49135_v1  ;;  %43001 = vmatprep.subr.bf16.mxu1 %v49135_v1 }
0x2db2   :  { %38600 = vmatprep.mubr.msk.f32.mxu0 %vm44853_vm0, %v49134_v0  ;;  %38633 = vmatprep.mubr.msk.f32.mxu1 %vm44853_vm0, %v49134_v0 }
0x2db4   :  { %42985 = vmatpush3.bf16.msra.mxu0 %v49162_v15  ;;  %43003 = vmatpush3.bf16.msra.mxu1 %v44960_v11 }
0x2db5   :  { %42992 = vmatprep.subr.bf16.mxu0 %v49135_v1  ;;  %43076 = vmatprep.subr.bf16.mxu1 %v49135_v1 }
0x2db7   :  { %38601 = vmatmul.mubr.f32.vlgmr.msra.gmra.mrb[106].mxu0 %v20873_v3  ;;  %38634 = vmatmul.mubr.f32.vlgmr.msra.gmra.mrb[108].mxu1 %v20872_v58 }
0x2db8   :  { %42994 = vmatpush3.bf16.msra.mxu0 %v49167_v57  ;;  %38622 = vmatprep.mubr.msk.f32.mxu0 %vm44853_vm0, %v49134_v0 }
0x2db9   :  { %42995 = vmatprep.subr.bf16.mxu0 %v49135_v1  ;;  %43078 = vmatpush3.bf16.msra.mxu1 %v45059_v54 }
0x2dba   :  { %43079 = vmatprep.subr.bf16.mxu1 %v49135_v1  ;;  %38766 = vmatprep.mubr.msk.f32.mxu1 %vm44853_vm0, %v49134_v0 }
0x2dbc   :  { %42997 = vmatpush3.bf16.msra.mxu0 %v49168_v18 }
0x2dbd   :  { %43004 = vmatprep.subr.bf16.mxu0 %v49135_v1  ;;  %43081 = vmatpush3.bf16.msra.mxu1 %v45100_v2 }
0x2dbe   :  { %43082 = vmatprep.subr.bf16.mxu1 %v49135_v1 }
0x2dbf   :  { %38623 = vmatmul.mubr.f32.vlgmr.msra.gmra.mrb[108].mxu0 %v20872_v58 }
0x2dc0   :  { %43006 = vmatpush3.bf16.msra.mxu0 %v45078_v59  ;;  %38652 = vmatprep.mubr.msk.f32.mxu0 %vm44853_vm0, %v49134_v0 }
0x2dc1   :  { %43007 = vmatprep.subr.bf16.mxu0 %v49135_v1  ;;  %43084 = vmatpush3.bf16.msra.mxu1 %v45145_v14 }
0x2dc2   :  { %43085 = vmatprep.subr.bf16.mxu1 %v49135_v1 }
0x2dc4   :  { %43009 = vmatpush3.bf16.msra.mxu0 %v45120_v7 }
0x2dc5   :  { %43010 = vmatprep.subr.bf16.mxu0 %v49135_v1  ;;  %43087 = vmatpush3.bf16.msra.mxu1 %v45165_v20 }
0x2dc6   :  { %43088 = vmatprep.subr.bf16.mxu1 %v49135_v1 }
0x2dc8   :  { %43012 = vmatpush3.bf16.msra.mxu0 %v45154_v17 }
0x2dc9   :  { %43013 = vmatprep.subr.bf16.mxu0 %v49135_v1 }
0x2dcc   :  { %43015 = vmatpush3.bf16.msra.mxu0 %v45172_v21 }
0x2dcd   :  { %43016 = vmatprep.subr.bf16.mxu0 %v49135_v1 }
0x2e7a   :  { %v20969_v61 = vpop.f32.mrb[104].mxu1 }
0x2e7b   :  { %v38591_v22 = vpop.f32.mrb[105].mxu1 }
0x2e82   :  { %v21126_v42 = vpop.f32.mrb[106].mxu1  ;;  %v20878_v37 = vpop.f32.mrb[104].mxu0 }
0x2e83   :  { %v20879_v53 = vadd.f32 %v20878_v37, %v20799_v38  ;;  %v38613_v27 = vpop.f32.mrb[107].mxu1  ;;  %v38580_v23 = vpop.f32.mrb[105].mxu0 }
0x2e85   :  { %v20970_v60 = vadd.f32 %v20969_v61, %v20879_v53 }
0x2e8a   :  { %v21049_v51 = vpop.f32.mrb[106].mxu0  ;;  %v21284_v52 = vpop.f32.mrb[108].mxu1 }
0x2e8b   :  { %v21050_v58 = vadd.f32 %v21049_v51, %v20970_v60  ;;  %v38602_v3 = vpop.f32.mrb[107].mxu0  ;;  %v38635_v62 = vpop.f32.mrb[109].mxu1 }
0x2e8d   :  { %v21127_v47 = vadd.f32 %v21126_v42, %v21050_v58 }
0x2e92   :  { %v21209_v39 = vpop.f32.mrb[108].mxu0 }
0x2e93   :  { %v21210_v18 = vadd.f32 %v21209_v39, %v21127_v47  ;;  %v38624_v57 = vpop.f32.mrb[109].mxu0 }
0x2e95   :  { %v21285_v15 = vadd.f32 %v21284_v52, %v21210_v18 }
0x2e97   :  { %v21288_v22 = vadd.f32 %v47469_v41, %v21285_v15 }
0x2e99   :  { %v21290_v28 = vmin.f32 %v21288_v22, 0.0  ;;  %vm21289_vm3 = vcmp.gt.f32.partialorder %v21288_v22, 0.0 }
0x2e9b   :  { %v21291_v44 = vmul.f32 1.442695, %v21290_v28 }
0x2e9d   :  { %44726 = vpow2.f32 %v21291_v44 }
0x2ea7   :  { %v44727_v56 = vpop.eup %44726 }
0x2ea8   :  { %v31974_v38 = vadd.f32 -1.0, %v44727_v56 }
0x2eaa   :  { %v21294_v37 = vsel %vm21289_vm3, %v21288_v22, %v31974_v38  ;;  %v22383_v38 = vstv %s22382_s4 }
0x2eab   :  { %v21296_v61 = vsel %vm625_vm2, %v21294_v37, 0 }
0x2eac   :  { %v21371_v53 = vand.u32 4294901760, %v21296_v61 }
0x2eae   :  { %v21372_v27 = vsub.f32 %v21296_v61, %v21371_v53 }
0x2eb0   :  { %v21373_v23 = vand.u32 4294901760, %v21372_v27 }
0x2eb2   :  { %v21374_v60 = vsub.f32 %v21372_v27, %v21373_v23 }
0x2eb4   :  { %v21375_v42 = vand.u32 4294901760, %v21374_v60 }
0x2eb6   :  { %38653 = vmatmul.mubr.f32.vlgmr.msra.gmra.mrb[110].mxu0 %v21375_v42 }
0x2eb7   :  { %43018 = vmatpush3.bf16.msra.mxu0 %v45261_v25  ;;  %38671 = vmatprep.mubr.msk.f32.mxu0 %vm44853_vm0, %v49134_v0 }
0x2eb8   :  { %43019 = vmatprep.subr.bf16.mxu0 %v49135_v1 }
0x2ebb   :  { %43021 = vmatpush3.bf16.msra.mxu0 %v45271_v19 }
0x2ebc   :  { %43022 = vmatprep.subr.bf16.mxu0 %v49135_v1 }
0x2ebf   :  { %43024 = vmatpush3.bf16.msra.mxu0 %v45280_v35 }
0x2ec0   :  { %43025 = vmatprep.subr.bf16.mxu0 %v49135_v1 }
0x2ec3   :  { %43027 = vmatpush3.bf16.msra.mxu0 %v45284_v24 }
0x2ec4   :  { %43028 = vmatprep.subr.bf16.mxu0 %v49135_v1 }
0x2ec6   :  { %38672 = vmatmul.mubr.f32.vlgmr.msra.gmra.mrb[110].mxu0 %v21371_v53 }
0x2ec7   :  { %43030 = vmatpush3.bf16.msra.mxu0 %v45290_v26  ;;  %38690 = vmatprep.mubr.msk.f32.mxu0 %vm44853_vm0, %v49134_v0 }
0x2ec8   :  { %43031 = vmatprep.subr.bf16.mxu0 %v49135_v1 }
0x2ecb   :  { %43033 = vmatpush3.bf16.msra.mxu0 %v45297_v43 }
0x2ecc   :  { %43034 = vmatprep.subr.bf16.mxu0 %v49135_v1 }
0x2ecf   :  { %43036 = vmatpush3.bf16.msra.mxu0 %v45305_v49 }
0x2ed0   :  { %43037 = vmatprep.subr.bf16.mxu0 %v49135_v1 }
0x2ed3   :  { %43039 = vmatpush3.bf16.msra.mxu0 %v45311_v12 }
0x2ed4   :  { %43040 = vmatprep.subr.bf16.mxu0 %v49135_v1 }
0x2ed6   :  { %38691 = vmatmul.mubr.f32.vlgmr.msra.gmra.mrb[110].mxu0 %v21372_v27 }
0x2ed7   :  { %43042 = vmatpush3.bf16.msra.mxu0 %v45078_v59  ;;  %38709 = vmatprep.mubr.msk.f32.mxu0 %vm44853_vm0, %v49134_v0 }
0x2ed8   :  { %43043 = vmatprep.subr.bf16.mxu0 %v49135_v1 }
0x2edb   :  { %43045 = vmatpush3.bf16.msra.mxu0 %v45120_v7 }
0x2edc   :  { %43046 = vmatprep.subr.bf16.mxu0 %v49135_v1 }
0x2edf   :  { %43048 = vmatpush3.bf16.msra.mxu0 %v45154_v17 }
0x2ee0   :  { %43049 = vmatprep.subr.bf16.mxu0 %v49135_v1 }
0x2ee3   :  { %43051 = vmatpush3.bf16.msra.mxu0 %v45172_v21 }
0x2ee4   :  { %43052 = vmatprep.subr.bf16.mxu0 %v49135_v1 }
0x2ee6   :  { %38710 = vmatmul.mubr.f32.vlgmr.msra.gmra.mrb[110].mxu0 %v21373_v23 }
0x2ee7   :  { %43054 = vmatpush3.bf16.msra.mxu0 %v45329_v34  ;;  %38728 = vmatprep.mubr.msk.f32.mxu0 %vm44853_vm0, %v49134_v0 }
0x2ee8   :  { %43055 = vmatprep.subr.bf16.mxu0 %v49135_v1 }
0x2eeb   :  { %43057 = vmatpush3.bf16.msra.mxu0 %v45337_v63 }
0x2eec   :  { %43058 = vmatprep.subr.bf16.mxu0 %v49135_v1 }
0x2eef   :  { %43060 = vmatpush3.bf16.msra.mxu0 %v45347_v16 }
0x2ef0   :  { %43061 = vmatprep.subr.bf16.mxu0 %v49135_v1 }
0x2ef3   :  { %43063 = vmatpush3.bf16.msra.mxu0 %v45351_v46 }
0x2ef4   :  { %43064 = vmatprep.subr.bf16.mxu0 %v49135_v1 }
0x2ef6   :  { %38729 = vmatmul.mubr.f32.vlgmr.msra.gmra.mrb[110].mxu0 %v21371_v53 }
0x2ef7   :  { %43066 = vmatpush3.bf16.msra.mxu0 %v45078_v59  ;;  %38747 = vmatprep.mubr.msk.f32.mxu0 %vm44853_vm0, %v49134_v0 }
0x2ef8   :  { %43067 = vmatprep.subr.bf16.mxu0 %v49135_v1 }
0x2efb   :  { %43069 = vmatpush3.bf16.msra.mxu0 %v45120_v7 }
0x2efc   :  { %43070 = vmatprep.subr.bf16.mxu0 %v49135_v1 }
0x2eff   :  { %43072 = vmatpush3.bf16.msra.mxu0 %v45154_v17 }
0x2f00   :  { %43073 = vmatprep.subr.bf16.mxu0 %v49135_v1 }
0x2f03   :  { %43075 = vmatpush3.bf16.msra.mxu0 %v45172_v21 }
0x2f04   :  { %43148 = vmatprep.subr.bf16.mxu0 %v49135_v1 }
0x2f06   :  { %38748 = vmatmul.mubr.f32.vlgmr.msra.gmra.mrb[110].mxu0 %v21371_v53 }
0x2f07   :  { %43150 = vmatpush3.bf16.msra.mxu0 %v44958_v8  ;;  %38872 = vmatprep.mubr.msk.f32.mxu0 %vm44853_vm0, %v49134_v0 }
0x2f08   :  { %43151 = vmatprep.subr.bf16.mxu0 %v49135_v1 }
0x2f0b   :  { %43153 = vmatpush3.bf16.msra.mxu0 %v44960_v11 }
0x2f0c   :  { %43160 = vmatprep.subr.bf16.mxu0 %v49135_v1 }
0x2fd9   :  { %v21831_v28 = vpop.f32.mrb[110].mxu0 }
0x2fda   :  { %v44254_v15 = vadd.f32 %v47708_v13, %v21831_v28  ;;  %v38749_v41 = vpop.f32.mrb[111].mxu0 }
0x2fdb   :  { %v49170_v41 = vld [vmem:[#allocation15_spill] sm:$0xff] }
0x2fdc   :  { %v21836_v57 = vmin.f32 %v44254_v15, 0.0  ;;  %vm21835_vm4 = vcmp.gt.f32.partialorder %v44254_v15, 0.0 }
0x2fde   :  { %v21837_v18 = vmul.f32 1.442695, %v21836_v57  ;;  %v49171_v57 = vld [vmem:[#allocation16_spill] sm:$0xff] }
0x2fe0   :  { %44728 = vpow2.f32 %v21837_v18  ;;  %v49172_v18 = vld [vmem:[#allocation17_spill] sm:$0xff] }
0x2fea   :  { %v44729_v51 = vpop.eup %44728 }
0x2feb   :  { %v31975_v52 = vadd.f32 -1.0, %v44729_v51  ;;  %v49173_v51 = vld [vmem:[#allocation18_spill] sm:$0xff] }
0x2fed   :  { %v21840_v58 = vsel %vm21835_vm4, %v44254_v15, %v31975_v52 }
0x2fee   :  { %v21842_v3 = vsel %vm625_vm2, %v21840_v58, 0 }
0x2fef   :  { %v21917_v62 = vand.u32 4294901760, %v21842_v3 }
0x2ff1   :  { %v21918_v47 = vsub.f32 %v21842_v3, %v21917_v62  ;;  %v22388_v3 = vstv %s22387_s15 }
0x2ff3   :  { %v21919_v39 = vand.u32 4294901760, %v21918_v47 }
0x2ff5   :  { %v21920_v22 = vsub.f32 %v21918_v47, %v21919_v39 }
0x2ff7   :  { %v21921_v44 = vand.u32 4294901760, %v21920_v22 }
0x2ff9   :  { %38767 = vmatmul.mubr.f32.vlgmr.msra.gmra.mrb[110].mxu1 %v21921_v44 }
0x2ffa   :  { %43090 = vmatpush3.bf16.msra.mxu1 %v45439_v50  ;;  %38785 = vmatprep.mubr.msk.f32.mxu1 %vm44853_vm0, %v49134_v0 }
0x2ffb   :  { %43091 = vmatprep.subr.bf16.mxu1 %v49135_v1 }
0x2ffe   :  { %43093 = vmatpush3.bf16.msra.mxu1 %v45449_v40 }
0x2fff   :  { %43094 = vmatprep.subr.bf16.mxu1 %v49135_v1 }
0x3002   :  { %43096 = vmatpush3.bf16.msra.mxu1 %v45458_v10 }
0x3003   :  { %43097 = vmatprep.subr.bf16.mxu1 %v49135_v1 }
0x3006   :  { %43099 = vmatpush3.bf16.msra.mxu1 %v45462_v48 }
0x3007   :  { %43100 = vmatprep.subr.bf16.mxu1 %v49135_v1 }
0x3009   :  { %38786 = vmatmul.mubr.f32.vlgmr.msra.gmra.mrb[110].mxu1 %v21917_v62 }
0x300a   :  { %43102 = vmatpush3.bf16.msra.mxu1 %v45468_v36  ;;  %38804 = vmatprep.mubr.msk.f32.mxu1 %vm44853_vm0, %v49134_v0 }
0x300b   :  { %43103 = vmatprep.subr.bf16.mxu1 %v49135_v1 }
0x300e   :  { %43105 = vmatpush3.bf16.msra.mxu1 %v45475_v5 }
0x300f   :  { %43106 = vmatprep.subr.bf16.mxu1 %v49135_v1 }
0x3012   :  { %43108 = vmatpush3.bf16.msra.mxu1 %v45483_v6 }
0x3013   :  { %43109 = vmatprep.subr.bf16.mxu1 %v49135_v1 }
0x3016   :  { %43111 = vmatpush3.bf16.msra.mxu1 %v45489_v55 }
0x3017   :  { %43112 = vmatprep.subr.bf16.mxu1 %v49135_v1 }
0x3019   :  { %38805 = vmatmul.mubr.f32.vlgmr.msra.gmra.mrb[110].mxu1 %v21918_v47 }
0x301a   :  { %43114 = vmatpush3.bf16.msra.mxu1 %v45059_v54  ;;  %38823 = vmatprep.mubr.msk.f32.mxu1 %vm44853_vm0, %v49134_v0 }
0x301b   :  { %43115 = vmatprep.subr.bf16.mxu1 %v49135_v1 }
0x301e   :  { %43117 = vmatpush3.bf16.msra.mxu1 %v45100_v2 }
0x301f   :  { %43118 = vmatprep.subr.bf16.mxu1 %v49135_v1 }
0x3022   :  { %43120 = vmatpush3.bf16.msra.mxu1 %v45145_v14 }
0x3023   :  { %43121 = vmatprep.subr.bf16.mxu1 %v49135_v1 }
0x3026   :  { %43123 = vmatpush3.bf16.msra.mxu1 %v45165_v20 }
0x3027   :  { %43124 = vmatprep.subr.bf16.mxu1 %v49135_v1 }
0x3029   :  { %38824 = vmatmul.mubr.f32.vlgmr.msra.gmra.mrb[110].mxu1 %v21919_v39 }
0x302a   :  { %43126 = vmatpush3.bf16.msra.mxu1 %v45507_v4  ;;  %38842 = vmatprep.mubr.msk.f32.mxu1 %vm44853_vm0, %v49134_v0 }
0x302b   :  { %43127 = vmatprep.subr.bf16.mxu1 %v49135_v1 }
0x302e   :  { %43129 = vmatpush3.bf16.msra.mxu1 %v45515_v45 }
0x302f   :  { %43130 = vmatprep.subr.bf16.mxu1 %v49135_v1 }
0x3032   :  { %43132 = vmatpush3.bf16.msra.mxu1 %v45525_v30 }
0x3033   :  { %43133 = vmatprep.subr.bf16.mxu1 %v49135_v1 }
0x3036   :  { %43135 = vmatpush3.bf16.msra.mxu1 %v45529_v9 }
0x3037   :  { %43136 = vmatprep.subr.bf16.mxu1 %v49135_v1 }
0x3039   :  { %38843 = vmatmul.mubr.f32.vlgmr.msra.gmra.mrb[110].mxu1 %v21917_v62 }
0x303a   :  { %43138 = vmatpush3.bf16.msra.mxu1 %v45059_v54  ;;  %38861 = vmatprep.mubr.msk.f32.mxu1 %vm44853_vm0, %v49134_v0 }
0x303b   :  { %43139 = vmatprep.subr.bf16.mxu1 %v49135_v1 }
0x303e   :  { %43141 = vmatpush3.bf16.msra.mxu1 %v45100_v2 }
0x303f   :  { %43142 = vmatprep.subr.bf16.mxu1 %v49135_v1 }
0x3042   :  { %43144 = vmatpush3.bf16.msra.mxu1 %v45145_v14 }
0x3043   :  { %43145 = vmatprep.subr.bf16.mxu1 %v49135_v1 }
0x3046   :  { %43147 = vmatpush3.bf16.msra.mxu1 %v45165_v20 }
0x3047   :  { %43154 = vmatprep.subr.bf16.mxu1 %v49135_v1 }
0x3049   :  { %38862 = vmatmul.mubr.f32.vlgmr.msra.gmra.mrb[110].mxu1 %v21917_v62  ;;  %v48017_v62 = vld [vmem:[%s49073_s5] ss:$0 sm:$0xff] }
0x304a   :  { %43156 = vmatpush3.bf16.msra.mxu1 %v44971_v31  ;;  %38883 = vmatprep.mubr.msk.f32.mxu1 %vm44853_vm0, %v49134_v0  ;;  %49174 = vst [vmem:[#allocation19_spill] sm:$0xff] %v48017_v62  ;;  %v22389_v47 = vmul.f32 %v48017_v62, %v22388_v3  ;;  %v48023_v3 = vld [vmem:[%s49074_s6] ss:$0 sm:$0xff] }
0x304b   :  { %43157 = vmatprep.subr.bf16.mxu1 %v49135_v1 }
0x304e   :  { %43159 = vmatpush3.bf16.msra.mxu1 %v44976_v33 }
0x304f   :  { %43166 = vmatprep.subr.bf16.mxu1 %v49135_v1 }
0x311c   :  { %v22377_v56 = vpop.f32.mrb[110].mxu1 }
0x311d   :  { %v44255_v37 = vadd.f32 %v47777_v32, %v22377_v56  ;;  %v38863_v61 = vpop.f32.mrb[111].mxu1 }
0x311f   :  { %v22384_v53 = vmul.f32 %v44255_v37, %v22383_v38 }
0x3121   :  { %v47960_v27 = vadd.f32 %v22384_v53, %v47781_v29 }
0x3123   :  { %v22391_v23 = vsel %vm71_vm1, %v47960_v27, 0 }
0x3124   :  { %v22462_v60 = vand.u32 4294901760, %v22391_v23 }
0x3126   :  { %v22463_v42 = vsub.f32 %v22391_v23, %v22462_v60  ;;  %38884 = vmatmul.mubr.f32.vlgmr.msra.gmra.mrb[112].mxu1 %v22462_v60 }
0x3127   :  { %43168 = vmatpush3.bf16.msra.mxu1 %v44958_v8  ;;  %38905 = vmatprep.mubr.msk.f32.mxu1 %vm44853_vm0, %v49134_v0 }
0x3128   :  { %43169 = vmatprep.subr.bf16.mxu1 %v49135_v1  ;;  %v22464_v28 = vand.u32 4294901760, %v22463_v42 }
0x312a   :  { %v22465_v15 = vsub.f32 %v22463_v42, %v22464_v28 }
0x312b   :  { %43171 = vmatpush3.bf16.msra.mxu1 %v44960_v11 }
0x312c   :  { %43178 = vmatprep.subr.bf16.mxu1 %v49135_v1  ;;  %v22466_v29 = vand.u32 4294901760, %v22465_v15 }
0x312e   :  { %38906 = vmatmul.mubr.f32.vlgmr.msra.gmra.mrb[114].mxu1 %v22464_v28  ;;  %38873 = vmatmul.mubr.f32.vlgmr.msra.gmra.mrb[112].mxu0 %v22466_v29 }
0x312f   :  { %43162 = vmatpush3.bf16.msra.mxu0 %v49170_v41  ;;  %43180 = vmatpush3.bf16.msra.mxu1 %v44958_v8 }
0x3130   :  { %43163 = vmatprep.subr.bf16.mxu0 %v49135_v1  ;;  %43181 = vmatprep.subr.bf16.mxu1 %v49135_v1 }
0x3131   :  { %38894 = vmatprep.mubr.msk.f32.mxu0 %vm44853_vm0, %v49134_v0  ;;  %38927 = vmatprep.mubr.msk.f32.mxu1 %vm44853_vm0, %v49134_v0 }
0x3133   :  { %43165 = vmatpush3.bf16.msra.mxu0 %v49171_v57  ;;  %43183 = vmatpush3.bf16.msra.mxu1 %v44960_v11 }
0x3134   :  { %43172 = vmatprep.subr.bf16.mxu0 %v49135_v1  ;;  %43256 = vmatprep.subr.bf16.mxu1 %v49135_v1 }
0x3136   :  { %38895 = vmatmul.mubr.f32.vlgmr.msra.gmra.mrb[114].mxu0 %v22463_v42  ;;  %38928 = vmatmul.mubr.f32.vlgmr.msra.gmra.mrb[116].mxu1 %v22462_v60 }
0x3137   :  { %43174 = vmatpush3.bf16.msra.mxu0 %v49172_v18  ;;  %38916 = vmatprep.mubr.msk.f32.mxu0 %vm44853_vm0, %v49134_v0 }
0x3138   :  { %43175 = vmatprep.subr.bf16.mxu0 %v49135_v1  ;;  %43258 = vmatpush3.bf16.msra.mxu1 %v45059_v54 }
0x3139   :  { %43259 = vmatprep.subr.bf16.mxu1 %v49135_v1  ;;  %39060 = vmatprep.mubr.msk.f32.mxu1 %vm44853_vm0, %v49134_v0 }
0x313b   :  { %43177 = vmatpush3.bf16.msra.mxu0 %v49173_v51 }
0x313c   :  { %43184 = vmatprep.subr.bf16.mxu0 %v49135_v1  ;;  %43261 = vmatpush3.bf16.msra.mxu1 %v45100_v2 }
0x313d   :  { %43262 = vmatprep.subr.bf16.mxu1 %v49135_v1 }
0x313e   :  { %38917 = vmatmul.mubr.f32.vlgmr.msra.gmra.mrb[116].mxu0 %v22462_v60 }
0x313f   :  { %43186 = vmatpush3.bf16.msra.mxu0 %v45078_v59  ;;  %38946 = vmatprep.mubr.msk.f32.mxu0 %vm44853_vm0, %v49134_v0 }
0x3140   :  { %43187 = vmatprep.subr.bf16.mxu0 %v49135_v1  ;;  %43264 = vmatpush3.bf16.msra.mxu1 %v45145_v14 }
0x3141   :  { %43265 = vmatprep.subr.bf16.mxu1 %v49135_v1 }
0x3143   :  { %43189 = vmatpush3.bf16.msra.mxu0 %v45120_v7 }
0x3144   :  { %43190 = vmatprep.subr.bf16.mxu0 %v49135_v1  ;;  %43267 = vmatpush3.bf16.msra.mxu1 %v45165_v20 }
0x3145   :  { %43268 = vmatprep.subr.bf16.mxu1 %v49135_v1 }
0x3147   :  { %43192 = vmatpush3.bf16.msra.mxu0 %v45154_v17 }
0x3148   :  { %43193 = vmatprep.subr.bf16.mxu0 %v49135_v1 }
0x314b   :  { %43195 = vmatpush3.bf16.msra.mxu0 %v45172_v21 }
0x314c   :  { %43196 = vmatprep.subr.bf16.mxu0 %v49135_v1 }
0x31f9   :  { %v22559_v52 = vpop.f32.mrb[112].mxu1 }
0x31fa   :  { %v38885_v58 = vpop.f32.mrb[113].mxu1 }
0x3201   :  { %v22716_v39 = vpop.f32.mrb[114].mxu1  ;;  %v22468_v22 = vpop.f32.mrb[112].mxu0 }
0x3202   :  { %v22469_v44 = vadd.f32 %v22468_v22, %v22389_v47  ;;  %v38907_v56 = vpop.f32.mrb[115].mxu1  ;;  %v38874_v38 = vpop.f32.mrb[113].mxu0 }
0x3204   :  { %v22560_v37 = vadd.f32 %v22559_v52, %v22469_v44 }
0x3209   :  { %v22639_v61 = vpop.f32.mrb[114].mxu0  ;;  %v22874_v53 = vpop.f32.mrb[116].mxu1 }
0x320a   :  { %v22640_v23 = vadd.f32 %v22639_v61, %v22560_v37  ;;  %v38896_v60 = vpop.f32.mrb[115].mxu0  ;;  %v38929_v42 = vpop.f32.mrb[117].mxu1 }
0x320c   :  { %v22717_v28 = vadd.f32 %v22716_v39, %v22640_v23 }
0x3211   :  { %v22799_v15 = vpop.f32.mrb[116].mxu0 }
0x3212   :  { %v22800_v29 = vadd.f32 %v22799_v15, %v22717_v28  ;;  %v38918_v58 = vpop.f32.mrb[117].mxu0 }
0x3214   :  { %v22875_v51 = vadd.f32 %v22874_v53, %v22800_v29 }
0x3216   :  { %v22878_v47 = vadd.f32 %v48023_v3, %v22875_v51 }
0x3218   :  { %v22880_v22 = vmin.f32 %v22878_v47, 0.0  ;;  %vm22879_vm5 = vcmp.gt.f32.partialorder %v22878_v47, 0.0 }
0x321a   :  { %v22881_v56 = vmul.f32 1.442695, %v22880_v22 }
0x321c   :  { %44730 = vpow2.f32 %v22881_v56 }
0x3226   :  { %v44731_v52 = vpop.eup %44730 }
0x3227   :  { %v31976_v44 = vadd.f32 -1.0, %v44731_v52 }
0x3229   :  { %v22884_v38 = vsel %vm22879_vm5, %v22878_v47, %v31976_v44 }
0x322a   :  { %v22886_v39 = vsel %vm625_vm2, %v22884_v38, 0 }
0x322b   :  { %v22961_v37 = vand.u32 4294901760, %v22886_v39 }
0x322d   :  { %v22962_v61 = vsub.f32 %v22886_v39, %v22961_v37 }
0x322f   :  { %v22963_v23 = vand.u32 4294901760, %v22962_v61 }
0x3231   :  { %v22964_v53 = vsub.f32 %v22962_v61, %v22963_v23 }
0x3233   :  { %v22965_v60 = vand.u32 4294901760, %v22964_v53 }
0x3235   :  { %38947 = vmatmul.mubr.f32.vlgmr.msra.gmra.mrb[118].mxu0 %v22965_v60 }
0x3236   :  { %43198 = vmatpush3.bf16.msra.mxu0 %v45261_v25  ;;  %38965 = vmatprep.mubr.msk.f32.mxu0 %vm44853_vm0, %v49134_v0 }
0x3237   :  { %43199 = vmatprep.subr.bf16.mxu0 %v49135_v1 }
0x323a   :  { %43201 = vmatpush3.bf16.msra.mxu0 %v45271_v19 }
0x323b   :  { %43202 = vmatprep.subr.bf16.mxu0 %v49135_v1 }
0x323e   :  { %43204 = vmatpush3.bf16.msra.mxu0 %v45280_v35 }
0x323f   :  { %43205 = vmatprep.subr.bf16.mxu0 %v49135_v1 }
0x3242   :  { %43207 = vmatpush3.bf16.msra.mxu0 %v45284_v24 }
0x3243   :  { %43208 = vmatprep.subr.bf16.mxu0 %v49135_v1 }
0x3245   :  { %38966 = vmatmul.mubr.f32.vlgmr.msra.gmra.mrb[118].mxu0 %v22961_v37 }
0x3246   :  { %43210 = vmatpush3.bf16.msra.mxu0 %v45290_v26  ;;  %38984 = vmatprep.mubr.msk.f32.mxu0 %vm44853_vm0, %v49134_v0 }
0x3247   :  { %43211 = vmatprep.subr.bf16.mxu0 %v49135_v1 }
0x324a   :  { %43213 = vmatpush3.bf16.msra.mxu0 %v45297_v43 }
0x324b   :  { %43214 = vmatprep.subr.bf16.mxu0 %v49135_v1 }
0x324e   :  { %43216 = vmatpush3.bf16.msra.mxu0 %v45305_v49 }
0x324f   :  { %43217 = vmatprep.subr.bf16.mxu0 %v49135_v1 }
0x3252   :  { %43219 = vmatpush3.bf16.msra.mxu0 %v45311_v12 }
0x3253   :  { %43220 = vmatprep.subr.bf16.mxu0 %v49135_v1 }
0x3255   :  { %38985 = vmatmul.mubr.f32.vlgmr.msra.gmra.mrb[118].mxu0 %v22962_v61  ;;  %v23973_v61 = vstv %s23972_s18  ;;  %s27152_s18 = scalar_select %p27151_p4, %s49069_s1, 0.0 }
0x3256   :  { %43222 = vmatpush3.bf16.msra.mxu0 %v45078_v59  ;;  %39003 = vmatprep.mubr.msk.f32.mxu0 %vm44853_vm0, %v49134_v0 }
0x3257   :  { %43223 = vmatprep.subr.bf16.mxu0 %v49135_v1 }
0x325a   :  { %43225 = vmatpush3.bf16.msra.mxu0 %v45120_v7 }
0x325b   :  { %43226 = vmatprep.subr.bf16.mxu0 %v49135_v1 }
0x325e   :  { %43228 = vmatpush3.bf16.msra.mxu0 %v45154_v17 }
0x325f   :  { %43229 = vmatprep.subr.bf16.mxu0 %v49135_v1 }
0x3262   :  { %43231 = vmatpush3.bf16.msra.mxu0 %v45172_v21 }
0x3263   :  { %43232 = vmatprep.subr.bf16.mxu0 %v49135_v1 }
0x3265   :  { %39004 = vmatmul.mubr.f32.vlgmr.msra.gmra.mrb[118].mxu0 %v22963_v23 }
0x3266   :  { %43234 = vmatpush3.bf16.msra.mxu0 %v45329_v34  ;;  %39022 = vmatprep.mubr.msk.f32.mxu0 %vm44853_vm0, %v49134_v0 }
0x3267   :  { %43235 = vmatprep.subr.bf16.mxu0 %v49135_v1 }
0x326a   :  { %43237 = vmatpush3.bf16.msra.mxu0 %v45337_v63 }
0x326b   :  { %43238 = vmatprep.subr.bf16.mxu0 %v49135_v1 }
0x326e   :  { %43240 = vmatpush3.bf16.msra.mxu0 %v45347_v16 }
0x326f   :  { %43241 = vmatprep.subr.bf16.mxu0 %v49135_v1 }
0x3272   :  { %43243 = vmatpush3.bf16.msra.mxu0 %v45351_v46 }
0x3273   :  { %43244 = vmatprep.subr.bf16.mxu0 %v49135_v1 }
0x3275   :  { %39023 = vmatmul.mubr.f32.vlgmr.msra.gmra.mrb[118].mxu0 %v22961_v37 }
0x3276   :  { %43246 = vmatpush3.bf16.msra.mxu0 %v45078_v59  ;;  %39041 = vmatprep.mubr.msk.f32.mxu0 %vm44853_vm0, %v49134_v0 }
0x3277   :  { %43247 = vmatprep.subr.bf16.mxu0 %v49135_v1 }
0x327a   :  { %43249 = vmatpush3.bf16.msra.mxu0 %v45120_v7 }
0x327b   :  { %43250 = vmatprep.subr.bf16.mxu0 %v49135_v1 }
0x327e   :  { %43252 = vmatpush3.bf16.msra.mxu0 %v45154_v17 }
0x327f   :  { %43253 = vmatprep.subr.bf16.mxu0 %v49135_v1 }
0x3282   :  { %43255 = vmatpush3.bf16.msra.mxu0 %v45172_v21 }
0x3283   :  { %43328 = vmatprep.subr.bf16.mxu0 %v49135_v1 }
0x3285   :  { %39042 = vmatmul.mubr.f32.vlgmr.msra.gmra.mrb[118].mxu0 %v22961_v37 }
0x3286   :  { %43330 = vmatpush3.bf16.msra.mxu0 %v44958_v8  ;;  %39166 = vmatprep.mubr.msk.f32.mxu0 %vm44853_vm0, %v49134_v0 }
0x3287   :  { %43331 = vmatprep.subr.bf16.mxu0 %v49135_v1 }
0x328a   :  { %43333 = vmatpush3.bf16.msra.mxu0 %v44960_v11 }
0x328b   :  { %43340 = vmatprep.subr.bf16.mxu0 %v49135_v1 }
0x3358   :  { %v23421_v51 = vpop.f32.mrb[118].mxu0 }
0x3359   :  { %v44256_v42 = vadd.f32 %v47708_v13, %v23421_v51  ;;  %v39043_v28 = vpop.f32.mrb[119].mxu0 }
0x335b   :  { %v23426_v15 = vmin.f32 %v44256_v42, 0.0  ;;  %vm23425_vm6 = vcmp.gt.f32.partialorder %v44256_v42, 0.0 }
0x335d   :  { %v23427_v29 = vmul.f32 1.442695, %v23426_v15 }
0x335f   :  { %44732 = vpow2.f32 %v23427_v29 }
0x3369   :  { %v44733_v58 = vpop.eup %44732 }
0x336a   :  { %v31977_v47 = vadd.f32 -1.0, %v44733_v58  ;;  %v49175_v58 = vld [vmem:[#allocation18_spill] sm:$0xff] }
0x336c   :  { %v23430_v22 = vsel %vm23425_vm6, %v44256_v42, %v31977_v47 }
0x336d   :  { %v23432_v56 = vsel %vm625_vm2, %v23430_v22, 0 }
0x336e   :  { %v23507_v52 = vand.u32 4294901760, %v23432_v56 }
0x3370   :  { %v23508_v44 = vsub.f32 %v23432_v56, %v23507_v52  ;;  %v23978_v56 = vstv %s23977_s26  ;;  %s27157_s26 = sadd.f32 %s27156_s8, %s49068_s0 }
0x3372   :  { %v23509_v38 = vand.u32 4294901760, %v23508_v44 }
0x3374   :  { %v23510_v39 = vsub.f32 %v23508_v44, %v23509_v38 }
0x3376   :  { %v23511_v37 = vand.u32 4294901760, %v23510_v39 }
0x3378   :  { %39061 = vmatmul.mubr.f32.vlgmr.msra.gmra.mrb[118].mxu1 %v23511_v37 }
0x3379   :  { %43270 = vmatpush3.bf16.msra.mxu1 %v45439_v50  ;;  %39079 = vmatprep.mubr.msk.f32.mxu1 %vm44853_vm0, %v49134_v0 }
0x337a   :  { %43271 = vmatprep.subr.bf16.mxu1 %v49135_v1 }
0x337d   :  { %43273 = vmatpush3.bf16.msra.mxu1 %v45449_v40 }
0x337e   :  { %43274 = vmatprep.subr.bf16.mxu1 %v49135_v1 }
0x3381   :  { %43276 = vmatpush3.bf16.msra.mxu1 %v45458_v10 }
0x3382   :  { %43277 = vmatprep.subr.bf16.mxu1 %v49135_v1 }
0x3385   :  { %43279 = vmatpush3.bf16.msra.mxu1 %v45462_v48 }
0x3386   :  { %43280 = vmatprep.subr.bf16.mxu1 %v49135_v1 }
0x3388   :  { %39080 = vmatmul.mubr.f32.vlgmr.msra.gmra.mrb[118].mxu1 %v23507_v52 }
0x3389   :  { %43282 = vmatpush3.bf16.msra.mxu1 %v45468_v36  ;;  %39098 = vmatprep.mubr.msk.f32.mxu1 %vm44853_vm0, %v49134_v0 }
0x338a   :  { %43283 = vmatprep.subr.bf16.mxu1 %v49135_v1 }
0x338d   :  { %43285 = vmatpush3.bf16.msra.mxu1 %v45475_v5 }
0x338e   :  { %43286 = vmatprep.subr.bf16.mxu1 %v49135_v1 }
0x3391   :  { %43288 = vmatpush3.bf16.msra.mxu1 %v45483_v6 }
0x3392   :  { %43289 = vmatprep.subr.bf16.mxu1 %v49135_v1 }
0x3395   :  { %43291 = vmatpush3.bf16.msra.mxu1 %v45489_v55 }
0x3396   :  { %43292 = vmatprep.subr.bf16.mxu1 %v49135_v1 }
0x3398   :  { %39099 = vmatmul.mubr.f32.vlgmr.msra.gmra.mrb[118].mxu1 %v23508_v44 }
0x3399   :  { %43294 = vmatpush3.bf16.msra.mxu1 %v45059_v54  ;;  %39117 = vmatprep.mubr.msk.f32.mxu1 %vm44853_vm0, %v49134_v0 }
0x339a   :  { %43295 = vmatprep.subr.bf16.mxu1 %v49135_v1 }
0x339d   :  { %43297 = vmatpush3.bf16.msra.mxu1 %v45100_v2 }
0x339e   :  { %43298 = vmatprep.subr.bf16.mxu1 %v49135_v1 }
0x33a1   :  { %43300 = vmatpush3.bf16.msra.mxu1 %v45145_v14 }
0x33a2   :  { %43301 = vmatprep.subr.bf16.mxu1 %v49135_v1 }
0x33a5   :  { %43303 = vmatpush3.bf16.msra.mxu1 %v45165_v20 }
0x33a6   :  { %43304 = vmatprep.subr.bf16.mxu1 %v49135_v1 }
0x33a8   :  { %39118 = vmatmul.mubr.f32.vlgmr.msra.gmra.mrb[118].mxu1 %v23509_v38 }
0x33a9   :  { %43306 = vmatpush3.bf16.msra.mxu1 %v45507_v4  ;;  %39136 = vmatprep.mubr.msk.f32.mxu1 %vm44853_vm0, %v49134_v0 }
0x33aa   :  { %43307 = vmatprep.subr.bf16.mxu1 %v49135_v1 }
0x33ad   :  { %43309 = vmatpush3.bf16.msra.mxu1 %v45515_v45 }
0x33ae   :  { %43310 = vmatprep.subr.bf16.mxu1 %v49135_v1 }
0x33b1   :  { %43312 = vmatpush3.bf16.msra.mxu1 %v45525_v30 }
0x33b2   :  { %43313 = vmatprep.subr.bf16.mxu1 %v49135_v1 }
0x33b5   :  { %43315 = vmatpush3.bf16.msra.mxu1 %v45529_v9 }
0x33b6   :  { %43316 = vmatprep.subr.bf16.mxu1 %v49135_v1 }
0x33b8   :  { %39137 = vmatmul.mubr.f32.vlgmr.msra.gmra.mrb[118].mxu1 %v23507_v52 }
0x33b9   :  { %43318 = vmatpush3.bf16.msra.mxu1 %v45059_v54  ;;  %39155 = vmatprep.mubr.msk.f32.mxu1 %vm44853_vm0, %v49134_v0 }
0x33ba   :  { %43319 = vmatprep.subr.bf16.mxu1 %v49135_v1 }
0x33bd   :  { %43321 = vmatpush3.bf16.msra.mxu1 %v45100_v2 }
0x33be   :  { %43322 = vmatprep.subr.bf16.mxu1 %v49135_v1 }
0x33c1   :  { %43324 = vmatpush3.bf16.msra.mxu1 %v45145_v14 }
0x33c2   :  { %43325 = vmatprep.subr.bf16.mxu1 %v49135_v1 }
0x33c5   :  { %43327 = vmatpush3.bf16.msra.mxu1 %v45165_v20 }
0x33c6   :  { %43334 = vmatprep.subr.bf16.mxu1 %v49135_v1 }
0x33c8   :  { %39156 = vmatmul.mubr.f32.vlgmr.msra.gmra.mrb[118].mxu1 %v23507_v52  ;;  %v23979_v52 = vmul.f32 %v48017_v62, %v23978_v56 }
0x33c9   :  { %43336 = vmatpush3.bf16.msra.mxu1 %v44971_v31  ;;  %39177 = vmatprep.mubr.msk.f32.mxu1 %vm44853_vm0, %v49134_v0 }
0x33ca   :  { %43337 = vmatprep.subr.bf16.mxu1 %v49135_v1 }
0x33cd   :  { %43339 = vmatpush3.bf16.msra.mxu1 %v44976_v33 }
0x33ce   :  { %43346 = vmatprep.subr.bf16.mxu1 %v49135_v1 }
0x349b   :  { %v23967_v13 = vpop.f32.mrb[118].mxu1 }
0x349c   :  { %v44257_v23 = vadd.f32 %v47777_v32, %v23967_v13  ;;  %v39157_v53 = vpop.f32.mrb[119].mxu1 }
0x349e   :  { %v23974_v60 = vmul.f32 %v44257_v23, %v23973_v61 }
0x34a0   :  { %v48149_v51 = vadd.f32 %v23974_v60, %v47960_v27 }
0x34a2   :  { %v23981_v42 = vsel %vm71_vm1, %v48149_v51, 0 }
0x34a3   :  { %v24052_v28 = vand.u32 4294901760, %v23981_v42 }
0x34a5   :  { %v24053_v15 = vsub.f32 %v23981_v42, %v24052_v28  ;;  %39178 = vmatmul.mubr.f32.vlgmr.msra.gmra.mrb[120].mxu1 %v24052_v28 }
0x34a6   :  { %43348 = vmatpush3.bf16.msra.mxu1 %v44958_v8  ;;  %39199 = vmatprep.mubr.msk.f32.mxu1 %vm44853_vm0, %v49134_v0 }
0x34a7   :  { %43349 = vmatprep.subr.bf16.mxu1 %v49135_v1  ;;  %v24054_v29 = vand.u32 4294901760, %v24053_v15 }
0x34a9   :  { %v24055_v32 = vsub.f32 %v24053_v15, %v24054_v29 }
0x34aa   :  { %43351 = vmatpush3.bf16.msra.mxu1 %v44960_v11 }
0x34ab   :  { %43358 = vmatprep.subr.bf16.mxu1 %v49135_v1  ;;  %v24056_v27 = vand.u32 4294901760, %v24055_v32 }
0x34ad   :  { %39200 = vmatmul.mubr.f32.vlgmr.msra.gmra.mrb[122].mxu1 %v24054_v29  ;;  %39167 = vmatmul.mubr.f32.vlgmr.msra.gmra.mrb[120].mxu0 %v24056_v27 }
0x34ae   :  { %43342 = vmatpush3.bf16.msra.mxu0 %v49170_v41  ;;  %43360 = vmatpush3.bf16.msra.mxu1 %v44958_v8 }
0x34af   :  { %43343 = vmatprep.subr.bf16.mxu0 %v49135_v1  ;;  %43361 = vmatprep.subr.bf16.mxu1 %v49135_v1 }
0x34b0   :  { %39188 = vmatprep.mubr.msk.f32.mxu0 %vm44853_vm0, %v49134_v0  ;;  %39221 = vmatprep.mubr.msk.f32.mxu1 %vm44853_vm0, %v49134_v0 }
0x34b2   :  { %43345 = vmatpush3.bf16.msra.mxu0 %v49171_v57  ;;  %43363 = vmatpush3.bf16.msra.mxu1 %v44960_v11 }
0x34b3   :  { %43352 = vmatprep.subr.bf16.mxu0 %v49135_v1  ;;  %43436 = vmatprep.subr.bf16.mxu1 %v49135_v1 }
0x34b5   :  { %39189 = vmatmul.mubr.f32.vlgmr.msra.gmra.mrb[122].mxu0 %v24053_v15  ;;  %39222 = vmatmul.mubr.f32.vlgmr.msra.gmra.mrb[124].mxu1 %v24052_v28 }
0x34b6   :  { %43354 = vmatpush3.bf16.msra.mxu0 %v49172_v18  ;;  %39210 = vmatprep.mubr.msk.f32.mxu0 %vm44853_vm0, %v49134_v0 }
0x34b7   :  { %43355 = vmatprep.subr.bf16.mxu0 %v49135_v1  ;;  %43438 = vmatpush3.bf16.msra.mxu1 %v45059_v54 }
0x34b8   :  { %43439 = vmatprep.subr.bf16.mxu1 %v49135_v1  ;;  %39354 = vmatprep.mubr.msk.f32.mxu1 %vm44853_vm0, %v49134_v0 }
0x34ba   :  { %43357 = vmatpush3.bf16.msra.mxu0 %v49175_v58 }
0x34bb   :  { %43364 = vmatprep.subr.bf16.mxu0 %v49135_v1  ;;  %43441 = vmatpush3.bf16.msra.mxu1 %v45100_v2 }
0x34bc   :  { %43442 = vmatprep.subr.bf16.mxu1 %v49135_v1 }
0x34bd   :  { %39211 = vmatmul.mubr.f32.vlgmr.msra.gmra.mrb[124].mxu0 %v24052_v28 }
0x34be   :  { %43366 = vmatpush3.bf16.msra.mxu0 %v45078_v59  ;;  %39240 = vmatprep.mubr.msk.f32.mxu0 %vm44853_vm0, %v49134_v0 }
0x34bf   :  { %43367 = vmatprep.subr.bf16.mxu0 %v49135_v1  ;;  %43444 = vmatpush3.bf16.msra.mxu1 %v45145_v14 }
0x34c0   :  { %43445 = vmatprep.subr.bf16.mxu1 %v49135_v1 }
0x34c2   :  { %43369 = vmatpush3.bf16.msra.mxu0 %v45120_v7 }
0x34c3   :  { %43370 = vmatprep.subr.bf16.mxu0 %v49135_v1  ;;  %43447 = vmatpush3.bf16.msra.mxu1 %v45165_v20 }
0x34c4   :  { %43448 = vmatprep.subr.bf16.mxu1 %v49135_v1 }
0x34c6   :  { %43372 = vmatpush3.bf16.msra.mxu0 %v45154_v17 }
0x34c7   :  { %43373 = vmatprep.subr.bf16.mxu0 %v49135_v1 }
0x34ca   :  { %43375 = vmatpush3.bf16.msra.mxu0 %v45172_v21 }
0x34cb   :  { %43376 = vmatprep.subr.bf16.mxu0 %v49135_v1 }
0x3578   :  { %v24149_v47 = vpop.f32.mrb[120].mxu1 }
0x3579   :  { %v39179_v22 = vpop.f32.mrb[121].mxu1 }
0x3580   :  { %v24306_v44 = vpop.f32.mrb[122].mxu1  ;;  %v24058_v38 = vpop.f32.mrb[120].mxu0 }
0x3581   :  { %v24059_v39 = vadd.f32 %v24058_v38, %v23979_v52  ;;  %v39201_v37 = vpop.f32.mrb[123].mxu1  ;;  %v39168_v13 = vpop.f32.mrb[121].mxu0 }
0x3583   :  { %v24150_v61 = vadd.f32 %v24149_v47, %v24059_v39 }
0x3588   :  { %v24229_v23 = vpop.f32.mrb[122].mxu0  ;;  %v24464_v53 = vpop.f32.mrb[124].mxu1 }
0x3589   :  { %v24230_v60 = vadd.f32 %v24229_v23, %v24150_v61  ;;  %v39190_v42 = vpop.f32.mrb[123].mxu0  ;;  %v39223_v28 = vpop.f32.mrb[125].mxu1 }
0x358b   :  { %v24307_v15 = vadd.f32 %v24306_v44, %v24230_v60 }
0x3590   :  { %v24389_v29 = vpop.f32.mrb[124].mxu0 }
0x3591   :  { %v24390_v32 = vadd.f32 %v24389_v29, %v24307_v15  ;;  %v39212_v27 = vpop.f32.mrb[125].mxu0 }
0x3593   :  { %v24465_v58 = vadd.f32 %v24464_v53, %v24390_v32 }
0x3595   :  { %v24468_v22 = vadd.f32 %v48023_v3, %v24465_v58 }
0x3597   :  { %v24470_v18 = vmin.f32 %v24468_v22, 0.0  ;;  %vm24469_vm7 = vcmp.gt.f32.partialorder %v24468_v22, 0.0 }
0x3599   :  { %v24471_v56 = vmul.f32 1.442695, %v24470_v18 }
0x359b   :  { %44734 = vpow2.f32 %v24471_v56 }
0x35a5   :  { %v44735_v62 = vpop.eup %44734 }
0x35a6   :  { %v31978_v52 = vadd.f32 -1.0, %v44735_v62  ;;  %v48262_v62 = vld [vmem:[#allocation9] ss:$0 sm:$0xff] }
0x35a8   :  { %v24474_v38 = vsel %vm24469_vm7, %v24468_v22, %v31978_v52 }
0x35a9   :  { %v24476_v47 = vsel %vm625_vm2, %v24474_v38, 0 }
0x35aa   :  { %v24551_v39 = vand.u32 4294901760, %v24476_v47 }
0x35ac   :  { %v24552_v37 = vsub.f32 %v24476_v47, %v24551_v39  ;;  %v25563_v47 = vstv %s25562_s30 }
0x35ae   :  { %v24553_v13 = vand.u32 4294901760, %v24552_v37 }
0x35b0   :  { %v24554_v61 = vsub.f32 %v24552_v37, %v24553_v13 }
0x35b2   :  { %v24555_v44 = vand.u32 4294901760, %v24554_v61 }
0x35b4   :  { %39241 = vmatmul.mubr.f32.vlgmr.msra.gmra.mrb[126].mxu0 %v24555_v44 }
0x35b5   :  { %43378 = vmatpush3.bf16.msra.mxu0 %v45261_v25  ;;  %39259 = vmatprep.mubr.msk.f32.mxu0 %vm44853_vm0, %v49134_v0 }
0x35b6   :  { %43379 = vmatprep.subr.bf16.mxu0 %v49135_v1 }
0x35b9   :  { %43381 = vmatpush3.bf16.msra.mxu0 %v45271_v19 }
0x35ba   :  { %43382 = vmatprep.subr.bf16.mxu0 %v49135_v1 }
0x35bd   :  { %43384 = vmatpush3.bf16.msra.mxu0 %v45280_v35 }
0x35be   :  { %43385 = vmatprep.subr.bf16.mxu0 %v49135_v1 }
0x35c1   :  { %43387 = vmatpush3.bf16.msra.mxu0 %v45284_v24 }
0x35c2   :  { %43388 = vmatprep.subr.bf16.mxu0 %v49135_v1 }
0x35c4   :  { %39260 = vmatmul.mubr.f32.vlgmr.msra.gmra.mrb[126].mxu0 %v24551_v39 }
0x35c5   :  { %43390 = vmatpush3.bf16.msra.mxu0 %v45290_v26  ;;  %39278 = vmatprep.mubr.msk.f32.mxu0 %vm44853_vm0, %v49134_v0 }
0x35c6   :  { %43391 = vmatprep.subr.bf16.mxu0 %v49135_v1 }
0x35c9   :  { %43393 = vmatpush3.bf16.msra.mxu0 %v45297_v43 }
0x35ca   :  { %43394 = vmatprep.subr.bf16.mxu0 %v49135_v1 }
0x35cd   :  { %43396 = vmatpush3.bf16.msra.mxu0 %v45305_v49 }
0x35ce   :  { %43397 = vmatprep.subr.bf16.mxu0 %v49135_v1 }
0x35d1   :  { %43399 = vmatpush3.bf16.msra.mxu0 %v45311_v12 }
0x35d2   :  { %43400 = vmatprep.subr.bf16.mxu0 %v49135_v1 }
0x35d4   :  { %39279 = vmatmul.mubr.f32.vlgmr.msra.gmra.mrb[126].mxu0 %v24552_v37 }
0x35d5   :  { %43402 = vmatpush3.bf16.msra.mxu0 %v45078_v59  ;;  %39297 = vmatprep.mubr.msk.f32.mxu0 %vm44853_vm0, %v49134_v0 }
0x35d6   :  { %43403 = vmatprep.subr.bf16.mxu0 %v49135_v1 }
0x35d9   :  { %43405 = vmatpush3.bf16.msra.mxu0 %v45120_v7 }
0x35da   :  { %43406 = vmatprep.subr.bf16.mxu0 %v49135_v1 }
0x35dd   :  { %43408 = vmatpush3.bf16.msra.mxu0 %v45154_v17 }
0x35de   :  { %43409 = vmatprep.subr.bf16.mxu0 %v49135_v1 }
0x35e1   :  { %43411 = vmatpush3.bf16.msra.mxu0 %v45172_v21 }
0x35e2   :  { %43412 = vmatprep.subr.bf16.mxu0 %v49135_v1 }
0x35e4   :  { %39298 = vmatmul.mubr.f32.vlgmr.msra.gmra.mrb[126].mxu0 %v24553_v13 }
0x35e5   :  { %43414 = vmatpush3.bf16.msra.mxu0 %v45329_v34  ;;  %39316 = vmatprep.mubr.msk.f32.mxu0 %vm44853_vm0, %v49134_v0 }
0x35e6   :  { %43415 = vmatprep.subr.bf16.mxu0 %v49135_v1 }
0x35e9   :  { %43417 = vmatpush3.bf16.msra.mxu0 %v45337_v63 }
0x35ea   :  { %43418 = vmatprep.subr.bf16.mxu0 %v49135_v1 }
0x35ed   :  { %43420 = vmatpush3.bf16.msra.mxu0 %v45347_v16 }
0x35ee   :  { %43421 = vmatprep.subr.bf16.mxu0 %v49135_v1 }
0x35f1   :  { %43423 = vmatpush3.bf16.msra.mxu0 %v45351_v46 }
0x35f2   :  { %43424 = vmatprep.subr.bf16.mxu0 %v49135_v1 }
0x35f4   :  { %39317 = vmatmul.mubr.f32.vlgmr.msra.gmra.mrb[126].mxu0 %v24551_v39 }
0x35f5   :  { %43426 = vmatpush3.bf16.msra.mxu0 %v45078_v59  ;;  %39335 = vmatprep.mubr.msk.f32.mxu0 %vm44853_vm0, %v49134_v0 }
0x35f6   :  { %43427 = vmatprep.subr.bf16.mxu0 %v49135_v1 }
0x35f9   :  { %43429 = vmatpush3.bf16.msra.mxu0 %v45120_v7 }
0x35fa   :  { %43430 = vmatprep.subr.bf16.mxu0 %v49135_v1 }
0x35fd   :  { %43432 = vmatpush3.bf16.msra.mxu0 %v45154_v17 }
0x35fe   :  { %43433 = vmatprep.subr.bf16.mxu0 %v49135_v1 }
0x3601   :  { %43435 = vmatpush3.bf16.msra.mxu0 %v45172_v21 }
0x3602   :  { %43508 = vmatprep.subr.bf16.mxu0 %v49135_v1 }
0x3604   :  { %39336 = vmatmul.mubr.f32.vlgmr.msra.gmra.mrb[126].mxu0 %v24551_v39  ;;  %v48331_v39 = vld [vmem:[%s49078_s10] ss:$0 sm:$0xff] }
0x3605   :  { %43510 = vmatpush3.bf16.msra.mxu0 %v44958_v8  ;;  %39460 = vmatprep.mubr.msk.f32.mxu0 %vm44853_vm0, %v49134_v0 }
0x3606   :  { %43511 = vmatprep.subr.bf16.mxu0 %v49135_v1 }
0x3609   :  { %43513 = vmatpush3.bf16.msra.mxu0 %v44960_v11 }
0x360a   :  { %43520 = vmatprep.subr.bf16.mxu0 %v49135_v1 }
0x36d7   :  { %v25011_v18 = vpop.f32.mrb[126].mxu0 }
0x36d8   :  { %v44258_v58 = vadd.f32 %v48262_v62, %v25011_v18  ;;  %v39337_v23 = vpop.f32.mrb[127].mxu0 }
0x36da   :  { %v25016_v53 = vmin.f32 %v44258_v58, 0.0  ;;  %vm25015_vm8 = vcmp.gt.f32.partialorder %v44258_v58, 0.0 }
0x36dc   :  { %v25017_v60 = vmul.f32 1.442695, %v25016_v53 }
0x36de   :  { %44736 = vpow2.f32 %v25017_v60 }
0x36e8   :  { %v44737_v42 = vpop.eup %44736 }
0x36e9   :  { %v31979_v28 = vadd.f32 -1.0, %v44737_v42  ;;  %v49176_v42 = vld [vmem:[#allocation17_spill] sm:$0xff] }
0x36eb   :  { %v25020_v15 = vsel %vm25015_vm8, %v44258_v58, %v31979_v28  ;;  %v49177_v28 = vld [vmem:[#allocation18_spill] sm:$0xff] }
0x36ec   :  { %v25022_v29 = vsel %vm625_vm2, %v25020_v15, 0 }
0x36ed   :  { %v25097_v32 = vand.u32 4294901760, %v25022_v29 }
0x36ef   :  { %v25098_v27 = vsub.f32 %v25022_v29, %v25097_v32 }
0x36f1   :  { %v25099_v22 = vand.u32 4294901760, %v25098_v27 }
0x36f3   :  { %v25100_v56 = vsub.f32 %v25098_v27, %v25099_v22 }
0x36f5   :  { %v25101_v52 = vand.u32 4294901760, %v25100_v56 }
0x36f7   :  { %39355 = vmatmul.mubr.f32.vlgmr.msra.gmra.mrb[126].mxu1 %v25101_v52 }
0x36f8   :  { %43450 = vmatpush3.bf16.msra.mxu1 %v45439_v50  ;;  %39373 = vmatprep.mubr.msk.f32.mxu1 %vm44853_vm0, %v49134_v0 }
0x36f9   :  { %43451 = vmatprep.subr.bf16.mxu1 %v49135_v1 }
0x36fc   :  { %43453 = vmatpush3.bf16.msra.mxu1 %v45449_v40 }
0x36fd   :  { %43454 = vmatprep.subr.bf16.mxu1 %v49135_v1 }
0x3700   :  { %43456 = vmatpush3.bf16.msra.mxu1 %v45458_v10 }
0x3701   :  { %43457 = vmatprep.subr.bf16.mxu1 %v49135_v1 }
0x3704   :  { %43459 = vmatpush3.bf16.msra.mxu1 %v45462_v48 }
0x3705   :  { %43460 = vmatprep.subr.bf16.mxu1 %v49135_v1 }
0x3707   :  { %39374 = vmatmul.mubr.f32.vlgmr.msra.gmra.mrb[126].mxu1 %v25097_v32 }
0x3708   :  { %43462 = vmatpush3.bf16.msra.mxu1 %v45468_v36  ;;  %39392 = vmatprep.mubr.msk.f32.mxu1 %vm44853_vm0, %v49134_v0 }
0x3709   :  { %43463 = vmatprep.subr.bf16.mxu1 %v49135_v1 }
0x370c   :  { %43465 = vmatpush3.bf16.msra.mxu1 %v45475_v5 }
0x370d   :  { %43466 = vmatprep.subr.bf16.mxu1 %v49135_v1 }
0x3710   :  { %43468 = vmatpush3.bf16.msra.mxu1 %v45483_v6 }
0x3711   :  { %43469 = vmatprep.subr.bf16.mxu1 %v49135_v1 }
0x3714   :  { %43471 = vmatpush3.bf16.msra.mxu1 %v45489_v55 }
0x3715   :  { %43472 = vmatprep.subr.bf16.mxu1 %v49135_v1 }
0x3717   :  { %39393 = vmatmul.mubr.f32.vlgmr.msra.gmra.mrb[126].mxu1 %v25098_v27  ;;  %v49178_v27 = vld [vmem:[#allocation19_spill] sm:$0xff] }
0x3718   :  { %43474 = vmatpush3.bf16.msra.mxu1 %v45059_v54  ;;  %39411 = vmatprep.mubr.msk.f32.mxu1 %vm44853_vm0, %v49134_v0 }
0x3719   :  { %43475 = vmatprep.subr.bf16.mxu1 %v49135_v1 }
0x371c   :  { %43477 = vmatpush3.bf16.msra.mxu1 %v45100_v2 }
0x371d   :  { %43478 = vmatprep.subr.bf16.mxu1 %v49135_v1 }
0x3720   :  { %43480 = vmatpush3.bf16.msra.mxu1 %v45145_v14 }
0x3721   :  { %43481 = vmatprep.subr.bf16.mxu1 %v49135_v1 }
0x3724   :  { %43483 = vmatpush3.bf16.msra.mxu1 %v45165_v20 }
0x3725   :  { %43484 = vmatprep.subr.bf16.mxu1 %v49135_v1 }
0x3727   :  { %39412 = vmatmul.mubr.f32.vlgmr.msra.gmra.mrb[126].mxu1 %v25099_v22 }
0x3728   :  { %43486 = vmatpush3.bf16.msra.mxu1 %v45507_v4  ;;  %39430 = vmatprep.mubr.msk.f32.mxu1 %vm44853_vm0, %v49134_v0 }
0x3729   :  { %43487 = vmatprep.subr.bf16.mxu1 %v49135_v1 }
0x372c   :  { %43489 = vmatpush3.bf16.msra.mxu1 %v45515_v45 }
0x372d   :  { %43490 = vmatprep.subr.bf16.mxu1 %v49135_v1 }
0x3730   :  { %43492 = vmatpush3.bf16.msra.mxu1 %v45525_v30 }
0x3731   :  { %43493 = vmatprep.subr.bf16.mxu1 %v49135_v1 }
0x3734   :  { %43495 = vmatpush3.bf16.msra.mxu1 %v45529_v9 }
0x3735   :  { %43496 = vmatprep.subr.bf16.mxu1 %v49135_v1 }
0x3737   :  { %39431 = vmatmul.mubr.f32.vlgmr.msra.gmra.mrb[126].mxu1 %v25097_v32 }
0x3738   :  { %43498 = vmatpush3.bf16.msra.mxu1 %v45059_v54  ;;  %39449 = vmatprep.mubr.msk.f32.mxu1 %vm44853_vm0, %v49134_v0 }
0x3739   :  { %43499 = vmatprep.subr.bf16.mxu1 %v49135_v1 }
0x373c   :  { %43501 = vmatpush3.bf16.msra.mxu1 %v45100_v2 }
0x373d   :  { %43502 = vmatprep.subr.bf16.mxu1 %v49135_v1 }
0x3740   :  { %43504 = vmatpush3.bf16.msra.mxu1 %v45145_v14 }
0x3741   :  { %43505 = vmatprep.subr.bf16.mxu1 %v49135_v1 }
0x3744   :  { %43507 = vmatpush3.bf16.msra.mxu1 %v45165_v20 }
0x3745   :  { %43514 = vmatprep.subr.bf16.mxu1 %v49135_v1 }
0x3747   :  { %39450 = vmatmul.mubr.f32.vlgmr.msra.gmra.mrb[126].mxu1 %v25097_v32  ;;  %v25568_v32 = vstv %s25567_s7  ;;  %s28747_s7 = sadd.f32 %s28746_s16, %s49068_s0 }
0x3748   :  { %43516 = vmatpush3.bf16.msra.mxu1 %v44971_v31  ;;  %39471 = vmatprep.mubr.msk.f32.mxu1 %vm44853_vm0, %v49134_v0  ;;  %v25569_v22 = vmul.f32 %v49178_v27, %v25568_v32 }
0x3749   :  { %43517 = vmatprep.subr.bf16.mxu1 %v49135_v1 }
0x374c   :  { %43519 = vmatpush3.bf16.msra.mxu1 %v44976_v33 }
0x374d   :  { %43526 = vmatprep.subr.bf16.mxu1 %v49135_v1 }
0x381a   :  { %v25557_v38 = vpop.f32.mrb[126].mxu1 }
0x381b   :  { %v44259_v37 = vadd.f32 %v48331_v39, %v25557_v38  ;;  %v39451_v13 = vpop.f32.mrb[127].mxu1 }
0x381d   :  { %v25564_v61 = vmul.f32 %v44259_v37, %v25563_v47 }
0x381f   :  { %v48335_v44 = vadd.f32 %v25564_v61, %v48149_v51 }
0x3821   :  { %v25571_v18 = vsel %vm71_vm1, %v48335_v44, 0 }
0x3822   :  { %v25642_v58 = vand.u32 4294901760, %v25571_v18 }
0x3824   :  { %v25643_v23 = vsub.f32 %v25571_v18, %v25642_v58  ;;  %39472 = vmatmul.mubr.f32.vlgmr.msra.gmra.mrb[128].mxu1 %v25642_v58 }
0x3825   :  { %43528 = vmatpush3.bf16.msra.mxu1 %v44958_v8  ;;  %39493 = vmatprep.mubr.msk.f32.mxu1 %vm44853_vm0, %v49134_v0 }
0x3826   :  { %43529 = vmatprep.subr.bf16.mxu1 %v49135_v1  ;;  %v25644_v53 = vand.u32 4294901760, %v25643_v23 }
0x3828   :  { %v25645_v60 = vsub.f32 %v25643_v23, %v25644_v53 }
0x3829   :  { %43531 = vmatpush3.bf16.msra.mxu1 %v44960_v11 }
0x382a   :  { %43538 = vmatprep.subr.bf16.mxu1 %v49135_v1  ;;  %v25646_v51 = vand.u32 4294901760, %v25645_v60 }
0x382c   :  { %39494 = vmatmul.mubr.f32.vlgmr.msra.gmra.mrb[130].mxu1 %v25644_v53  ;;  %39461 = vmatmul.mubr.f32.vlgmr.msra.gmra.mrb[128].mxu0 %v25646_v51 }
0x382d   :  { %43522 = vmatpush3.bf16.msra.mxu0 %v49170_v41  ;;  %43540 = vmatpush3.bf16.msra.mxu1 %v44958_v8 }
0x382e   :  { %43523 = vmatprep.subr.bf16.mxu0 %v49135_v1  ;;  %43541 = vmatprep.subr.bf16.mxu1 %v49135_v1 }
0x382f   :  { %39482 = vmatprep.mubr.msk.f32.mxu0 %vm44853_vm0, %v49134_v0  ;;  %39515 = vmatprep.mubr.msk.f32.mxu1 %vm44853_vm0, %v49134_v0 }
0x3831   :  { %43525 = vmatpush3.bf16.msra.mxu0 %v49171_v57  ;;  %43543 = vmatpush3.bf16.msra.mxu1 %v44960_v11 }
0x3832   :  { %43532 = vmatprep.subr.bf16.mxu0 %v49135_v1  ;;  %43616 = vmatprep.subr.bf16.mxu1 %v49135_v1 }
0x3834   :  { %39483 = vmatmul.mubr.f32.vlgmr.msra.gmra.mrb[130].mxu0 %v25643_v23  ;;  %39516 = vmatmul.mubr.f32.vlgmr.msra.gmra.mrb[132].mxu1 %v25642_v58 }
0x3835   :  { %43534 = vmatpush3.bf16.msra.mxu0 %v49176_v42  ;;  %39504 = vmatprep.mubr.msk.f32.mxu0 %vm44853_vm0, %v49134_v0 }
0x3836   :  { %43535 = vmatprep.subr.bf16.mxu0 %v49135_v1  ;;  %43618 = vmatpush3.bf16.msra.mxu1 %v45059_v54 }
0x3837   :  { %43619 = vmatprep.subr.bf16.mxu1 %v49135_v1  ;;  %39648 = vmatprep.mubr.msk.f32.mxu1 %vm44853_vm0, %v49134_v0 }
0x3839   :  { %43537 = vmatpush3.bf16.msra.mxu0 %v49177_v28 }
0x383a   :  { %43544 = vmatprep.subr.bf16.mxu0 %v49135_v1  ;;  %43621 = vmatpush3.bf16.msra.mxu1 %v45100_v2 }
0x383b   :  { %43622 = vmatprep.subr.bf16.mxu1 %v49135_v1 }
0x383c   :  { %39505 = vmatmul.mubr.f32.vlgmr.msra.gmra.mrb[132].mxu0 %v25642_v58 }
0x383d   :  { %43546 = vmatpush3.bf16.msra.mxu0 %v45078_v59  ;;  %39534 = vmatprep.mubr.msk.f32.mxu0 %vm44853_vm0, %v49134_v0 }
0x383e   :  { %43547 = vmatprep.subr.bf16.mxu0 %v49135_v1  ;;  %43624 = vmatpush3.bf16.msra.mxu1 %v45145_v14 }
0x383f   :  { %43625 = vmatprep.subr.bf16.mxu1 %v49135_v1 }
0x3841   :  { %43549 = vmatpush3.bf16.msra.mxu0 %v45120_v7 }
0x3842   :  { %43550 = vmatprep.subr.bf16.mxu0 %v49135_v1  ;;  %43627 = vmatpush3.bf16.msra.mxu1 %v45165_v20 }
0x3843   :  { %43628 = vmatprep.subr.bf16.mxu1 %v49135_v1 }
0x3845   :  { %43552 = vmatpush3.bf16.msra.mxu0 %v45154_v17 }
0x3846   :  { %43553 = vmatprep.subr.bf16.mxu0 %v49135_v1 }
0x3849   :  { %43555 = vmatpush3.bf16.msra.mxu0 %v45172_v21 }
0x384a   :  { %43556 = vmatprep.subr.bf16.mxu0 %v49135_v1 }
0x38f7   :  { %v25739_v15 = vpop.f32.mrb[128].mxu1 }
0x38f8   :  { %v39473_v29 = vpop.f32.mrb[129].mxu1 }
0x38ff   :  { %v25896_v56 = vpop.f32.mrb[130].mxu1  ;;  %v25648_v52 = vpop.f32.mrb[128].mxu0 }
0x3900   :  { %v25649_v38 = vadd.f32 %v25648_v52, %v25569_v22  ;;  %v39495_v47 = vpop.f32.mrb[131].mxu1  ;;  %v39462_v37 = vpop.f32.mrb[129].mxu0 }
0x3902   :  { %v25740_v13 = vadd.f32 %v25739_v15, %v25649_v38 }
0x3907   :  { %v25819_v61 = vpop.f32.mrb[130].mxu0  ;;  %v26054_v18 = vpop.f32.mrb[132].mxu1 }
0x3908   :  { %v25820_v58 = vadd.f32 %v25819_v61, %v25740_v13  ;;  %v39484_v23 = vpop.f32.mrb[131].mxu0  ;;  %v39517_v53 = vpop.f32.mrb[133].mxu1 }
0x390a   :  { %v25897_v60 = vadd.f32 %v25896_v56, %v25820_v58 }
0x390f   :  { %v25979_v51 = vpop.f32.mrb[132].mxu0 }
0x3910   :  { %v25980_v28 = vadd.f32 %v25979_v51, %v25897_v60  ;;  %v39506_v42 = vpop.f32.mrb[133].mxu0 }
0x3912   :  { %v26055_v57 = vadd.f32 %v26054_v18, %v25980_v28 }
0x3914   :  { %v26058_v29 = vadd.f32 %v48023_v3, %v26055_v57 }
0x3916   :  { %v26060_v41 = vmin.f32 %v26058_v29, 0.0  ;;  %vm26059_vm9 = vcmp.gt.f32.partialorder %v26058_v29, 0.0 }
0x3918   :  { %v26061_v32 = vmul.f32 1.442695, %v26060_v41 }
0x391a   :  { %44738 = vpow2.f32 %v26061_v32 }
0x3924   :  { %v44739_v27 = vpop.eup %44738 }
0x3925   :  { %v31980_v22 = vadd.f32 -1.0, %v44739_v27 }
0x3927   :  { %v26064_v52 = vsel %vm26059_vm9, %v26058_v29, %v31980_v22  ;;  %v27153_v22 = vstv %s27152_s18  ;;  %s30332_s18 = scalar_select %p30331_p6, %s49069_s1, 0.0 }
0x3928   :  { %v26066_v15 = vsel %vm625_vm2, %v26064_v52, 0  ;;  %s49189_s1 = smov (!%p31921_p7, %s49069_s1), 0.0 }
0x3929   :  { %v26141_v38 = vand.u32 4294901760, %v26066_v15 }
0x392b   :  { %v26142_v47 = vsub.f32 %v26066_v15, %v26141_v38 }
0x392d   :  { %v26143_v37 = vand.u32 4294901760, %v26142_v47 }
0x392f   :  { %v26144_v13 = vsub.f32 %v26142_v47, %v26143_v37 }
0x3931   :  { %v26145_v56 = vand.u32 4294901760, %v26144_v13 }
0x3933   :  { %39535 = vmatmul.mubr.f32.vlgmr.msra.gmra.mrb[134].mxu0 %v26145_v56 }
0x3934   :  { %43558 = vmatpush3.bf16.msra.mxu0 %v45261_v25  ;;  %39553 = vmatprep.mubr.msk.f32.mxu0 %vm44853_vm0, %v49134_v0 }
0x3935   :  { %43559 = vmatprep.subr.bf16.mxu0 %v49135_v1 }
0x3938   :  { %43561 = vmatpush3.bf16.msra.mxu0 %v45271_v19 }
0x3939   :  { %43562 = vmatprep.subr.bf16.mxu0 %v49135_v1 }
0x393c   :  { %43564 = vmatpush3.bf16.msra.mxu0 %v45280_v35 }
0x393d   :  { %43565 = vmatprep.subr.bf16.mxu0 %v49135_v1 }
0x3940   :  { %43567 = vmatpush3.bf16.msra.mxu0 %v45284_v24 }
0x3941   :  { %43568 = vmatprep.subr.bf16.mxu0 %v49135_v1 }
0x3943   :  { %39554 = vmatmul.mubr.f32.vlgmr.msra.gmra.mrb[134].mxu0 %v26141_v38 }
0x3944   :  { %43570 = vmatpush3.bf16.msra.mxu0 %v45290_v26  ;;  %39572 = vmatprep.mubr.msk.f32.mxu0 %vm44853_vm0, %v49134_v0 }
0x3945   :  { %43571 = vmatprep.subr.bf16.mxu0 %v49135_v1 }
0x3948   :  { %43573 = vmatpush3.bf16.msra.mxu0 %v45297_v43 }
0x3949   :  { %43574 = vmatprep.subr.bf16.mxu0 %v49135_v1 }
0x394c   :  { %43576 = vmatpush3.bf16.msra.mxu0 %v45305_v49 }
0x394d   :  { %43577 = vmatprep.subr.bf16.mxu0 %v49135_v1 }
0x3950   :  { %43579 = vmatpush3.bf16.msra.mxu0 %v45311_v12 }
0x3951   :  { %43580 = vmatprep.subr.bf16.mxu0 %v49135_v1 }
0x3953   :  { %39573 = vmatmul.mubr.f32.vlgmr.msra.gmra.mrb[134].mxu0 %v26142_v47 }
0x3954   :  { %43582 = vmatpush3.bf16.msra.mxu0 %v45078_v59  ;;  %39591 = vmatprep.mubr.msk.f32.mxu0 %vm44853_vm0, %v49134_v0 }
0x3955   :  { %43583 = vmatprep.subr.bf16.mxu0 %v49135_v1 }
0x3958   :  { %43585 = vmatpush3.bf16.msra.mxu0 %v45120_v7 }
0x3959   :  { %43586 = vmatprep.subr.bf16.mxu0 %v49135_v1 }
0x395c   :  { %43588 = vmatpush3.bf16.msra.mxu0 %v45154_v17 }
0x395d   :  { %43589 = vmatprep.subr.bf16.mxu0 %v49135_v1 }
0x3960   :  { %43591 = vmatpush3.bf16.msra.mxu0 %v45172_v21 }
0x3961   :  { %43592 = vmatprep.subr.bf16.mxu0 %v49135_v1 }
0x3963   :  { %39592 = vmatmul.mubr.f32.vlgmr.msra.gmra.mrb[134].mxu0 %v26143_v37 }
0x3964   :  { %43594 = vmatpush3.bf16.msra.mxu0 %v45329_v34  ;;  %39610 = vmatprep.mubr.msk.f32.mxu0 %vm44853_vm0, %v49134_v0 }
0x3965   :  { %43595 = vmatprep.subr.bf16.mxu0 %v49135_v1 }
0x3968   :  { %43597 = vmatpush3.bf16.msra.mxu0 %v45337_v63 }
0x3969   :  { %43598 = vmatprep.subr.bf16.mxu0 %v49135_v1 }
0x396c   :  { %43600 = vmatpush3.bf16.msra.mxu0 %v45347_v16 }
0x396d   :  { %43601 = vmatprep.subr.bf16.mxu0 %v49135_v1 }
0x3970   :  { %43603 = vmatpush3.bf16.msra.mxu0 %v45351_v46 }
0x3971   :  { %43604 = vmatprep.subr.bf16.mxu0 %v49135_v1 }
0x3973   :  { %39611 = vmatmul.mubr.f32.vlgmr.msra.gmra.mrb[134].mxu0 %v26141_v38 }
0x3974   :  { %43606 = vmatpush3.bf16.msra.mxu0 %v45078_v59  ;;  %39629 = vmatprep.mubr.msk.f32.mxu0 %vm44853_vm0, %v49134_v0 }
0x3975   :  { %43607 = vmatprep.subr.bf16.mxu0 %v49135_v1 }
0x3978   :  { %43609 = vmatpush3.bf16.msra.mxu0 %v45120_v7 }
0x3979   :  { %43610 = vmatprep.subr.bf16.mxu0 %v49135_v1 }
0x397c   :  { %43612 = vmatpush3.bf16.msra.mxu0 %v45154_v17 }
0x397d   :  { %43613 = vmatprep.subr.bf16.mxu0 %v49135_v1 }
0x3980   :  { %43615 = vmatpush3.bf16.msra.mxu0 %v45172_v21 }
0x3981   :  { %43688 = vmatprep.subr.bf16.mxu0 %v49135_v1 }
0x3983   :  { %39630 = vmatmul.mubr.f32.vlgmr.msra.gmra.mrb[134].mxu0 %v26141_v38 }
0x3984   :  { %43690 = vmatpush3.bf16.msra.mxu0 %v44958_v8  ;;  %39754 = vmatprep.mubr.msk.f32.mxu0 %vm44853_vm0, %v49134_v0 }
0x3985   :  { %43691 = vmatprep.subr.bf16.mxu0 %v49135_v1 }
0x3988   :  { %43693 = vmatpush3.bf16.msra.mxu0 %v44960_v11 }
0x3989   :  { %43700 = vmatprep.subr.bf16.mxu0 %v49135_v1 }
0x3a56   :  { %v26601_v41 = vpop.f32.mrb[134].mxu0 }
0x3a57   :  { %v44260_v57 = vadd.f32 %v48262_v62, %v26601_v41  ;;  %v39631_v3 = vpop.f32.mrb[135].mxu0 }
0x3a58   :  { %v49179_v3 = vld [vmem:[#allocation15_spill] sm:$0xff] }
0x3a59   :  { %v26606_v42 = vmin.f32 %v44260_v57, 0.0  ;;  %vm26605_vm10 = vcmp.gt.f32.partialorder %v44260_v57, 0.0 }
0x3a5b   :  { %v26607_v28 = vmul.f32 1.442695, %v26606_v42  ;;  %v49180_v42 = vld [vmem:[#allocation16_spill] sm:$0xff] }
0x3a5d   :  { %44740 = vpow2.f32 %v26607_v28  ;;  %v49181_v28 = vld [vmem:[#allocation17_spill] sm:$0xff] }
0x3a67   :  { %v44741_v61 = vpop.eup %44740 }
0x3a68   :  { %v31981_v18 = vadd.f32 -1.0, %v44741_v61  ;;  %v49182_v61 = vld [vmem:[#allocation18_spill] sm:$0xff] }
0x3a6a   :  { %v26610_v58 = vsel %vm26605_vm10, %v44260_v57, %v31981_v18 }
0x3a6b   :  { %v26612_v23 = vsel %vm625_vm2, %v26610_v58, 0 }
0x3a6c   :  { %v26687_v53 = vand.u32 4294901760, %v26612_v23 }
0x3a6e   :  { %v26688_v60 = vsub.f32 %v26612_v23, %v26687_v53  ;;  %v27158_v23 = vstv %s27157_s26 }
0x3a70   :  { %v26689_v51 = vand.u32 4294901760, %v26688_v60 }
0x3a72   :  { %v26690_v29 = vsub.f32 %v26688_v60, %v26689_v51 }
0x3a74   :  { %v26691_v32 = vand.u32 4294901760, %v26690_v29 }
0x3a76   :  { %39649 = vmatmul.mubr.f32.vlgmr.msra.gmra.mrb[134].mxu1 %v26691_v32 }
0x3a77   :  { %43630 = vmatpush3.bf16.msra.mxu1 %v45439_v50  ;;  %39667 = vmatprep.mubr.msk.f32.mxu1 %vm44853_vm0, %v49134_v0 }
0x3a78   :  { %43631 = vmatprep.subr.bf16.mxu1 %v49135_v1 }
0x3a7b   :  { %43633 = vmatpush3.bf16.msra.mxu1 %v45449_v40 }
0x3a7c   :  { %43634 = vmatprep.subr.bf16.mxu1 %v49135_v1 }
0x3a7f   :  { %43636 = vmatpush3.bf16.msra.mxu1 %v45458_v10 }
0x3a80   :  { %43637 = vmatprep.subr.bf16.mxu1 %v49135_v1 }
0x3a83   :  { %43639 = vmatpush3.bf16.msra.mxu1 %v45462_v48 }
0x3a84   :  { %43640 = vmatprep.subr.bf16.mxu1 %v49135_v1 }
0x3a86   :  { %39668 = vmatmul.mubr.f32.vlgmr.msra.gmra.mrb[134].mxu1 %v26687_v53 }
0x3a87   :  { %43642 = vmatpush3.bf16.msra.mxu1 %v45468_v36  ;;  %39686 = vmatprep.mubr.msk.f32.mxu1 %vm44853_vm0, %v49134_v0 }
0x3a88   :  { %43643 = vmatprep.subr.bf16.mxu1 %v49135_v1 }
0x3a8b   :  { %43645 = vmatpush3.bf16.msra.mxu1 %v45475_v5 }
0x3a8c   :  { %43646 = vmatprep.subr.bf16.mxu1 %v49135_v1 }
0x3a8f   :  { %43648 = vmatpush3.bf16.msra.mxu1 %v45483_v6 }
0x3a90   :  { %43649 = vmatprep.subr.bf16.mxu1 %v49135_v1 }
0x3a93   :  { %43651 = vmatpush3.bf16.msra.mxu1 %v45489_v55 }
0x3a94   :  { %43652 = vmatprep.subr.bf16.mxu1 %v49135_v1 }
0x3a96   :  { %39687 = vmatmul.mubr.f32.vlgmr.msra.gmra.mrb[134].mxu1 %v26688_v60 }
0x3a97   :  { %43654 = vmatpush3.bf16.msra.mxu1 %v45059_v54  ;;  %39705 = vmatprep.mubr.msk.f32.mxu1 %vm44853_vm0, %v49134_v0 }
0x3a98   :  { %43655 = vmatprep.subr.bf16.mxu1 %v49135_v1 }
0x3a9b   :  { %43657 = vmatpush3.bf16.msra.mxu1 %v45100_v2 }
0x3a9c   :  { %43658 = vmatprep.subr.bf16.mxu1 %v49135_v1 }
0x3a9f   :  { %43660 = vmatpush3.bf16.msra.mxu1 %v45145_v14 }
0x3aa0   :  { %43661 = vmatprep.subr.bf16.mxu1 %v49135_v1 }
0x3aa3   :  { %43663 = vmatpush3.bf16.msra.mxu1 %v45165_v20 }
0x3aa4   :  { %43664 = vmatprep.subr.bf16.mxu1 %v49135_v1 }
0x3aa6   :  { %39706 = vmatmul.mubr.f32.vlgmr.msra.gmra.mrb[134].mxu1 %v26689_v51 }
0x3aa7   :  { %43666 = vmatpush3.bf16.msra.mxu1 %v45507_v4  ;;  %39724 = vmatprep.mubr.msk.f32.mxu1 %vm44853_vm0, %v49134_v0 }
0x3aa8   :  { %43667 = vmatprep.subr.bf16.mxu1 %v49135_v1 }
0x3aab   :  { %43669 = vmatpush3.bf16.msra.mxu1 %v45515_v45 }
0x3aac   :  { %43670 = vmatprep.subr.bf16.mxu1 %v49135_v1 }
0x3aaf   :  { %43672 = vmatpush3.bf16.msra.mxu1 %v45525_v30 }
0x3ab0   :  { %43673 = vmatprep.subr.bf16.mxu1 %v49135_v1 }
0x3ab3   :  { %43675 = vmatpush3.bf16.msra.mxu1 %v45529_v9 }
0x3ab4   :  { %43676 = vmatprep.subr.bf16.mxu1 %v49135_v1 }
0x3ab6   :  { %39725 = vmatmul.mubr.f32.vlgmr.msra.gmra.mrb[134].mxu1 %v26687_v53 }
0x3ab7   :  { %43678 = vmatpush3.bf16.msra.mxu1 %v45059_v54  ;;  %39743 = vmatprep.mubr.msk.f32.mxu1 %vm44853_vm0, %v49134_v0 }
0x3ab8   :  { %43679 = vmatprep.subr.bf16.mxu1 %v49135_v1 }
0x3abb   :  { %43681 = vmatpush3.bf16.msra.mxu1 %v45100_v2 }
0x3abc   :  { %43682 = vmatprep.subr.bf16.mxu1 %v49135_v1 }
0x3abf   :  { %43684 = vmatpush3.bf16.msra.mxu1 %v45145_v14 }
0x3ac0   :  { %43685 = vmatprep.subr.bf16.mxu1 %v49135_v1 }
0x3ac3   :  { %43687 = vmatpush3.bf16.msra.mxu1 %v45165_v20 }
0x3ac4   :  { %43694 = vmatprep.subr.bf16.mxu1 %v49135_v1 }
0x3ac6   :  { %39744 = vmatmul.mubr.f32.vlgmr.msra.gmra.mrb[134].mxu1 %v26687_v53  ;;  %v48571_v53 = vld [vmem:[%s49073_s5] ss:$0 sm:$0xff] }
0x3ac7   :  { %43696 = vmatpush3.bf16.msra.mxu1 %v44971_v31  ;;  %39765 = vmatprep.mubr.msk.f32.mxu1 %vm44853_vm0, %v49134_v0  ;;  %49183 = vst [vmem:[#allocation19_spill] sm:$0xff] %v48571_v53  ;;  %v27159_v60 = vmul.f32 %v48571_v53, %v27158_v23  ;;  %v48577_v23 = vld [vmem:[%s49074_s6] ss:$0 sm:$0xff]  ;;  %s44855_s6 = smov [#allocation11]  }
0x3ac8   :  { %43697 = vmatprep.subr.bf16.mxu1 %v49135_v1  ;;  %s31934_s29 = sshll.u32 %s44855_s6, 4  ;;  %s31935_s29 = int_to_ptr.vmem [resolvable:$true] %s31934_s29 }
0x3ac9   :  { %s44822_s2 = scalar_lea.vmem %s31935_s29, 128  ;;  %p44827_p9 = scmp.lt.s32.totalorder %s31935_s29, %s31935_s29 }
0x3aca   :  { %p44823_p8 = scmp.ne.s32.totalorder %s31935_s29, %s44822_s2  ;;  %p44828_p10 = scmp.lt.s32.totalorder %s44822_s2, %s44822_s2 }
0x3acb   :  { %43699 = vmatpush3.bf16.msra.mxu1 %v44976_v33 }
0x3acc   :  { %43706 = vmatprep.subr.bf16.mxu1 %v49135_v1  ;;  %p44829_p11 = por %p44828_p10, %p44827_p9 }
0x3ace   :  { %p44830_p12 = pnand %p44829_p11, %p44823_p8 }
0x3b99   :  { %v27147_v27 = vpop.f32.mrb[134].mxu1 }
0x3b9a   :  { %v44261_v52 = vadd.f32 %v48331_v39, %v27147_v27  ;;  %v39745_v15 = vpop.f32.mrb[135].mxu1 }
0x3b9c   :  { %v27154_v38 = vmul.f32 %v44261_v52, %v27153_v22 }
0x3b9e   :  { %v48514_v47 = vadd.f32 %v27154_v38, %v48335_v44 }
0x3ba0   :  { %v27161_v37 = vsel %vm71_vm1, %v48514_v47, 0 }
0x3ba1   :  { %v27232_v13 = vand.u32 4294901760, %v27161_v37 }
0x3ba3   :  { %v27233_v56 = vsub.f32 %v27161_v37, %v27232_v13  ;;  %39766 = vmatmul.mubr.f32.vlgmr.msra.gmra.mrb[136].mxu1 %v27232_v13 }
0x3ba4   :  { %43708 = vmatpush3.bf16.msra.mxu1 %v44958_v8  ;;  %39787 = vmatprep.mubr.msk.f32.mxu1 %vm44853_vm0, %v49134_v0 }
0x3ba5   :  { %43709 = vmatprep.subr.bf16.mxu1 %v49135_v1  ;;  %v27234_v41 = vand.u32 4294901760, %v27233_v56 }
0x3ba7   :  { %v27235_v57 = vsub.f32 %v27233_v56, %v27234_v41 }
0x3ba8   :  { %43711 = vmatpush3.bf16.msra.mxu1 %v44960_v11 }
0x3ba9   :  { %43718 = vmatprep.subr.bf16.mxu1 %v49135_v1  ;;  %v27236_v44 = vand.u32 4294901760, %v27235_v57 }
0x3bab   :  { %39788 = vmatmul.mubr.f32.vlgmr.msra.gmra.mrb[138].mxu1 %v27234_v41  ;;  %39755 = vmatmul.mubr.f32.vlgmr.msra.gmra.mrb[136].mxu0 %v27236_v44 }
0x3bac   :  { %43702 = vmatpush3.bf16.msra.mxu0 %v49179_v3  ;;  %43720 = vmatpush3.bf16.msra.mxu1 %v44958_v8 }
0x3bad   :  { %43703 = vmatprep.subr.bf16.mxu0 %v49135_v1  ;;  %43721 = vmatprep.subr.bf16.mxu1 %v49135_v1 }
0x3bae   :  { %39776 = vmatprep.mubr.msk.f32.mxu0 %vm44853_vm0, %v49134_v0  ;;  %39809 = vmatprep.mubr.msk.f32.mxu1 %vm44853_vm0, %v49134_v0 }
0x3bb0   :  { %43705 = vmatpush3.bf16.msra.mxu0 %v49180_v42  ;;  %43723 = vmatpush3.bf16.msra.mxu1 %v44960_v11 }
0x3bb1   :  { %43712 = vmatprep.subr.bf16.mxu0 %v49135_v1  ;;  %43796 = vmatprep.subr.bf16.mxu1 %v49135_v1 }
0x3bb3   :  { %39777 = vmatmul.mubr.f32.vlgmr.msra.gmra.mrb[138].mxu0 %v27233_v56  ;;  %39810 = vmatmul.mubr.f32.vlgmr.msra.gmra.mrb[140].mxu1 %v27232_v13 }
0x3bb4   :  { %43714 = vmatpush3.bf16.msra.mxu0 %v49181_v28  ;;  %39798 = vmatprep.mubr.msk.f32.mxu0 %vm44853_vm0, %v49134_v0 }
0x3bb5   :  { %43715 = vmatprep.subr.bf16.mxu0 %v49135_v1  ;;  %43798 = vmatpush3.bf16.msra.mxu1 %v45059_v54 }
0x3bb6   :  { %43799 = vmatprep.subr.bf16.mxu1 %v49135_v1  ;;  %39942 = vmatprep.mubr.msk.f32.mxu1 %vm44853_vm0, %v49134_v0 }
0x3bb8   :  { %43717 = vmatpush3.bf16.msra.mxu0 %v49182_v61 }
0x3bb9   :  { %43724 = vmatprep.subr.bf16.mxu0 %v49135_v1  ;;  %43801 = vmatpush3.bf16.msra.mxu1 %v45100_v2 }
0x3bba   :  { %43802 = vmatprep.subr.bf16.mxu1 %v49135_v1 }
0x3bbb   :  { %39799 = vmatmul.mubr.f32.vlgmr.msra.gmra.mrb[140].mxu0 %v27232_v13 }
0x3bbc   :  { %43726 = vmatpush3.bf16.msra.mxu0 %v45078_v59  ;;  %39828 = vmatprep.mubr.msk.f32.mxu0 %vm44853_vm0, %v49134_v0 }
0x3bbd   :  { %43727 = vmatprep.subr.bf16.mxu0 %v49135_v1  ;;  %43804 = vmatpush3.bf16.msra.mxu1 %v45145_v14 }
0x3bbe   :  { %43805 = vmatprep.subr.bf16.mxu1 %v49135_v1 }
0x3bc0   :  { %43729 = vmatpush3.bf16.msra.mxu0 %v45120_v7 }
0x3bc1   :  { %43730 = vmatprep.subr.bf16.mxu0 %v49135_v1  ;;  %43807 = vmatpush3.bf16.msra.mxu1 %v45165_v20 }
0x3bc2   :  { %43808 = vmatprep.subr.bf16.mxu1 %v49135_v1 }
0x3bc4   :  { %43732 = vmatpush3.bf16.msra.mxu0 %v45154_v17 }
0x3bc5   :  { %43733 = vmatprep.subr.bf16.mxu0 %v49135_v1 }
0x3bc8   :  { %43735 = vmatpush3.bf16.msra.mxu0 %v45172_v21 }
0x3bc9   :  { %43736 = vmatprep.subr.bf16.mxu0 %v49135_v1 }
0x3c76   :  { %v27329_v18 = vpop.f32.mrb[136].mxu1 }
0x3c77   :  { %v39767_v58 = vpop.f32.mrb[137].mxu1 }
0x3c7e   :  { %v27486_v51 = vpop.f32.mrb[138].mxu1  ;;  %v27238_v29 = vpop.f32.mrb[136].mxu0 }
0x3c7f   :  { %v27239_v32 = vadd.f32 %v27238_v29, %v27159_v60  ;;  %v39789_v27 = vpop.f32.mrb[139].mxu1  ;;  %v39756_v22 = vpop.f32.mrb[137].mxu0 }
0x3c81   :  { %v27330_v52 = vadd.f32 %v27329_v18, %v27239_v32 }
0x3c86   :  { %v27409_v15 = vpop.f32.mrb[138].mxu0  ;;  %v27644_v38 = vpop.f32.mrb[140].mxu1 }
0x3c87   :  { %v27410_v37 = vadd.f32 %v27409_v15, %v27330_v52  ;;  %v39778_v13 = vpop.f32.mrb[139].mxu0  ;;  %v39811_v56 = vpop.f32.mrb[141].mxu1 }
0x3c89   :  { %v27487_v41 = vadd.f32 %v27486_v51, %v27410_v37 }
0x3c8e   :  { %v27569_v57 = vpop.f32.mrb[140].mxu0 }
0x3c8f   :  { %v27570_v44 = vadd.f32 %v27569_v57, %v27487_v41  ;;  %v39800_v58 = vpop.f32.mrb[141].mxu0 }
0x3c91   :  { %v27645_v61 = vadd.f32 %v27644_v38, %v27570_v44 }
0x3c93   :  { %v27648_v60 = vadd.f32 %v48577_v23, %v27645_v61 }
0x3c95   :  { %v27650_v29 = vmin.f32 %v27648_v60, 0.0  ;;  %vm27649_vm11 = vcmp.gt.f32.partialorder %v27648_v60, 0.0 }
0x3c97   :  { %v27651_v27 = vmul.f32 1.442695, %v27650_v29 }
0x3c99   :  { %44742 = vpow2.f32 %v27651_v27 }
0x3ca3   :  { %v44743_v18 = vpop.eup %44742 }
0x3ca4   :  { %v31982_v32 = vadd.f32 -1.0, %v44743_v18 }
0x3ca6   :  { %v27654_v22 = vsel %vm27649_vm11, %v27648_v60, %v31982_v32 }
0x3ca7   :  { %v27656_v51 = vsel %vm625_vm2, %v27654_v22, 0 }
0x3ca8   :  { %v27731_v52 = vand.u32 4294901760, %v27656_v51 }
0x3caa   :  { %v27732_v15 = vsub.f32 %v27656_v51, %v27731_v52 }
0x3cac   :  { %v27733_v37 = vand.u32 4294901760, %v27732_v15 }
0x3cae   :  { %v27734_v38 = vsub.f32 %v27732_v15, %v27733_v37 }
0x3cb0   :  { %v27735_v13 = vand.u32 4294901760, %v27734_v38 }
0x3cb2   :  { %39829 = vmatmul.mubr.f32.vlgmr.msra.gmra.mrb[142].mxu0 %v27735_v13 }
0x3cb3   :  { %43738 = vmatpush3.bf16.msra.mxu0 %v45261_v25  ;;  %39847 = vmatprep.mubr.msk.f32.mxu0 %vm44853_vm0, %v49134_v0 }
0x3cb4   :  { %43739 = vmatprep.subr.bf16.mxu0 %v49135_v1 }
0x3cb7   :  { %43741 = vmatpush3.bf16.msra.mxu0 %v45271_v19 }
0x3cb8   :  { %43742 = vmatprep.subr.bf16.mxu0 %v49135_v1 }
0x3cbb   :  { %43744 = vmatpush3.bf16.msra.mxu0 %v45280_v35 }
0x3cbc   :  { %43745 = vmatprep.subr.bf16.mxu0 %v49135_v1 }
0x3cbf   :  { %43747 = vmatpush3.bf16.msra.mxu0 %v45284_v24 }
0x3cc0   :  { %43748 = vmatprep.subr.bf16.mxu0 %v49135_v1 }
0x3cc2   :  { %39848 = vmatmul.mubr.f32.vlgmr.msra.gmra.mrb[142].mxu0 %v27731_v52 }
0x3cc3   :  { %43750 = vmatpush3.bf16.msra.mxu0 %v45290_v26  ;;  %39866 = vmatprep.mubr.msk.f32.mxu0 %vm44853_vm0, %v49134_v0 }
0x3cc4   :  { %43751 = vmatprep.subr.bf16.mxu0 %v49135_v1 }
0x3cc7   :  { %43753 = vmatpush3.bf16.msra.mxu0 %v45297_v43 }
0x3cc8   :  { %43754 = vmatprep.subr.bf16.mxu0 %v49135_v1 }
0x3ccb   :  { %43756 = vmatpush3.bf16.msra.mxu0 %v45305_v49 }
0x3ccc   :  { %43757 = vmatprep.subr.bf16.mxu0 %v49135_v1 }
0x3ccf   :  { %43759 = vmatpush3.bf16.msra.mxu0 %v45311_v12 }
0x3cd0   :  { %43760 = vmatprep.subr.bf16.mxu0 %v49135_v1 }
0x3cd2   :  { %39867 = vmatmul.mubr.f32.vlgmr.msra.gmra.mrb[142].mxu0 %v27732_v15  ;;  %v28743_v15 = vstv %s28742_s13 }
0x3cd3   :  { %43762 = vmatpush3.bf16.msra.mxu0 %v45078_v59  ;;  %39885 = vmatprep.mubr.msk.f32.mxu0 %vm44853_vm0, %v49134_v0 }
0x3cd4   :  { %43763 = vmatprep.subr.bf16.mxu0 %v49135_v1 }
0x3cd7   :  { %43765 = vmatpush3.bf16.msra.mxu0 %v45120_v7 }
0x3cd8   :  { %43766 = vmatprep.subr.bf16.mxu0 %v49135_v1 }
0x3cdb   :  { %43768 = vmatpush3.bf16.msra.mxu0 %v45154_v17 }
0x3cdc   :  { %43769 = vmatprep.subr.bf16.mxu0 %v49135_v1 }
0x3cdf   :  { %43771 = vmatpush3.bf16.msra.mxu0 %v45172_v21 }
0x3ce0   :  { %43772 = vmatprep.subr.bf16.mxu0 %v49135_v1 }
0x3ce2   :  { %39886 = vmatmul.mubr.f32.vlgmr.msra.gmra.mrb[142].mxu0 %v27733_v37 }
0x3ce3   :  { %43774 = vmatpush3.bf16.msra.mxu0 %v45329_v34  ;;  %39904 = vmatprep.mubr.msk.f32.mxu0 %vm44853_vm0, %v49134_v0 }
0x3ce4   :  { %43775 = vmatprep.subr.bf16.mxu0 %v49135_v1 }
0x3ce7   :  { %43777 = vmatpush3.bf16.msra.mxu0 %v45337_v63 }
0x3ce8   :  { %43778 = vmatprep.subr.bf16.mxu0 %v49135_v1 }
0x3ceb   :  { %43780 = vmatpush3.bf16.msra.mxu0 %v45347_v16 }
0x3cec   :  { %43781 = vmatprep.subr.bf16.mxu0 %v49135_v1 }
0x3cef   :  { %43783 = vmatpush3.bf16.msra.mxu0 %v45351_v46 }
0x3cf0   :  { %43784 = vmatprep.subr.bf16.mxu0 %v49135_v1 }
0x3cf2   :  { %39905 = vmatmul.mubr.f32.vlgmr.msra.gmra.mrb[142].mxu0 %v27731_v52 }
0x3cf3   :  { %43786 = vmatpush3.bf16.msra.mxu0 %v45078_v59  ;;  %39923 = vmatprep.mubr.msk.f32.mxu0 %vm44853_vm0, %v49134_v0 }
0x3cf4   :  { %43787 = vmatprep.subr.bf16.mxu0 %v49135_v1 }
0x3cf7   :  { %43789 = vmatpush3.bf16.msra.mxu0 %v45120_v7 }
0x3cf8   :  { %43790 = vmatprep.subr.bf16.mxu0 %v49135_v1 }
0x3cfb   :  { %43792 = vmatpush3.bf16.msra.mxu0 %v45154_v17 }
0x3cfc   :  { %43793 = vmatprep.subr.bf16.mxu0 %v49135_v1 }
0x3cff   :  { %43795 = vmatpush3.bf16.msra.mxu0 %v45172_v21 }
0x3d00   :  { %43868 = vmatprep.subr.bf16.mxu0 %v49135_v1 }
0x3d02   :  { %39924 = vmatmul.mubr.f32.vlgmr.msra.gmra.mrb[142].mxu0 %v27731_v52 }
0x3d03   :  { %43870 = vmatpush3.bf16.msra.mxu0 %v44958_v8  ;;  %40048 = vmatprep.mubr.msk.f32.mxu0 %vm44853_vm0, %v49134_v0 }
0x3d04   :  { %43871 = vmatprep.subr.bf16.mxu0 %v49135_v1 }
0x3d07   :  { %43873 = vmatpush3.bf16.msra.mxu0 %v44960_v11 }
0x3d08   :  { %43880 = vmatprep.subr.bf16.mxu0 %v49135_v1 }
0x3dd5   :  { %v28191_v61 = vpop.f32.mrb[142].mxu0 }
0x3dd6   :  { %v44262_v56 = vadd.f32 %v48262_v62, %v28191_v61  ;;  %v39925_v41 = vpop.f32.mrb[143].mxu0 }
0x3dd8   :  { %v28196_v57 = vmin.f32 %v44262_v56, 0.0  ;;  %vm28195_vm12 = vcmp.gt.f32.partialorder %v44262_v56, 0.0 }
0x3dda   :  { %v28197_v44 = vmul.f32 1.442695, %v28196_v57 }
0x3ddc   :  { %44744 = vpow2.f32 %v28197_v44 }
0x3de6   :  { %v44745_v58 = vpop.eup %44744 }
0x3de7   :  { %v31983_v60 = vadd.f32 -1.0, %v44745_v58  ;;  %v49184_v58 = vld [vmem:[#allocation18_spill] sm:$0xff] }
0x3de9   :  { %v28200_v29 = vsel %vm28195_vm12, %v44262_v56, %v31983_v60 }
0x3dea   :  { %v28202_v27 = vsel %vm625_vm2, %v28200_v29, 0 }
0x3deb   :  { %v28277_v18 = vand.u32 4294901760, %v28202_v27 }
0x3ded   :  { %v28278_v32 = vsub.f32 %v28202_v27, %v28277_v18  ;;  %v28748_v27 = vstv %s28747_s7 }
0x3def   :  { %v28279_v22 = vand.u32 4294901760, %v28278_v32 }
0x3df1   :  { %v28280_v51 = vsub.f32 %v28278_v32, %v28279_v22 }
0x3df3   :  { %v28281_v52 = vand.u32 4294901760, %v28280_v51 }
0x3df5   :  { %39943 = vmatmul.mubr.f32.vlgmr.msra.gmra.mrb[142].mxu1 %v28281_v52 }
0x3df6   :  { %43810 = vmatpush3.bf16.msra.mxu1 %v45439_v50  ;;  %39961 = vmatprep.mubr.msk.f32.mxu1 %vm44853_vm0, %v49134_v0 }
0x3df7   :  { %43811 = vmatprep.subr.bf16.mxu1 %v49135_v1 }
0x3dfa   :  { %43813 = vmatpush3.bf16.msra.mxu1 %v45449_v40 }
0x3dfb   :  { %43814 = vmatprep.subr.bf16.mxu1 %v49135_v1 }
0x3dfe   :  { %43816 = vmatpush3.bf16.msra.mxu1 %v45458_v10 }
0x3dff   :  { %43817 = vmatprep.subr.bf16.mxu1 %v49135_v1 }
0x3e02   :  { %43819 = vmatpush3.bf16.msra.mxu1 %v45462_v48 }
0x3e03   :  { %43820 = vmatprep.subr.bf16.mxu1 %v49135_v1 }
0x3e05   :  { %39962 = vmatmul.mubr.f32.vlgmr.msra.gmra.mrb[142].mxu1 %v28277_v18 }
0x3e06   :  { %43822 = vmatpush3.bf16.msra.mxu1 %v45468_v36  ;;  %39980 = vmatprep.mubr.msk.f32.mxu1 %vm44853_vm0, %v49134_v0 }
0x3e07   :  { %43823 = vmatprep.subr.bf16.mxu1 %v49135_v1 }
0x3e0a   :  { %43825 = vmatpush3.bf16.msra.mxu1 %v45475_v5 }
0x3e0b   :  { %43826 = vmatprep.subr.bf16.mxu1 %v49135_v1 }
0x3e0e   :  { %43828 = vmatpush3.bf16.msra.mxu1 %v45483_v6 }
0x3e0f   :  { %43829 = vmatprep.subr.bf16.mxu1 %v49135_v1 }
0x3e12   :  { %43831 = vmatpush3.bf16.msra.mxu1 %v45489_v55 }
0x3e13   :  { %43832 = vmatprep.subr.bf16.mxu1 %v49135_v1 }
0x3e15   :  { %39981 = vmatmul.mubr.f32.vlgmr.msra.gmra.mrb[142].mxu1 %v28278_v32 }
0x3e16   :  { %43834 = vmatpush3.bf16.msra.mxu1 %v45059_v54  ;;  %39999 = vmatprep.mubr.msk.f32.mxu1 %vm44853_vm0, %v49134_v0 }
0x3e17   :  { %43835 = vmatprep.subr.bf16.mxu1 %v49135_v1 }
0x3e1a   :  { %43837 = vmatpush3.bf16.msra.mxu1 %v45100_v2 }
0x3e1b   :  { %43838 = vmatprep.subr.bf16.mxu1 %v49135_v1 }
0x3e1e   :  { %43840 = vmatpush3.bf16.msra.mxu1 %v45145_v14 }
0x3e1f   :  { %43841 = vmatprep.subr.bf16.mxu1 %v49135_v1 }
0x3e22   :  { %43843 = vmatpush3.bf16.msra.mxu1 %v45165_v20 }
0x3e23   :  { %43844 = vmatprep.subr.bf16.mxu1 %v49135_v1 }
0x3e25   :  { %40000 = vmatmul.mubr.f32.vlgmr.msra.gmra.mrb[142].mxu1 %v28279_v22 }
0x3e26   :  { %43846 = vmatpush3.bf16.msra.mxu1 %v45507_v4  ;;  %40018 = vmatprep.mubr.msk.f32.mxu1 %vm44853_vm0, %v49134_v0 }
0x3e27   :  { %43847 = vmatprep.subr.bf16.mxu1 %v49135_v1 }
0x3e2a   :  { %43849 = vmatpush3.bf16.msra.mxu1 %v45515_v45 }
0x3e2b   :  { %43850 = vmatprep.subr.bf16.mxu1 %v49135_v1 }
0x3e2e   :  { %43852 = vmatpush3.bf16.msra.mxu1 %v45525_v30 }
0x3e2f   :  { %43853 = vmatprep.subr.bf16.mxu1 %v49135_v1 }
0x3e32   :  { %43855 = vmatpush3.bf16.msra.mxu1 %v45529_v9 }
0x3e33   :  { %43856 = vmatprep.subr.bf16.mxu1 %v49135_v1 }
0x3e35   :  { %40019 = vmatmul.mubr.f32.vlgmr.msra.gmra.mrb[142].mxu1 %v28277_v18 }
0x3e36   :  { %43858 = vmatpush3.bf16.msra.mxu1 %v45059_v54  ;;  %40037 = vmatprep.mubr.msk.f32.mxu1 %vm44853_vm0, %v49134_v0 }
0x3e37   :  { %43859 = vmatprep.subr.bf16.mxu1 %v49135_v1 }
0x3e3a   :  { %43861 = vmatpush3.bf16.msra.mxu1 %v45100_v2 }
0x3e3b   :  { %43862 = vmatprep.subr.bf16.mxu1 %v49135_v1 }
0x3e3e   :  { %43864 = vmatpush3.bf16.msra.mxu1 %v45145_v14 }
0x3e3f   :  { %43865 = vmatprep.subr.bf16.mxu1 %v49135_v1 }
0x3e42   :  { %43867 = vmatpush3.bf16.msra.mxu1 %v45165_v20 }
0x3e43   :  { %43874 = vmatprep.subr.bf16.mxu1 %v49135_v1 }
0x3e45   :  { %40038 = vmatmul.mubr.f32.vlgmr.msra.gmra.mrb[142].mxu1 %v28277_v18  ;;  %v28749_v18 = vmul.f32 %v48571_v53, %v28748_v27 }
0x3e46   :  { %43876 = vmatpush3.bf16.msra.mxu1 %v44971_v31  ;;  %40059 = vmatprep.mubr.msk.f32.mxu1 %vm44853_vm0, %v49134_v0 }
0x3e47   :  { %43877 = vmatprep.subr.bf16.mxu1 %v49135_v1 }
0x3e4a   :  { %43879 = vmatpush3.bf16.msra.mxu1 %v44976_v33 }
0x3e4b   :  { %43886 = vmatprep.subr.bf16.mxu1 %v49135_v1 }
0x3f18   :  { %v28737_v62 = vpop.f32.mrb[142].mxu1 }
0x3f19   :  { %v44263_v37 = vadd.f32 %v48331_v39, %v28737_v62  ;;  %v40039_v38 = vpop.f32.mrb[143].mxu1 }
0x3f1b   :  { %v28744_v13 = vmul.f32 %v44263_v37, %v28743_v15 }
0x3f1d   :  { %v48703_v61 = vadd.f32 %v28744_v13, %v48514_v47 }
0x3f1f   :  { %v28751_v56 = vsel %vm71_vm1, %v48703_v61, 0 }
0x3f20   :  { %v28822_v41 = vand.u32 4294901760, %v28751_v56 }
0x3f22   :  { %v28823_v57 = vsub.f32 %v28751_v56, %v28822_v41  ;;  %40060 = vmatmul.mubr.f32.vlgmr.msra.gmra.mrb[144].mxu1 %v28822_v41 }
0x3f23   :  { %43888 = vmatpush3.bf16.msra.mxu1 %v44958_v8  ;;  %40081 = vmatprep.mubr.msk.f32.mxu1 %vm44853_vm0, %v49134_v0 }
0x3f24   :  { %43889 = vmatprep.subr.bf16.mxu1 %v49135_v1  ;;  %v28824_v44 = vand.u32 4294901760, %v28823_v57 }
0x3f26   :  { %v28825_v39 = vsub.f32 %v28823_v57, %v28824_v44 }
0x3f27   :  { %43891 = vmatpush3.bf16.msra.mxu1 %v44960_v11 }
0x3f28   :  { %43898 = vmatprep.subr.bf16.mxu1 %v49135_v1  ;;  %v28826_v47 = vand.u32 4294901760, %v28825_v39 }
0x3f2a   :  { %40082 = vmatmul.mubr.f32.vlgmr.msra.gmra.mrb[146].mxu1 %v28824_v44  ;;  %40049 = vmatmul.mubr.f32.vlgmr.msra.gmra.mrb[144].mxu0 %v28826_v47 }
0x3f2b   :  { %43882 = vmatpush3.bf16.msra.mxu0 %v49179_v3  ;;  %43900 = vmatpush3.bf16.msra.mxu1 %v44958_v8 }
0x3f2c   :  { %43883 = vmatprep.subr.bf16.mxu0 %v49135_v1  ;;  %43901 = vmatprep.subr.bf16.mxu1 %v49135_v1 }
0x3f2d   :  { %40070 = vmatprep.mubr.msk.f32.mxu0 %vm44853_vm0, %v49134_v0  ;;  %40103 = vmatprep.mubr.msk.f32.mxu1 %vm44853_vm0, %v49134_v0 }
0x3f2f   :  { %43885 = vmatpush3.bf16.msra.mxu0 %v49180_v42  ;;  %43903 = vmatpush3.bf16.msra.mxu1 %v44960_v11 }
0x3f30   :  { %43892 = vmatprep.subr.bf16.mxu0 %v49135_v1  ;;  %43976 = vmatprep.subr.bf16.mxu1 %v49135_v1 }
0x3f32   :  { %40071 = vmatmul.mubr.f32.vlgmr.msra.gmra.mrb[146].mxu0 %v28823_v57  ;;  %40104 = vmatmul.mubr.f32.vlgmr.msra.gmra.mrb[148].mxu1 %v28822_v41 }
0x3f33   :  { %43894 = vmatpush3.bf16.msra.mxu0 %v49181_v28  ;;  %40092 = vmatprep.mubr.msk.f32.mxu0 %vm44853_vm0, %v49134_v0 }
0x3f34   :  { %43895 = vmatprep.subr.bf16.mxu0 %v49135_v1  ;;  %43978 = vmatpush3.bf16.msra.mxu1 %v45059_v54 }
0x3f35   :  { %43979 = vmatprep.subr.bf16.mxu1 %v49135_v1  ;;  %40236 = vmatprep.mubr.msk.f32.mxu1 %vm44853_vm0, %v49134_v0 }
0x3f37   :  { %43897 = vmatpush3.bf16.msra.mxu0 %v49184_v58 }
0x3f38   :  { %43904 = vmatprep.subr.bf16.mxu0 %v49135_v1  ;;  %43981 = vmatpush3.bf16.msra.mxu1 %v45100_v2 }
0x3f39   :  { %43982 = vmatprep.subr.bf16.mxu1 %v49135_v1 }
0x3f3a   :  { %40093 = vmatmul.mubr.f32.vlgmr.msra.gmra.mrb[148].mxu0 %v28822_v41 }
0x3f3b   :  { %43906 = vmatpush3.bf16.msra.mxu0 %v45078_v59  ;;  %40122 = vmatprep.mubr.msk.f32.mxu0 %vm44853_vm0, %v49134_v0 }
0x3f3c   :  { %43907 = vmatprep.subr.bf16.mxu0 %v49135_v1  ;;  %43984 = vmatpush3.bf16.msra.mxu1 %v45145_v14 }
0x3f3d   :  { %43985 = vmatprep.subr.bf16.mxu1 %v49135_v1 }
0x3f3f   :  { %43909 = vmatpush3.bf16.msra.mxu0 %v45120_v7 }
0x3f40   :  { %43910 = vmatprep.subr.bf16.mxu0 %v49135_v1  ;;  %43987 = vmatpush3.bf16.msra.mxu1 %v45165_v20 }
0x3f41   :  { %43988 = vmatprep.subr.bf16.mxu1 %v49135_v1 }
0x3f43   :  { %43912 = vmatpush3.bf16.msra.mxu0 %v45154_v17 }
0x3f44   :  { %43913 = vmatprep.subr.bf16.mxu0 %v49135_v1 }
0x3f47   :  { %43915 = vmatpush3.bf16.msra.mxu0 %v45172_v21 }
0x3f48   :  { %43916 = vmatprep.subr.bf16.mxu0 %v49135_v1 }
0x3ff5   :  { %v28919_v60 = vpop.f32.mrb[144].mxu1 }
0x3ff6   :  { %v40061_v29 = vpop.f32.mrb[145].mxu1 }
0x3ffd   :  { %v29076_v32 = vpop.f32.mrb[146].mxu1  ;;  %v28828_v22 = vpop.f32.mrb[144].mxu0 }
0x3ffe   :  { %v28829_v51 = vadd.f32 %v28828_v22, %v28749_v18  ;;  %v40083_v52 = vpop.f32.mrb[147].mxu1  ;;  %v40050_v62 = vpop.f32.mrb[145].mxu0 }
0x4000   :  { %v28920_v15 = vadd.f32 %v28919_v60, %v28829_v51 }
0x4005   :  { %v28999_v37 = vpop.f32.mrb[146].mxu0  ;;  %v29234_v38 = vpop.f32.mrb[148].mxu1 }
0x4006   :  { %v29000_v13 = vadd.f32 %v28999_v37, %v28920_v15  ;;  %v40072_v56 = vpop.f32.mrb[147].mxu0  ;;  %v40105_v41 = vpop.f32.mrb[149].mxu1 }
0x4008   :  { %v29077_v57 = vadd.f32 %v29076_v32, %v29000_v13 }
0x400d   :  { %v29159_v44 = vpop.f32.mrb[148].mxu0 }
0x400e   :  { %v29160_v39 = vadd.f32 %v29159_v44, %v29077_v57  ;;  %v40094_v47 = vpop.f32.mrb[149].mxu0 }
0x4010   :  { %v29235_v58 = vadd.f32 %v29234_v38, %v29160_v39 }
0x4012   :  { %v29238_v29 = vadd.f32 %v48577_v23, %v29235_v58 }
0x4014   :  { %v29240_v28 = vmin.f32 %v29238_v29, 0.0  ;;  %vm29239_vm13 = vcmp.gt.f32.partialorder %v29238_v29, 0.0 }
0x4016   :  { %v29241_v27 = vmul.f32 1.442695, %v29240_v28 }
0x4018   :  { %44746 = vpow2.f32 %v29241_v27 }
0x4022   :  { %v44747_v53 = vpop.eup %44746 }
0x4023   :  { %v31984_v18 = vadd.f32 -1.0, %v44747_v53  ;;  %v48816_v53 = vld [vmem:[#allocation9] ss:$0 sm:$0xff] }
0x4025   :  { %v29244_v22 = vsel %vm29239_vm13, %v29238_v29, %v31984_v18 }
0x4026   :  { %v29246_v60 = vsel %vm625_vm2, %v29244_v22, 0 }
0x4027   :  { %v29321_v51 = vand.u32 4294901760, %v29246_v60 }
0x4029   :  { %v29322_v52 = vsub.f32 %v29246_v60, %v29321_v51  ;;  %v30333_v60 = vstv %s30332_s18 }
0x402b   :  { %v29323_v62 = vand.u32 4294901760, %v29322_v52 }
0x402d   :  { %v29324_v15 = vsub.f32 %v29322_v52, %v29323_v62 }
0x402f   :  { %v29325_v32 = vand.u32 4294901760, %v29324_v15 }
0x4031   :  { %40123 = vmatmul.mubr.f32.vlgmr.msra.gmra.mrb[150].mxu0 %v29325_v32 }
0x4032   :  { %43918 = vmatpush3.bf16.msra.mxu0 %v45261_v25  ;;  %40141 = vmatprep.mubr.msk.f32.mxu0 %vm44853_vm0, %v49134_v0 }
0x4033   :  { %43919 = vmatprep.subr.bf16.mxu0 %v49135_v1 }
0x4036   :  { %43921 = vmatpush3.bf16.msra.mxu0 %v45271_v19 }
0x4037   :  { %43922 = vmatprep.subr.bf16.mxu0 %v49135_v1 }
0x403a   :  { %43924 = vmatpush3.bf16.msra.mxu0 %v45280_v35 }
0x403b   :  { %43925 = vmatprep.subr.bf16.mxu0 %v49135_v1 }
0x403e   :  { %43927 = vmatpush3.bf16.msra.mxu0 %v45284_v24 }
0x403f   :  { %43928 = vmatprep.subr.bf16.mxu0 %v49135_v1 }
0x4041   :  { %40142 = vmatmul.mubr.f32.vlgmr.msra.gmra.mrb[150].mxu0 %v29321_v51 }
0x4042   :  { %43930 = vmatpush3.bf16.msra.mxu0 %v45290_v26  ;;  %40160 = vmatprep.mubr.msk.f32.mxu0 %vm44853_vm0, %v49134_v0 }
0x4043   :  { %43931 = vmatprep.subr.bf16.mxu0 %v49135_v1 }
0x4046   :  { %43933 = vmatpush3.bf16.msra.mxu0 %v45297_v43 }
0x4047   :  { %43934 = vmatprep.subr.bf16.mxu0 %v49135_v1 }
0x404a   :  { %43936 = vmatpush3.bf16.msra.mxu0 %v45305_v49 }
0x404b   :  { %43937 = vmatprep.subr.bf16.mxu0 %v49135_v1 }
0x404e   :  { %43939 = vmatpush3.bf16.msra.mxu0 %v45311_v12 }
0x404f   :  { %43940 = vmatprep.subr.bf16.mxu0 %v49135_v1 }
0x4051   :  { %40161 = vmatmul.mubr.f32.vlgmr.msra.gmra.mrb[150].mxu0 %v29322_v52 }
0x4052   :  { %43942 = vmatpush3.bf16.msra.mxu0 %v45078_v59  ;;  %40179 = vmatprep.mubr.msk.f32.mxu0 %vm44853_vm0, %v49134_v0 }
0x4053   :  { %43943 = vmatprep.subr.bf16.mxu0 %v49135_v1 }
0x4056   :  { %43945 = vmatpush3.bf16.msra.mxu0 %v45120_v7 }
0x4057   :  { %43946 = vmatprep.subr.bf16.mxu0 %v49135_v1 }
0x405a   :  { %43948 = vmatpush3.bf16.msra.mxu0 %v45154_v17 }
0x405b   :  { %43949 = vmatprep.subr.bf16.mxu0 %v49135_v1 }
0x405e   :  { %43951 = vmatpush3.bf16.msra.mxu0 %v45172_v21 }
0x405f   :  { %43952 = vmatprep.subr.bf16.mxu0 %v49135_v1 }
0x4061   :  { %40180 = vmatmul.mubr.f32.vlgmr.msra.gmra.mrb[150].mxu0 %v29323_v62 }
0x4062   :  { %43954 = vmatpush3.bf16.msra.mxu0 %v45329_v34  ;;  %40198 = vmatprep.mubr.msk.f32.mxu0 %vm44853_vm0, %v49134_v0 }
0x4063   :  { %43955 = vmatprep.subr.bf16.mxu0 %v49135_v1 }
0x4066   :  { %43957 = vmatpush3.bf16.msra.mxu0 %v45337_v63 }
0x4067   :  { %43958 = vmatprep.subr.bf16.mxu0 %v49135_v1 }
0x406a   :  { %43960 = vmatpush3.bf16.msra.mxu0 %v45347_v16 }
0x406b   :  { %43961 = vmatprep.subr.bf16.mxu0 %v49135_v1 }
0x406e   :  { %43963 = vmatpush3.bf16.msra.mxu0 %v45351_v46 }
0x406f   :  { %43964 = vmatprep.subr.bf16.mxu0 %v49135_v1 }
0x4071   :  { %40199 = vmatmul.mubr.f32.vlgmr.msra.gmra.mrb[150].mxu0 %v29321_v51 }
0x4072   :  { %43966 = vmatpush3.bf16.msra.mxu0 %v45078_v59  ;;  %40217 = vmatprep.mubr.msk.f32.mxu0 %vm44853_vm0, %v49134_v0 }
0x4073   :  { %43967 = vmatprep.subr.bf16.mxu0 %v49135_v1 }
0x4076   :  { %43969 = vmatpush3.bf16.msra.mxu0 %v45120_v7 }
0x4077   :  { %43970 = vmatprep.subr.bf16.mxu0 %v49135_v1 }
0x407a   :  { %43972 = vmatpush3.bf16.msra.mxu0 %v45154_v17 }
0x407b   :  { %43973 = vmatprep.subr.bf16.mxu0 %v49135_v1 }
0x407e   :  { %43975 = vmatpush3.bf16.msra.mxu0 %v45172_v21 }
0x407f   :  { %44048 = vmatprep.subr.bf16.mxu0 %v49135_v1 }
0x4081   :  { %40218 = vmatmul.mubr.f32.vlgmr.msra.gmra.mrb[150].mxu0 %v29321_v51 }
0x4082   :  { %44050 = vmatpush3.bf16.msra.mxu0 %v44958_v8  ;;  %40342 = vmatprep.mubr.msk.f32.mxu0 %vm44853_vm0, %v49134_v0 }
0x4083   :  { %44051 = vmatprep.subr.bf16.mxu0 %v49135_v1 }
0x4086   :  { %44053 = vmatpush3.bf16.msra.mxu0 %v44960_v11 }
0x4087   :  { %44060 = vmatprep.subr.bf16.mxu0 %v49135_v1 }
0x4154   :  { %v29781_v28 = vpop.f32.mrb[150].mxu0 }
0x4155   :  { %v44264_v58 = vadd.f32 %v48816_v53, %v29781_v28  ;;  %v40219_v37 = vpop.f32.mrb[151].mxu0 }
0x4157   :  { %v29786_v38 = vmin.f32 %v44264_v58, 0.0  ;;  %vm29785_vm14 = vcmp.gt.f32.partialorder %v44264_v58, 0.0 }
0x4159   :  { %v29787_v13 = vmul.f32 1.442695, %v29786_v38  ;;  %v30338_v38 = vstv %s30337_s27 }
0x415b   :  { %44748 = vpow2.f32 %v29787_v13  ;;  %v49187_v13 = vld [vmem:[#allocation19_spill] sm:$0xff] }
0x4165   :  { %v44749_v56 = vpop.eup %44748 }
0x4166   :  { %v31985_v41 = vadd.f32 -1.0, %v44749_v56  ;;  %v30339_v56 = vmul.f32 %v49187_v13, %v30338_v38 }
0x4168   :  { %v29790_v57 = vsel %vm29785_vm14, %v44264_v58, %v31985_v41 }
0x4169   :  { %v29792_v44 = vsel %vm625_vm2, %v29790_v57, 0 }
0x416a   :  { %v29867_v39 = vand.u32 4294901760, %v29792_v44 }
0x416c   :  { %v29868_v47 = vsub.f32 %v29792_v44, %v29867_v39 }
0x416e   :  { %v29869_v29 = vand.u32 4294901760, %v29868_v47 }
0x4170   :  { %v29870_v27 = vsub.f32 %v29868_v47, %v29869_v29 }
0x4172   :  { %v29871_v18 = vand.u32 4294901760, %v29870_v27 }
0x4174   :  { %40237 = vmatmul.mubr.f32.vlgmr.msra.gmra.mrb[150].mxu1 %v29871_v18 }
0x4175   :  { %43990 = vmatpush3.bf16.msra.mxu1 %v45439_v50  ;;  %40255 = vmatprep.mubr.msk.f32.mxu1 %vm44853_vm0, %v49134_v0 }
0x4176   :  { %43991 = vmatprep.subr.bf16.mxu1 %v49135_v1 }
0x4179   :  { %43993 = vmatpush3.bf16.msra.mxu1 %v45449_v40 }
0x417a   :  { %43994 = vmatprep.subr.bf16.mxu1 %v49135_v1 }
0x417d   :  { %43996 = vmatpush3.bf16.msra.mxu1 %v45458_v10 }
0x417e   :  { %43997 = vmatprep.subr.bf16.mxu1 %v49135_v1 }
0x4181   :  { %43999 = vmatpush3.bf16.msra.mxu1 %v45462_v48 }
0x4182   :  { %44000 = vmatprep.subr.bf16.mxu1 %v49135_v1 }
0x4184   :  { %40256 = vmatmul.mubr.f32.vlgmr.msra.gmra.mrb[150].mxu1 %v29867_v39 }
0x4185   :  { %44002 = vmatpush3.bf16.msra.mxu1 %v45468_v36  ;;  %40274 = vmatprep.mubr.msk.f32.mxu1 %vm44853_vm0, %v49134_v0 }
0x4186   :  { %44003 = vmatprep.subr.bf16.mxu1 %v49135_v1 }
0x4189   :  { %44005 = vmatpush3.bf16.msra.mxu1 %v45475_v5 }
0x418a   :  { %44006 = vmatprep.subr.bf16.mxu1 %v49135_v1 }
0x418d   :  { %44008 = vmatpush3.bf16.msra.mxu1 %v45483_v6 }
0x418e   :  { %44009 = vmatprep.subr.bf16.mxu1 %v49135_v1 }
0x4191   :  { %44011 = vmatpush3.bf16.msra.mxu1 %v45489_v55 }
0x4192   :  { %44012 = vmatprep.subr.bf16.mxu1 %v49135_v1 }
0x4194   :  { %40275 = vmatmul.mubr.f32.vlgmr.msra.gmra.mrb[150].mxu1 %v29868_v47 }
0x4195   :  { %44014 = vmatpush3.bf16.msra.mxu1 %v45059_v54  ;;  %40293 = vmatprep.mubr.msk.f32.mxu1 %vm44853_vm0, %v49134_v0 }
0x4196   :  { %44015 = vmatprep.subr.bf16.mxu1 %v49135_v1 }
0x4199   :  { %44017 = vmatpush3.bf16.msra.mxu1 %v45100_v2 }
0x419a   :  { %44018 = vmatprep.subr.bf16.mxu1 %v49135_v1 }
0x419d   :  { %44020 = vmatpush3.bf16.msra.mxu1 %v45145_v14 }
0x419e   :  { %44021 = vmatprep.subr.bf16.mxu1 %v49135_v1 }
0x41a1   :  { %44023 = vmatpush3.bf16.msra.mxu1 %v45165_v20 }
0x41a2   :  { %44024 = vmatprep.subr.bf16.mxu1 %v49135_v1 }
0x41a4   :  { %40294 = vmatmul.mubr.f32.vlgmr.msra.gmra.mrb[150].mxu1 %v29869_v29 }
0x41a5   :  { %44026 = vmatpush3.bf16.msra.mxu1 %v45507_v4  ;;  %40312 = vmatprep.mubr.msk.f32.mxu1 %vm44853_vm0, %v49134_v0 }
0x41a6   :  { %44027 = vmatprep.subr.bf16.mxu1 %v49135_v1 }
0x41a9   :  { %44029 = vmatpush3.bf16.msra.mxu1 %v45515_v45 }
0x41aa   :  { %44030 = vmatprep.subr.bf16.mxu1 %v49135_v1 }
0x41ad   :  { %44032 = vmatpush3.bf16.msra.mxu1 %v45525_v30 }
0x41ae   :  { %44033 = vmatprep.subr.bf16.mxu1 %v49135_v1 }
0x41b1   :  { %44035 = vmatpush3.bf16.msra.mxu1 %v45529_v9 }
0x41b2   :  { %44036 = vmatprep.subr.bf16.mxu1 %v49135_v1 }
0x41b4   :  { %40313 = vmatmul.mubr.f32.vlgmr.msra.gmra.mrb[150].mxu1 %v29867_v39 }
0x41b5   :  { %44038 = vmatpush3.bf16.msra.mxu1 %v45059_v54  ;;  %40331 = vmatprep.mubr.msk.f32.mxu1 %vm44853_vm0, %v49134_v0 }
0x41b6   :  { %44039 = vmatprep.subr.bf16.mxu1 %v49135_v1 }
0x41b9   :  { %44041 = vmatpush3.bf16.msra.mxu1 %v45100_v2 }
0x41ba   :  { %44042 = vmatprep.subr.bf16.mxu1 %v49135_v1 }
0x41bd   :  { %44044 = vmatpush3.bf16.msra.mxu1 %v45145_v14 }
0x41be   :  { %44045 = vmatprep.subr.bf16.mxu1 %v49135_v1 }
0x41c1   :  { %44047 = vmatpush3.bf16.msra.mxu1 %v45165_v20 }
0x41c2   :  { %44054 = vmatprep.subr.bf16.mxu1 %v49135_v1 }
0x41c4   :  { %40332 = vmatmul.mubr.f32.vlgmr.msra.gmra.mrb[150].mxu1 %v29867_v39 }
0x41c5   :  { %44056 = vmatpush3.bf16.msra.mxu1 %v44971_v31  ;;  %40353 = vmatprep.mubr.msk.f32.mxu1 %vm44853_vm0, %v49134_v0  ;;  %v48885_v31 = vld [vmem:[%s49078_s10] ss:$0 sm:$0xff] }
0x41c6   :  { %44057 = vmatprep.subr.bf16.mxu1 %v49135_v1 }
0x41c9   :  { %44059 = vmatpush3.bf16.msra.mxu1 %v44976_v33 }
0x41ca   :  { %44066 = vmatprep.subr.bf16.mxu1 %v49135_v1 }
0x4297   :  { %v30327_v22 = vpop.f32.mrb[150].mxu1 }
0x4298   :  { %v44265_v51 = vadd.f32 %v48885_v31, %v30327_v22  ;;  %v40333_v33 = vpop.f32.mrb[151].mxu1 }
0x429a   :  { %v30334_v52 = vmul.f32 %v44265_v51, %v30333_v60 }
0x429c   :  { %v48889_v62 = vadd.f32 %v30334_v52, %v48703_v61 }
0x429e   :  { %v30341_v15 = vsel %vm71_vm1, %v48889_v62, 0 }
0x429f   :  { %v30412_v32 = vand.u32 4294901760, %v30341_v15 }
0x42a1   :  { %v30413_v28 = vsub.f32 %v30341_v15, %v30412_v32  ;;  %40354 = vmatmul.mubr.f32.vlgmr.msra.gmra.mrb[152].mxu1 %v30412_v32 }
0x42a2   :  { %44068 = vmatpush3.bf16.msra.mxu1 %v44958_v8  ;;  %40375 = vmatprep.mubr.msk.f32.mxu1 %vm44853_vm0, %v49134_v0 }
0x42a3   :  { %44069 = vmatprep.subr.bf16.mxu1 %v49135_v1  ;;  %v30414_v58 = vand.u32 4294901760, %v30413_v28 }
0x42a5   :  { %v30415_v37 = vsub.f32 %v30413_v28, %v30414_v58 }
0x42a6   :  { %44071 = vmatpush3.bf16.msra.mxu1 %v44960_v11 }
0x42a7   :  { %44078 = vmatprep.subr.bf16.mxu1 %v49135_v1  ;;  %v30416_v61 = vand.u32 4294901760, %v30415_v37 }
0x42a9   :  { %40376 = vmatmul.mubr.f32.vlgmr.msra.gmra.mrb[154].mxu1 %v30414_v58  ;;  %40343 = vmatmul.mubr.f32.vlgmr.msra.gmra.mrb[152].mxu0 %v30416_v61 }
0x42aa   :  { %44062 = vmatpush3.bf16.msra.mxu0 %v49179_v3  ;;  %44080 = vmatpush3.bf16.msra.mxu1 %v44958_v8  ;;  %v49185_v8 = vld [vmem:[#allocation17_spill] sm:$0xff] }
0x42ab   :  { %44063 = vmatprep.subr.bf16.mxu0 %v49135_v1  ;;  %44081 = vmatprep.subr.bf16.mxu1 %v49135_v1 }
0x42ac   :  { %40364 = vmatprep.mubr.msk.f32.mxu0 %vm44853_vm0, %v49134_v0  ;;  %40397 = vmatprep.mubr.msk.f32.mxu1 %vm44853_vm0, %v49134_v0 }
0x42ae   :  { %44065 = vmatpush3.bf16.msra.mxu0 %v49180_v42  ;;  %44083 = vmatpush3.bf16.msra.mxu1 %v44960_v11  ;;  %v49186_v11 = vld [vmem:[#allocation18_spill] sm:$0xff] }
0x42af   :  { %44072 = vmatprep.subr.bf16.mxu0 %v49135_v1  ;;  %44156 = vmatprep.subr.bf16.mxu1 %v49135_v1 }
0x42b1   :  { %40365 = vmatmul.mubr.f32.vlgmr.msra.gmra.mrb[154].mxu0 %v30413_v28  ;;  %40398 = vmatmul.mubr.f32.vlgmr.msra.gmra.mrb[156].mxu1 %v30412_v32 }
0x42b2   :  { %44074 = vmatpush3.bf16.msra.mxu0 %v49185_v8  ;;  %40386 = vmatprep.mubr.msk.f32.mxu0 %vm44853_vm0, %v49134_v0 }
0x42b3   :  { %44075 = vmatprep.subr.bf16.mxu0 %v49135_v1  ;;  %44158 = vmatpush3.bf16.msra.mxu1 %v45059_v54 }
0x42b4   :  { %44159 = vmatprep.subr.bf16.mxu1 %v49135_v1  ;;  %40530 = vmatprep.mubr.msk.f32.mxu1 %vm44853_vm0, %v49134_v0 }
0x42b6   :  { %44077 = vmatpush3.bf16.msra.mxu0 %v49186_v11 }
0x42b7   :  { %44084 = vmatprep.subr.bf16.mxu0 %v49135_v1  ;;  %44161 = vmatpush3.bf16.msra.mxu1 %v45100_v2 }
0x42b8   :  { %44162 = vmatprep.subr.bf16.mxu1 %v49135_v1 }
0x42b9   :  { %40387 = vmatmul.mubr.f32.vlgmr.msra.gmra.mrb[156].mxu0 %v30412_v32 }
0x42ba   :  { %44086 = vmatpush3.bf16.msra.mxu0 %v45078_v59  ;;  %40416 = vmatprep.mubr.msk.f32.mxu0 %vm44853_vm0, %v49134_v0 }
0x42bb   :  { %44087 = vmatprep.subr.bf16.mxu0 %v49135_v1  ;;  %44164 = vmatpush3.bf16.msra.mxu1 %v45145_v14 }
0x42bc   :  { %44165 = vmatprep.subr.bf16.mxu1 %v49135_v1 }
0x42be   :  { %44089 = vmatpush3.bf16.msra.mxu0 %v45120_v7 }
0x42bf   :  { %44090 = vmatprep.subr.bf16.mxu0 %v49135_v1  ;;  %44167 = vmatpush3.bf16.msra.mxu1 %v45165_v20 }
0x42c0   :  { %44168 = vmatprep.subr.bf16.mxu1 %v49135_v1 }
0x42c2   :  { %44092 = vmatpush3.bf16.msra.mxu0 %v45154_v17 }
0x42c3   :  { %44093 = vmatprep.subr.bf16.mxu0 %v49135_v1 }
0x42c6   :  { %44095 = vmatpush3.bf16.msra.mxu0 %v45172_v21 }
0x42c7   :  { %44096 = vmatprep.subr.bf16.mxu0 %v49135_v1 }
0x4374   :  { %v30509_v3 = vpop.f32.mrb[152].mxu1 }
0x4375   :  { %v40355_v42 = vpop.f32.mrb[153].mxu1 }
0x437c   :  { %v30666_v41 = vpop.f32.mrb[154].mxu1  ;;  %v30418_v57 = vpop.f32.mrb[152].mxu0 }
0x437d   :  { %v30419_v44 = vadd.f32 %v30418_v57, %v30339_v56  ;;  %v40377_v39 = vpop.f32.mrb[155].mxu1  ;;  %v40344_v47 = vpop.f32.mrb[153].mxu0 }
0x437f   :  { %v30510_v29 = vadd.f32 %v30509_v3, %v30419_v44 }
0x4384   :  { %v30589_v27 = vpop.f32.mrb[154].mxu0  ;;  %v30824_v18 = vpop.f32.mrb[156].mxu1 }
0x4385   :  { %v30590_v22 = vadd.f32 %v30589_v27, %v30510_v29  ;;  %v40366_v60 = vpop.f32.mrb[155].mxu0  ;;  %v40399_v51 = vpop.f32.mrb[157].mxu1 }
0x4387   :  { %v30667_v33 = vadd.f32 %v30666_v41, %v30590_v22 }
0x438c   :  { %v30749_v52 = vpop.f32.mrb[156].mxu0 }
0x438d   :  { %v30750_v15 = vadd.f32 %v30749_v52, %v30667_v33  ;;  %v40388_v32 = vpop.f32.mrb[157].mxu0 }
0x438f   :  { %v30825_v28 = vadd.f32 %v30824_v18, %v30750_v15 }
0x4391   :  { %v30828_v58 = vadd.f32 %v48577_v23, %v30825_v28 }
0x4393   :  { %v30830_v37 = vmin.f32 %v30828_v58, 0.0  ;;  %vm30829_vm15 = vcmp.gt.f32.partialorder %v30828_v58, 0.0 }
0x4395   :  { %v30831_v61 = vmul.f32 1.442695, %v30830_v37 }
0x4397   :  { %44750 = vpow2.f32 %v30831_v61 }
0x43a1   :  { %v44751_v8 = vpop.eup %44750 }
0x43a2   :  { %v31986_v11 = vadd.f32 -1.0, %v44751_v8 }
0x43a4   :  { %v30834_v42 = vsel %vm30829_vm15, %v30828_v58, %v31986_v11 }
0x43a5   :  { %v30836_v3 = vsel %vm625_vm2, %v30834_v42, 0 }
0x43a6   :  { %v30911_v38 = vand.u32 4294901760, %v30836_v3 }
0x43a8   :  { %v30912_v13 = vsub.f32 %v30836_v3, %v30911_v38 }
0x43aa   :  { %v30913_v56 = vand.u32 4294901760, %v30912_v13 }
0x43ac   :  { %v30914_v57 = vsub.f32 %v30912_v13, %v30913_v56 }
0x43ae   :  { %v30915_v41 = vand.u32 4294901760, %v30914_v57 }
0x43b0   :  { %40417 = vmatmul.mubr.f32.vlgmr.msra.gmra.mrb[158].mxu0 %v30915_v41 }
0x43b1   :  { %44098 = vmatpush3.bf16.msra.mxu0 %v45261_v25  ;;  %40435 = vmatprep.mubr.msk.f32.mxu0 %vm44853_vm0, %v49134_v0 }
0x43b2   :  { %44099 = vmatprep.subr.bf16.mxu0 %v49135_v1 }
0x43b5   :  { %44101 = vmatpush3.bf16.msra.mxu0 %v45271_v19 }
0x43b6   :  { %44102 = vmatprep.subr.bf16.mxu0 %v49135_v1 }
0x43b9   :  { %44104 = vmatpush3.bf16.msra.mxu0 %v45280_v35 }
0x43ba   :  { %44105 = vmatprep.subr.bf16.mxu0 %v49135_v1 }
0x43bd   :  { %44107 = vmatpush3.bf16.msra.mxu0 %v45284_v24 }
0x43be   :  { %44108 = vmatprep.subr.bf16.mxu0 %v49135_v1 }
0x43c0   :  { %40436 = vmatmul.mubr.f32.vlgmr.msra.gmra.mrb[158].mxu0 %v30911_v38 }
0x43c1   :  { %44110 = vmatpush3.bf16.msra.mxu0 %v45290_v26  ;;  %40454 = vmatprep.mubr.msk.f32.mxu0 %vm44853_vm0, %v49134_v0 }
0x43c2   :  { %44111 = vmatprep.subr.bf16.mxu0 %v49135_v1 }
0x43c5   :  { %44113 = vmatpush3.bf16.msra.mxu0 %v45297_v43 }
0x43c6   :  { %44114 = vmatprep.subr.bf16.mxu0 %v49135_v1 }
0x43c9   :  { %44116 = vmatpush3.bf16.msra.mxu0 %v45305_v49 }
0x43ca   :  { %44117 = vmatprep.subr.bf16.mxu0 %v49135_v1 }
0x43cd   :  { %44119 = vmatpush3.bf16.msra.mxu0 %v45311_v12 }
0x43ce   :  { %44120 = vmatprep.subr.bf16.mxu0 %v49135_v1 }
0x43d0   :  { %40455 = vmatmul.mubr.f32.vlgmr.msra.gmra.mrb[158].mxu0 %v30912_v13 }
0x43d1   :  { %44122 = vmatpush3.bf16.msra.mxu0 %v45078_v59  ;;  %40473 = vmatprep.mubr.msk.f32.mxu0 %vm44853_vm0, %v49134_v0 }
0x43d2   :  { %44123 = vmatprep.subr.bf16.mxu0 %v49135_v1 }
0x43d5   :  { %44125 = vmatpush3.bf16.msra.mxu0 %v45120_v7 }
0x43d6   :  { %44126 = vmatprep.subr.bf16.mxu0 %v49135_v1 }
0x43d9   :  { %44128 = vmatpush3.bf16.msra.mxu0 %v45154_v17 }
0x43da   :  { %44129 = vmatprep.subr.bf16.mxu0 %v49135_v1 }
0x43dd   :  { %44131 = vmatpush3.bf16.msra.mxu0 %v45172_v21 }
0x43de   :  { %44132 = vmatprep.subr.bf16.mxu0 %v49135_v1 }
0x43e0   :  { %40474 = vmatmul.mubr.f32.vlgmr.msra.gmra.mrb[158].mxu0 %v30913_v56 }
0x43e1   :  { %44134 = vmatpush3.bf16.msra.mxu0 %v45329_v34  ;;  %40492 = vmatprep.mubr.msk.f32.mxu0 %vm44853_vm0, %v49134_v0 }
0x43e2   :  { %44135 = vmatprep.subr.bf16.mxu0 %v49135_v1 }
0x43e5   :  { %44137 = vmatpush3.bf16.msra.mxu0 %v45337_v63 }
0x43e6   :  { %44138 = vmatprep.subr.bf16.mxu0 %v49135_v1 }
0x43e9   :  { %44140 = vmatpush3.bf16.msra.mxu0 %v45347_v16 }
0x43ea   :  { %44141 = vmatprep.subr.bf16.mxu0 %v49135_v1 }
0x43ed   :  { %44143 = vmatpush3.bf16.msra.mxu0 %v45351_v46 }
0x43ee   :  { %44144 = vmatprep.subr.bf16.mxu0 %v49135_v1 }
0x43f0   :  { %40493 = vmatmul.mubr.f32.vlgmr.msra.gmra.mrb[158].mxu0 %v30911_v38 }
0x43f1   :  { %44146 = vmatpush3.bf16.msra.mxu0 %v45078_v59  ;;  %40511 = vmatprep.mubr.msk.f32.mxu0 %vm44853_vm0, %v49134_v0 }
0x43f2   :  { %44147 = vmatprep.subr.bf16.mxu0 %v49135_v1 }
0x43f5   :  { %44149 = vmatpush3.bf16.msra.mxu0 %v45120_v7 }
0x43f6   :  { %44150 = vmatprep.subr.bf16.mxu0 %v49135_v1 }
0x43f9   :  { %44152 = vmatpush3.bf16.msra.mxu0 %v45154_v17 }
0x43fa   :  { %44153 = vmatprep.subr.bf16.mxu0 %v49135_v1 }
0x43fd   :  { %44155 = vmatpush3.bf16.msra.mxu0 %v45172_v21  ;;  %v31923_v21 = vstv %s49189_s1 }
0x4400   :  { %40512 = vmatmul.mubr.f32.vlgmr.msra.gmra.mrb[158].mxu0 %v30911_v38 }
0x44d3   :  { %v31371_v25 = vpop.f32.mrb[158].mxu0 }
0x44d4   :  { %v44266_v19 = vadd.f32 %v48816_v53, %v31371_v25  ;;  %v40513_v59 = vpop.f32.mrb[159].mxu0 }
0x44d6   :  { %v31376_v35 = vmin.f32 %v44266_v19, 0.0  ;;  %vm31375_vm3 = vcmp.gt.f32.partialorder %v44266_v19, 0.0 }
0x44d8   :  { %v31377_v24 = vmul.f32 1.442695, %v31376_v35 }
0x44da   :  { %44752 = vpow2.f32 %v31377_v24 }
0x44e4   :  { %v44753_v26 = vpop.eup %44752 }
0x44e5   :  { %v31987_v43 = vadd.f32 -1.0, %v44753_v26 }
0x44e7   :  { %v31380_v7 = vsel %vm31375_vm3, %v44266_v19, %v31987_v43 }
0x44e8   :  { %v31382_v49 = vsel %vm625_vm2, %v31380_v7, 0 }
0x44e9   :  { %v31457_v12 = vand.u32 4294901760, %v31382_v49 }
0x44eb   :  { %v31458_v17 = vsub.f32 %v31382_v49, %v31457_v12 }
0x44ed   :  { %v31459_v34 = vand.u32 4294901760, %v31458_v17 }
0x44ef   :  { %v31460_v63 = vsub.f32 %v31458_v17, %v31459_v34 }
0x44f1   :  { %v31461_v16 = vand.u32 4294901760, %v31460_v63 }
0x44f3   :  { %40531 = vmatmul.mubr.f32.vlgmr.msra.gmra.mrb[158].mxu1 %v31461_v16 }
0x44f4   :  { %44170 = vmatpush3.bf16.msra.mxu1 %v45439_v50  ;;  %40549 = vmatprep.mubr.msk.f32.mxu1 %vm44853_vm0, %v49134_v0 }
0x44f5   :  { %44171 = vmatprep.subr.bf16.mxu1 %v49135_v1 }
0x44f8   :  { %44173 = vmatpush3.bf16.msra.mxu1 %v45449_v40 }
0x44f9   :  { %44174 = vmatprep.subr.bf16.mxu1 %v49135_v1 }
0x44fc   :  { %44176 = vmatpush3.bf16.msra.mxu1 %v45458_v10 }
0x44fd   :  { %44177 = vmatprep.subr.bf16.mxu1 %v49135_v1 }
0x4500   :  { %44179 = vmatpush3.bf16.msra.mxu1 %v45462_v48 }
0x4501   :  { %44180 = vmatprep.subr.bf16.mxu1 %v49135_v1 }
0x4503   :  { %40550 = vmatmul.mubr.f32.vlgmr.msra.gmra.mrb[158].mxu1 %v31457_v12 }
0x4504   :  { %44182 = vmatpush3.bf16.msra.mxu1 %v45468_v36  ;;  %40568 = vmatprep.mubr.msk.f32.mxu1 %vm44853_vm0, %v49134_v0 }
0x4505   :  { %44183 = vmatprep.subr.bf16.mxu1 %v49135_v1 }
0x4508   :  { %44185 = vmatpush3.bf16.msra.mxu1 %v45475_v5 }
0x4509   :  { %44186 = vmatprep.subr.bf16.mxu1 %v49135_v1 }
0x450c   :  { %44188 = vmatpush3.bf16.msra.mxu1 %v45483_v6 }
0x450d   :  { %44189 = vmatprep.subr.bf16.mxu1 %v49135_v1 }
0x4510   :  { %44191 = vmatpush3.bf16.msra.mxu1 %v45489_v55 }
0x4511   :  { %44192 = vmatprep.subr.bf16.mxu1 %v49135_v1 }
0x4513   :  { %40569 = vmatmul.mubr.f32.vlgmr.msra.gmra.mrb[158].mxu1 %v31458_v17 }
0x4514   :  { %44194 = vmatpush3.bf16.msra.mxu1 %v45059_v54  ;;  %40587 = vmatprep.mubr.msk.f32.mxu1 %vm44853_vm0, %v49134_v0 }
0x4515   :  { %44195 = vmatprep.subr.bf16.mxu1 %v49135_v1 }
0x4518   :  { %44197 = vmatpush3.bf16.msra.mxu1 %v45100_v2 }
0x4519   :  { %44198 = vmatprep.subr.bf16.mxu1 %v49135_v1 }
0x451c   :  { %44200 = vmatpush3.bf16.msra.mxu1 %v45145_v14 }
0x451d   :  { %44201 = vmatprep.subr.bf16.mxu1 %v49135_v1 }
0x4520   :  { %44203 = vmatpush3.bf16.msra.mxu1 %v45165_v20 }
0x4521   :  { %44204 = vmatprep.subr.bf16.mxu1 %v49135_v1 }
0x4523   :  { %40588 = vmatmul.mubr.f32.vlgmr.msra.gmra.mrb[158].mxu1 %v31459_v34 }
0x4524   :  { %44206 = vmatpush3.bf16.msra.mxu1 %v45507_v4  ;;  %40606 = vmatprep.mubr.msk.f32.mxu1 %vm44853_vm0, %v49134_v0 }
0x4525   :  { %44207 = vmatprep.subr.bf16.mxu1 %v49135_v1 }
0x4528   :  { %44209 = vmatpush3.bf16.msra.mxu1 %v45515_v45 }
0x4529   :  { %44210 = vmatprep.subr.bf16.mxu1 %v49135_v1 }
0x452c   :  { %44212 = vmatpush3.bf16.msra.mxu1 %v45525_v30 }
0x452d   :  { %44213 = vmatprep.subr.bf16.mxu1 %v49135_v1 }
0x4530   :  { %44215 = vmatpush3.bf16.msra.mxu1 %v45529_v9 }
0x4531   :  { %44216 = vmatprep.subr.bf16.mxu1 %v49135_v1 }
0x4533   :  { %40607 = vmatmul.mubr.f32.vlgmr.msra.gmra.mrb[158].mxu1 %v31457_v12 }
0x4534   :  { %44218 = vmatpush3.bf16.msra.mxu1 %v45059_v54  ;;  %40625 = vmatprep.mubr.msk.f32.mxu1 %vm44853_vm0, %v49134_v0 }
0x4535   :  { %44219 = vmatprep.subr.bf16.mxu1 %v49135_v1 }
0x4538   :  { %44221 = vmatpush3.bf16.msra.mxu1 %v45100_v2 }
0x4539   :  { %44222 = vmatprep.subr.bf16.mxu1 %v49135_v1 }
0x453c   :  { %44224 = vmatpush3.bf16.msra.mxu1 %v45145_v14 }
0x453d   :  { %44225 = vmatprep.subr.bf16.mxu1 %v49135_v1 }
0x4540   :  { %44227 = vmatpush3.bf16.msra.mxu1 %v45165_v20 }
0x4543   :  { %40626 = vmatmul.mubr.f32.vlgmr.msra.gmra.mrb[158].mxu1 %v31457_v12 }
0x4616   :  { %v31917_v54 = vpop.f32.mrb[158].mxu1 }
0x4617   :  { %v44267_v2 = vadd.f32 %v48885_v31, %v31917_v54  ;;  %v40627_v46 = vpop.f32.mrb[159].mxu1 }
0x4619   :  { %v31924_v14 = vmul.f32 %v44267_v2, %v31923_v21 }
0x461b   :  { %v31925_v10 = vadd.f32 %v31924_v14, %v48889_v62 }
0x461d   :  { %31926 = vst.msk [vmem:[#allocation2] sm:$0xff] %vm71_vm1, %v31925_v10  ;;  %31927 = vst.msk [vmem:[#allocation11] sm:$0xff] %vm71_vm1, %v31925_v10 }
0x461e   :  { %44833 = shalt.err (!%p44830_p12)
}
0x461f   :  { %s44834_s12 = scalar_lea.hbm %s49079_s11, 128 }
0x4620   :  { %p44835_p13 = scmp.ne.s32.totalorder %s49079_s11, %s44834_s12  ;;  %p44838_p0 = scmp.lt.u32.totalorder %s44834_s12, %s49079_s11 }
0x4622   :  { %p44840_p1 = pnand %p44838_p0, %p44835_p13 }
0x4624   :  { %44843 = shalt.err (!%p44840_p1)
}
0x4625   :  { %31937 = dma.vmem_to_hbm [thread:$0]  %s31935_s29, 128, %s49079_s11, [#allocation8]  }
0x4626   :  { %44848 = dma.done.wait [#allocation8], 128  }
0x4627   :  { %44849 = vsyncadd [#allocation8], 4294967168 }
0x4628   :  { %31941 = vsyncpa [#allocation7], 1 }
0x4629   :  { %31942 = vsyncpa [#allocation10], 1 }
0x462a   :  { %31943 = vsyncpa [#allocation8], 1 }

</bundles_post_ra>
